<compile_context>
chip_gen: v7x
topology: tpu7x:2x2x1
jax: 0.10.0
libtpu: 0.0.40
codegen_flags: <defaults>
</compile_context>

<pallas_src>
import functools

import jax
import jax.numpy as jnp
from jax import lax
from jax.experimental import pallas as pl
from jax.experimental.pallas import tpu as pltpu

BN_EPS = 1e-5        # PyTorch BatchNorm2d default
LANE = 128           # TPU lane width


def _round_up(x, m):
    return ((x + m - 1) // m) * m


# --------------------------- canvas geometry ----------------------------------
#
# Each sample is embedded in a zero canvas:
#   canvas grid : (H + 4) rows x (W + 2) cols (2 zero rows top/bottom, 1 zero col l/r)
#   real pixel (h, w)  <->  canvas (row h + 2, col w + 1)
#   flattened   : row-major, G zero guard rows prepended/appended  -> length Lc
# A 3x3 / stride-1 / pad-1 conv output at flattened canvas position p only needs the nine
# positions p + (dy-1)*(W+2) + (dx-1); each tap is one contiguous shifted slice of the
# flattened canvas.  Outputs are computed for a window of Mout rows starting at F0 and
# masked so every non-image position is exactly 0 (which is simultaneously the zero padding
# the next conv needs and what keeps the BatchNorm statistics exact).

def _geom(H, W):
    Wp = W + 2
    F0 = _round_up(Wp + 1, 8) + 8            # 8-aligned window start, generous guard
    G = F0 - Wp                              # guard rows before canvas row 0 (>= 9)
    Mout = _round_up((H + 2) * Wp, 8)        # output window rows (multiple of 8)
    Lc = (H + 4) * Wp + 2 * G                # flattened canvas length
    assert F0 - (Wp + 1) >= 0 and F0 + Mout + (Wp + 1) <= Lc
    return Wp, G, F0, Mout, Lc


def _canvas_mask(H, W, G, Lc):
    """(Lc, 1) f32 mask: 1.0 at flattened canvas positions holding a real image pixel."""
    Wp = W + 2
    idx = jnp.arange(Lc, dtype=jnp.int32) - G
    r = idx // Wp
    c = idx - r * Wp
    valid = (idx >= 0) & (r >= 2) & (r <= H + 1) & (c >= 1) & (c <= W)
    return valid.astype(jnp.float32).reshape(Lc, 1)


def _to_canvas(x_nhwc, G, dtype):
    """(N, H, W, Cp) -> (N, Lc, Cp) flattened zero-padded canvas (cast BEFORE padding)."""
    N, H, W, Cp = x_nhwc.shape
    xp = jnp.pad(x_nhwc.astype(dtype), ((0, 0), (2, 2), (1, 1), (0, 0)))
    xf = xp.reshape(N, (H + 4) * (W + 2), Cp)
    return jnp.pad(xf, ((0, 0), (G, G), (0, 0)))


# ----------------------------- Pallas kernels ---------------------------------

def _conv_relu_stats_kernel(x_ref, w_ref, b_ref, sc_ref, sh_ref, mask_ref,
                            h_ref, stats_ref, *, F0, Mout, Wp, mm_dtype):
    """Fused: input affine (folds previous BN) -> 3x3 conv as 9 shifted-slice MXU matmuls
    -> +bias -> ReLU -> mask -> per-sample BN partial stats -> store (compute dtype)."""
    Lc, Cp = x_ref.shape[1], x_ref.shape[2]

    # Input-side per-channel affine + zero mask.  Identity for conv-1; for conv-2 it applies
    # the folded BatchNorm-1 on data already in VMEM and restores exact zeros at padding
    # positions (the shift would otherwise leak into the conv padding).
    z = mask_ref[...] * (x_ref[0].astype(jnp.float32) * sc_ref[...] + sh_ref[...])
    z = z.astype(mm_dtype)

    acc = jnp.zeros((Mout, Cp), jnp.float32)
    for t in range(9):                              # statically unrolled
        dy, dx = t // 3, t % 3
        s = F0 + (dy - 1) * Wp + (dx - 1)           # static shifted-slice start
        acc = acc + jnp.dot(z[s:s + Mout, :], w_ref[t],
                            preferred_element_type=jnp.float32)

    h = jnp.maximum(acc + b_ref[...], 0.0)          # conv bias + ReLU (f32)
    h = h * mask_ref[F0:F0 + Mout, :]               # exact zeros off-image

    # Partial BN statistics from the f32 value (before the low-precision store) => BN exact.
    stats_ref[0, 0:1, :] = jnp.sum(h, axis=0, keepdims=True)
    stats_ref[0, 1:2, :] = jnp.sum(h * h, axis=0, keepdims=True)

    # Write the full canvas block: zeros outside the compute window.
    h_ref[0, :F0, :] = jnp.zeros((F0, Cp), h_ref.dtype)
    h_ref[0, F0:F0 + Mout, :] = h.astype(h_ref.dtype)
    h_ref[0, F0 + Mout:, :] = jnp.zeros((Lc - F0 - Mout, Cp), h_ref.dtype)


def _bn_residual_kernel(h_ref, sc_ref, sh_ref, res_ref, o_ref):
    """y = BN2(h) + residual on the canvas layout (scale/shift fold mean/var/gamma/beta)."""
    y = (h_ref[0].astype(jnp.float32) * sc_ref[...] + sh_ref[...]
         + res_ref[0].astype(jnp.float32))
    o_ref[0] = y


# ----------------------------- call wrappers -----------------------------------

def _const_spec(block_shape, single_buffer):
    """BlockSpec for a VMEM-resident operand (constant index_map)."""
    zero = (0,) * len(block_shape)
    kwargs = {"pipeline_mode": pl.Buffered(1)} if single_buffer else {}
    return pl.BlockSpec(block_shape, lambda *_: zero, **kwargs)


def _mosaic_params(vmem_needed):
    limit = None
    if vmem_needed > 24 * 1024 * 1024:
        try:
            cap = pltpu.get_tpu_info().vmem_capacity_bytes   # 64 MiB v7x, 128 MiB v5e/v6e
        except Exception:
            cap = 64 * 1024 * 1024
        limit = min(int(vmem_needed * 1.25), int(cap * 0.85))
    return pltpu.CompilerParams(dimension_semantics=("parallel",),
                                vmem_limit_bytes=limit)


def _conv_relu_stats(xc, w, b, in_scale, in_shift, mask, geom, mm_dtype):
    """One conv3x3+ReLU pass over the canvas; returns (activation canvas, per-sample stats)."""
    N, Lc, Cp = xc.shape
    Wp, _, F0, Mout, _ = geom
    big_cp = Cp >= 512          # single-buffer resident slabs only when they are big
    msz = jnp.dtype(mm_dtype).itemsize

    # TODO(synk): for very large H*W the per-sample canvas block may exceed VMEM; add
    # row-band tiling with a manual halo DMA (memory_space=pl.ANY) in that regime.
    vmem_needed = (2 * Lc * Cp * msz) * 2 + 9 * Cp * Cp * msz * (1 if big_cp else 2) \
                  + 6 * Lc * Cp * 4 + Lc * LANE * 4
    cost = pl.CostEstimate(
        flops=2 * N * Mout * 9 * Cp * Cp,
        transcendentals=0,
        bytes_accessed=N * (2 * Lc * Cp * msz + 2 * Cp * 4) + 9 * Cp * Cp * msz,
    )

    kernel = functools.partial(_conv_relu_stats_kernel,
                               F0=F0, Mout=Mout, Wp=Wp, mm_dtype=mm_dtype)
    h, stats = pl.pallas_call(
        kernel,
        grid=(N,),
        in_specs=[
            pl.BlockSpec((1, Lc, Cp), lambda n: (n, 0, 0)),   # input canvas   (streamed)
            _const_spec((9, Cp, Cp), big_cp),                 # conv weights   (resident)
            _const_spec((1, Cp), big_cp),                     # conv bias      (resident)
            _const_spec((1, Cp), big_cp),                     # folded BN scale(resident)
            _const_spec((1, Cp), big_cp),                     # folded BN shift(resident)
            _const_spec((Lc, 1), big_cp),                     # canvas mask    (resident)
        ],
        out_specs=(
            pl.BlockSpec((1, Lc, Cp), lambda n: (n, 0, 0)),   # activation canvas
            pl.BlockSpec((1, 2, Cp), lambda n: (n, 0, 0)),    # per-sample (sum, sumsq)
        ),
        out_shape=(
            jax.ShapeDtypeStruct((N, Lc, Cp), mm_dtype),      # bf16 intermediate (perf path)
            jax.ShapeDtypeStruct((N, 2, Cp), jnp.float32),
        ),
        compiler_params=_mosaic_params(vmem_needed),
        cost_estimate=cost,
    )(xc, w, b, in_scale, in_shift, mask)
    return h, stats


def _bn_affine_residual(h, scale, shift, res, mm_dtype):
    N, Lc, Cp = h.shape
    msz = jnp.dtype(mm_dtype).itemsize
    vmem_needed = 2 * Lc * Cp * (2 * msz + 4) + 4 * Cp * 4
    cost = pl.CostEstimate(
        flops=3 * N * Lc * Cp,
        transcendentals=0,
        bytes_accessed=N * Lc * Cp * (2 * msz + 4) + 4 * Cp * 4,
    )
    return pl.pallas_call(
        _bn_residual_kernel,
        grid=(N,),
        in_specs=[
            pl.BlockSpec((1, Lc, Cp), lambda n: (n, 0, 0)),
            _const_spec((1, Cp), False),
            _const_spec((1, Cp), False),
            pl.BlockSpec((1, Lc, Cp), lambda n: (n, 0, 0)),
        ],
        out_specs=pl.BlockSpec((1, Lc, Cp), lambda n: (n, 0, 0)),
        out_shape=jax.ShapeDtypeStruct((N, Lc, Cp), jnp.float32),
        compiler_params=_mosaic_params(vmem_needed),
        cost_estimate=cost,
    )(h, scale, shift, res)


def _bn_scale_shift(stats, count, gamma, beta):
    """Exact training-mode BN (biased var) folded to per-channel scale/shift."""
    # TODO(synk): merge per-tile (count, mean, M2) Welford-style if E[x^2]-E[x]^2
    # cancellation ever matters for very large batches.
    tot = jnp.sum(stats, axis=0)                              # (2, Cp)
    mean = tot[0] / count
    var = jnp.maximum(tot[1] / count - mean * mean, 0.0)
    inv_std = lax.rsqrt(var + BN_EPS)
    scale = gamma.astype(jnp.float32) * inv_std
    shift = beta.astype(jnp.float32) - mean * scale
    return scale.reshape(1, -1), shift.reshape(1, -1)


def res_block(x_nchw, params, *, compute_dtype=jnp.bfloat16):
    """ResBlock forward: x + ConvBlock2(ConvBlock1(x)); x in PyTorch NCHW convention."""
    x = jnp.transpose(x_nchw, (0, 2, 3, 1))                   # NHWC
    N, H, W, C = x.shape
    Cp = _round_up(C, LANE)                                   # lane-dense channels
    geom = _geom(H, W)
    Wp, G, F0, Mout, Lc = geom
    M = N * H * W                                             # true pixel count for BN

    cpad = Cp - C
    xpadc = jnp.pad(x, ((0, 0), (0, 0), (0, 0), (0, cpad)))
    xc = _to_canvas(xpadc, G, compute_dtype)                  # (N, Lc, Cp)
    mask = _canvas_mask(H, W, G, Lc)

    def pad_w(w9):                                            # (9, Cin, Cout) -> (9, Cp, Cp)
        return jnp.pad(w9, ((0, 0), (0, cpad), (0, cpad))).astype(compute_dtype)

    def pad_v(v):                                             # (C,) -> (1, Cp) f32
        return jnp.pad(v, (0, cpad)).astype(jnp.float32).reshape(1, Cp)

    ones = jnp.ones((1, Cp), jnp.float32)
    zeros = jnp.zeros((1, Cp), jnp.float32)

    # ConvBlock 1: conv + bias + ReLU + partial BN stats (BN-1 affine deferred).
    h1, st1 = _conv_relu_stats(xc, pad_w(params["w1"]), pad_v(params["b1"]),
                               ones, zeros, mask, geom, compute_dtype)
    sc1, sh1 = _bn_scale_shift(st1, M, jnp.pad(params["g1"], (0, cpad)),
                               jnp.pad(params["be1"], (0, cpad)))

    # ConvBlock 2: BN-1 folded into conv-2's in-kernel input affine (no elementwise pass).
    h2, st2 = _conv_relu_stats(h1, pad_w(params["w2"]), pad_v(params["b2"]),
                               sc1, sh1, mask, geom, compute_dtype)
    sc2, sh2 = _bn_scale_shift(st2, M, jnp.pad(params["g2"], (0, cpad)),
                               jnp.pad(params["be2"], (0, cpad)))

    # BN-2 affine + residual add (single elementwise pass on the canvas layout).
    y = _bn_affine_residual(h2, sc2, sh2, xc, compute_dtype)  # (N, Lc, Cp) f32

    y = y[:, G:G + (H + 4) * Wp, :].reshape(N, H + 4, Wp, Cp)
    y = y[:, 2:H + 2, 1:W + 1, :C]                            # strip canvas pad + channel pad
    return jnp.transpose(y, (0, 3, 1, 2))                     # back to NCHW


def init_params(key, C):
    # Deterministic synthetic parameters (shapes match nn.Conv2d(C,C,3) + BatchNorm2d(C)).
    k1, k2, k3, k4 = jax.random.split(key, 4)
    # conv weight stored per-tap as (9, Cin, Cout); equivalent to torch (Cout, Cin, 3, 3).
    return {
        "w1": jax.random.normal(k1, (9, C, C), jnp.float32) * 0.1,
        "b1": jax.random.normal(k2, (C,), jnp.float32) * 0.1,
        "g1": jnp.ones((C,), jnp.float32),    # BatchNorm weight init (PyTorch default)
        "be1": jnp.zeros((C,), jnp.float32),  # BatchNorm bias init (PyTorch default)
        "w2": jax.random.normal(k3, (9, C, C), jnp.float32) * 0.1,
        "b2": jax.random.normal(k4, (C,), jnp.float32) * 0.1,
        "g2": jnp.ones((C,), jnp.float32),
        "be2": jnp.zeros((C,), jnp.float32),
    }


# ----------------------------- pure-JAX reference (self-check) -----------------

def _ref_conv_block(x, w9, b, gamma, beta):
    C = x.shape[1]
    w_oihw = jnp.transpose(w9.reshape(3, 3, C, C), (3, 2, 0, 1))
    y = lax.conv_general_dilated(x, w_oihw, window_strides=(1, 1), padding=((1, 1), (1, 1)),
                                 dimension_numbers=("NCHW", "OIHW", "NCHW"),
                                 precision=lax.Precision.HIGHEST)
    y = y + b[None, :, None, None]
    y = jnp.maximum(y, 0.0)
    mean = jnp.mean(y, axis=(0, 2, 3), keepdims=True)
    var = jnp.mean((y - mean) ** 2, axis=(0, 2, 3), keepdims=True)
    y = (y - mean) * lax.rsqrt(var + BN_EPS)
    return y * gamma[None, :, None, None] + beta[None, :, None, None]


def _ref_res_block(x, params):
    h1 = _ref_conv_block(x, params["w1"], params["b1"], params["g1"], params["be1"])
    h2 = _ref_conv_block(h1, params["w2"], params["b2"], params["g2"], params["be2"])
    return x + h2


# ----------------------------- demo --------------------------------------------

if __name__ == "__main__":
    N, C, H, W = 2, 4, 16, 16
    key = jax.random.PRNGKey(0)
    kp, kx = jax.random.split(key)
    params = init_params(kp, C)
    x = jax.random.normal(kx, (N, C, H, W), jnp.float32)

    ref = _ref_res_block(x, params)

    # f32 MXU path (exercises the canvas conv + cross-sample BN stat reduction): tight check.
    fwd_f32 = jax.jit(functools.partial(res_block, compute_dtype=jnp.float32))
    out_f32 = jax.block_until_ready(fwd_f32(x, params))
    assert out_f32.shape == (N, C, H, W) and out_f32.dtype == jnp.float32
    err_f32 = float(jnp.max(jnp.abs(out_f32 - ref)))
    assert err_f32 < 3e-2, f"f32 path max abs err too large: {err_f32}"

    # Default perf path: bf16 canvases / weights, f32 accumulation and f32 BN math.
    fwd = jax.jit(res_block)
    out = jax.block_until_ready(fwd(x, params))
    assert out.shape == (N, C, H, W) and out.dtype == jnp.float32
    err_bf16 = float(jnp.max(jnp.abs(out - ref)))
    assert err_bf16 < 3.5e-1, f"bf16 path max abs err too large: {err_bf16}"

    print("KERNEL_OK")
</pallas_src>

<mosaic_0001>
module attributes {stable_mosaic.version = 11 : i64} {
  func.func @_conv_relu_stats_kernel(%arg0: i32, %arg1: memref<1x388x128xf32, #tpu.memory_space<vmem>>, %arg2: memref<9x128x128xf32, #tpu.memory_space<vmem>>, %arg3: memref<1x128xf32, #tpu.memory_space<vmem>>, %arg4: memref<1x128xf32, #tpu.memory_space<vmem>>, %arg5: memref<1x128xf32, #tpu.memory_space<vmem>>, %arg6: memref<388x1xf32, #tpu.memory_space<vmem>>, %arg7: memref<1x388x128xf32, #tpu.memory_space<vmem>>, %arg8: memref<1x2x128xf32, #tpu.memory_space<vmem>>) attributes {dimension_semantics = [#tpu.dimension_semantics<parallel>], iteration_bounds = array<i64: 2>, scalar_prefetch = 0 : i64, scratch_operands = 0 : i64, tpu.core_type = #tpu.core_type<tc>, window_params = [{transform_indices = @transform_0, window_bounds = array<i64: 1, 388, 128>}, {pipeline_mode = #tpu.pipeline_mode<synchronous>, transform_indices = @transform_1, window_bounds = array<i64: 9, 128, 128>}, {pipeline_mode = #tpu.pipeline_mode<synchronous>, transform_indices = @transform_2, window_bounds = array<i64: 1, 128>}, {pipeline_mode = #tpu.pipeline_mode<synchronous>, transform_indices = @transform_3, window_bounds = array<i64: 1, 128>}, {pipeline_mode = #tpu.pipeline_mode<synchronous>, transform_indices = @transform_4, window_bounds = array<i64: 1, 128>}, {pipeline_mode = #tpu.pipeline_mode<synchronous>, transform_indices = @transform_5, window_bounds = array<i64: 388, 1>}, {transform_indices = @transform_6, window_bounds = array<i64: 1, 388, 128>}, {transform_indices = @transform_7, window_bounds = array<i64: 1, 2, 128>}]} {
    %c0 = arith.constant 0 : index
    %c0_0 = arith.constant 0 : index
    %0 = vector.load %arg6[%c0, %c0_0] : memref<388x1xf32, #tpu.memory_space<vmem>>, vector<388x1xf32>
    %c0_1 = arith.constant 0 : index
    %c0_2 = arith.constant 0 : index
    %c0_3 = arith.constant 0 : index
    %1 = vector.load %arg1[%c0_1, %c0_2, %c0_3] : memref<1x388x128xf32, #tpu.memory_space<vmem>>, vector<1x388x128xf32>
    %2 = vector.shape_cast %1 : vector<1x388x128xf32> to vector<388x128xf32>
    %c0_4 = arith.constant 0 : index
    %c0_5 = arith.constant 0 : index
    %3 = vector.load %arg4[%c0_4, %c0_5] : memref<1x128xf32, #tpu.memory_space<vmem>>, vector<1x128xf32>
    %4 = vector.broadcast %3 : vector<1x128xf32> to vector<388x128xf32>
    %5 = arith.mulf %2, %4 : vector<388x128xf32>
    %c0_6 = arith.constant 0 : index
    %c0_7 = arith.constant 0 : index
    %6 = vector.load %arg5[%c0_6, %c0_7] : memref<1x128xf32, #tpu.memory_space<vmem>>, vector<1x128xf32>
    %7 = vector.broadcast %6 : vector<1x128xf32> to vector<388x128xf32>
    %8 = arith.addf %5, %7 : vector<388x128xf32>
    %9 = vector.broadcast %0 : vector<388x1xf32> to vector<388x128xf32>
    %10 = arith.mulf %9, %8 : vector<388x128xf32>
    %cst = arith.constant 0.000000e+00 : f32
    %11 = vector.broadcast %cst : f32 to vector<328x128xf32>
    %12 = vector.extract_strided_slice %10 {offsets = [13, 0], sizes = [328, 128], strides = [1, 1]} : vector<388x128xf32> to vector<328x128xf32>
    %c0_8 = arith.constant 0 : index
    %c0_9 = arith.constant 0 : index
    %c0_10 = arith.constant 0 : index
    %13 = vector.load %arg2[%c0_8, %c0_9, %c0_10] : memref<9x128x128xf32, #tpu.memory_space<vmem>>, vector<1x128x128xf32>
    %14 = vector.shape_cast %13 : vector<1x128x128xf32> to vector<128x128xf32>
    %cst_11 = arith.constant dense<0.000000e+00> : vector<328x128xf32>
    %15 = tpu.matmul %12, %14, %cst_11 {dimension_numbers = #tpu.dot_dimension_numbers<[1], [0], [0], [1], [0, 0, 1, 1], [], []>} : vector<328x128xf32>, vector<128x128xf32>, vector<328x128xf32> -> vector<328x128xf32>
    %16 = arith.addf %11, %15 : vector<328x128xf32>
    %17 = vector.extract_strided_slice %10 {offsets = [14, 0], sizes = [328, 128], strides = [1, 1]} : vector<388x128xf32> to vector<328x128xf32>
    %c1 = arith.constant 1 : index
    %c0_12 = arith.constant 0 : index
    %c0_13 = arith.constant 0 : index
    %18 = vector.load %arg2[%c1, %c0_12, %c0_13] : memref<9x128x128xf32, #tpu.memory_space<vmem>>, vector<1x128x128xf32>
    %19 = vector.shape_cast %18 : vector<1x128x128xf32> to vector<128x128xf32>
    %cst_14 = arith.constant dense<0.000000e+00> : vector<328x128xf32>
    %20 = tpu.matmul %17, %19, %cst_14 {dimension_numbers = #tpu.dot_dimension_numbers<[1], [0], [0], [1], [0, 0, 1, 1], [], []>} : vector<328x128xf32>, vector<128x128xf32>, vector<328x128xf32> -> vector<328x128xf32>
    %21 = arith.addf %16, %20 : vector<328x128xf32>
    %22 = vector.extract_strided_slice %10 {offsets = [15, 0], sizes = [328, 128], strides = [1, 1]} : vector<388x128xf32> to vector<328x128xf32>
    %c2 = arith.constant 2 : index
    %c0_15 = arith.constant 0 : index
    %c0_16 = arith.constant 0 : index
    %23 = vector.load %arg2[%c2, %c0_15, %c0_16] : memref<9x128x128xf32, #tpu.memory_space<vmem>>, vector<1x128x128xf32>
    %24 = vector.shape_cast %23 : vector<1x128x128xf32> to vector<128x128xf32>
    %cst_17 = arith.constant dense<0.000000e+00> : vector<328x128xf32>
    %25 = tpu.matmul %22, %24, %cst_17 {dimension_numbers = #tpu.dot_dimension_numbers<[1], [0], [0], [1], [0, 0, 1, 1], [], []>} : vector<328x128xf32>, vector<128x128xf32>, vector<328x128xf32> -> vector<328x128xf32>
    %26 = arith.addf %21, %25 : vector<328x128xf32>
    %27 = vector.extract_strided_slice %10 {offsets = [31, 0], sizes = [328, 128], strides = [1, 1]} : vector<388x128xf32> to vector<328x128xf32>
    %c3 = arith.constant 3 : index
    %c0_18 = arith.constant 0 : index
    %c0_19 = arith.constant 0 : index
    %28 = vector.load %arg2[%c3, %c0_18, %c0_19] : memref<9x128x128xf32, #tpu.memory_space<vmem>>, vector<1x128x128xf32>
    %29 = vector.shape_cast %28 : vector<1x128x128xf32> to vector<128x128xf32>
    %cst_20 = arith.constant dense<0.000000e+00> : vector<328x128xf32>
    %30 = tpu.matmul %27, %29, %cst_20 {dimension_numbers = #tpu.dot_dimension_numbers<[1], [0], [0], [1], [0, 0, 1, 1], [], []>} : vector<328x128xf32>, vector<128x128xf32>, vector<328x128xf32> -> vector<328x128xf32>
    %31 = arith.addf %26, %30 : vector<328x128xf32>
    %32 = vector.extract_strided_slice %10 {offsets = [32, 0], sizes = [328, 128], strides = [1, 1]} : vector<388x128xf32> to vector<328x128xf32>
    %c4 = arith.constant 4 : index
    %c0_21 = arith.constant 0 : index
    %c0_22 = arith.constant 0 : index
    %33 = vector.load %arg2[%c4, %c0_21, %c0_22] : memref<9x128x128xf32, #tpu.memory_space<vmem>>, vector<1x128x128xf32>
    %34 = vector.shape_cast %33 : vector<1x128x128xf32> to vector<128x128xf32>
    %cst_23 = arith.constant dense<0.000000e+00> : vector<328x128xf32>
    %35 = tpu.matmul %32, %34, %cst_23 {dimension_numbers = #tpu.dot_dimension_numbers<[1], [0], [0], [1], [0, 0, 1, 1], [], []>} : vector<328x128xf32>, vector<128x128xf32>, vector<328x128xf32> -> vector<328x128xf32>
    %36 = arith.addf %31, %35 : vector<328x128xf32>
    %37 = vector.extract_strided_slice %10 {offsets = [33, 0], sizes = [328, 128], strides = [1, 1]} : vector<388x128xf32> to vector<328x128xf32>
    %c5 = arith.constant 5 : index
    %c0_24 = arith.constant 0 : index
    %c0_25 = arith.constant 0 : index
    %38 = vector.load %arg2[%c5, %c0_24, %c0_25] : memref<9x128x128xf32, #tpu.memory_space<vmem>>, vector<1x128x128xf32>
    %39 = vector.shape_cast %38 : vector<1x128x128xf32> to vector<128x128xf32>
    %cst_26 = arith.constant dense<0.000000e+00> : vector<328x128xf32>
    %40 = tpu.matmul %37, %39, %cst_26 {dimension_numbers = #tpu.dot_dimension_numbers<[1], [0], [0], [1], [0, 0, 1, 1], [], []>} : vector<328x128xf32>, vector<128x128xf32>, vector<328x128xf32> -> vector<328x128xf32>
    %41 = arith.addf %36, %40 : vector<328x128xf32>
    %42 = vector.extract_strided_slice %10 {offsets = [49, 0], sizes = [328, 128], strides = [1, 1]} : vector<388x128xf32> to vector<328x128xf32>
    %c6 = arith.constant 6 : index
    %c0_27 = arith.constant 0 : index
    %c0_28 = arith.constant 0 : index
    %43 = vector.load %arg2[%c6, %c0_27, %c0_28] : memref<9x128x128xf32, #tpu.memory_space<vmem>>, vector<1x128x128xf32>
    %44 = vector.shape_cast %43 : vector<1x128x128xf32> to vector<128x128xf32>
    %cst_29 = arith.constant dense<0.000000e+00> : vector<328x128xf32>
    %45 = tpu.matmul %42, %44, %cst_29 {dimension_numbers = #tpu.dot_dimension_numbers<[1], [0], [0], [1], [0, 0, 1, 1], [], []>} : vector<328x128xf32>, vector<128x128xf32>, vector<328x128xf32> -> vector<328x128xf32>
    %46 = arith.addf %41, %45 : vector<328x128xf32>
    %47 = vector.extract_strided_slice %10 {offsets = [50, 0], sizes = [328, 128], strides = [1, 1]} : vector<388x128xf32> to vector<328x128xf32>
    %c7 = arith.constant 7 : index
    %c0_30 = arith.constant 0 : index
    %c0_31 = arith.constant 0 : index
    %48 = vector.load %arg2[%c7, %c0_30, %c0_31] : memref<9x128x128xf32, #tpu.memory_space<vmem>>, vector<1x128x128xf32>
    %49 = vector.shape_cast %48 : vector<1x128x128xf32> to vector<128x128xf32>
    %cst_32 = arith.constant dense<0.000000e+00> : vector<328x128xf32>
    %50 = tpu.matmul %47, %49, %cst_32 {dimension_numbers = #tpu.dot_dimension_numbers<[1], [0], [0], [1], [0, 0, 1, 1], [], []>} : vector<328x128xf32>, vector<128x128xf32>, vector<328x128xf32> -> vector<328x128xf32>
    %51 = arith.addf %46, %50 : vector<328x128xf32>
    %52 = vector.extract_strided_slice %10 {offsets = [51, 0], sizes = [328, 128], strides = [1, 1]} : vector<388x128xf32> to vector<328x128xf32>
    %c8 = arith.constant 8 : index
    %c0_33 = arith.constant 0 : index
    %c0_34 = arith.constant 0 : index
    %53 = vector.load %arg2[%c8, %c0_33, %c0_34] : memref<9x128x128xf32, #tpu.memory_space<vmem>>, vector<1x128x128xf32>
    %54 = vector.shape_cast %53 : vector<1x128x128xf32> to vector<128x128xf32>
    %cst_35 = arith.constant dense<0.000000e+00> : vector<328x128xf32>
    %55 = tpu.matmul %52, %54, %cst_35 {dimension_numbers = #tpu.dot_dimension_numbers<[1], [0], [0], [1], [0, 0, 1, 1], [], []>} : vector<328x128xf32>, vector<128x128xf32>, vector<328x128xf32> -> vector<328x128xf32>
    %56 = arith.addf %51, %55 : vector<328x128xf32>
    %c0_36 = arith.constant 0 : index
    %c0_37 = arith.constant 0 : index
    %57 = vector.load %arg3[%c0_36, %c0_37] : memref<1x128xf32, #tpu.memory_space<vmem>>, vector<1x128xf32>
    %58 = vector.broadcast %57 : vector<1x128xf32> to vector<328x128xf32>
    %59 = arith.addf %56, %58 : vector<328x128xf32>
    %cst_38 = arith.constant 0.000000e+00 : f32
    %60 = vector.broadcast %cst_38 : f32 to vector<328x128xf32>
    %61 = arith.maximumf %59, %60 : vector<328x128xf32>
    %c32 = arith.constant 32 : index
    %c0_39 = arith.constant 0 : index
    %62 = vector.load %arg6[%c32, %c0_39] : memref<388x1xf32, #tpu.memory_space<vmem>>, vector<328x1xf32>
    %63 = vector.broadcast %62 : vector<328x1xf32> to vector<328x128xf32>
    %64 = arith.mulf %61, %63 : vector<328x128xf32>
    %cst_40 = arith.constant dense<0.000000e+00> : vector<128xf32>
    %65 = vector.multi_reduction <add>, %64, %cst_40 [0] : vector<328x128xf32> to vector<128xf32>
    %66 = vector.shape_cast %65 : vector<128xf32> to vector<1x128xf32>
    %c0_41 = arith.constant 0 : index
    %c0_42 = arith.constant 0 : index
    %c0_43 = arith.constant 0 : index
    %67 = vector.load %arg8[%c0_41, %c0_42, %c0_43] : memref<1x2x128xf32, #tpu.memory_space<vmem>>, vector<1x1x128xf32>
    %68 = vector.shape_cast %67 : vector<1x1x128xf32> to vector<1x128xf32>
    %69 = vector.shape_cast %66 : vector<1x128xf32> to vector<1x1x128xf32>
    tpu.vector_store %arg8[%c0_41, %c0_42, %c0_43], %69 {strides = array<i32>} : memref<1x2x128xf32, #tpu.memory_space<vmem>>, vector<1x1x128xf32>,
    %70 = arith.mulf %64, %64 : vector<328x128xf32>
    %cst_44 = arith.constant dense<0.000000e+00> : vector<128xf32>
    %71 = vector.multi_reduction <add>, %70, %cst_44 [0] : vector<328x128xf32> to vector<128xf32>
    %72 = vector.shape_cast %71 : vector<128xf32> to vector<1x128xf32>
    %c0_45 = arith.constant 0 : index
    %c1_46 = arith.constant 1 : index
    %c0_47 = arith.constant 0 : index
    %73 = vector.load %arg8[%c0_45, %c1_46, %c0_47] : memref<1x2x128xf32, #tpu.memory_space<vmem>>, vector<1x1x128xf32>
    %74 = vector.shape_cast %73 : vector<1x1x128xf32> to vector<1x128xf32>
    %75 = vector.shape_cast %72 : vector<1x128xf32> to vector<1x1x128xf32>
    tpu.vector_store %arg8[%c0_45, %c1_46, %c0_47], %75 {strides = array<i32>} : memref<1x2x128xf32, #tpu.memory_space<vmem>>, vector<1x1x128xf32>,
    %cst_48 = arith.constant 0.000000e+00 : f32
    %76 = vector.broadcast %cst_48 : f32 to vector<32x128xf32>
    %c0_49 = arith.constant 0 : index
    %c0_50 = arith.constant 0 : index
    %c0_51 = arith.constant 0 : index
    %77 = vector.load %arg7[%c0_49, %c0_50, %c0_51] : memref<1x388x128xf32, #tpu.memory_space<vmem>>, vector<1x32x128xf32>
    %78 = vector.shape_cast %77 : vector<1x32x128xf32> to vector<32x128xf32>
    %79 = vector.shape_cast %76 : vector<32x128xf32> to vector<1x32x128xf32>
    tpu.vector_store %arg7[%c0_49, %c0_50, %c0_51], %79 {strides = array<i32>} : memref<1x388x128xf32, #tpu.memory_space<vmem>>, vector<1x32x128xf32>,
    %c0_52 = arith.constant 0 : index
    %c32_53 = arith.constant 32 : index
    %c0_54 = arith.constant 0 : index
    %80 = vector.load %arg7[%c0_52, %c32_53, %c0_54] : memref<1x388x128xf32, #tpu.memory_space<vmem>>, vector<1x328x128xf32>
    %81 = vector.shape_cast %80 : vector<1x328x128xf32> to vector<328x128xf32>
    %82 = vector.shape_cast %64 : vector<328x128xf32> to vector<1x328x128xf32>
    tpu.vector_store %arg7[%c0_52, %c32_53, %c0_54], %82 {strides = array<i32>} : memref<1x388x128xf32, #tpu.memory_space<vmem>>, vector<1x328x128xf32>,
    %cst_55 = arith.constant 0.000000e+00 : f32
    %83 = vector.broadcast %cst_55 : f32 to vector<28x128xf32>
    %c0_56 = arith.constant 0 : index
    %c360 = arith.constant 360 : index
    %c0_57 = arith.constant 0 : index
    %84 = vector.load %arg7[%c0_56, %c360, %c0_57] : memref<1x388x128xf32, #tpu.memory_space<vmem>>, vector<1x28x128xf32>
    %85 = vector.shape_cast %84 : vector<1x28x128xf32> to vector<28x128xf32>
    %86 = vector.shape_cast %83 : vector<28x128xf32> to vector<1x28x128xf32>
    tpu.vector_store %arg7[%c0_56, %c360, %c0_57], %86 {strides = array<i32>} : memref<1x388x128xf32, #tpu.memory_space<vmem>>, vector<1x28x128xf32>,
    return
  }
  func.func @transform_0(%arg0: i32) -> (i32, i32, i32) {
    %c0_i32 = arith.constant 0 : i32
    %c0_i32_0 = arith.constant 0 : i32
    %c0_i32_1 = arith.constant 0 : i32
    return %arg0, %c0_i32, %c0_i32_0 : i32, i32, i32
  }
  func.func @transform_1(%arg0: i32) -> (i32, i32, i32) {
    %c0_i32 = arith.constant 0 : i32
    %c0_i32_0 = arith.constant 0 : i32
    %c0_i32_1 = arith.constant 0 : i32
    %c0_i32_2 = arith.constant 0 : i32
    return %c0_i32, %c0_i32_0, %c0_i32_1 : i32, i32, i32
  }
  func.func @transform_2(%arg0: i32) -> (i32, i32) {
    %c0_i32 = arith.constant 0 : i32
    %c0_i32_0 = arith.constant 0 : i32
    %c0_i32_1 = arith.constant 0 : i32
    return %c0_i32, %c0_i32_0 : i32, i32
  }
  func.func @transform_3(%arg0: i32) -> (i32, i32) {
    %c0_i32 = arith.constant 0 : i32
    %c0_i32_0 = arith.constant 0 : i32
    %c0_i32_1 = arith.constant 0 : i32
    return %c0_i32, %c0_i32_0 : i32, i32
  }
  func.func @transform_4(%arg0: i32) -> (i32, i32) {
    %c0_i32 = arith.constant 0 : i32
    %c0_i32_0 = arith.constant 0 : i32
    %c0_i32_1 = arith.constant 0 : i32
    return %c0_i32, %c0_i32_0 : i32, i32
  }
  func.func @transform_5(%arg0: i32) -> (i32, i32) {
    %c0_i32 = arith.constant 0 : i32
    %c0_i32_0 = arith.constant 0 : i32
    %c0_i32_1 = arith.constant 0 : i32
    return %c0_i32, %c0_i32_0 : i32, i32
  }
  func.func @transform_6(%arg0: i32) -> (i32, i32, i32) {
    %c0_i32 = arith.constant 0 : i32
    %c0_i32_0 = arith.constant 0 : i32
    %c0_i32_1 = arith.constant 0 : i32
    return %arg0, %c0_i32, %c0_i32_0 : i32, i32, i32
  }
  func.func @transform_7(%arg0: i32) -> (i32, i32, i32) {
    %c0_i32 = arith.constant 0 : i32
    %c0_i32_0 = arith.constant 0 : i32
    %c0_i32_1 = arith.constant 0 : i32
    return %arg0, %c0_i32, %c0_i32_0 : i32, i32, i32
  }
}

module attributes {stable_mosaic.version = 11 : i64} {
  func.func @_bn_residual_kernel(%arg0: i32, %arg1: memref<1x388x128xf32, #tpu.memory_space<vmem>>, %arg2: memref<1x128xf32, #tpu.memory_space<vmem>>, %arg3: memref<1x128xf32, #tpu.memory_space<vmem>>, %arg4: memref<1x388x128xf32, #tpu.memory_space<vmem>>, %arg5: memref<1x388x128xf32, #tpu.memory_space<vmem>>) attributes {dimension_semantics = [#tpu.dimension_semantics<parallel>], iteration_bounds = array<i64: 2>, scalar_prefetch = 0 : i64, scratch_operands = 0 : i64, tpu.core_type = #tpu.core_type<tc>, window_params = [{transform_indices = @transform_0, window_bounds = array<i64: 1, 388, 128>}, {pipeline_mode = #tpu.pipeline_mode<synchronous>, transform_indices = @transform_1, window_bounds = array<i64: 1, 128>}, {pipeline_mode = #tpu.pipeline_mode<synchronous>, transform_indices = @transform_2, window_bounds = array<i64: 1, 128>}, {transform_indices = @transform_3, window_bounds = array<i64: 1, 388, 128>}, {transform_indices = @transform_4, window_bounds = array<i64: 1, 388, 128>}]} {
    %c0 = arith.constant 0 : index
    %c0_0 = arith.constant 0 : index
    %c0_1 = arith.constant 0 : index
    %0 = vector.load %arg1[%c0, %c0_0, %c0_1] : memref<1x388x128xf32, #tpu.memory_space<vmem>>, vector<1x388x128xf32>
    %1 = vector.shape_cast %0 : vector<1x388x128xf32> to vector<388x128xf32>
    %c0_2 = arith.constant 0 : index
    %c0_3 = arith.constant 0 : index
    %2 = vector.load %arg2[%c0_2, %c0_3] : memref<1x128xf32, #tpu.memory_space<vmem>>, vector<1x128xf32>
    %3 = vector.broadcast %2 : vector<1x128xf32> to vector<388x128xf32>
    %4 = arith.mulf %1, %3 : vector<388x128xf32>
    %c0_4 = arith.constant 0 : index
    %c0_5 = arith.constant 0 : index
    %5 = vector.load %arg3[%c0_4, %c0_5] : memref<1x128xf32, #tpu.memory_space<vmem>>, vector<1x128xf32>
    %6 = vector.broadcast %5 : vector<1x128xf32> to vector<388x128xf32>
    %7 = arith.addf %4, %6 : vector<388x128xf32>
    %c0_6 = arith.constant 0 : index
    %c0_7 = arith.constant 0 : index
    %c0_8 = arith.constant 0 : index
    %8 = vector.load %arg4[%c0_6, %c0_7, %c0_8] : memref<1x388x128xf32, #tpu.memory_space<vmem>>, vector<1x388x128xf32>
    %9 = vector.shape_cast %8 : vector<1x388x128xf32> to vector<388x128xf32>
    %10 = arith.addf %7, %9 : vector<388x128xf32>
    %c0_9 = arith.constant 0 : index
    %c0_10 = arith.constant 0 : index
    %c0_11 = arith.constant 0 : index
    %11 = vector.load %arg5[%c0_9, %c0_10, %c0_11] : memref<1x388x128xf32, #tpu.memory_space<vmem>>, vector<1x388x128xf32>
    %12 = vector.shape_cast %11 : vector<1x388x128xf32> to vector<388x128xf32>
    %13 = vector.shape_cast %10 : vector<388x128xf32> to vector<1x388x128xf32>
    tpu.vector_store %arg5[%c0_9, %c0_10, %c0_11], %13 {strides = array<i32>} : memref<1x388x128xf32, #tpu.memory_space<vmem>>, vector<1x388x128xf32>,
    return
  }
  func.func @transform_0(%arg0: i32) -> (i32, i32, i32) {
    %c0_i32 = arith.constant 0 : i32
    %c0_i32_0 = arith.constant 0 : i32
    %c0_i32_1 = arith.constant 0 : i32
    return %arg0, %c0_i32, %c0_i32_0 : i32, i32, i32
  }
  func.func @transform_1(%arg0: i32) -> (i32, i32) {
    %c0_i32 = arith.constant 0 : i32
    %c0_i32_0 = arith.constant 0 : i32
    %c0_i32_1 = arith.constant 0 : i32
    return %c0_i32, %c0_i32_0 : i32, i32
  }
  func.func @transform_2(%arg0: i32) -> (i32, i32) {
    %c0_i32 = arith.constant 0 : i32
    %c0_i32_0 = arith.constant 0 : i32
    %c0_i32_1 = arith.constant 0 : i32
    return %c0_i32, %c0_i32_0 : i32, i32
  }
  func.func @transform_3(%arg0: i32) -> (i32, i32, i32) {
    %c0_i32 = arith.constant 0 : i32
    %c0_i32_0 = arith.constant 0 : i32
    %c0_i32_1 = arith.constant 0 : i32
    return %arg0, %c0_i32, %c0_i32_0 : i32, i32, i32
  }
  func.func @transform_4(%arg0: i32) -> (i32, i32, i32) {
    %c0_i32 = arith.constant 0 : i32
    %c0_i32_0 = arith.constant 0 : i32
    %c0_i32_1 = arith.constant 0 : i32
    return %arg0, %c0_i32, %c0_i32_0 : i32, i32, i32
  }
}

</mosaic_0001>

<bundles_post_ra>
// kernel: res_block.5
= control target key start
LH: loop header
LB: loop body
LE: loop exit
PB: predicated region body
PF: predicated region fallthrough
CT: control target
= control target key end

     0   :  { %s647_s15 = smov 0   ;;  %s928_s0 = inlined_call_operand.vmem [shape: f32[2,388,128], index: 0, kind: input, shape index: {}]   ;;  %s929_s1 = inlined_call_operand.vmem [shape: f32[1,128], index: 1, kind: input, shape index: {}]   ;;  %s930_s2 = inlined_call_operand.vmem [shape: f32[1,128], index: 2, kind: input, shape index: {}]   ;;  %s931_s3 = inlined_call_operand.vmem [shape: f32[2,388,128], index: 3, kind: input, shape index: {}]   ;;  %s932_s4 = inlined_call_operand.vmem [shape: f32[2,388,128], index: 4, kind: output, shape index: {}]  }
   0x1 LB: > { %s593_s16 = sadd.s32 4294967295, %s620_s15   ;;  %p597_p0 = scmp.ge.s32.totalorder %s620_s15, 1  ;;  %s620_s15 = sphi %s647_s15, %s14_s15  }
   0x2   : > { %p172_p1 = scmp.lt.s32.totalorder %s620_s15, 3 }
   0x4   : > { %p173_p2 = pnand %p597_p0, %p172_p1 }
   0x5   : > { %p203_p3 = scmp.lt.s32.totalorder (!%p173_p2), %s593_s16, 1  ;;  %v658_v0 = vld [vmem:[%s929_s1] ss:$0 sm:$0xff] (!%p173_p2) }
   0x6   : > { %176 = sbr.rel (%p173_p2) target bundleno = 64 (0x40), region = 36  ;;  %v674_v2 = vld [vmem:[%s930_s2] ss:$0 sm:$0xff] (!%p173_p2) }
   0xd   : > { %s934_s16 = smov (!%p203_p3, %s593_s16), 1 }
   0xe   : > { %s605_s17 = smul.u32 392, %s934_s16 }
  0x10   : > { %s663_s22 = scalar_lea.vmem %s928_s0, %s605_s17  ;;  %s668_s25 = scalar_lea.vmem %s931_s3, %s605_s17 }
  0x11   : > { %v218_v1 = vld [vmem:[%s663_s22] sm:$0xff]  ;;  %v219_v3 = vld [vmem:[%s663_s22 + $0x8] sm:$0xff]  ;;  %v220_v7 = vld [vmem:[%s663_s22 + $0x10] sm:$0xff]  ;;  %s695_s30 = scalar_lea.vmem %s932_s4, %s605_s17 }
  0x12   : > { %v274_v4 = vmul.f32 %v658_v0, %v218_v1  ;;  %v379_v5 = vld [vmem:[%s668_s25] sm:$0xff]  ;;  %v275_v6 = vmul.f32 %v658_v0, %v219_v3  ;;  %v380_v8 = vld [vmem:[%s668_s25 + $0x8] sm:$0xff]  ;;  %v276_v9 = vmul.f32 %v658_v0, %v220_v7  ;;  %v221_v10 = vld [vmem:[%s663_s22 + $0x18] sm:$0xff] }
  0x13   : > { %v222_v11 = vld [vmem:[%s663_s22 + $0x20] sm:$0xff]  ;;  %v381_v14 = vld [vmem:[%s668_s25 + $0x10] sm:$0xff]  ;;  %v277_v15 = vmul.f32 %v658_v0, %v221_v10  ;;  %v382_v16 = vld [vmem:[%s668_s25 + $0x18] sm:$0xff] }
  0x14   : > { %v330_v12 = vadd.f32 %v674_v2, %v274_v4  ;;  %v331_v13 = vadd.f32 %v674_v2, %v275_v6  ;;  %v278_v17 = vmul.f32 %v658_v0, %v222_v11  ;;  %v223_v18 = vld [vmem:[%s663_s22 + $0x28] sm:$0xff]  ;;  %v332_v19 = vadd.f32 %v674_v2, %v276_v9  ;;  %v383_v20 = vld [vmem:[%s668_s25 + $0x20] sm:$0xff]  ;;  %v224_v22 = vld [vmem:[%s663_s22 + $0x30] sm:$0xff] }
  0x15   : > { %v279_v21 = vmul.f32 %v658_v0, %v223_v18  ;;  %v225_v23 = vld [vmem:[%s663_s22 + $0x38] sm:$0xff]  ;;  %v333_v26 = vadd.f32 %v674_v2, %v277_v15  ;;  %v384_v28 = vld [vmem:[%s668_s25 + $0x28] sm:$0xff]  ;;  %v226_v29 = vld [vmem:[%s663_s22 + $0x40] sm:$0xff]  ;;  %v280_v32 = vmul.f32 %v658_v0, %v224_v22 }
  0x16   : > { %v428_v24 = vadd.f32 %v379_v5, %v330_v12  ;;  %v429_v25 = vadd.f32 %v380_v8, %v331_v13  ;;  %v334_v27 = vadd.f32 %v674_v2, %v278_v17  ;;  %v430_v30 = vadd.f32 %v381_v14, %v332_v19  ;;  %v385_v33 = vld [vmem:[%s668_s25 + $0x30] sm:$0xff]  ;;  %v227_v35 = vld [vmem:[%s663_s22 + $0x48] sm:$0xff]  ;;  %v386_v39 = vld [vmem:[%s668_s25 + $0x38] sm:$0xff] }
  0x17   : > { %v335_v31 = vadd.f32 %v674_v2, %v279_v21  ;;  %v281_v34 = vmul.f32 %v658_v0, %v225_v23  ;;  %v228_v36 = vld [vmem:[%s663_s22 + $0x50] sm:$0xff]  ;;  %v431_v37 = vadd.f32 %v382_v16, %v333_v26  ;;  %v282_v40 = vmul.f32 %v658_v0, %v226_v29  ;;  %v387_v41 = vld [vmem:[%s668_s25 + $0x40] sm:$0xff]  ;;  %v229_v43 = vld [vmem:[%s663_s22 + $0x58] sm:$0xff] }
  0x18   : > { %477 = vst [vmem:[%s695_s30] sm:$0xff] %v428_v24  ;;  %478 = vst [vmem:[%s695_s30 + $0x8] sm:$0xff] %v429_v25  ;;  %v432_v38 = vadd.f32 %v383_v20, %v334_v27  ;;  %v283_v42 = vmul.f32 %v658_v0, %v227_v35  ;;  %v336_v45 = vadd.f32 %v674_v2, %v280_v32  ;;  %v388_v47 = vld [vmem:[%s668_s25 + $0x48] sm:$0xff]  ;;  %v230_v49 = vld [vmem:[%s663_s22 + $0x60] sm:$0xff] }
  0x19   : > { %479 = vst [vmem:[%s695_s30 + $0x10] sm:$0xff] %v430_v30  ;;  %v433_v44 = vadd.f32 %v384_v28, %v335_v31  ;;  %v337_v46 = vadd.f32 %v674_v2, %v281_v34  ;;  %v284_v48 = vmul.f32 %v658_v0, %v228_v36  ;;  %v231_v50 = vld [vmem:[%s663_s22 + $0x68] sm:$0xff]  ;;  %480 = vst [vmem:[%s695_s30 + $0x18] sm:$0xff] %v431_v37  ;;  %v389_v53 = vld [vmem:[%s668_s25 + $0x50] sm:$0xff] }
  0x1a   : > { %481 = vst [vmem:[%s695_s30 + $0x20] sm:$0xff] %v432_v38  ;;  %v338_v51 = vadd.f32 %v674_v2, %v282_v40  ;;  %v339_v52 = vadd.f32 %v674_v2, %v283_v42  ;;  %v285_v54 = vmul.f32 %v658_v0, %v229_v43  ;;  %v390_v55 = vld [vmem:[%s668_s25 + $0x58] sm:$0xff]  ;;  %v286_v56 = vmul.f32 %v658_v0, %v230_v49  ;;  %v232_v57 = vld [vmem:[%s663_s22 + $0x70] sm:$0xff]  ;;  %v391_v61 = vld [vmem:[%s668_s25 + $0x60] sm:$0xff] }
  0x1b   : > { %482 = vst [vmem:[%s695_s30 + $0x28] sm:$0xff] %v433_v44  ;;  %v434_v58 = vadd.f32 %v385_v33, %v336_v45  ;;  %v435_v59 = vadd.f32 %v386_v39, %v337_v46  ;;  %v340_v60 = vadd.f32 %v674_v2, %v284_v48  ;;  %v287_v62 = vmul.f32 %v658_v0, %v231_v50  ;;  %v233_v63 = vld [vmem:[%s663_s22 + $0x78] sm:$0xff]  ;;  %v234_v1 = vld [vmem:[%s663_s22 + $0x80] sm:$0xff]  ;;  %v392_v7 = vld [vmem:[%s668_s25 + $0x68] sm:$0xff] }
  0x1c   : > { %v436_v3 = vadd.f32 %v387_v41, %v338_v51  ;;  %v437_v4 = vadd.f32 %v388_v47, %v339_v52  ;;  %v341_v5 = vadd.f32 %v674_v2, %v285_v54  ;;  %v342_v6 = vadd.f32 %v674_v2, %v286_v56  ;;  %v235_v8 = vld [vmem:[%s663_s22 + $0x88] sm:$0xff]  ;;  %v393_v12 = vld [vmem:[%s668_s25 + $0x70] sm:$0xff]  ;;  %v237_v15 = vld [vmem:[%s663_s22 + $0x98] sm:$0xff] }
  0x1d   : > { %483 = vst [vmem:[%s695_s30 + $0x30] sm:$0xff] %v434_v58  ;;  %484 = vst [vmem:[%s695_s30 + $0x38] sm:$0xff] %v435_v59  ;;  %v438_v9 = vadd.f32 %v389_v53, %v340_v60  ;;  %v343_v10 = vadd.f32 %v674_v2, %v287_v62  ;;  %v288_v11 = vmul.f32 %v658_v0, %v232_v57  ;;  %v236_v14 = vld [vmem:[%s663_s22 + $0x90] sm:$0xff]  ;;  %v394_v18 = vld [vmem:[%s668_s25 + $0x78] sm:$0xff] }
  0x1e   : > { %v289_v13 = vmul.f32 %v658_v0, %v233_v63  ;;  %485 = vst [vmem:[%s695_s30 + $0x40] sm:$0xff] %v436_v3  ;;  %486 = vst [vmem:[%s695_s30 + $0x48] sm:$0xff] %v437_v4  ;;  %v439_v16 = vadd.f32 %v390_v55, %v341_v5  ;;  %v440_v17 = vadd.f32 %v391_v61, %v342_v6  ;;  %v395_v20 = vld [vmem:[%s668_s25 + $0x80] sm:$0xff]  ;;  %v396_v26 = vld [vmem:[%s668_s25 + $0x88] sm:$0xff] }
  0x1f   : > { %v290_v19 = vmul.f32 %v658_v0, %v234_v1  ;;  %v291_v21 = vmul.f32 %v658_v0, %v235_v8  ;;  %v238_v22 = vld [vmem:[%s663_s22 + $0xa0] sm:$0xff]  ;;  %487 = vst [vmem:[%s695_s30 + $0x50] sm:$0xff] %v438_v9  ;;  %v441_v23 = vadd.f32 %v392_v7, %v343_v10  ;;  %v344_v24 = vadd.f32 %v674_v2, %v288_v11  ;;  %v397_v28 = vld [vmem:[%s668_s25 + $0x90] sm:$0xff]  ;;  %v239_v29 = vld [vmem:[%s663_s22 + $0xa8] sm:$0xff] }
  0x20   : > { %v345_v25 = vadd.f32 %v674_v2, %v289_v13  ;;  %v292_v27 = vmul.f32 %v658_v0, %v236_v14  ;;  %488 = vst [vmem:[%s695_s30 + $0x58] sm:$0xff] %v439_v16  ;;  %489 = vst [vmem:[%s695_s30 + $0x60] sm:$0xff] %v440_v17  ;;  %v293_v32 = vmul.f32 %v658_v0, %v237_v15  ;;  %v398_v33 = vld [vmem:[%s668_s25 + $0x98] sm:$0xff]  ;;  %v240_v35 = vld [vmem:[%s663_s22 + $0xb0] sm:$0xff] }
  0x21   : > { %v346_v30 = vadd.f32 %v674_v2, %v290_v19  ;;  %v347_v31 = vadd.f32 %v674_v2, %v291_v21  ;;  %v294_v34 = vmul.f32 %v658_v0, %v238_v22  ;;  %v241_v36 = vld [vmem:[%s663_s22 + $0xb8] sm:$0xff]  ;;  %490 = vst [vmem:[%s695_s30 + $0x68] sm:$0xff] %v441_v23  ;;  %v442_v37 = vadd.f32 %v393_v12, %v344_v24  ;;  %v399_v40 = vld [vmem:[%s668_s25 + $0xa0] sm:$0xff]  ;;  %v243_v43 = vld [vmem:[%s663_s22 + $0xc8] sm:$0xff] }
  0x22   : > { %v443_v38 = vadd.f32 %v394_v18, %v345_v25  ;;  %v348_v39 = vadd.f32 %v674_v2, %v292_v27  ;;  %v295_v41 = vmul.f32 %v658_v0, %v239_v29  ;;  %v242_v42 = vld [vmem:[%s663_s22 + $0xc0] sm:$0xff]  ;;  %v349_v46 = vadd.f32 %v674_v2, %v293_v32  ;;  %v400_v48 = vld [vmem:[%s668_s25 + $0xa8] sm:$0xff]  ;;  %v244_v49 = vld [vmem:[%s663_s22 + $0xd0] sm:$0xff] }
  0x23   : > { %v444_v44 = vadd.f32 %v395_v20, %v346_v30  ;;  %v445_v45 = vadd.f32 %v396_v26, %v347_v31  ;;  %v350_v47 = vadd.f32 %v674_v2, %v294_v34  ;;  %491 = vst [vmem:[%s695_s30 + $0x70] sm:$0xff] %v442_v37  ;;  %v296_v52 = vmul.f32 %v658_v0, %v240_v35  ;;  %v245_v54 = vld [vmem:[%s663_s22 + $0xd8] sm:$0xff]  ;;  %v246_v55 = vld [vmem:[%s663_s22 + $0xe0] sm:$0xff]  ;;  %v401_v58 = vld [vmem:[%s668_s25 + $0xb0] sm:$0xff] }
  0x24   : > { %492 = vst [vmem:[%s695_s30 + $0x78] sm:$0xff] %v443_v38  ;;  %v446_v50 = vadd.f32 %v397_v28, %v348_v39  ;;  %v351_v51 = vadd.f32 %v674_v2, %v295_v41  ;;  %v297_v53 = vmul.f32 %v658_v0, %v241_v36  ;;  %v447_v56 = vadd.f32 %v398_v33, %v349_v46  ;;  %v402_v59 = vld [vmem:[%s668_s25 + $0xb8] sm:$0xff]  ;;  %v247_v62 = vld [vmem:[%s663_s22 + $0xe8] sm:$0xff]  ;;  %v403_v4 = vld [vmem:[%s668_s25 + $0xc0] sm:$0xff] }
  0x25   : > { %493 = vst [vmem:[%s695_s30 + $0x80] sm:$0xff] %v444_v44  ;;  %494 = vst [vmem:[%s695_s30 + $0x88] sm:$0xff] %v445_v45  ;;  %v448_v57 = vadd.f32 %v399_v40, %v350_v47  ;;  %v298_v60 = vmul.f32 %v658_v0, %v242_v42  ;;  %v299_v61 = vmul.f32 %v658_v0, %v243_v43  ;;  %v404_v5 = vld [vmem:[%s668_s25 + $0xc8] sm:$0xff]  ;;  %v405_v7 = vld [vmem:[%s668_s25 + $0xd0] sm:$0xff] }
  0x26   : > { %495 = vst [vmem:[%s695_s30 + $0x90] sm:$0xff] %v446_v50  ;;  %v449_v63 = vadd.f32 %v400_v48, %v351_v51  ;;  %v352_v1 = vadd.f32 %v674_v2, %v296_v52  ;;  %v353_v3 = vadd.f32 %v674_v2, %v297_v53  ;;  %v300_v6 = vmul.f32 %v658_v0, %v244_v49  ;;  %v406_v11 = vld [vmem:[%s668_s25 + $0xd8] sm:$0xff]  ;;  %v248_v13 = vld [vmem:[%s663_s22 + $0xf0] sm:$0xff]  ;;  %v407_v18 = vld [vmem:[%s668_s25 + $0xe0] sm:$0xff] }
  0x27   : > { %496 = vst [vmem:[%s695_s30 + $0x98] sm:$0xff] %v447_v56  ;;  %497 = vst [vmem:[%s695_s30 + $0xa0] sm:$0xff] %v448_v57  ;;  %v354_v8 = vadd.f32 %v674_v2, %v298_v60  ;;  %v355_v9 = vadd.f32 %v674_v2, %v299_v61  ;;  %v301_v10 = vmul.f32 %v658_v0, %v245_v54  ;;  %v249_v14 = vld [vmem:[%s663_s22 + $0xf8] sm:$0xff]  ;;  %v250_v20 = vld [vmem:[%s663_s22 + $0x100] sm:$0xff] }
  0x28   : > { %v302_v12 = vmul.f32 %v658_v0, %v246_v55  ;;  %498 = vst [vmem:[%s695_s30 + $0xa8] sm:$0xff] %v449_v63  ;;  %v450_v15 = vadd.f32 %v401_v58, %v352_v1  ;;  %v451_v16 = vadd.f32 %v402_v59, %v353_v3  ;;  %v356_v17 = vadd.f32 %v674_v2, %v300_v6  ;;  %v251_v21 = vld [vmem:[%s663_s22 + $0x108] sm:$0xff]  ;;  %v252_v27 = vld [vmem:[%s663_s22 + $0x110] sm:$0xff]  ;;  %v253_v32 = vld [vmem:[%s663_s22 + $0x118] sm:$0xff] }
  0x29   : > { %v303_v19 = vmul.f32 %v658_v0, %v247_v62  ;;  %v452_v22 = vadd.f32 %v403_v4, %v354_v8  ;;  %v453_v23 = vadd.f32 %v404_v5, %v355_v9  ;;  %v357_v24 = vadd.f32 %v674_v2, %v301_v10  ;;  %v408_v26 = vld [vmem:[%s668_s25 + $0xe8] sm:$0xff]  ;;  %v254_v33 = vld [vmem:[%s663_s22 + $0x120] sm:$0xff]  ;;  %v409_v36 = vld [vmem:[%s668_s25 + $0xf0] sm:$0xff] }
  0x2a   : > { %v358_v25 = vadd.f32 %v674_v2, %v302_v12  ;;  %499 = vst [vmem:[%s695_s30 + $0xb0] sm:$0xff] %v450_v15  ;;  %500 = vst [vmem:[%s695_s30 + $0xb8] sm:$0xff] %v451_v16  ;;  %v454_v28 = vadd.f32 %v405_v7, %v356_v17  ;;  %v304_v30 = vmul.f32 %v658_v0, %v248_v13  ;;  %v410_v37 = vld [vmem:[%s668_s25 + $0xf8] sm:$0xff]  ;;  %v255_v40 = vld [vmem:[%s663_s22 + $0x128] sm:$0xff] }
  0x2b   : > { %v359_v29 = vadd.f32 %v674_v2, %v303_v19  ;;  %v305_v31 = vmul.f32 %v658_v0, %v249_v14  ;;  %501 = vst [vmem:[%s695_s30 + $0xc0] sm:$0xff] %v452_v22  ;;  %502 = vst [vmem:[%s695_s30 + $0xc8] sm:$0xff] %v453_v23  ;;  %v455_v34 = vadd.f32 %v406_v11, %v357_v24  ;;  %v411_v44 = vld [vmem:[%s668_s25 + $0x100] sm:$0xff]  ;;  %v412_v45 = vld [vmem:[%s668_s25 + $0x108] sm:$0xff] }
  0x2c   : > { %v456_v35 = vadd.f32 %v407_v18, %v358_v25  ;;  %v306_v38 = vmul.f32 %v658_v0, %v250_v20  ;;  %v307_v39 = vmul.f32 %v658_v0, %v251_v21  ;;  %503 = vst [vmem:[%s695_s30 + $0xd0] sm:$0xff] %v454_v28  ;;  %v360_v42 = vadd.f32 %v674_v2, %v304_v30  ;;  %v413_v47 = vld [vmem:[%s668_s25 + $0x110] sm:$0xff]  ;;  %v414_v51 = vld [vmem:[%s668_s25 + $0x118] sm:$0xff]  ;;  %v415_v58 = vld [vmem:[%s668_s25 + $0x120] sm:$0xff] }
  0x2d   : > { %v457_v41 = vadd.f32 %v408_v26, %v359_v29  ;;  %v361_v43 = vadd.f32 %v674_v2, %v305_v31  ;;  %v308_v46 = vmul.f32 %v658_v0, %v252_v27  ;;  %504 = vst [vmem:[%s695_s30 + $0xd8] sm:$0xff] %v455_v34  ;;  %v309_v50 = vmul.f32 %v658_v0, %v253_v32  ;;  %v256_v53 = vld [vmem:[%s663_s22 + $0x130] sm:$0xff]  ;;  %v257_v54 = vld [vmem:[%s663_s22 + $0x138] sm:$0xff]  ;;  %v258_v60 = vld [vmem:[%s663_s22 + $0x140] sm:$0xff] }
  0x2e   : > { %505 = vst [vmem:[%s695_s30 + $0xe0] sm:$0xff] %v456_v35  ;;  %v362_v48 = vadd.f32 %v674_v2, %v306_v38  ;;  %v363_v49 = vadd.f32 %v674_v2, %v307_v39  ;;  %v310_v52 = vmul.f32 %v658_v0, %v254_v33  ;;  %v458_v55 = vadd.f32 %v409_v36, %v360_v42  ;;  %v259_v61 = vld [vmem:[%s663_s22 + $0x148] sm:$0xff]  ;;  %v260_v5 = vld [vmem:[%s663_s22 + $0x150] sm:$0xff]  ;;  %v261_v10 = vld [vmem:[%s663_s22 + $0x158] sm:$0xff] }
  0x2f   : > { %506 = vst [vmem:[%s695_s30 + $0xe8] sm:$0xff] %v457_v41  ;;  %v459_v56 = vadd.f32 %v410_v37, %v361_v43  ;;  %v364_v57 = vadd.f32 %v674_v2, %v308_v46  ;;  %v311_v59 = vmul.f32 %v658_v0, %v255_v40  ;;  %v365_v1 = vadd.f32 %v674_v2, %v309_v50  ;;  %v416_v4 = vld [vmem:[%s668_s25 + $0x128] sm:$0xff]  ;;  %v262_v11 = vld [vmem:[%s663_s22 + $0x160] sm:$0xff]  ;;  %v417_v14 = vld [vmem:[%s668_s25 + $0x130] sm:$0xff] }
  0x30   : > { %v460_v62 = vadd.f32 %v411_v44, %v362_v48  ;;  %v461_v63 = vadd.f32 %v412_v45, %v363_v49  ;;  %v366_v3 = vadd.f32 %v674_v2, %v310_v52  ;;  %507 = vst [vmem:[%s695_s30 + $0xf0] sm:$0xff] %v458_v55  ;;  %v312_v8 = vmul.f32 %v658_v0, %v256_v53  ;;  %v418_v15 = vld [vmem:[%s668_s25 + $0x138] sm:$0xff]  ;;  %v263_v18 = vld [vmem:[%s663_s22 + $0x168] sm:$0xff]  ;;  %v419_v22 = vld [vmem:[%s668_s25 + $0x140] sm:$0xff] }
  0x31   : > { %508 = vst [vmem:[%s695_s30 + $0xf8] sm:$0xff] %v459_v56  ;;  %v462_v6 = vadd.f32 %v413_v47, %v364_v57  ;;  %v367_v7 = vadd.f32 %v674_v2, %v311_v59  ;;  %v313_v9 = vmul.f32 %v658_v0, %v257_v54  ;;  %v463_v12 = vadd.f32 %v414_v51, %v365_v1  ;;  %v420_v23 = vld [vmem:[%s668_s25 + $0x148] sm:$0xff]  ;;  %v421_v27 = vld [vmem:[%s668_s25 + $0x150] sm:$0xff]  ;;  %v265_v31 = vld [vmem:[%s663_s22 + $0x178] sm:$0xff] }
  0x32   : > { %509 = vst [vmem:[%s695_s30 + $0x100] sm:$0xff] %v460_v62  ;;  %510 = vst [vmem:[%s695_s30 + $0x108] sm:$0xff] %v461_v63  ;;  %v464_v13 = vadd.f32 %v415_v58, %v366_v3  ;;  %v314_v16 = vmul.f32 %v658_v0, %v258_v60  ;;  %v315_v17 = vmul.f32 %v658_v0, %v259_v61  ;;  %v264_v30 = vld [vmem:[%s663_s22 + $0x170] sm:$0xff]  ;;  %v422_v35 = vld [vmem:[%s668_s25 + $0x158] sm:$0xff] }
  0x33   : > { %511 = vst [vmem:[%s695_s30 + $0x110] sm:$0xff] %v462_v6  ;;  %v465_v19 = vadd.f32 %v416_v4, %v367_v7  ;;  %v368_v20 = vadd.f32 %v674_v2, %v312_v8  ;;  %v369_v21 = vadd.f32 %v674_v2, %v313_v9  ;;  %v316_v24 = vmul.f32 %v658_v0, %v260_v5  ;;  %v423_v36 = vld [vmem:[%s668_s25 + $0x160] sm:$0xff]  ;;  %v424_v43 = vld [vmem:[%s668_s25 + $0x168] sm:$0xff]  ;;  %v425_v50 = vld [vmem:[%s668_s25 + $0x170] sm:$0xff] }
  0x34   : > { %512 = vst [vmem:[%s695_s30 + $0x118] sm:$0xff] %v463_v12  ;;  %513 = vst [vmem:[%s695_s30 + $0x120] sm:$0xff] %v464_v13  ;;  %v370_v25 = vadd.f32 %v674_v2, %v314_v16  ;;  %v371_v26 = vadd.f32 %v674_v2, %v315_v17  ;;  %v317_v28 = vmul.f32 %v658_v0, %v261_v10  ;;  %v266_v38 = vld [vmem:[%s663_s22 + $0x180] sm:$0xf]  ;;  %v426_v51 = vld [vmem:[%s668_s25 + $0x178] sm:$0xff] }
  0x35   : > { %v318_v29 = vmul.f32 %v658_v0, %v262_v11  ;;  %514 = vst [vmem:[%s695_s30 + $0x128] sm:$0xff] %v465_v19  ;;  %v466_v32 = vadd.f32 %v417_v14, %v368_v20  ;;  %v467_v33 = vadd.f32 %v418_v15, %v369_v21  ;;  %v372_v34 = vadd.f32 %v674_v2, %v316_v24  ;;  %v427_v56 = vld [vmem:[%s668_s25 + $0x180] sm:$0xf] }
  0x36   : > { %v319_v37 = vmul.f32 %v658_v0, %v263_v18  ;;  %v468_v39 = vadd.f32 %v419_v22, %v370_v25  ;;  %v469_v40 = vadd.f32 %v420_v23, %v371_v26  ;;  %v373_v41 = vadd.f32 %v674_v2, %v317_v28 }
  0x37   : > { %v374_v42 = vadd.f32 %v674_v2, %v318_v29  ;;  %515 = vst [vmem:[%s695_s30 + $0x130] sm:$0xff] %v466_v32  ;;  %516 = vst [vmem:[%s695_s30 + $0x138] sm:$0xff] %v467_v33  ;;  %v470_v44 = vadd.f32 %v421_v27, %v372_v34  ;;  %v320_v46 = vmul.f32 %v658_v0, %v264_v30 }
  0x38   : > { %v375_v45 = vadd.f32 %v674_v2, %v319_v37  ;;  %v321_v47 = vmul.f32 %v658_v0, %v265_v31  ;;  %517 = vst [vmem:[%s695_s30 + $0x140] sm:$0xff] %v468_v39  ;;  %518 = vst [vmem:[%s695_s30 + $0x148] sm:$0xff] %v469_v40  ;;  %v471_v48 = vadd.f32 %v422_v35, %v373_v41 }
  0x39   : > { %v472_v49 = vadd.f32 %v423_v36, %v374_v42  ;;  %v322_v52 = vmul.f32 %v658_v0, %v266_v38  ;;  %519 = vst [vmem:[%s695_s30 + $0x150] sm:$0xff] %v470_v44  ;;  %v376_v54 = vadd.f32 %v674_v2, %v320_v46 }
  0x3a   : > { %v473_v53 = vadd.f32 %v424_v43, %v375_v45  ;;  %v377_v55 = vadd.f32 %v674_v2, %v321_v47  ;;  %520 = vst [vmem:[%s695_s30 + $0x158] sm:$0xff] %v471_v48 }
  0x3b   : > { %521 = vst [vmem:[%s695_s30 + $0x160] sm:$0xff] %v472_v49  ;;  %v378_v57 = vadd.f32 %v674_v2, %v322_v52  ;;  %v474_v58 = vadd.f32 %v425_v50, %v376_v54 }
  0x3c   : > { %522 = vst [vmem:[%s695_s30 + $0x168] sm:$0xff] %v473_v53  ;;  %v475_v59 = vadd.f32 %v426_v51, %v377_v55 }
  0x3d   : > { %v476_v60 = vadd.f32 %v427_v56, %v378_v57  ;;  %523 = vst [vmem:[%s695_s30 + $0x170] sm:$0xff] %v474_v58 }
  0x3e   : > { %524 = vst [vmem:[%s695_s30 + $0x178] sm:$0xff] %v475_v59 }
  0x3f   : > { %525 = vst [vmem:[%s695_s30 + $0x180] sm:$0xf] %v476_v60 }
  0x40 PF: > { %s14_s15 = sadd.s32 1, %s620_s15  }
  0x41   : > { %p11_p4 = scmp.ge.s32.totalorder %s14_s15, 4  }
  0x43   :  { %13 = sbr.rel (!%p11_p4) target bundleno = 1 (0x1), region = 69 }

// kernel: res_block.3
= control target key start
LH: loop header
LB: loop body
LE: loop exit
PB: predicated region body
PF: predicated region fallthrough
CT: control target
= control target key end

     0   :  { %s7451_s24 = smov 0   ;;  %s10597_s0 = inlined_call_operand.vmem [shape: f32[2,388,128], index: 0, kind: input, shape index: {}]   ;;  %s10598_s1 = inlined_call_operand.vmem [shape: f32[9,128,128], index: 1, kind: input, shape index: {}]   ;;  %s10599_s2 = inlined_call_operand.vmem [shape: f32[1,128], index: 2, kind: input, shape index: {}]   ;;  %s10600_s3 = inlined_call_operand.vmem [shape: f32[1,128], index: 3, kind: input, shape index: {}]   ;;  %s10601_s4 = inlined_call_operand.vmem [shape: f32[1,128], index: 4, kind: input, shape index: {}]   ;;  %s10602_s5 = inlined_call_operand.vmem [shape: f32[388,1], index: 5, kind: input, shape index: {}]   ;;  %s10603_s6 = inlined_call_operand.vmem [shape: f32[2,388,128], index: 6, kind: output, shape index: {0}]   ;;  %s10604_s7 = inlined_call_operand.vmem [shape: f32[2,2,128], index: 7, kind: output, shape index: {1}]  }
   0x1 LB: > { %s5098_s25 = sadd.s32 4294967295, %s7405_s24   ;;  %p5102_p0 = scmp.ge.s32.totalorder %s7405_s24, 1  ;;  %s7405_s24 = sphi %s7451_s24, %s18_s24  }
   0x2   : > { %p240_p1 = scmp.lt.s32.totalorder %s7405_s24, 3 }
   0x4   : > { %p241_p2 = pnand %p5102_p0, %p240_p1 }
   0x6   : > { %244 = sbr.rel (%p241_p2) target bundleno = 1126 (0x466), region = 44 }
   0xd   : > { %v7462_v0 = vld [vmem:[%s10602_s5 + $0xb0] sm:$0xff]  ;;  %v290_v1 = vld [vmem:[%s10602_s5 + $0x8] sm:$0xff]  ;;  %v7407_v2 = vmov 0   ;;  %v7471_v3 = vld [vmem:[%s10602_s5 + $0xb8] sm:$0xff]  ;;  %v10609_v5 = vmov 0.0|0.0   ;;  %vm7409_vm0 = vmmov 0  }
   0xe   : > { %7393 = vset.pattern.permute.xlu1 %v7407_v2  ;;  %7392 = vset.pattern.permute.xlu0 %v7407_v2  ;;  %v291_v4 = vld [vmem:[%s10602_s5 + $0x10] sm:$0xff]  ;;  %v7482_v6 = vld [vmem:[%s10602_s5 + $0xc0] sm:$0xff]  ;;  %v292_v7 = vld [vmem:[%s10602_s5 + $0x18] sm:$0xff]  ;;  %v10607_v10 = vmov 0.0   ;;  %p276_p3 = scmp.lt.s32.totalorder %s5098_s25, 1  ;;  %vm849_vm1 = vcmask 1041408  }
   0xf   : > { %599 = vperm.xlu1 %7393, %v7462_v0   ;;  %494 = vperm.xlu0 %7392, %v290_v1   ;;  %v7491_v8 = vld [vmem:[%s10602_s5 + $0xc8] sm:$0xff]  ;;  %v7496_v9 = vld [vmem:[%s10602_s5 + $0x20] sm:$0xff]  ;;  %v7507_v11 = vld [vmem:[%s10602_s5 + $0xd0] sm:$0xff]  ;;  %vm1244_vm2 = vcmask 1042432   ;;  %vm1656_vm3 = vcmask 1040384   ;;  %vm3563_vm4 = vcmask 1045504  }
  0x10   : > { %7147 = vmatprep.subr.bf16.mxu0 %v10609_v5  ;;  %7363 = vmatprep.subr.bf16.mxu1 %v10609_v5  ;;  %v7512_v12 = vld [vmem:[%s10602_s5 + $0x28] sm:$0xff]  ;;  %v5108_v13 = vld [vmem:[%s10598_s1 + $0x80] sm:$0xff]  ;;  %v5110_v15 = vld [vmem:[%s10598_s1 + $0x90] sm:$0xff]  ;;  %s10934_s25 = smov (!%p276_p3, %s5098_s25), 1  ;;  %vm4016_vm5 = vcmask 1044480   ;;  %vm2774_vm6 = vcmask 1046528  }
  0x11   : > { %5784 = vmatprep.mubr.msk.f32.mxu0 %vm7409_vm0, %v10607_v10  ;;  %5847 = vmatprep.mubr.msk.f32.mxu1 %vm7409_vm0, %v10607_v10  ;;  %v5109_v14 = vld [vmem:[%s10598_s1 + $0x88] sm:$0xff]  ;;  %v5111_v16 = vld [vmem:[%s10598_s1 + $0x98] sm:$0xff]  ;;  %v7536_v19 = vld [vmem:[%s10602_s5 + $0x30] sm:$0xff]  ;;  %s7379_s26 = smul.u32 392, %s10934_s25  ;;  %s5105_s11 = sshll.u32 %s10934_s25, 1 }
  0x12   : > { %v7148_v17 = vpack.c.bf16 %v5109_v14, %v5108_v13  ;;  %v7531_v18 = vld [vmem:[%s10602_s5 + $0xd8] sm:$0xff]  ;;  %v7151_v20 = vpack.c.bf16 %v5111_v16, %v5110_v15  ;;  %v5112_v21 = vld [vmem:[%s10598_s1 + $0xa0] sm:$0xff]  ;;  %v5113_v22 = vld [vmem:[%s10598_s1 + $0xa8] sm:$0xff]  ;;  %s289_s14 = scalar_lea.vmem %s10604_s7, %s5105_s11 }
  0x13   : > { %604 = vperm.xlu1 %7393, %v7471_v3   ;;  %499 = vperm.xlu0 %7392, %v291_v4   ;;  %v7551_v23 = vld [vmem:[%s10602_s5 + $0xe0] sm:$0xff]  ;;  %v7556_v24 = vld [vmem:[%s10602_s5 + $0x38] sm:$0xff]  ;;  %v7154_v25 = vpack.c.bf16 %v5113_v22, %v5112_v21  ;;  %v5114_v26 = vld [vmem:[%s10598_s1 + $0xb0] sm:$0xff]  ;;  %s7787_s29 = scalar_lea.vmem %s10597_s0, %s7379_s26  ;;  %s10213_s30 = scalar_lea.vmem %s10603_s6, %s7379_s26 }
  0x14   : > { %7149 = vmatpush3.bf16.msra.mxu0 %v7148_v17  ;;  %7371 = vmatpush3.bf16.msra.mxu1 %v7148_v17  ;;  %v5115_v27 = vld [vmem:[%s10598_s1 + $0xb8] sm:$0xff]  ;;  %v7571_v28 = vld [vmem:[%s10602_s5 + $0xe8] sm:$0xff]  ;;  %v7576_v29 = vld [vmem:[%s10602_s5 + $0x40] sm:$0xff] }
  0x15   : > { %7150 = vmatprep.subr.bf16.mxu0 %v10609_v5  ;;  %7364 = vmatprep.subr.bf16.mxu1 %v10609_v5  ;;  %v7157_v30 = vpack.c.bf16 %v5115_v27, %v5114_v26  ;;  %v5116_v31 = vld [vmem:[%s10598_s1 + $0xc0] sm:$0xff]  ;;  %v5117_v32 = vld [vmem:[%s10598_s1 + $0xc8] sm:$0xff]  ;;  %v7591_v33 = vld [vmem:[%s10602_s5 + $0xf0] sm:$0xff] }
  0x16   : > { %v7596_v34 = vld [vmem:[%s10602_s5 + $0x48] sm:$0xff]  ;;  %v7160_v35 = vpack.c.bf16 %v5117_v32, %v5116_v31  ;;  %v5118_v36 = vld [vmem:[%s10598_s1 + $0xd0] sm:$0xff]  ;;  %v5119_v37 = vld [vmem:[%s10598_s1 + $0xd8] sm:$0xff] }
  0x17   : > { %609 = vperm.xlu1 %7393, %v7482_v6   ;;  %504 = vperm.xlu0 %7392, %v292_v7   ;;  %v7611_v38 = vld [vmem:[%s10602_s5 + $0xf8] sm:$0xff]  ;;  %v7616_v39 = vld [vmem:[%s10602_s5 + $0x50] sm:$0xff]  ;;  %v7163_v40 = vpack.c.bf16 %v5119_v37, %v5118_v36  ;;  %v5120_v41 = vld [vmem:[%s10598_s1 + $0xe0] sm:$0xff] }
  0x18   : > { %7152 = vmatpush3.bf16.msra.mxu0 %v7151_v20  ;;  %7372 = vmatpush3.bf16.msra.mxu1 %v7151_v20  ;;  %v5121_v42 = vld [vmem:[%s10598_s1 + $0xe8] sm:$0xff]  ;;  %v7631_v43 = vld [vmem:[%s10602_s5 + $0x100] sm:$0xff]  ;;  %v7636_v44 = vld [vmem:[%s10602_s5 + $0x58] sm:$0xff] }
  0x19   : > { %7153 = vmatprep.subr.bf16.mxu0 %v10609_v5  ;;  %7365 = vmatprep.subr.bf16.mxu1 %v10609_v5  ;;  %v7166_v45 = vpack.c.bf16 %v5121_v42, %v5120_v41  ;;  %v5122_v46 = vld [vmem:[%s10598_s1 + $0xf0] sm:$0xff]  ;;  %v5123_v47 = vld [vmem:[%s10598_s1 + $0xf8] sm:$0xff]  ;;  %v7651_v48 = vld [vmem:[%s10602_s5 + $0x108] sm:$0xff] }
  0x1a   : > { %v7656_v49 = vld [vmem:[%s10602_s5 + $0x60] sm:$0xff]  ;;  %v7169_v50 = vpack.c.bf16 %v5123_v47, %v5122_v46  ;;  %v7665_v51 = vld [vmem:[%s10602_s5 + $0x110] sm:$0xff]  ;;  %v302_v52 = vld [vmem:[%s10602_s5 + $0x68] sm:$0xff] }
  0x1b   : > { %614 = vperm.xlu1 %7393, %v7491_v8   ;;  %509 = vperm.xlu0 %7392, %v7496_v9   ;;  %v7676_v53 = vld [vmem:[%s10602_s5 + $0x118] sm:$0xff]  ;;  %v303_v54 = vld [vmem:[%s10602_s5 + $0x70] sm:$0xff]  ;;  %v7685_v55 = vld [vmem:[%s10602_s5 + $0x120] sm:$0xff] }
  0x1c   : > { %7155 = vmatpush3.bf16.msra.mxu0 %v7154_v25  ;;  %7373 = vmatpush3.bf16.msra.mxu1 %v7154_v25  ;;  %v304_v56 = vld [vmem:[%s10602_s5 + $0x78] sm:$0xff]  ;;  %v7694_v57 = vld [vmem:[%s10602_s5 + $0x128] sm:$0xff]  ;;  %v305_v58 = vld [vmem:[%s10602_s5 + $0x80] sm:$0xff] }
  0x1d   : > { %7156 = vmatprep.subr.bf16.mxu0 %v10609_v5  ;;  %7366 = vmatprep.subr.bf16.mxu1 %v10609_v5  ;;  %v7703_v59 = vld [vmem:[%s10602_s5 + $0x130] sm:$0xff]  ;;  %v306_v60 = vld [vmem:[%s10602_s5 + $0x88] sm:$0xff]  ;;  %v7712_v61 = vld [vmem:[%s10602_s5 + $0x138] sm:$0xff] }
  0x1e   : > { %v307_v62 = vld [vmem:[%s10602_s5 + $0x90] sm:$0xff]  ;;  %v7721_v63 = vld [vmem:[%s10602_s5 + $0x140] sm:$0xff]  ;;  %v308_v1 = vld [vmem:[%s10602_s5 + $0x98] sm:$0xff] }
  0x1f   : > { %619 = vperm.xlu1 %7393, %v7507_v11   ;;  %514 = vperm.xlu0 %7392, %v7512_v12   ;;  %v7730_v2 = vld [vmem:[%s10602_s5 + $0x148] sm:$0xff]  ;;  %v309_v4 = vld [vmem:[%s10602_s5 + $0xa0] sm:$0xff]  ;;  %v7739_v7 = vld [vmem:[%s10602_s5 + $0x150] sm:$0xff] }
  0x20   : > { %7158 = vmatpush3.bf16.msra.mxu0 %v7157_v30  ;;  %7374 = vmatpush3.bf16.msra.mxu1 %v7157_v30  ;;  %v310_v13 = vld [vmem:[%s10602_s5 + $0xa8] sm:$0xff]  ;;  %v7748_v14 = vld [vmem:[%s10602_s5 + $0x160] sm:$0xff]  ;;  %v7753_v15 = vld [vmem:[%s10602_s5 + $0x158] sm:$0xff] }
  0x21   : > { %7159 = vmatprep.subr.bf16.mxu0 %v10609_v5  ;;  %7367 = vmatprep.subr.bf16.mxu1 %v10609_v5  ;;  %v335_v16 = vld [vmem:[%s10602_s5 + $0x170] sm:$0xff]  ;;  %v334_v17 = vld [vmem:[%s10602_s5 + $0x168] sm:$0xff]  ;;  %v336_v20 = vld [vmem:[%s10602_s5 + $0x178] sm:$0xff] }
  0x22   : > { %v359_v22 = vld [vmem:[%s7787_s29 + $0xb8] sm:$0xff]  ;;  %v7802_v25 = vld [vmem:[%s10601_s4] ss:$0 sm:$0xff]  ;;  %v5125_v46 = vld [vmem:[%s10598_s1 + $0x108] sm:$0xff] }
  0x23   : > { %624 = vperm.xlu1 %7393, %v7531_v18   ;;  %519 = vperm.xlu0 %7392, %v7536_v19   ;;  %v360_v30 = vld [vmem:[%s7787_s29 + $0xc0] sm:$0xff]  ;;  %v339_v32 = vld [vmem:[%s7787_s29 + $0x18] sm:$0xff] }
  0x24   : > { %7161 = vmatpush3.bf16.msra.mxu0 %v7160_v35  ;;  %7375 = vmatpush3.bf16.msra.mxu1 %v7160_v35  ;;  %v340_v35 = vld [vmem:[%s7787_s29 + $0x20] sm:$0xff] }
  0x25   : > { %7162 = vmatprep.subr.bf16.mxu0 %v10609_v5  ;;  %7368 = vmatprep.subr.bf16.mxu1 %v10609_v5  ;;  %v5124_v41 = vld [vmem:[%s10598_s1 + $0x100] sm:$0xff] }
  0x26   : > { %v774_v47 = vld [vmem:[%s10598_s1] sm:$0xff] }
  0x27   : > { %629 = vperm.xlu1 %7393, %v7551_v23   ;;  %524 = vperm.xlu0 %7392, %v7556_v24  }
  0x28   : > { %7164 = vmatpush3.bf16.msra.mxu0 %v7163_v40  ;;  %7376 = vmatpush3.bf16.msra.mxu1 %v7163_v40 }
  0x29   : > { %7165 = vmatprep.subr.bf16.mxu0 %v10609_v5  ;;  %7369 = vmatprep.subr.bf16.mxu1 %v10609_v5 }
  0x2b   : > { %634 = vperm.xlu1 %7393, %v7571_v28   ;;  %529 = vperm.xlu0 %7392, %v7576_v29  }
  0x2c   : > { %7167 = vmatpush3.bf16.msra.mxu0 %v7166_v45  ;;  %7377 = vmatpush3.bf16.msra.mxu1 %v7166_v45 }
  0x2d   : > { %7168 = vmatprep.subr.bf16.mxu0 %v10609_v5  ;;  %7370 = vmatprep.subr.bf16.mxu1 %v10609_v5 }
  0x2f   : > { %639 = vperm.xlu1 %7393, %v7591_v33   ;;  %534 = vperm.xlu0 %7392, %v7596_v34  }
  0x30   : > { %7170 = vmatpush3.bf16.msra.mxu0 %v7169_v50  ;;  %7378 = vmatpush3.bf16.msra.mxu1 %v7169_v50 }
  0x31   : > { %7195 = vmatprep.subr.bf16.mxu0 %v10609_v5  ;;  %7171 = vmatprep.subr.bf16.mxu1 %v10609_v5 }
  0x33   : > { %644 = vperm.xlu1 %7393, %v7611_v38   ;;  %539 = vperm.xlu0 %7392, %v7616_v39  }
  0x37   : > { %649 = vperm.xlu1 %7393, %v7631_v43   ;;  %544 = vperm.xlu0 %7392, %v7636_v44  }
  0x3b   : > { %654 = vperm.xlu1 %7393, %v7651_v48   ;;  %549 = vperm.xlu0 %7392, %v7656_v49  }
  0x3f   : > { %659 = vperm.xlu1 %7393, %v7665_v51   ;;  %554 = vperm.xlu0 %7392, %v302_v52  }
  0x43   : > { %664 = vperm.xlu1 %7393, %v7676_v53   ;;  %559 = vperm.xlu0 %7392, %v303_v54  }
  0x47   : > { %669 = vperm.xlu1 %7393, %v7685_v55   ;;  %564 = vperm.xlu0 %7392, %v304_v56  }
  0x4b   : > { %674 = vperm.xlu1 %7393, %v7694_v57   ;;  %569 = vperm.xlu0 %7392, %v305_v58  }
  0x4f   : > { %679 = vperm.xlu1 %7393, %v7703_v59   ;;  %574 = vperm.xlu0 %7392, %v306_v60  }
  0x53   : > { %684 = vperm.xlu1 %7393, %v7712_v61   ;;  %579 = vperm.xlu0 %7392, %v307_v62  }
  0x57   : > { %689 = vperm.xlu1 %7393, %v7721_v63   ;;  %584 = vperm.xlu0 %7392, %v308_v1  }
  0x5b   : > { %694 = vperm.xlu1 %7393, %v7730_v2   ;;  %589 = vperm.xlu0 %7392, %v309_v4  }
  0x5f   : > { %699 = vperm.xlu1 %7393, %v7739_v7   ;;  %594 = vperm.xlu0 %7392, %v310_v13  }
  0x63   : > { %709 = vperm.xlu1 %7393, %v7748_v14   ;;  %704 = vperm.xlu0 %7392, %v7753_v15  }
  0x67   : > { %719 = vperm.xlu1 %7393, %v335_v16   ;;  %714 = vperm.xlu0 %7392, %v334_v17  }
  0x6b   : > { %4584 = vperm.xlu1 %7393, %v7496_v9   ;;  %724 = vperm.xlu0 %7392, %v336_v20   ;;  %v7792_v9 = vld [vmem:[%s10600_s3] ss:$0 sm:$0xff]  ;;  %v341_v20 = vld [vmem:[%s7787_s29 + $0x28] sm:$0xff] }
  0x6c   : > { %v413_v27 = vmul.f32 %v7792_v9, %v359_v22  ;;  %v414_v40 = vmul.f32 %v7792_v9, %v360_v30  ;;  %v393_v45 = vmul.f32 %v7792_v9, %v339_v32 }
  0x6e   : > { %v467_v42 = vadd.f32 %v7802_v25, %v413_v27  ;;  %v447_v17 = vadd.f32 %v7802_v25, %v393_v45 }
  0x6f   : > { %4594 = vperm.xlu1 %7393, %v7536_v19   ;;  %4589 = vperm.xlu0 %7392, %v7512_v12   ;;  %v337_v12 = vld [vmem:[%s7787_s29 + $0x8] sm:$0xff]  ;;  %v358_v19 = vld [vmem:[%s7787_s29 + $0xb0] sm:$0xff] }
  0x70   : > { %v391_v21 = vmul.f32 %v7792_v9, %v337_v12  ;;  %v412_v26 = vmul.f32 %v7792_v9, %v358_v19 }
  0x72   : > { %v445_v31 = vadd.f32 %v7802_v25, %v391_v21  ;;  %v466_v37 = vadd.f32 %v7802_v25, %v412_v26 }
  0x73   : > { %4604 = vperm.xlu1 %7393, %v7576_v29   ;;  %4599 = vperm.xlu0 %7392, %v7556_v24   ;;  %v338_v24 = vld [vmem:[%s7787_s29 + $0x10] sm:$0xff] }
  0x74   : > { %v392_v29 = vmul.f32 %v7792_v9, %v338_v24 }
  0x77   : > { %4614 = vperm.xlu1 %7393, %v7616_v39   ;;  %4609 = vperm.xlu0 %7392, %v7596_v34   ;;  %v361_v34 = vld [vmem:[%s7787_s29 + $0xc8] sm:$0xff] }
  0x78   : > { %v415_v50 = vmul.f32 %v7792_v9, %v361_v34 }
  0x7a   : > { %v469_v19 = vadd.f32 %v7802_v25, %v415_v50 }
  0x7b   : > { %4624 = vperm.xlu1 %7393, %v7656_v49   ;;  %4619 = vperm.xlu0 %7392, %v7636_v44   ;;  %v446_v44 = vadd.f32 %v7802_v25, %v392_v29  ;;  %v775_v49 = vld [vmem:[%s10598_s1 + $0x8] sm:$0xff] }
  0x7f   : > { %4634 = vperm.xlu1 %7393, %v303_v54   ;;  %4629 = vperm.xlu0 %7392, %v302_v52   ;;  %v394_v52 = vmul.f32 %v7792_v9, %v340_v35  ;;  %v362_v54 = vld [vmem:[%s7787_s29 + $0xd0] sm:$0xff]  ;;  %v395_v35 = vmul.f32 %v7792_v9, %v341_v20 }
  0x80   : > { %v416_v22 = vmul.f32 %v7792_v9, %v362_v54 }
  0x81   : > { %v448_v21 = vadd.f32 %v7802_v25, %v394_v52  ;;  %v449_v52 = vadd.f32 %v7802_v25, %v395_v35 }
  0x82   : > { %v470_v50 = vadd.f32 %v7802_v25, %v416_v22 }
  0x83   : > { %4644 = vperm.xlu1 %7393, %v305_v58   ;;  %4639 = vperm.xlu0 %7392, %v304_v56  }
  0x87   : > { %4654 = vperm.xlu1 %7393, %v307_v62   ;;  %4649 = vperm.xlu0 %7392, %v306_v60   ;;  %v468_v62 = vadd.f32 %v7802_v25, %v414_v40  ;;  %v342_v40 = vld [vmem:[%s7787_s29 + $0x30] sm:$0xff] }
  0x88   : > { %v396_v54 = vmul.f32 %v7792_v9, %v342_v40  ;;  %v344_v40 = vld [vmem:[%s7787_s29 + $0x40] sm:$0xff] }
  0x8b   : > { %4664 = vperm.xlu1 %7393, %v309_v4   ;;  %4659 = vperm.xlu0 %7392, %v308_v1   ;;  %v7196_v1 = vpack.c.bf16 %v5125_v46, %v5124_v41  ;;  %v7172_v4 = vpack.c.bf16 %v775_v49, %v774_v47 }
  0x8e   : > { %v600_v36 = vpop.permute.xlu1 %599  ;;  %v495_v39 = vpop.permute.xlu0 %494 }
  0x8f   : > { %4674 = vperm.xlu1 %7393, %v7462_v0   ;;  %4669 = vperm.xlu0 %7392, %v310_v13   ;;  %v727_v0 = vmul.f32 %v495_v39, %v445_v31  ;;  %v7833_v56 = vmul.f32 %v600_v36, %v466_v37 }
  0x91   : > { %v850_v12 = vrot.slane %v727_v0, 6  ;;  %v1245_v30 = vrot.slane %v727_v0, 5  ;;  %v891_v34 = vrot.slane %v7833_v56, 6 }
  0x92   : > { %v605_v58 = vpop.permute.xlu1 %604  ;;  %v500_v60 = vpop.permute.xlu0 %499 }
  0x93   : > { %v7836_v13 = vmul.f32 %v605_v58, %v467_v42  ;;  %v728_v16 = vmul.f32 %v500_v60, %v446_v44  ;;  %4684 = vperm.xlu1 %7393, %v7482_v6   ;;  %4679 = vperm.xlu0 %7392, %v7471_v3   ;;  %v363_v6 = vld [vmem:[%s7787_s29 + $0xd8] sm:$0xff]  ;;  %v1657_v3 = vrot.slane %v727_v0, 7  ;;  %v5126_v58 = vld [vmem:[%s10598_s1 + $0x110] sm:$0xff] }
  0x94   : > { %v417_v42 = vmul.f32 %v7792_v9, %v363_v6  ;;  %v5127_v60 = vld [vmem:[%s10598_s1 + $0x118] sm:$0xff]  ;;  %v450_v6 = vadd.f32 %v7802_v25, %v396_v54  ;;  %v366_v54 = vld [vmem:[%s7787_s29 + $0xf0] sm:$0xff] }
  0x95   : > { %v851_v24 = vrot.slane %v728_v16, 6  ;;  %v1246_v26 = vrot.slane %v728_v16, 5  ;;  %v1658_v27 = vrot.slane %v728_v16, 7  ;;  %v893_v29 = vrot.slane %v7836_v13, 6  ;;  %v364_v16 = vld [vmem:[%s7787_s29 + $0xe0] sm:$0xff] }
  0x96   : > { %v610_v31 = vpop.permute.xlu1 %609  ;;  %v505_v32 = vpop.permute.xlu0 %504  ;;  %v7199_v22 = vpack.c.bf16 %v5127_v60, %v5126_v58 }
  0x97   : > { %v7849_v36 = vmul.f32 %v610_v31, %v468_v62  ;;  %v7851_v37 = vmul.f32 %v505_v32, %v447_v17  ;;  %4694 = vperm.xlu1 %7393, %v7507_v11   ;;  %4689 = vperm.xlu0 %7392, %v7491_v8   ;;  %v852_v39 = vsel %vm849_vm1, %v850_v12, %v851_v24  ;;  %v343_v17 = vld [vmem:[%s7787_s29 + $0x38] sm:$0xff]  ;;  %v365_v31 = vld [vmem:[%s7787_s29 + $0xe8] sm:$0xff] }
  0x98   : > { %5785 = vmatmul.mubr.f32.vlgmr.msra.gmra.mrb[0].mxu0 %v852_v39  ;;  %v894_v41 = vsel %vm849_vm1, %v891_v34, %v893_v29  ;;  %v7862_v44 = vsel %vm1244_vm2, %v1245_v30, %v1246_v26  ;;  %v7865_v45 = vsel %vm1656_vm3, %v1657_v3, %v1658_v27  ;;  %v418_v30 = vmul.f32 %v7792_v9, %v364_v16  ;;  %v5128_v16 = vld [vmem:[%s10598_s1 + $0x120] sm:$0xff] }
  0x99   : > { %v853_v11 = vrot.slane %v7851_v37, 6  ;;  %v10606_v8 = vrot.slane %v7851_v37, 5  ;;  %v10605_v46 = vrot.slane %v7851_v37, 7  ;;  %5848 = vmatmul.mubr.f32.vlgmr.msra.gmra.mrb[0].mxu1 %v894_v41  ;;  %7197 = vmatpush3.bf16.msra.mxu0 %v7196_v1  ;;  %v895_v47 = vrot.slane %v7849_v36, 6 }
  0x9a   : > { %v615_v49 = vpop.permute.xlu1 %614  ;;  %v510_v0 = vpop.permute.xlu0 %509  ;;  %7173 = vmatpush3.bf16.msra.mxu1 %v7172_v4  ;;  %5787 = vmatprep.mubr.msk.f32.mxu0 %vm7409_vm0, %v10607_v10  ;;  %v397_v3 = vmul.f32 %v7792_v9, %v343_v17  ;;  %v5129_v17 = vld [vmem:[%s10598_s1 + $0x128] sm:$0xff] }
  0x9b   : > { %v7882_v62 = vmul.f32 %v615_v49, %v469_v19  ;;  %v7884_v1 = vmul.f32 %v510_v0, %v448_v21  ;;  %4704 = vperm.xlu1 %7393, %v7551_v23   ;;  %4699 = vperm.xlu0 %7392, %v7531_v18   ;;  %v854_v4 = vsel %vm849_vm1, %v851_v24, %v853_v11  ;;  %v776_v24 = vld [vmem:[%s10598_s1 + $0x10] sm:$0xff] }
  0x9c   : > { %5850 = vmatprep.mubr.msk.f32.mxu1 %vm7409_vm0, %v10607_v10  ;;  %5788 = vmatmul.mubr.f32.gmra.mrb[2].mxu0 %v854_v4  ;;  %v896_v20 = vsel %vm849_vm1, %v893_v29, %v895_v47  ;;  %v7897_v12 = vsel %vm1244_vm2, %v1246_v26, %v10606_v8  ;;  %v7902_v23 = vsel %vm1656_vm3, %v1658_v27, %v10605_v46  ;;  %v777_v26 = vld [vmem:[%s10598_s1 + $0x18] sm:$0xff]  ;;  %v357_v46 = vld [vmem:[%s7787_s29 + $0xa8] sm:$0xff] }
  0x9d   : > { %10695 = vst [vmem:[#allocation2_spill] sm:$0xff] %v7884_v1  ;;  %5851 = vmatmul.mubr.f32.gmra.mrb[2].mxu1 %v896_v20  ;;  %5790 = vmatprep.mubr.msk.f32.mxu0 %vm7409_vm0, %v10607_v10  ;;  %v855_v18 = vrot.slane %v7884_v1, 6  ;;  %v897_v19 = vrot.slane %v7882_v62, 6  ;;  %v471_v21 = vadd.f32 %v7802_v25, %v417_v42  ;;  %v7175_v42 = vpack.c.bf16 %v777_v26, %v776_v24  ;;  %v345_v20 = vld [vmem:[%s7787_s29 + $0x48] sm:$0xff]  ;;  %v778_v24 = vld [vmem:[%s10598_s1 + $0x20] sm:$0xff] }
  0x9e   : > { %v620_v27 = vpop.permute.xlu1 %619  ;;  %v515_v29 = vpop.permute.xlu0 %514  ;;  %5853 = vmatprep.mubr.msk.f32.mxu1 %vm7409_vm0, %v10607_v10  ;;  %7198 = vmatprep.subr.bf16.mxu0 %v10609_v5 }
  0x9f   : > { %v7922_v32 = vmul.f32 %v620_v27, %v470_v50  ;;  %v7924_v35 = vmul.f32 %v515_v29, %v449_v52  ;;  %4714 = vperm.xlu1 %7393, %v7591_v33   ;;  %4709 = vperm.xlu0 %7392, %v7571_v28   ;;  %v856_v39 = vsel %vm849_vm1, %v853_v11, %v855_v18 }
  0xa0   : > { %5791 = vmatmul.mubr.f32.gmra.mrb[4].mxu0 %v856_v39  ;;  %v898_v41 = vsel %vm849_vm1, %v895_v47, %v897_v19  ;;  %7174 = vmatprep.subr.bf16.mxu1 %v10609_v5  ;;  %v419_v28 = vmul.f32 %v7792_v9, %v365_v31  ;;  %v472_v47 = vadd.f32 %v7802_v25, %v418_v30 }
  0xa1   : > { %10696 = vst [vmem:[#allocation3_spill] sm:$0xff] %v7922_v32  ;;  %10697 = vst [vmem:[#allocation4_spill] sm:$0xff] %v7924_v35  ;;  %5854 = vmatmul.mubr.f32.gmra.mrb[4].mxu1 %v898_v41  ;;  %5793 = vmatprep.mubr.msk.f32.mxu0 %vm7409_vm0, %v10607_v10  ;;  %v857_v49 = vrot.slane %v7924_v35, 6  ;;  %v899_v33 = vrot.slane %v7922_v32, 6  ;;  %v451_v50 = vadd.f32 %v7802_v25, %v397_v3  ;;  %v346_v41 = vld [vmem:[%s7787_s29 + $0x50] sm:$0xff] }
  0xa2   : > { %v625_v11 = vpop.permute.xlu1 %624  ;;  %v520_v0 = vpop.permute.xlu0 %519  ;;  %5856 = vmatprep.mubr.msk.f32.mxu1 %vm7409_vm0, %v10607_v10  ;;  %7200 = vmatpush3.bf16.msra.mxu0 %v7199_v22  ;;  %v398_v52 = vmul.f32 %v7792_v9, %v344_v40  ;;  %v420_v22 = vmul.f32 %v7792_v9, %v366_v54  ;;  %v399_v30 = vmul.f32 %v7792_v9, %v345_v20  ;;  %v367_v40 = vld [vmem:[%s7787_s29 + $0xf8] sm:$0xff]  ;;  %v780_v20 = vld [vmem:[%s10598_s1 + $0x30] sm:$0xff] }
  0xa3   : > { %v7943_v58 = vmul.f32 %v625_v11, %v471_v21  ;;  %v7945_v60 = vmul.f32 %v520_v0, %v450_v6  ;;  %4724 = vperm.xlu1 %7393, %v7631_v43   ;;  %4719 = vperm.xlu0 %7392, %v7611_v38   ;;  %v858_v4 = vsel %vm849_vm1, %v855_v18, %v857_v49  ;;  %v347_v54 = vld [vmem:[%s7787_s29 + $0x58] sm:$0xff] }
  0xa4   : > { %5794 = vmatmul.mubr.f32.gmra.mrb[6].mxu0 %v858_v4  ;;  %v900_v21 = vsel %vm849_vm1, %v897_v19, %v899_v33  ;;  %7176 = vmatpush3.bf16.msra.mxu1 %v7175_v42  ;;  %v473_v18 = vadd.f32 %v7802_v25, %v419_v28  ;;  %v779_v19 = vld [vmem:[%s10598_s1 + $0x28] sm:$0xff]  ;;  %v452_v29 = vadd.f32 %v7802_v25, %v398_v52  ;;  %v368_v52 = vld [vmem:[%s7787_s29 + $0x100] sm:$0xff] }
  0xa5   : > { %10698 = vst [vmem:[#allocation5_spill] sm:$0xff] %v7943_v58  ;;  %10699 = vst [vmem:[#allocation6_spill] sm:$0xff] %v7945_v60  ;;  %5857 = vmatmul.mubr.f32.gmra.mrb[6].mxu1 %v900_v21  ;;  %5796 = vmatprep.mubr.msk.f32.mxu0 %vm7409_vm0, %v10607_v10  ;;  %v859_v38 = vrot.slane %v7945_v60, 6  ;;  %v901_v43 = vrot.slane %v7943_v58, 6  ;;  %v7202_v6 = vpack.c.bf16 %v5129_v17, %v5128_v16  ;;  %v781_v21 = vld [vmem:[%s10598_s1 + $0x38] sm:$0xff] }
  0xa6   : > { %v630_v26 = vpop.permute.xlu1 %629  ;;  %v525_v27 = vpop.permute.xlu0 %524  ;;  %5859 = vmatprep.mubr.msk.f32.mxu1 %vm7409_vm0, %v10607_v10  ;;  %7201 = vmatprep.subr.bf16.mxu0 %v10609_v5  ;;  %v7178_v28 = vpack.c.bf16 %v779_v19, %v778_v24 }
  0xa7   : > { %v7975_v3 = vmul.f32 %v630_v26, %v472_v47  ;;  %v7977_v31 = vmul.f32 %v525_v27, %v451_v50  ;;  %4734 = vperm.xlu1 %7393, %v7665_v51   ;;  %4729 = vperm.xlu0 %7392, %v7651_v48   ;;  %v860_v39 = vsel %vm849_vm1, %v857_v49, %v859_v38 }
  0xa8   : > { %5797 = vmatmul.mubr.f32.gmra.mrb[8].mxu0 %v860_v39  ;;  %v902_v42 = vsel %vm849_vm1, %v899_v33, %v901_v43  ;;  %7177 = vmatprep.subr.bf16.mxu1 %v10609_v5  ;;  %v474_v49 = vadd.f32 %v7802_v25, %v420_v22  ;;  %v453_v33 = vadd.f32 %v7802_v25, %v399_v30 }
  0xa9   : > { %10700 = vst [vmem:[#allocation7_spill] sm:$0xff] %v7975_v3  ;;  %10701 = vst [vmem:[#allocation8_spill] sm:$0xff] %v7977_v31  ;;  %5860 = vmatmul.mubr.f32.gmra.mrb[8].mxu1 %v902_v42  ;;  %5799 = vmatprep.mubr.msk.f32.mxu0 %vm7409_vm0, %v10607_v10  ;;  %v861_v51 = vrot.slane %v7977_v31, 6  ;;  %v903_v48 = vrot.slane %v7975_v3, 6  ;;  %v421_v47 = vmul.f32 %v7792_v9, %v367_v40  ;;  %v5130_v40 = vld [vmem:[%s10598_s1 + $0x130] sm:$0xff]  ;;  %v348_v42 = vld [vmem:[%s7787_s29 + $0x60] sm:$0xff] }
  0xaa   : > { %v635_v11 = vpop.permute.xlu1 %634  ;;  %v530_v0 = vpop.permute.xlu0 %529  ;;  %5862 = vmatprep.mubr.msk.f32.mxu1 %vm7409_vm0, %v10607_v10  ;;  %7203 = vmatpush3.bf16.msra.mxu0 %v7202_v6  ;;  %v400_v50 = vmul.f32 %v7792_v9, %v346_v41  ;;  %v401_v22 = vmul.f32 %v7792_v9, %v347_v54  ;;  %v7181_v27 = vpack.c.bf16 %v781_v21, %v780_v20  ;;  %v5131_v41 = vld [vmem:[%s10598_s1 + $0x138] sm:$0xff]  ;;  %v782_v21 = vld [vmem:[%s10598_s1 + $0x40] sm:$0xff] }
  0xab   : > { %v7998_v4 = vmul.f32 %v635_v11, %v473_v18  ;;  %v8000_v16 = vmul.f32 %v530_v0, %v452_v29  ;;  %4744 = vperm.xlu1 %7393, %v7685_v55   ;;  %4739 = vperm.xlu0 %7392, %v7676_v53   ;;  %v862_v17 = vsel %vm849_vm1, %v859_v38, %v861_v51  ;;  %v369_v29 = vld [vmem:[%s7787_s29 + $0x108] sm:$0xff]  ;;  %v370_v11 = vld [vmem:[%s7787_s29 + $0x110] sm:$0xff] }
  0xac   : > { %5800 = vmatmul.mubr.f32.gmra.mrb[10].mxu0 %v862_v17  ;;  %v904_v18 = vsel %vm849_vm1, %v901_v43, %v903_v48  ;;  %7179 = vmatpush3.bf16.msra.mxu1 %v7178_v28  ;;  %v422_v38 = vmul.f32 %v7792_v9, %v368_v52  ;;  %v475_v43 = vadd.f32 %v7802_v25, %v421_v47  ;;  %v349_v52 = vld [vmem:[%s7787_s29 + $0x68] sm:$0xff] }
  0xad   : > { %10702 = vst [vmem:[#allocation9_spill] sm:$0xff] %v7998_v4  ;;  %10703 = vst [vmem:[#allocation10_spill] sm:$0xff] %v8000_v16  ;;  %5863 = vmatmul.mubr.f32.gmra.mrb[10].mxu1 %v904_v18  ;;  %5802 = vmatprep.mubr.msk.f32.mxu0 %vm7409_vm0, %v10607_v10  ;;  %v863_v53 = vrot.slane %v8000_v16, 6  ;;  %v905_v55 = vrot.slane %v7998_v4, 6  ;;  %v454_v26 = vadd.f32 %v7802_v25, %v400_v50  ;;  %v783_v18 = vld [vmem:[%s10598_s1 + $0x48] sm:$0xff] }
  0xae   : > { %v640_v24 = vpop.permute.xlu1 %639  ;;  %v535_v19 = vpop.permute.xlu0 %534  ;;  %5865 = vmatprep.mubr.msk.f32.mxu1 %vm7409_vm0, %v10607_v10  ;;  %7180 = vmatprep.subr.bf16.mxu1 %v10609_v5  ;;  %v423_v47 = vmul.f32 %v7792_v9, %v369_v29  ;;  %v402_v50 = vmul.f32 %v7792_v9, %v348_v42  ;;  %v7184_v29 = vpack.c.bf16 %v783_v18, %v782_v21 }
  0xaf   : > { %v8024_v6 = vmul.f32 %v640_v24, %v474_v49  ;;  %v8026_v30 = vmul.f32 %v535_v19, %v453_v33  ;;  %4754 = vperm.xlu1 %7393, %v7703_v59   ;;  %4749 = vperm.xlu0 %7392, %v7694_v57   ;;  %v864_v39 = vsel %vm849_vm1, %v861_v51, %v863_v53 }
  0xb0   : > { %5803 = vmatmul.mubr.f32.gmra.mrb[12].mxu0 %v864_v39  ;;  %v906_v28 = vsel %vm849_vm1, %v903_v48, %v905_v55  ;;  %7204 = vmatprep.subr.bf16.mxu0 %v10609_v5  ;;  %v476_v51 = vadd.f32 %v7802_v25, %v422_v38  ;;  %v455_v49 = vadd.f32 %v7802_v25, %v401_v22  ;;  %v5132_v39 = vld [vmem:[%s10598_s1 + $0x140] sm:$0xff] }
  0xb1   : > { %10704 = vst [vmem:[#allocation11_spill] sm:$0xff] %v8024_v6  ;;  %10705 = vst [vmem:[#allocation12_spill] sm:$0xff] %v8026_v30  ;;  %5866 = vmatmul.mubr.f32.gmra.mrb[12].mxu1 %v906_v28  ;;  %5805 = vmatprep.mubr.msk.f32.mxu0 %vm7409_vm0, %v10607_v10  ;;  %v865_v57 = vrot.slane %v8026_v30, 6  ;;  %v907_v59 = vrot.slane %v8024_v6, 6  ;;  %v7205_v48 = vpack.c.bf16 %v5131_v41, %v5130_v40  ;;  %v5133_v28 = vld [vmem:[%s10598_s1 + $0x148] sm:$0xff] }
  0xb2   : > { %v645_v0 = vpop.permute.xlu1 %644  ;;  %v540_v33 = vpop.permute.xlu0 %539  ;;  %5868 = vmatprep.mubr.msk.f32.mxu1 %vm7409_vm0, %v10607_v10  ;;  %7182 = vmatpush3.bf16.msra.mxu1 %v7181_v27  ;;  %v424_v22 = vmul.f32 %v7792_v9, %v370_v11  ;;  %v350_v27 = vld [vmem:[%s7787_s29 + $0x70] sm:$0xff] }
  0xb3   : > { %v8052_v54 = vmul.f32 %v645_v0, %v475_v43  ;;  %v8054_v17 = vmul.f32 %v540_v33, %v454_v26  ;;  %4764 = vperm.xlu1 %7393, %v7721_v63   ;;  %4759 = vperm.xlu0 %7392, %v7712_v61   ;;  %v866_v20 = vsel %vm849_vm1, %v863_v53, %v865_v57  ;;  %v371_v26 = vld [vmem:[%s7787_s29 + $0x118] sm:$0xff]  ;;  %v784_v11 = vld [vmem:[%s10598_s1 + $0x50] sm:$0xff] }
  0xb4   : > { %5806 = vmatmul.mubr.f32.gmra.mrb[14].mxu0 %v866_v20  ;;  %v908_v38 = vsel %vm849_vm1, %v905_v55, %v907_v59  ;;  %7183 = vmatprep.subr.bf16.mxu1 %v10609_v5  ;;  %v403_v53 = vmul.f32 %v7792_v9, %v349_v52  ;;  %v477_v55 = vadd.f32 %v7802_v25, %v423_v47  ;;  %v372_v52 = vld [vmem:[%s7787_s29 + $0x120] sm:$0xff] }
  0xb5   : > { %10706 = vst [vmem:[#allocation13_spill] sm:$0xff] %v8052_v54  ;;  %10707 = vst [vmem:[#allocation14_spill] sm:$0xff] %v8054_v17  ;;  %5869 = vmatmul.mubr.f32.gmra.mrb[14].mxu1 %v908_v38  ;;  %5808 = vmatprep.mubr.msk.f32.mxu0 %vm7409_vm0, %v10607_v10  ;;  %v867_v61 = vrot.slane %v8054_v17, 6  ;;  %v909_v63 = vrot.slane %v8052_v54, 6  ;;  %v456_v43 = vadd.f32 %v7802_v25, %v402_v50 }
  0xb6   : > { %v650_v24 = vpop.permute.xlu1 %649  ;;  %v545_v19 = vpop.permute.xlu0 %544  ;;  %5871 = vmatprep.mubr.msk.f32.mxu1 %vm7409_vm0, %v10607_v10  ;;  %7206 = vmatpush3.bf16.msra.mxu0 %v7205_v48  ;;  %v457_v0 = vadd.f32 %v7802_v25, %v403_v53  ;;  %v425_v33 = vmul.f32 %v7792_v9, %v371_v26  ;;  %v7208_v50 = vpack.c.bf16 %v5133_v28, %v5132_v39  ;;  %v5134_v53 = vld [vmem:[%s10598_s1 + $0x150] sm:$0xff] }
  0xb7   : > { %v8082_v40 = vmul.f32 %v650_v24, %v476_v51  ;;  %v8084_v41 = vmul.f32 %v545_v19, %v455_v49  ;;  %4774 = vperm.xlu1 %7393, %v7739_v7   ;;  %4769 = vperm.xlu0 %7392, %v7730_v2   ;;  %v868_v42 = vsel %vm849_vm1, %v865_v57, %v867_v61  ;;  %v785_v51 = vld [vmem:[%s10598_s1 + $0x58] sm:$0xff] }
  0xb8   : > { %5809 = vmatmul.mubr.f32.gmra.mrb[16].mxu0 %v868_v42  ;;  %v910_v7 = vsel %vm849_vm1, %v907_v59, %v909_v63  ;;  %v478_v2 = vadd.f32 %v7802_v25, %v424_v22  ;;  %7207 = vmatprep.subr.bf16.mxu0 %v10609_v5  ;;  %v404_v59 = vmul.f32 %v7792_v9, %v350_v27  ;;  %v351_v22 = vld [vmem:[%s7787_s29 + $0x78] sm:$0xff]  ;;  %v373_v42 = vld [vmem:[%s7787_s29 + $0x128] sm:$0xff] }
  0xb9   : > { %10708 = vst [vmem:[#allocation15_spill] sm:$0xff] %v8082_v40  ;;  %10709 = vst [vmem:[#allocation16_spill] sm:$0xff] %v8084_v41  ;;  %5872 = vmatmul.mubr.f32.gmra.mrb[16].mxu1 %v910_v7  ;;  %5811 = vmatprep.mubr.msk.f32.mxu0 %vm7409_vm0, %v10607_v10  ;;  %v869_v57 = vrot.slane %v8084_v41, 6  ;;  %v911_v49 = vrot.slane %v8082_v40, 6  ;;  %v7187_v20 = vpack.c.bf16 %v785_v51, %v784_v11  ;;  %v5135_v24 = vld [vmem:[%s10598_s1 + $0x158] sm:$0xff] }
  0xba   : > { %v655_v48 = vpop.permute.xlu1 %654  ;;  %v550_v47 = vpop.permute.xlu0 %549  ;;  %5874 = vmatprep.mubr.msk.f32.mxu1 %vm7409_vm0, %v10607_v10  ;;  %7185 = vmatpush3.bf16.msra.mxu1 %v7184_v29  ;;  %v458_v29 = vadd.f32 %v7802_v25, %v404_v59  ;;  %v405_v39 = vmul.f32 %v7792_v9, %v351_v22  ;;  %v7211_v28 = vpack.c.bf16 %v5135_v24, %v5134_v53  ;;  %v5137_v59 = vld [vmem:[%s10598_s1 + $0x168] sm:$0xff]  ;;  %v374_v53 = vld [vmem:[%s7787_s29 + $0x130] sm:$0xff] }
  0xbb   : > { %v8111_v21 = vmul.f32 %v655_v48, %v477_v55  ;;  %v8113_v18 = vmul.f32 %v550_v47, %v456_v43  ;;  %4784 = vperm.xlu1 %7393, %v7748_v14   ;;  %4779 = vperm.xlu0 %7392, %v7753_v15   ;;  %v870_v38 = vsel %vm849_vm1, %v867_v61, %v869_v57  ;;  %v787_v43 = vld [vmem:[%s10598_s1 + $0x68] sm:$0xff]  ;;  %v352_v48 = vld [vmem:[%s7787_s29 + $0x80] sm:$0xff] }
  0xbc   : > { %5812 = vmatmul.mubr.f32.gmra.mrb[18].mxu0 %v870_v38  ;;  %v912_v19 = vsel %vm849_vm1, %v909_v63, %v911_v49  ;;  %7186 = vmatprep.subr.bf16.mxu1 %v10609_v5  ;;  %v479_v61 = vadd.f32 %v7802_v25, %v425_v33  ;;  %v426_v55 = vmul.f32 %v7792_v9, %v372_v52  ;;  %v786_v63 = vld [vmem:[%s10598_s1 + $0x60] sm:$0xff] }
  0xbd   : > { %10710 = vst [vmem:[#allocation17_spill] sm:$0xff] %v8111_v21  ;;  %10711 = vst [vmem:[#allocation18_spill] sm:$0xff] %v8113_v18  ;;  %5875 = vmatmul.mubr.f32.gmra.mrb[18].mxu1 %v912_v19  ;;  %5814 = vmatprep.mubr.msk.f32.mxu0 %vm7409_vm0, %v10607_v10  ;;  %v871_v14 = vrot.slane %v8113_v18, 6  ;;  %v913_v15 = vrot.slane %v8111_v21, 6  ;;  %v5136_v47 = vld [vmem:[%s10598_s1 + $0x160] sm:$0xff]  ;;  %v459_v38 = vadd.f32 %v7802_v25, %v405_v39  ;;  %v789_v39 = vld [vmem:[%s10598_s1 + $0x78] sm:$0xff] }
  0xbe   : > { %v660_v26 = vpop.permute.xlu1 %659  ;;  %v555_v27 = vpop.permute.xlu0 %554  ;;  %5877 = vmatprep.mubr.msk.f32.mxu1 %vm7409_vm0, %v10607_v10  ;;  %7209 = vmatpush3.bf16.msra.mxu0 %v7208_v50  ;;  %v427_v50 = vmul.f32 %v7792_v9, %v373_v42  ;;  %v406_v22 = vmul.f32 %v7792_v9, %v352_v48  ;;  %v7214_v24 = vpack.c.bf16 %v5137_v59, %v5136_v47  ;;  %v375_v48 = vld [vmem:[%s7787_s29 + $0x138] sm:$0xff] }
  0xbf   : > { %v8144_v11 = vmul.f32 %v660_v26, %v478_v2  ;;  %v8146_v51 = vmul.f32 %v555_v27, %v457_v0  ;;  %v872_v7 = vsel %vm849_vm1, %v869_v57, %v871_v14  ;;  %v914_v33 = vsel %vm849_vm1, %v911_v49, %v913_v15  ;;  %7188 = vmatpush3.bf16.msra.mxu1 %v7187_v20  ;;  %v353_v26 = vld [vmem:[%s7787_s29 + $0x88] sm:$0xff]  ;;  %v788_v27 = vld [vmem:[%s10598_s1 + $0x70] sm:$0xff] }
  0xc0   : > { %5815 = vmatmul.mubr.f32.gmra.mrb[20].mxu0 %v872_v7  ;;  %7210 = vmatprep.subr.bf16.mxu0 %v10609_v5  ;;  %v7190_v2 = vpack.c.bf16 %v787_v43, %v786_v63  ;;  %v480_v0 = vadd.f32 %v7802_v25, %v426_v55  ;;  %v460_v7 = vadd.f32 %v7802_v25, %v406_v22  ;;  %v5138_v22 = vld [vmem:[%s10598_s1 + $0x170] sm:$0xff] }
  0xc1   : > { %10712 = vst [vmem:[#allocation19_spill] sm:$0xff] %v8144_v11  ;;  %10713 = vst [vmem:[#allocation20_spill] sm:$0xff] %v8146_v51  ;;  %5878 = vmatmul.mubr.f32.gmra.mrb[20].mxu1 %v914_v33  ;;  %5817 = vmatprep.mubr.msk.f32.mxu0 %vm7409_vm0, %v10607_v10  ;;  %v873_v57 = vrot.slane %v8146_v51, 6  ;;  %v915_v49 = vrot.slane %v8144_v11, 6  ;;  %v407_v33 = vmul.f32 %v7792_v9, %v353_v26 }
  0xc2   : > { %v665_v52 = vpop.permute.xlu1 %664  ;;  %v560_v20 = vpop.permute.xlu0 %559  ;;  %5880 = vmatprep.mubr.msk.f32.mxu1 %vm7409_vm0, %v10607_v10  ;;  %7212 = vmatpush3.bf16.msra.mxu0 %v7211_v28  ;;  %v7193_v47 = vpack.c.bf16 %v789_v39, %v788_v27 }
  0xc3   : > { %v8169_v19 = vmul.f32 %v665_v52, %v479_v61  ;;  %v8171_v63 = vmul.f32 %v560_v20, %v458_v29  ;;  %v874_v55 = vsel %vm849_vm1, %v871_v14, %v873_v57  ;;  %v916_v43 = vsel %vm849_vm1, %v913_v15, %v915_v49  ;;  %7189 = vmatprep.subr.bf16.mxu1 %v10609_v5  ;;  %v354_v20 = vld [vmem:[%s7787_s29 + $0x90] sm:$0xff] }
  0xc4   : > { %5818 = vmatmul.mubr.f32.gmra.mrb[22].mxu0 %v874_v55  ;;  %7191 = vmatpush3.bf16.msra.mxu1 %v7190_v2  ;;  %v481_v61 = vadd.f32 %v7802_v25, %v427_v50  ;;  %v428_v29 = vmul.f32 %v7792_v9, %v374_v53  ;;  %v5139_v53 = vld [vmem:[%s10598_s1 + $0x178] sm:$0xff]  ;;  %v408_v26 = vmul.f32 %v7792_v9, %v354_v20 }
  0xc5   : > { %10714 = vst [vmem:[#allocation21_spill] sm:$0xff] %v8169_v19  ;;  %10715 = vst [vmem:[#allocation22_spill] sm:$0xff] %v8171_v63  ;;  %5881 = vmatmul.mubr.f32.gmra.mrb[22].mxu1 %v916_v43  ;;  %5820 = vmatprep.mubr.msk.f32.mxu0 %vm7409_vm0, %v10607_v10  ;;  %v875_v14 = vrot.slane %v8171_v63, 6  ;;  %v917_v15 = vrot.slane %v8169_v19, 6  ;;  %v461_v43 = vadd.f32 %v7802_v25, %v407_v33 }
  0xc6   : > { %v670_v42 = vpop.permute.xlu1 %669  ;;  %v565_v28 = vpop.permute.xlu0 %564  ;;  %5883 = vmatprep.mubr.msk.f32.mxu1 %vm7409_vm0, %v10607_v10  ;;  %7213 = vmatprep.subr.bf16.mxu0 %v10609_v5  ;;  %v7217_v27 = vpack.c.bf16 %v5139_v53, %v5138_v22 }
  0xc7   : > { %v8195_v59 = vmul.f32 %v670_v42, %v480_v0  ;;  %v8197_v2 = vmul.f32 %v565_v28, %v459_v38  ;;  %v876_v50 = vsel %vm849_vm1, %v873_v57, %v875_v14  ;;  %v918_v52 = vsel %vm849_vm1, %v915_v49, %v917_v15  ;;  %7215 = vmatpush3.bf16.msra.mxu0 %v7214_v24 }
  0xc8   : > { %5821 = vmatmul.mubr.f32.gmra.mrb[24].mxu0 %v876_v50  ;;  %7192 = vmatprep.subr.bf16.mxu1 %v10609_v5  ;;  %v482_v0 = vadd.f32 %v7802_v25, %v428_v29  ;;  %v429_v38 = vmul.f32 %v7792_v9, %v375_v48  ;;  %v376_v48 = vld [vmem:[%s7787_s29 + $0x140] sm:$0xff]  ;;  %v355_v50 = vld [vmem:[%s7787_s29 + $0x98] sm:$0xff] }
  0xc9   : > { %10716 = vst [vmem:[#allocation23_spill] sm:$0xff] %v8195_v59  ;;  %10717 = vst [vmem:[#allocation24_spill] sm:$0xff] %v8197_v2  ;;  %5884 = vmatmul.mubr.f32.gmra.mrb[24].mxu1 %v918_v52  ;;  %5823 = vmatprep.mubr.msk.f32.mxu0 %vm7409_vm0, %v10607_v10  ;;  %v877_v57 = vrot.slane %v8197_v2, 6  ;;  %v919_v49 = vrot.slane %v8195_v59, 6  ;;  %v430_v52 = vmul.f32 %v7792_v9, %v376_v48 }
  0xca   : > { %v675_v24 = vpop.permute.xlu1 %674  ;;  %v570_v55 = vpop.permute.xlu0 %569  ;;  %5886 = vmatprep.mubr.msk.f32.mxu1 %vm7409_vm0, %v10607_v10  ;;  %7194 = vmatpush3.bf16.msra.mxu1 %v7193_v47  ;;  %v462_v47 = vadd.f32 %v7802_v25, %v408_v26  ;;  %v409_v20 = vmul.f32 %v7792_v9, %v355_v50 }
  0xcb   : > { %v8219_v39 = vmul.f32 %v675_v24, %v481_v61  ;;  %v8221_v42 = vmul.f32 %v570_v55, %v460_v7  ;;  %v878_v28 = vsel %vm849_vm1, %v875_v14, %v877_v57  ;;  %v920_v29 = vsel %vm849_vm1, %v917_v15, %v919_v49  ;;  %7216 = vmatprep.subr.bf16.mxu0 %v10609_v5  ;;  %v377_v55 = vld [vmem:[%s7787_s29 + $0x148] sm:$0xff] }
  0xcc   : > { %5824 = vmatmul.mubr.f32.gmra.mrb[26].mxu0 %v878_v28  ;;  %7219 = vmatprep.subr.bf16.mxu1 %v10609_v5  ;;  %v483_v14 = vadd.f32 %v7802_v25, %v429_v38  ;;  %v356_v28 = vld [vmem:[%s7787_s29 + $0xa0] sm:$0xff] }
  0xcd   : > { %10718 = vst [vmem:[#allocation25_spill] sm:$0xff] %v8219_v39  ;;  %5887 = vmatmul.mubr.f32.gmra.mrb[26].mxu1 %v920_v29  ;;  %5826 = vmatprep.mubr.msk.f32.mxu0 %vm7409_vm0, %v10607_v10  ;;  %v879_v61 = vrot.slane %v8221_v42, 6  ;;  %v921_v7 = vrot.slane %v8219_v39, 6  ;;  %v431_v29 = vmul.f32 %v7792_v9, %v377_v55  ;;  %v410_v48 = vmul.f32 %v7792_v9, %v356_v28 }
  0xce   : > { %v680_v15 = vpop.permute.xlu1 %679  ;;  %v575_v33 = vpop.permute.xlu0 %574  ;;  %5889 = vmatprep.mubr.msk.f32.mxu1 %vm7409_vm0, %v10607_v10  ;;  %7218 = vmatpush3.bf16.msra.mxu0 %v7217_v27  ;;  %v411_v28 = vmul.f32 %v7792_v9, %v357_v46 }
  0xcf   : > { %v8239_v22 = vmul.f32 %v680_v15, %v482_v0  ;;  %v8241_v53 = vmul.f32 %v575_v33, %v461_v43  ;;  %v880_v24 = vsel %vm849_vm1, %v877_v57, %v879_v61  ;;  %v922_v38 = vsel %vm849_vm1, %v919_v49, %v921_v7  ;;  %7243 = vmatprep.subr.bf16.mxu0 %v10609_v5 }
  0xd0   : > { %5827 = vmatmul.mubr.f32.gmra.mrb[28].mxu0 %v880_v24  ;;  %v484_v57 = vadd.f32 %v7802_v25, %v430_v52  ;;  %v463_v49 = vadd.f32 %v7802_v25, %v409_v20  ;;  %v465_v46 = vadd.f32 %v7802_v25, %v411_v28 }
  0xd1   : > { %10719 = vst [vmem:[#allocation26_spill] sm:$0xff] %v8239_v22  ;;  %5890 = vmatmul.mubr.f32.gmra.mrb[28].mxu1 %v922_v38  ;;  %5829 = vmatprep.mubr.msk.f32.mxu0 %vm7409_vm0, %v10607_v10  ;;  %v881_v0 = vrot.slane %v8241_v53, 6  ;;  %v923_v43 = vrot.slane %v8239_v22, 6  ;;  %v378_v38 = vld [vmem:[%s7787_s29 + $0x150] sm:$0xff] }
  0xd2   : > { %v685_v26 = vpop.permute.xlu1 %684  ;;  %v580_v27 = vpop.permute.xlu0 %579  ;;  %5892 = vmatprep.mubr.msk.f32.mxu1 %vm7409_vm0, %v10607_v10 }
  0xd3   : > { %v8258_v50 = vmul.f32 %v685_v26, %v483_v14  ;;  %v8260_v15 = vmul.f32 %v580_v27, %v462_v47  ;;  %v882_v33 = vsel %vm849_vm1, %v879_v61, %v881_v0  ;;  %v924_v24 = vsel %vm849_vm1, %v921_v7, %v923_v43 }
  0xd4   : > { %5830 = vmatmul.mubr.f32.gmra.mrb[30].mxu0 %v882_v33  ;;  %v485_v61 = vadd.f32 %v7802_v25, %v431_v29  ;;  %v464_v7 = vadd.f32 %v7802_v25, %v410_v48  ;;  %v432_v47 = vmul.f32 %v7792_v9, %v378_v38 }
  0xd5   : > { %10720 = vst [vmem:[#allocation27_spill] sm:$0xff] %v8258_v50  ;;  %5893 = vmatmul.mubr.f32.gmra.mrb[30].mxu1 %v924_v24  ;;  %5832 = vmatprep.mubr.msk.f32.mxu0 %vm7409_vm0, %v10607_v10  ;;  %v883_v52 = vrot.slane %v8260_v15, 6  ;;  %v925_v20 = vrot.slane %v8258_v50, 6 }
  0xd6   : > { %v690_v55 = vpop.permute.xlu1 %689  ;;  %v585_v14 = vpop.permute.xlu0 %584  ;;  %5895 = vmatprep.mubr.msk.f32.mxu1 %vm7409_vm0, %v10607_v10  ;;  %v486_v9 = vadd.f32 %v7802_v25, %v432_v47 }
  0xd7   : > { %v8276_v26 = vmul.f32 %v690_v55, %v484_v57  ;;  %v8278_v27 = vmul.f32 %v585_v14, %v463_v49  ;;  %v884_v33 = vsel %vm849_vm1, %v881_v0, %v883_v52  ;;  %v926_v24 = vsel %vm849_vm1, %v923_v43, %v925_v20 }
  0xd8   : > { %5833 = vmatmul.mubr.f32.gmra.mrb[32].mxu0 %v884_v33 }
  0xd9   : > { %10721 = vst [vmem:[#allocation28_spill] sm:$0xff] %v8276_v26  ;;  %5896 = vmatmul.mubr.f32.gmra.mrb[32].mxu1 %v926_v24  ;;  %5835 = vmatprep.mubr.msk.f32.mxu0 %vm7409_vm0, %v10607_v10  ;;  %v885_v29 = vrot.slane %v8278_v27, 6  ;;  %v927_v48 = vrot.slane %v8276_v26, 6 }
  0xda   : > { %v695_v38 = vpop.permute.xlu1 %694  ;;  %v590_v8 = vpop.permute.xlu0 %589  ;;  %5898 = vmatprep.mubr.msk.f32.mxu1 %vm7409_vm0, %v10607_v10 }
  0xdb   : > { %v8290_v0 = vmul.f32 %v695_v38, %v485_v61  ;;  %v8292_v43 = vmul.f32 %v590_v8, %v464_v7  ;;  %v886_v57 = vsel %vm849_vm1, %v883_v52, %v885_v29  ;;  %v928_v49 = vsel %vm849_vm1, %v925_v20, %v927_v48 }
  0xdc   : > { %5836 = vmatmul.mubr.f32.gmra.mrb[34].mxu0 %v886_v57 }
  0xdd   : > { %10722 = vst [vmem:[#allocation29_spill] sm:$0xff] %v8290_v0  ;;  %5899 = vmatmul.mubr.f32.gmra.mrb[34].mxu1 %v928_v49  ;;  %5838 = vmatprep.mubr.msk.f32.mxu0 %vm7409_vm0, %v10607_v10  ;;  %v887_v55 = vrot.slane %v8292_v43, 6  ;;  %v929_v14 = vrot.slane %v8290_v0, 6  ;;  %v5142_v49 = vld [vmem:[%s10598_s1 + $0x190] sm:$0xff] }
  0xde   : > { %v700_v47 = vpop.permute.xlu1 %699  ;;  %v595_v33 = vpop.permute.xlu0 %594  ;;  %5901 = vmatprep.mubr.msk.f32.mxu1 %vm7409_vm0, %v10607_v10 }
  0xdf   : > { %v8302_v25 = vmul.f32 %v700_v47, %v486_v9  ;;  %v8304_v8 = vmul.f32 %v595_v33, %v465_v46  ;;  %v888_v52 = vsel %vm849_vm1, %v885_v29, %v887_v55  ;;  %v930_v20 = vsel %vm849_vm1, %v927_v48, %v929_v14  ;;  %v5140_v29 = vld [vmem:[%s10598_s1 + $0x180] sm:$0xff]  ;;  %v5141_v48 = vld [vmem:[%s10598_s1 + $0x188] sm:$0xff]  ;;  %v5158_v47 = vld [vmem:[%s10598_s1 + $0x210] sm:$0xff] }
  0xe0   : > { %5839 = vmatmul.mubr.f32.gmra.mrb[36].mxu0 %v888_v52  ;;  %v7220_v38 = vpack.c.bf16 %v5141_v48, %v5140_v29  ;;  %v5156_v9 = vld [vmem:[%s10598_s1 + $0x200] sm:$0xff]  ;;  %v5157_v46 = vld [vmem:[%s10598_s1 + $0x208] sm:$0xff]  ;;  %v5159_v33 = vld [vmem:[%s10598_s1 + $0x218] sm:$0xff]  ;;  %v1252_v48 = vrot.slane %v7924_v35, 5 }
  0xe1   : > { %10723 = vst [vmem:[#allocation30_spill] sm:$0xff] %v8302_v25  ;;  %5902 = vmatmul.mubr.f32.gmra.mrb[36].mxu1 %v930_v20  ;;  %5841 = vmatprep.mubr.msk.f32.mxu0 %vm7409_vm0, %v10607_v10  ;;  %v889_v61 = vrot.slane %v8304_v8, 6  ;;  %v931_v7 = vrot.slane %v8302_v25, 6  ;;  %v5144_v52 = vld [vmem:[%s10598_s1 + $0x1a0] sm:$0xff]  ;;  %v5145_v20 = vld [vmem:[%s10598_s1 + $0x1a8] sm:$0xff] }
  0xe2   : > { %5904 = vmatprep.mubr.msk.f32.mxu1 %vm7409_vm0, %v10607_v10 }
  0xe3   : > { %v890_v28 = vsel %vm849_vm1, %v887_v55, %v889_v61  ;;  %v932_v24 = vsel %vm849_vm1, %v929_v14, %v931_v7  ;;  %v892_v57 = vsel %vm849_vm1, %v889_v61, %v891_v34  ;;  %v5143_v55 = vld [vmem:[%s10598_s1 + $0x198] sm:$0xff]  ;;  %v7244_v14 = vpack.c.bf16 %v5157_v46, %v5156_v9 }
  0xe4   : > { %5842 = vmatmul.mubr.f32.gmra.mrb[38].mxu0 %v890_v28  ;;  %v7223_v34 = vpack.c.bf16 %v5143_v55, %v5142_v49  ;;  %v1662_v61 = vrot.slane %v7884_v1, 7  ;;  %v7226_v7 = vpack.c.bf16 %v5145_v20, %v5144_v52  ;;  %v5160_v28 = vld [vmem:[%s10598_s1 + $0x220] sm:$0xff]  ;;  %v5147_v9 = vld [vmem:[%s10598_s1 + $0x1b8] sm:$0xff]  ;;  %v10725_v46 = vrot.slane %v7851_v37, 7  ;;  %v5149_v52 = vld [vmem:[%s10598_s1 + $0x1c8] sm:$0xff] }
  0xe5   : > { %5905 = vmatmul.mubr.f32.gmra.mrb[38].mxu1 %v932_v24  ;;  %5844 = vmatprep.mubr.msk.f32.mxu0 %vm7409_vm0, %v10607_v10  ;;  %v10724_v24 = vrot.slane %v7851_v37, 5  ;;  %v1664_v49 = vrot.slane %v7924_v35, 7  ;;  %v1254_v37 = vrot.slane %v7945_v60, 5 }
  0xe6   : > { %5939 = vmatprep.mubr.msk.f32.mxu1 %vm7409_vm0, %v10607_v10 }
  0xe7   : > { %v8418_v20 = vsel %vm1656_vm3, %v1662_v61, %v1664_v49 }
  0xe8   : > { %5845 = vmatmul.mubr.f32.gmra.mrb[40].mxu0 %v892_v57  ;;  %v8393_v57 = vsel %vm1656_vm3, %v10725_v46, %v1662_v61  ;;  %v1256_v61 = vrot.slane %v7977_v31, 5 }
  0xe9   : > { %5940 = vmatmul.mubr.f32.vlgmr.msra.gmra.mrb[40].mxu1 %v7862_v44  ;;  %6094 = vmatprep.mubr.msk.f32.mxu0 %vm7409_vm0, %v10607_v10  ;;  %v1250_v44 = vrot.slane %v7884_v1, 5 }
  0xea   : > { %7221 = vmatpush3.bf16.msra.mxu1 %v7220_v38  ;;  %5942 = vmatprep.mubr.msk.f32.mxu1 %vm7409_vm0, %v10607_v10  ;;  %v5146_v38 = vld [vmem:[%s10598_s1 + $0x1b0] sm:$0xff] }
  0xeb   : > { %7222 = vmatprep.subr.bf16.mxu1 %v10609_v5  ;;  %v1251_v29 = vsel %vm1244_vm2, %v10724_v24, %v1250_v44  ;;  %v7229_v55 = vpack.c.bf16 %v5147_v9, %v5146_v38  ;;  %v1255_v24 = vsel %vm1244_vm2, %v1252_v48, %v1254_v37  ;;  %v5151_v38 = vld [vmem:[%s10598_s1 + $0x1d8] sm:$0xff] }
  0xec   : > { %6095 = vmatmul.mubr.f32.vlgmr.msra.gmra.mrb[42].mxu0 %v7865_v45  ;;  %v7247_v45 = vpack.c.bf16 %v5159_v33, %v5158_v47  ;;  %v1253_v47 = vsel %vm1244_vm2, %v1250_v44, %v1252_v48  ;;  %v5148_v33 = vld [vmem:[%s10598_s1 + $0x1c0] sm:$0xff] }
  0xed   : > { %5943 = vmatmul.mubr.f32.gmra.mrb[42].mxu1 %v7897_v12  ;;  %7245 = vmatpush3.bf16.msra.mxu0 %v7244_v14  ;;  %v5161_v12 = vld [vmem:[%s10598_s1 + $0x228] sm:$0xff]  ;;  %v5162_v14 = vld [vmem:[%s10598_s1 + $0x230] sm:$0xff] }
  0xee   : > { %5945 = vmatprep.mubr.msk.f32.mxu1 %vm7409_vm0, %v10607_v10  ;;  %6097 = vmatprep.mubr.msk.f32.mxu0 %vm7409_vm0, %v10607_v10 }
  0xef   : > { %7224 = vmatpush3.bf16.msra.mxu1 %v7223_v34  ;;  %7246 = vmatprep.subr.bf16.mxu0 %v10609_v5  ;;  %v5163_v34 = vld [vmem:[%s10598_s1 + $0x238] sm:$0xff] }
  0xf0   : > { %6098 = vmatmul.mubr.f32.gmra.mrb[44].mxu0 %v7902_v23  ;;  %7225 = vmatprep.subr.bf16.mxu1 %v10609_v5  ;;  %v7250_v23 = vpack.c.bf16 %v5161_v12, %v5160_v28  ;;  %v7253_v44 = vpack.c.bf16 %v5163_v34, %v5162_v14  ;;  %v5164_v28 = vld [vmem:[%s10598_s1 + $0x240] sm:$0xff]  ;;  %v5165_v12 = vld [vmem:[%s10598_s1 + $0x248] sm:$0xff]  ;;  %v5167_v14 = vld [vmem:[%s10598_s1 + $0x258] sm:$0xff]  ;;  %v1257_v34 = vsel %vm1244_vm2, %v1254_v37, %v1256_v61 }
  0xf1   : > { %5946 = vmatmul.mubr.f32.gmra.mrb[44].mxu1 %v1251_v29  ;;  %6100 = vmatprep.mubr.msk.f32.mxu0 %vm7409_vm0, %v10607_v10  ;;  %v5150_v29 = vld [vmem:[%s10598_s1 + $0x1d0] sm:$0xff]  ;;  %v7256_v48 = vpack.c.bf16 %v5165_v12, %v5164_v28  ;;  %v5168_v28 = vld [vmem:[%s10598_s1 + $0x260] sm:$0xff]  ;;  %v5169_v12 = vld [vmem:[%s10598_s1 + $0x268] sm:$0xff] }
  0xf2   : > { %5948 = vmatprep.mubr.msk.f32.mxu1 %vm7409_vm0, %v10607_v10  ;;  %7248 = vmatpush3.bf16.msra.mxu0 %v7247_v45  ;;  %v1666_v45 = vrot.slane %v7945_v60, 7  ;;  %v7235_v46 = vpack.c.bf16 %v5151_v38, %v5150_v29  ;;  %v5154_v29 = vld [vmem:[%s10598_s1 + $0x1f0] sm:$0xff]  ;;  %v5155_v38 = vld [vmem:[%s10598_s1 + $0x1f8] sm:$0xff] }
  0xf3   : > { %7227 = vmatpush3.bf16.msra.mxu1 %v7226_v7  ;;  %7249 = vmatprep.subr.bf16.mxu0 %v10609_v5  ;;  %v7232_v7 = vpack.c.bf16 %v5149_v52, %v5148_v33  ;;  %v5153_v33 = vld [vmem:[%s10598_s1 + $0x1e8] sm:$0xff] }
  0xf4   : > { %6101 = vmatmul.mubr.f32.gmra.mrb[46].mxu0 %v8393_v57  ;;  %7228 = vmatprep.subr.bf16.mxu1 %v10609_v5  ;;  %v8443_v9 = vsel %vm1656_vm3, %v1664_v49, %v1666_v45  ;;  %v1258_v49 = vrot.slane %v8000_v16, 5 }
  0xf5   : > { %5949 = vmatmul.mubr.f32.gmra.mrb[46].mxu1 %v1253_v47  ;;  %6103 = vmatprep.mubr.msk.f32.mxu0 %vm7409_vm0, %v10607_v10  ;;  %v5152_v47 = vld [vmem:[%s10598_s1 + $0x1e0] sm:$0xff] }
  0xf6   : > { %5951 = vmatprep.mubr.msk.f32.mxu1 %vm7409_vm0, %v10607_v10  ;;  %7251 = vmatpush3.bf16.msra.mxu0 %v7250_v23  ;;  %v1668_v23 = vrot.slane %v7977_v31, 7 }
  0xf7   : > { %7230 = vmatpush3.bf16.msra.mxu1 %v7229_v55  ;;  %7252 = vmatprep.subr.bf16.mxu0 %v10609_v5  ;;  %v5166_v55 = vld [vmem:[%s10598_s1 + $0x250] sm:$0xff] }
  0xf8   : > { %6104 = vmatmul.mubr.f32.gmra.mrb[48].mxu0 %v8418_v20  ;;  %7231 = vmatprep.subr.bf16.mxu1 %v10609_v5  ;;  %v7259_v37 = vpack.c.bf16 %v5167_v14, %v5166_v55  ;;  %v8468_v52 = vsel %vm1656_vm3, %v1666_v45, %v1668_v23  ;;  %v1260_v45 = vrot.slane %v8026_v30, 5  ;;  %v7241_v55 = vpack.c.bf16 %v5155_v38, %v5154_v29  ;;  %v5170_v14 = vld [vmem:[%s10598_s1 + $0x270] sm:$0xff]  ;;  %v381_v29 = vld [vmem:[%s7787_s29 + $0x168] sm:$0xff]  ;;  %v383_v38 = vld [vmem:[%s7787_s29 + $0x178] sm:$0xff] }
  0xf9   : > { %5952 = vmatmul.mubr.f32.gmra.mrb[48].mxu1 %v1255_v24  ;;  %6106 = vmatprep.mubr.msk.f32.mxu0 %vm7409_vm0, %v10607_v10  ;;  %v1259_v24 = vsel %vm1244_vm2, %v1256_v61, %v1258_v49  ;;  %v7262_v61 = vpack.c.bf16 %v5169_v12, %v5168_v28  ;;  %v1264_v12 = vrot.slane %v8084_v41, 5 }
  0xfa   : > { %5954 = vmatprep.mubr.msk.f32.mxu1 %vm7409_vm0, %v10607_v10  ;;  %7254 = vmatpush3.bf16.msra.mxu0 %v7253_v44  ;;  %v1670_v44 = vrot.slane %v8000_v16, 7 }
  0xfb   : > { %7233 = vmatpush3.bf16.msra.mxu1 %v7232_v7  ;;  %7255 = vmatprep.subr.bf16.mxu0 %v10609_v5  ;;  %v7238_v7 = vpack.c.bf16 %v5153_v33, %v5152_v47  ;;  %v1261_v47 = vsel %vm1244_vm2, %v1258_v49, %v1260_v45 }
  0xfc   : > { %6107 = vmatmul.mubr.f32.gmra.mrb[50].mxu0 %v8443_v9  ;;  %7234 = vmatprep.subr.bf16.mxu1 %v10609_v5 }
  0xfd   : > { %5955 = vmatmul.mubr.f32.gmra.mrb[50].mxu1 %v1257_v34  ;;  %6109 = vmatprep.mubr.msk.f32.mxu0 %vm7409_vm0, %v10607_v10  ;;  %v5171_v34 = vld [vmem:[%s10598_s1 + $0x278] sm:$0xff] }
  0xfe   : > { %5957 = vmatprep.mubr.msk.f32.mxu1 %vm7409_vm0, %v10607_v10  ;;  %7257 = vmatpush3.bf16.msra.mxu0 %v7256_v48  ;;  %v8493_v48 = vsel %vm1656_vm3, %v1668_v23, %v1670_v44  ;;  %v1262_v23 = vrot.slane %v8054_v17, 5  ;;  %v7265_v33 = vpack.c.bf16 %v5171_v34, %v5170_v14  ;;  %v7394_v14 = vld [vmem:[%s10600_s3] ss:$0 sm:$0xff] }
  0xff   : > { %7236 = vmatpush3.bf16.msra.mxu1 %v7235_v46  ;;  %7258 = vmatprep.subr.bf16.mxu0 %v10609_v5  ;;  %v1672_v46 = vrot.slane %v8026_v30, 7 }
 0x100   : > { %6110 = vmatmul.mubr.f32.gmra.mrb[52].mxu0 %v8468_v52  ;;  %7237 = vmatprep.subr.bf16.mxu1 %v10609_v5  ;;  %v1263_v28 = vsel %vm1244_vm2, %v1260_v45, %v1262_v23 }
 0x101   : > { %5958 = vmatmul.mubr.f32.gmra.mrb[52].mxu1 %v1259_v24  ;;  %6112 = vmatprep.mubr.msk.f32.mxu0 %vm7409_vm0, %v10607_v10  ;;  %v8514_v49 = vsel %vm1656_vm3, %v1670_v44, %v1672_v46  ;;  %v382_v24 = vld [vmem:[%s7787_s29 + $0x170] sm:$0xff]  ;;  %v710_v44 = vpop.permute.xlu1 %709 }
 0x102   : > { %5960 = vmatprep.mubr.msk.f32.mxu1 %vm7409_vm0, %v10607_v10  ;;  %7260 = vmatpush3.bf16.msra.mxu0 %v7259_v37  ;;  %v8511_v37 = vpop.permute.xlu0 %704  ;;  %v436_v34 = vmul.f32 %v7394_v14, %v382_v24  ;;  %v1678_v24 = vrot.slane %v8113_v18, 7 }
 0x103   : > { %7239 = vmatpush3.bf16.msra.mxu1 %v7238_v7  ;;  %7261 = vmatprep.subr.bf16.mxu0 %v10609_v5  ;;  %10726 = vst [vmem:[#allocation31_spill] sm:$0xff] %v8511_v37  ;;  %v1674_v7 = vrot.slane %v8054_v17, 7  ;;  %v437_v37 = vmul.f32 %v7394_v14, %v383_v38  ;;  %v1268_v38 = vrot.slane %v8146_v51, 5 }
 0x104   : > { %6113 = vmatmul.mubr.f32.gmra.mrb[54].mxu0 %v8493_v48  ;;  %7240 = vmatprep.subr.bf16.mxu1 %v10609_v5 }
 0x105   : > { %5961 = vmatmul.mubr.f32.gmra.mrb[54].mxu1 %v1261_v47  ;;  %6115 = vmatprep.mubr.msk.f32.mxu0 %vm7409_vm0, %v10607_v10  ;;  %v8530_v45 = vsel %vm1656_vm3, %v1672_v46, %v1674_v7  ;;  %v435_v47 = vmul.f32 %v7394_v14, %v381_v29  ;;  %v10728_v46 = vmov 0.0  }
 0x106   : > { %5963 = vmatprep.mubr.msk.f32.mxu1 %vm7409_vm0, %v10607_v10  ;;  %7263 = vmatpush3.bf16.msra.mxu0 %v7262_v61  ;;  %10727 = vst [vmem:[#allocation32_spill] sm:$0xff] %v8530_v45  ;;  %v1676_v61 = vrot.slane %v8084_v41, 7  ;;  %4963 = vst [vmem:[%s10213_s30] sm:$0xff] %v10728_v46 }
 0x107   : > { %7242 = vmatpush3.bf16.msra.mxu1 %v7241_v55  ;;  %7264 = vmatprep.subr.bf16.mxu0 %v10609_v5  ;;  %v380_v55 = vld [vmem:[%s7787_s29 + $0x160] sm:$0xff]  ;;  %4964 = vst [vmem:[%s10213_s30 + $0x8] sm:$0xff] %v10728_v46  ;;  %4965 = vst [vmem:[%s10213_s30 + $0x10] sm:$0xff] %v10728_v46 }
 0x108   : > { %6116 = vmatmul.mubr.f32.gmra.mrb[56].mxu0 %v8514_v49  ;;  %7267 = vmatprep.subr.bf16.mxu1 %v10609_v5  ;;  %v8546_v41 = vsel %vm1656_vm3, %v1674_v7, %v1676_v61  ;;  %4966 = vst [vmem:[%s10213_s30 + $0x18] sm:$0xff] %v10728_v46  ;;  %5008 = vst [vmem:[%s10213_s30 + $0x168] sm:$0xff] %v10728_v46 }
 0x109   : > { %5964 = vmatmul.mubr.f32.gmra.mrb[56].mxu1 %v1263_v28  ;;  %6118 = vmatprep.mubr.msk.f32.mxu0 %vm7409_vm0, %v10607_v10  ;;  %v1265_v28 = vsel %vm1244_vm2, %v1262_v23, %v1264_v12  ;;  %v7395_v23 = vld [vmem:[%s10601_s4] ss:$0 sm:$0xff]  ;;  %5009 = vst [vmem:[%s10213_s30 + $0x170] sm:$0xff] %v10728_v46  ;;  %5010 = vst [vmem:[%s10213_s30 + $0x178] sm:$0xff] %v10728_v46 }
 0x10a   : > { %5966 = vmatprep.mubr.msk.f32.mxu1 %vm7409_vm0, %v10607_v10  ;;  %7266 = vmatpush3.bf16.msra.mxu0 %v7265_v33  ;;  %v1266_v33 = vrot.slane %v8113_v18, 5  ;;  %v715_v10 = vpop.permute.xlu0 %714  ;;  %v490_v29 = vadd.f32 %v7395_v23, %v436_v34  ;;  %v489_v17 = vadd.f32 %v7395_v23, %v435_v47  ;;  %v491_v7 = vadd.f32 %v7395_v23, %v437_v37 }
 0x10b   : > { %7291 = vmatprep.subr.bf16.mxu0 %v10609_v5  ;;  %v434_v5 = vmul.f32 %v7394_v14, %v380_v55  ;;  %v8560_v34 = vsel %vm1656_vm3, %v1676_v61, %v1678_v24  ;;  %v1270_v37 = vrot.slane %v8171_v63, 5  ;;  %5011 = vst [vmem:[%s10213_s30 + $0x180] sm:$0xf] %v10728_v46 }
 0x10c   : > { %6119 = vmatmul.mubr.f32.gmra.mrb[58].mxu0 %v8530_v45  ;;  %v720_v45 = vpop.permute.xlu1 %719  ;;  %v8565_v18 = vmul.f32 %v715_v10, %v489_v17 }
 0x10d   : > { %5967 = vmatmul.mubr.f32.gmra.mrb[58].mxu1 %v1265_v28  ;;  %6121 = vmatprep.mubr.msk.f32.mxu0 %vm7409_vm0, %v10728_v46  ;;  %v1267_v28 = vsel %vm1244_vm2, %v1264_v12, %v1266_v33  ;;  %v488_v55 = vadd.f32 %v7395_v23, %v434_v5  ;;  %v1680_v12 = vrot.slane %v8146_v51, 7  ;;  %v8563_v47 = vmul.f32 %v720_v45, %v490_v29 }
 0x10e   : > { %5969 = vmatprep.mubr.msk.f32.mxu1 %vm7409_vm0, %v10728_v46  ;;  %v725_v14 = vpop.permute.xlu0 %724  ;;  %10730 = vst [vmem:[#allocation34_spill] sm:$0xff] %v8565_v18  ;;  %v1682_v45 = vrot.slane %v8171_v63, 7  ;;  %v1271_v23 = vsel %vm1244_vm2, %v1268_v38, %v1270_v37  ;;  %v1272_v29 = vrot.slane %v8197_v2, 5 }
 0x10f   : > { %10729 = vst [vmem:[#allocation33_spill] sm:$0xff] %v8563_v47  ;;  %v8572_v5 = vmul.f32 %v725_v14, %v491_v7  ;;  %v8577_v61 = vmul.f32 %v710_v44, %v488_v55  ;;  %v8580_v10 = vsel %vm1656_vm3, %v1678_v24, %v1680_v12  ;;  %v3643_v17 = vrot.slane %v8563_v47, 2 }
 0x110   : > { %6122 = vmatmul.mubr.f32.gmra.mrb[60].mxu0 %v8546_v41  ;;  %v4094_v44 = vrot.slane %v8565_v18, 3  ;;  %v8594_v24 = vsel %vm1656_vm3, %v1680_v12, %v1682_v45  ;;  %v1684_v14 = vrot.slane %v8197_v2, 7 }
 0x111   : > { %5970 = vmatmul.mubr.f32.gmra.mrb[60].mxu1 %v1267_v28  ;;  %6124 = vmatprep.mubr.msk.f32.mxu0 %vm7409_vm0, %v10728_v46  ;;  %v1269_v28 = vsel %vm1244_vm2, %v1266_v33, %v1268_v38  ;;  %10731 = vst [vmem:[#allocation35_spill] sm:$0xff] %v8572_v5  ;;  %10732 = vst [vmem:[#allocation36_spill] sm:$0xff] %v8577_v61  ;;  %v3641_v33 = vrot.slane %v8565_v18, 2  ;;  %v3645_v7 = vrot.slane %v8572_v5, 2  ;;  %v4096_v38 = vrot.slane %v8563_v47, 3 }
 0x112   : > { %5972 = vmatprep.mubr.msk.f32.mxu1 %vm7409_vm0, %v10728_v46  ;;  %v4098_v55 = vrot.slane %v8572_v5, 3  ;;  %v1274_v18 = vrot.slane %v8221_v42, 5  ;;  %v10626_v63 = vrot.slane %v8577_v61, 3  ;;  %v1686_v47 = vrot.slane %v8221_v42, 7 }
 0x113   : > { %v8605_v12 = vsel %vm3563_vm4, %v3641_v33, %v3643_v17  ;;  %v8629_v2 = vsel %vm4016_vm5, %v4094_v44, %v4096_v38 }
 0x114   : > { %6125 = vmatmul.mubr.f32.gmra.mrb[62].mxu0 %v8560_v34  ;;  %10733 = vst [vmem:[#allocation37_spill] sm:$0xff] %v8605_v12  ;;  %v8622_v12 = vsel %vm3563_vm4, %v3643_v17, %v3645_v7  ;;  %10737 = vst [vmem:[#allocation41_spill] sm:$0xff] %v8629_v2  ;;  %v1688_v17 = vrot.slane %v8241_v53, 7  ;;  %v1290_v2 = vrot.slane %v7849_v36, 5 }
 0x115   : > { %5973 = vmatmul.mubr.f32.gmra.mrb[62].mxu1 %v1269_v28  ;;  %6127 = vmatprep.mubr.msk.f32.mxu0 %vm7409_vm0, %v10728_v46  ;;  %v10625_v28 = vrot.slane %v8577_v61, 2  ;;  %10736 = vst [vmem:[#allocation40_spill] sm:$0xff] %v8622_v12 }
 0x116   : > { %5975 = vmatprep.mubr.msk.f32.mxu1 %vm7409_vm0, %v10728_v46  ;;  %v8653_v7 = vsel %vm1656_vm3, %v1686_v47, %v1688_v17 }
 0x117   : > { %v8612_v5 = vsel %vm3563_vm4, %v10625_v28, %v3641_v33  ;;  %v8632_v33 = vsel %vm4016_vm5, %v4096_v38, %v4098_v55  ;;  %v1275_v28 = vsel %vm1244_vm2, %v1272_v29, %v1274_v18  ;;  %v1690_v38 = vrot.slane %v8260_v15, 7 }
 0x118   : > { %6128 = vmatmul.mubr.f32.gmra.mrb[64].mxu0 %v8580_v10  ;;  %10734 = vst [vmem:[#allocation38_spill] sm:$0xff] %v8612_v5  ;;  %10738 = vst [vmem:[#allocation42_spill] sm:$0xff] %v8632_v33 }
 0x119   : > { %5976 = vmatmul.mubr.f32.gmra.mrb[64].mxu1 %v1271_v23  ;;  %6130 = vmatprep.mubr.msk.f32.mxu0 %vm7409_vm0, %v10728_v46  ;;  %v1273_v23 = vsel %vm1244_vm2, %v1270_v37, %v1272_v29  ;;  %v8619_v37 = vsel %vm4016_vm5, %v10626_v63, %v4094_v44  ;;  %v1276_v63 = vrot.slane %v8241_v53, 5  ;;  %v1278_v29 = vrot.slane %v8260_v15, 5 }
 0x11a   : > { %5978 = vmatprep.mubr.msk.f32.mxu1 %vm7409_vm0, %v10728_v46  ;;  %10735 = vst [vmem:[#allocation39_spill] sm:$0xff] %v8619_v37 }
 0x11b   : > { %v1277_v44 = vsel %vm1244_vm2, %v1274_v18, %v1276_v63  ;;  %v1279_v55 = vsel %vm1244_vm2, %v1276_v63, %v1278_v29  ;;  %v1280_v18 = vrot.slane %v8278_v27, 5  ;;  %v1282_v63 = vrot.slane %v8292_v43, 5 }
 0x11c   : > { %6131 = vmatmul.mubr.f32.gmra.mrb[66].mxu0 %v8594_v24 }
 0x11d   : > { %5979 = vmatmul.mubr.f32.gmra.mrb[66].mxu1 %v1273_v23  ;;  %6133 = vmatprep.mubr.msk.f32.mxu0 %vm7409_vm0, %v10728_v46  ;;  %v8625_v23 = vsel %vm1656_vm3, %v1682_v45, %v1684_v14  ;;  %v8642_v45 = vsel %vm1656_vm3, %v1684_v14, %v1686_v47  ;;  %v8664_v14 = vsel %vm1656_vm3, %v1688_v17, %v1690_v38  ;;  %v1692_v47 = vrot.slane %v8278_v27, 7 }
 0x11e   : > { %5981 = vmatprep.mubr.msk.f32.mxu1 %vm7409_vm0, %v10728_v46  ;;  %v1694_v17 = vrot.slane %v8292_v43, 7 }
 0x120   : > { %6134 = vmatmul.mubr.f32.gmra.mrb[68].mxu0 %v8625_v23 }
 0x121   : > { %5982 = vmatmul.mubr.f32.gmra.mrb[68].mxu1 %v1275_v28  ;;  %6136 = vmatprep.mubr.msk.f32.mxu0 %vm7409_vm0, %v10728_v46  ;;  %v1281_v28 = vsel %vm1244_vm2, %v1278_v29, %v1280_v18  ;;  %v1284_v29 = vrot.slane %v8304_v8, 5 }
 0x122   : > { %5984 = vmatprep.mubr.msk.f32.mxu1 %vm7409_vm0, %v10728_v46 }
 0x123   : > { %v1285_v33 = vsel %vm1244_vm2, %v1282_v63, %v1284_v29 }
 0x124   : > { %6137 = vmatmul.mubr.f32.gmra.mrb[70].mxu0 %v8642_v45 }
 0x125   : > { %5985 = vmatmul.mubr.f32.gmra.mrb[70].mxu1 %v1277_v44  ;;  %6139 = vmatprep.mubr.msk.f32.mxu0 %vm7409_vm0, %v10728_v46  ;;  %v8675_v44 = vsel %vm1656_vm3, %v1690_v38, %v1692_v47  ;;  %v1696_v38 = vrot.slane %v8304_v8, 7 }
 0x126   : > { %5987 = vmatprep.mubr.msk.f32.mxu1 %vm7409_vm0, %v10728_v46 }
 0x128   : > { %6140 = vmatmul.mubr.f32.gmra.mrb[72].mxu0 %v8653_v7 }
 0x129   : > { %5988 = vmatmul.mubr.f32.gmra.mrb[72].mxu1 %v1279_v55  ;;  %6142 = vmatprep.mubr.msk.f32.mxu0 %vm7409_vm0, %v10728_v46  ;;  %v1283_v55 = vsel %vm1244_vm2, %v1280_v18, %v1282_v63  ;;  %v1286_v18 = vrot.slane %v7833_v56, 5  ;;  %v1288_v63 = vrot.slane %v7836_v13, 5 }
 0x12a   : > { %5990 = vmatprep.mubr.msk.f32.mxu1 %vm7409_vm0, %v10728_v46 }
 0x12b   : > { %v1291_v37 = vsel %vm1244_vm2, %v1288_v63, %v1290_v2 }
 0x12c   : > { %6143 = vmatmul.mubr.f32.gmra.mrb[74].mxu0 %v8664_v14 }
 0x12d   : > { %5991 = vmatmul.mubr.f32.gmra.mrb[74].mxu1 %v1281_v28  ;;  %6145 = vmatprep.mubr.msk.f32.mxu0 %vm7409_vm0, %v10728_v46  ;;  %v8686_v28 = vsel %vm1656_vm3, %v1692_v47, %v1694_v17  ;;  %v1287_v47 = vsel %vm1244_vm2, %v1284_v29, %v1286_v18  ;;  %v1289_v29 = vsel %vm1244_vm2, %v1286_v18, %v1288_v63  ;;  %v1292_v18 = vrot.slane %v7882_v62, 5 }
 0x12e   : > { %5993 = vmatprep.mubr.msk.f32.mxu1 %vm7409_vm0, %v10728_v46  ;;  %v1294_v63 = vrot.slane %v7922_v32, 5 }
 0x12f   : > { %v1293_v5 = vsel %vm1244_vm2, %v1290_v2, %v1292_v18  ;;  %v1296_v2 = vrot.slane %v7943_v58, 5 }
 0x130   : > { %6146 = vmatmul.mubr.f32.gmra.mrb[76].mxu0 %v8675_v44  ;;  %v1295_v61 = vsel %vm1244_vm2, %v1292_v18, %v1294_v63  ;;  %v1298_v18 = vrot.slane %v7975_v3, 5 }
 0x131   : > { %5994 = vmatmul.mubr.f32.gmra.mrb[76].mxu1 %v1283_v55  ;;  %6148 = vmatprep.mubr.msk.f32.mxu0 %vm7409_vm0, %v10728_v46  ;;  %v8697_v55 = vsel %vm1656_vm3, %v1694_v17, %v1696_v38  ;;  %v1700_v17 = vrot.slane %v7836_v13, 7 }
 0x132   : > { %5996 = vmatprep.mubr.msk.f32.mxu1 %vm7409_vm0, %v10728_v46 }
 0x134   : > { %6149 = vmatmul.mubr.f32.gmra.mrb[78].mxu0 %v8686_v28 }
 0x135   : > { %5997 = vmatmul.mubr.f32.gmra.mrb[78].mxu1 %v1285_v33  ;;  %6151 = vmatprep.mubr.msk.f32.mxu0 %vm7409_vm0, %v10728_v46  ;;  %v1698_v33 = vrot.slane %v7833_v56, 7 }
 0x136   : > { %5999 = vmatprep.mubr.msk.f32.mxu1 %vm7409_vm0, %v10728_v46 }
 0x137   : > { %v8708_v12 = vsel %vm1656_vm3, %v1696_v38, %v1698_v33  ;;  %v1702_v38 = vrot.slane %v7849_v36, 7 }
 0x138   : > { %6152 = vmatmul.mubr.f32.gmra.mrb[80].mxu0 %v8697_v55 }
 0x139   : > { %6000 = vmatmul.mubr.f32.gmra.mrb[80].mxu1 %v1287_v47  ;;  %6154 = vmatprep.mubr.msk.f32.mxu0 %vm7409_vm0, %v10728_v46  ;;  %v8719_v47 = vsel %vm1656_vm3, %v1698_v33, %v1700_v17  ;;  %v1704_v33 = vrot.slane %v7882_v62, 7 }
 0x13a   : > { %6002 = vmatprep.mubr.msk.f32.mxu1 %vm7409_vm0, %v10728_v46 }
 0x13c   : > { %6155 = vmatmul.mubr.f32.gmra.mrb[82].mxu0 %v8708_v12 }
 0x13d   : > { %6003 = vmatmul.mubr.f32.gmra.mrb[82].mxu1 %v1289_v29  ;;  %6157 = vmatprep.mubr.msk.f32.mxu0 %vm7409_vm0, %v10728_v46  ;;  %v8730_v29 = vsel %vm1656_vm3, %v1700_v17, %v1702_v38  ;;  %v1706_v17 = vrot.slane %v7922_v32, 7  ;;  %v1297_v32 = vsel %vm1244_vm2, %v1294_v63, %v1296_v2  ;;  %v1300_v63 = vrot.slane %v7998_v4, 5 }
 0x13e   : > { %6005 = vmatprep.mubr.msk.f32.mxu1 %vm7409_vm0, %v10728_v46 }
 0x140   : > { %6158 = vmatmul.mubr.f32.gmra.mrb[84].mxu0 %v8719_v47 }
 0x141   : > { %6006 = vmatmul.mubr.f32.gmra.mrb[84].mxu1 %v1291_v37  ;;  %6160 = vmatprep.mubr.msk.f32.mxu0 %vm7409_vm0, %v10728_v46  ;;  %v8741_v37 = vsel %vm1656_vm3, %v1702_v38, %v1704_v33  ;;  %v1708_v38 = vrot.slane %v7943_v58, 7  ;;  %v1299_v58 = vsel %vm1244_vm2, %v1296_v2, %v1298_v18  ;;  %v1302_v2 = vrot.slane %v8024_v6, 5 }
 0x142   : > { %6008 = vmatprep.mubr.msk.f32.mxu1 %vm7409_vm0, %v10728_v46 }
 0x144   : > { %6161 = vmatmul.mubr.f32.gmra.mrb[86].mxu0 %v8730_v29 }
 0x145   : > { %6009 = vmatmul.mubr.f32.gmra.mrb[86].mxu1 %v1293_v5  ;;  %6163 = vmatprep.mubr.msk.f32.mxu0 %vm7409_vm0, %v10728_v46  ;;  %v8752_v5 = vsel %vm1656_vm3, %v1704_v33, %v1706_v17  ;;  %v1710_v33 = vrot.slane %v7975_v3, 7  ;;  %v1301_v3 = vsel %vm1244_vm2, %v1298_v18, %v1300_v63  ;;  %v1304_v18 = vrot.slane %v8052_v54, 5 }
 0x146   : > { %6011 = vmatprep.mubr.msk.f32.mxu1 %vm7409_vm0, %v10728_v46 }
 0x148   : > { %6164 = vmatmul.mubr.f32.gmra.mrb[88].mxu0 %v8741_v37 }
 0x149   : > { %6012 = vmatmul.mubr.f32.gmra.mrb[88].mxu1 %v1295_v61  ;;  %6166 = vmatprep.mubr.msk.f32.mxu0 %vm7409_vm0, %v10728_v46  ;;  %v8763_v61 = vsel %vm1656_vm3, %v1706_v17, %v1708_v38  ;;  %v1712_v17 = vrot.slane %v7998_v4, 7  ;;  %v1303_v4 = vsel %vm1244_vm2, %v1300_v63, %v1302_v2  ;;  %v1306_v63 = vrot.slane %v8082_v40, 5 }
 0x14a   : > { %6014 = vmatprep.mubr.msk.f32.mxu1 %vm7409_vm0, %v10728_v46 }
 0x14c   : > { %6167 = vmatmul.mubr.f32.gmra.mrb[90].mxu0 %v8752_v5 }
 0x14d   : > { %6015 = vmatmul.mubr.f32.gmra.mrb[90].mxu1 %v1297_v32  ;;  %6169 = vmatprep.mubr.msk.f32.mxu0 %vm7409_vm0, %v10728_v46  ;;  %v8774_v32 = vsel %vm1656_vm3, %v1708_v38, %v1710_v33  ;;  %v1714_v38 = vrot.slane %v8024_v6, 7  ;;  %v1305_v6 = vsel %vm1244_vm2, %v1302_v2, %v1304_v18  ;;  %v1308_v2 = vrot.slane %v8111_v21, 5 }
 0x14e   : > { %6017 = vmatprep.mubr.msk.f32.mxu1 %vm7409_vm0, %v10728_v46 }
 0x150   : > { %6170 = vmatmul.mubr.f32.gmra.mrb[92].mxu0 %v8763_v61 }
 0x151   : > { %6018 = vmatmul.mubr.f32.gmra.mrb[92].mxu1 %v1299_v58  ;;  %6172 = vmatprep.mubr.msk.f32.mxu0 %vm7409_vm0, %v10728_v46  ;;  %v8785_v58 = vsel %vm1656_vm3, %v1710_v33, %v1712_v17  ;;  %v1716_v33 = vrot.slane %v8052_v54, 7  ;;  %v1307_v54 = vsel %vm1244_vm2, %v1304_v18, %v1306_v63  ;;  %v1310_v18 = vrot.slane %v8144_v11, 5 }
 0x152   : > { %6020 = vmatprep.mubr.msk.f32.mxu1 %vm7409_vm0, %v10728_v46 }
 0x154   : > { %6173 = vmatmul.mubr.f32.gmra.mrb[94].mxu0 %v8774_v32 }
 0x155   : > { %6021 = vmatmul.mubr.f32.gmra.mrb[94].mxu1 %v1301_v3  ;;  %6175 = vmatprep.mubr.msk.f32.mxu0 %vm7409_vm0, %v10728_v46  ;;  %v8796_v3 = vsel %vm1656_vm3, %v1712_v17, %v1714_v38  ;;  %v1718_v17 = vrot.slane %v8082_v40, 7  ;;  %v1309_v40 = vsel %vm1244_vm2, %v1306_v63, %v1308_v2  ;;  %v1312_v63 = vrot.slane %v8169_v19, 5 }
 0x156   : > { %6023 = vmatprep.mubr.msk.f32.mxu1 %vm7409_vm0, %v10728_v46  ;;  %10739 = vst [vmem:[#allocation43_spill] sm:$0xff] %v8796_v3 }
 0x158   : > { %6176 = vmatmul.mubr.f32.gmra.mrb[96].mxu0 %v8785_v58 }
 0x159   : > { %6024 = vmatmul.mubr.f32.gmra.mrb[96].mxu1 %v1303_v4  ;;  %6178 = vmatprep.mubr.msk.f32.mxu0 %vm7409_vm0, %v10728_v46  ;;  %v8807_v4 = vsel %vm1656_vm3, %v1714_v38, %v1716_v33  ;;  %v1720_v38 = vrot.slane %v8111_v21, 7  ;;  %v1311_v21 = vsel %vm1244_vm2, %v1308_v2, %v1310_v18 }
 0x15a   : > { %6026 = vmatprep.mubr.msk.f32.mxu1 %vm7409_vm0, %v10728_v46  ;;  %10740 = vst [vmem:[#allocation44_spill] sm:$0xff] %v8807_v4 }
 0x15c   : > { %6179 = vmatmul.mubr.f32.gmra.mrb[98].mxu0 %v8796_v3 }
 0x15d   : > { %6027 = vmatmul.mubr.f32.gmra.mrb[98].mxu1 %v1305_v6  ;;  %6181 = vmatprep.mubr.msk.f32.mxu0 %vm7409_vm0, %v10728_v46  ;;  %v8818_v6 = vsel %vm1656_vm3, %v1716_v33, %v1718_v17  ;;  %v1722_v33 = vrot.slane %v8144_v11, 7  ;;  %v1724_v11 = vrot.slane %v8169_v19, 7 }
 0x15e   : > { %6029 = vmatprep.mubr.msk.f32.mxu1 %vm7409_vm0, %v10728_v46  ;;  %10741 = vst [vmem:[#allocation45_spill] sm:$0xff] %v8818_v6 }
 0x15f   : > { %v8857_v19 = vsel %vm1656_vm3, %v1722_v33, %v1724_v11 }
 0x160   : > { %6182 = vmatmul.mubr.f32.gmra.mrb[100].mxu0 %v8807_v4  ;;  %10745 = vst [vmem:[#allocation49_spill] sm:$0xff] %v8857_v19 }
 0x161   : > { %6030 = vmatmul.mubr.f32.gmra.mrb[100].mxu1 %v1307_v54  ;;  %6184 = vmatprep.mubr.msk.f32.mxu0 %vm7409_vm0, %v10728_v46  ;;  %v8829_v54 = vsel %vm1656_vm3, %v1718_v17, %v1720_v38  ;;  %v8842_v17 = vsel %vm1656_vm3, %v1720_v38, %v1722_v33 }
 0x162   : > { %6032 = vmatprep.mubr.msk.f32.mxu1 %vm7409_vm0, %v10728_v46  ;;  %10742 = vst [vmem:[#allocation46_spill] sm:$0xff] %v8829_v54  ;;  %10743 = vst [vmem:[#allocation47_spill] sm:$0xff] %v8842_v17 }
 0x164   : > { %6185 = vmatmul.mubr.f32.gmra.mrb[102].mxu0 %v8818_v6 }
 0x165   : > { %6033 = vmatmul.mubr.f32.gmra.mrb[102].mxu1 %v1309_v40  ;;  %6187 = vmatprep.mubr.msk.f32.mxu0 %vm7409_vm0, %v10728_v46 }
 0x166   : > { %6035 = vmatprep.mubr.msk.f32.mxu1 %vm7409_vm0, %v10728_v46 }
 0x168   : > { %6188 = vmatmul.mubr.f32.gmra.mrb[104].mxu0 %v8829_v54  ;;  %v1313_v54 = vsel %vm1244_vm2, %v1310_v18, %v1312_v63 }
 0x169   : > { %6036 = vmatmul.mubr.f32.gmra.mrb[104].mxu1 %v1311_v21  ;;  %6190 = vmatprep.mubr.msk.f32.mxu0 %vm7409_vm0, %v10728_v46  ;;  %v1314_v21 = vrot.slane %v8195_v59, 5 }
 0x16a   : > { %6038 = vmatprep.mubr.msk.f32.mxu1 %vm7409_vm0, %v10728_v46 }
 0x16b   : > { %v8839_v40 = vpop.f32.mrb[0].mxu0 }
 0x16c   : > { %v8845_v6 = vpop.f32.mrb[0].mxu1  ;;  %v5786_v2 = vpop.f32.mrb[1].mxu0  ;;  %6191 = vmatmul.mubr.f32.gmra.mrb[106].mxu0 %v8842_v17  ;;  %v1315_v17 = vsel %vm1244_vm2, %v1312_v63, %v1314_v21 }
 0x16d   : > { %10744 = vst [vmem:[#allocation48_spill] sm:$0xff] %v8845_v6  ;;  %v5849_v4 = vpop.f32.mrb[1].mxu1  ;;  %6039 = vmatmul.mubr.f32.gmra.mrb[106].mxu1 %v1313_v54  ;;  %6193 = vmatprep.mubr.msk.f32.mxu0 %vm7409_vm0, %v10728_v46  ;;  %v1726_v2 = vrot.slane %v8195_v59, 7 }
 0x16e   : > { %6041 = vmatprep.mubr.msk.f32.mxu1 %vm7409_vm0, %v10728_v46  ;;  %v1316_v4 = vrot.slane %v8219_v39, 5 }
 0x16f   : > { %v8854_v38 = vpop.f32.mrb[2].mxu0  ;;  %v8872_v59 = vsel %vm1656_vm3, %v1724_v11, %v1726_v2 }
 0x170   : > { %v8860_v18 = vpop.f32.mrb[2].mxu1  ;;  %v5789_v6 = vpop.f32.mrb[3].mxu0  ;;  %6194 = vmatmul.mubr.f32.gmra.mrb[108].mxu0 %v8857_v19  ;;  %10747 = vst [vmem:[#allocation51_spill] sm:$0xff] %v8872_v59  ;;  %v1317_v19 = vsel %vm1244_vm2, %v1314_v21, %v1316_v4 }
 0x171   : > { %10746 = vst [vmem:[#allocation50_spill] sm:$0xff] %v8860_v18  ;;  %v5852_v54 = vpop.f32.mrb[3].mxu1  ;;  %6042 = vmatmul.mubr.f32.gmra.mrb[108].mxu1 %v1315_v17  ;;  %6196 = vmatprep.mubr.msk.f32.mxu0 %vm7409_vm0, %v10728_v46  ;;  %v1728_v6 = vrot.slane %v8219_v39, 7  ;;  %v1318_v17 = vrot.slane %v8239_v22, 5 }
 0x172   : > { %6044 = vmatprep.mubr.msk.f32.mxu1 %vm7409_vm0, %v10728_v46 }
 0x173   : > { %v8869_v33 = vpop.f32.mrb[4].mxu0  ;;  %v8887_v39 = vsel %vm1656_vm3, %v1726_v2, %v1728_v6 }
 0x174   : > { %v8875_v63 = vpop.f32.mrb[4].mxu1  ;;  %v5792_v18 = vpop.f32.mrb[5].mxu0  ;;  %6197 = vmatmul.mubr.f32.gmra.mrb[110].mxu0 %v8872_v59  ;;  %10749 = vst [vmem:[#allocation53_spill] sm:$0xff] %v8887_v39  ;;  %v1319_v59 = vsel %vm1244_vm2, %v1316_v4, %v1318_v17 }
 0x175   : > { %10748 = vst [vmem:[#allocation52_spill] sm:$0xff] %v8875_v63  ;;  %v5855_v54 = vpop.f32.mrb[5].mxu1  ;;  %6045 = vmatmul.mubr.f32.gmra.mrb[110].mxu1 %v1317_v19  ;;  %6199 = vmatprep.mubr.msk.f32.mxu0 %vm7409_vm0, %v10728_v46  ;;  %v1730_v18 = vrot.slane %v8239_v22, 7  ;;  %v1320_v19 = vrot.slane %v8258_v50, 5 }
 0x176   : > { %6047 = vmatprep.mubr.msk.f32.mxu1 %vm7409_vm0, %v10728_v46 }
 0x177   : > { %v8884_v11 = vpop.f32.mrb[6].mxu0  ;;  %v8902_v22 = vsel %vm1656_vm3, %v1728_v6, %v1730_v18 }
 0x178   : > { %v8890_v21 = vpop.f32.mrb[6].mxu1  ;;  %v5795_v63 = vpop.f32.mrb[7].mxu0  ;;  %6200 = vmatmul.mubr.f32.gmra.mrb[112].mxu0 %v8887_v39  ;;  %10751 = vst [vmem:[#allocation55_spill] sm:$0xff] %v8902_v22  ;;  %v1321_v39 = vsel %vm1244_vm2, %v1318_v17, %v1320_v19 }
 0x179   : > { %10750 = vst [vmem:[#allocation54_spill] sm:$0xff] %v8890_v21  ;;  %v5858_v54 = vpop.f32.mrb[7].mxu1  ;;  %6048 = vmatmul.mubr.f32.gmra.mrb[112].mxu1 %v1319_v59  ;;  %6202 = vmatprep.mubr.msk.f32.mxu0 %vm7409_vm0, %v10728_v46  ;;  %v1732_v63 = vrot.slane %v8258_v50, 7  ;;  %v1322_v59 = vrot.slane %v8276_v26, 5 }
 0x17a   : > { %6050 = vmatprep.mubr.msk.f32.mxu1 %vm7409_vm0, %v10728_v46 }
 0x17b   : > { %v8899_v2 = vpop.f32.mrb[8].mxu0  ;;  %v8917_v50 = vsel %vm1656_vm3, %v1730_v18, %v1732_v63 }
 0x17c   : > { %v8905_v4 = vpop.f32.mrb[8].mxu1  ;;  %v5798_v21 = vpop.f32.mrb[9].mxu0  ;;  %6203 = vmatmul.mubr.f32.gmra.mrb[114].mxu0 %v8902_v22  ;;  %10753 = vst [vmem:[#allocation57_spill] sm:$0xff] %v8917_v50  ;;  %v1323_v22 = vsel %vm1244_vm2, %v1320_v19, %v1322_v59 }
 0x17d   : > { %10752 = vst [vmem:[#allocation56_spill] sm:$0xff] %v8905_v4  ;;  %v5861_v54 = vpop.f32.mrb[9].mxu1  ;;  %6051 = vmatmul.mubr.f32.gmra.mrb[114].mxu1 %v1321_v39  ;;  %6205 = vmatprep.mubr.msk.f32.mxu0 %vm7409_vm0, %v10728_v46  ;;  %v1734_v21 = vrot.slane %v8276_v26, 7  ;;  %v1324_v39 = vrot.slane %v8290_v0, 5 }
 0x17e   : > { %6053 = vmatprep.mubr.msk.f32.mxu1 %vm7409_vm0, %v10728_v46 }
 0x17f   : > { %v8914_v6 = vpop.f32.mrb[10].mxu0  ;;  %v8932_v26 = vsel %vm1656_vm3, %v1732_v63, %v1734_v21 }
 0x180   : > { %v8920_v17 = vpop.f32.mrb[10].mxu1  ;;  %v5801_v4 = vpop.f32.mrb[11].mxu0  ;;  %6206 = vmatmul.mubr.f32.gmra.mrb[116].mxu0 %v8917_v50  ;;  %10755 = vst [vmem:[#allocation59_spill] sm:$0xff] %v8932_v26  ;;  %v1325_v50 = vsel %vm1244_vm2, %v1322_v59, %v1324_v39  ;;  %v5172_v59 = vld [vmem:[%s10598_s1 + $0x280] sm:$0xff] }
 0x181   : > { %10754 = vst [vmem:[#allocation58_spill] sm:$0xff] %v8920_v17  ;;  %v5864_v54 = vpop.f32.mrb[11].mxu1  ;;  %6054 = vmatmul.mubr.f32.gmra.mrb[116].mxu1 %v1323_v22  ;;  %6208 = vmatprep.mubr.msk.f32.mxu0 %vm7409_vm0, %v10728_v46  ;;  %v1736_v4 = vrot.slane %v8290_v0, 7  ;;  %v1326_v22 = vrot.slane %v8302_v25, 5 }
 0x182   : > { %6056 = vmatprep.mubr.msk.f32.mxu1 %vm7409_vm0, %v10728_v46 }
 0x183   : > { %v8929_v18 = vpop.f32.mrb[12].mxu0  ;;  %v8947_v0 = vsel %vm1656_vm3, %v1734_v21, %v1736_v4 }
 0x184   : > { %v8935_v19 = vpop.f32.mrb[12].mxu1  ;;  %v5804_v17 = vpop.f32.mrb[13].mxu0  ;;  %6209 = vmatmul.mubr.f32.gmra.mrb[118].mxu0 %v8932_v26  ;;  %10757 = vst [vmem:[#allocation61_spill] sm:$0xff] %v8947_v0  ;;  %v1327_v26 = vsel %vm1244_vm2, %v1324_v39, %v1326_v22 }
 0x185   : > { %10756 = vst [vmem:[#allocation60_spill] sm:$0xff] %v8935_v19  ;;  %v5867_v54 = vpop.f32.mrb[13].mxu1  ;;  %6057 = vmatmul.mubr.f32.gmra.mrb[118].mxu1 %v1325_v50  ;;  %6211 = vmatprep.mubr.msk.f32.mxu0 %vm7409_vm0, %v10728_v46  ;;  %v5173_v50 = vld [vmem:[%s10598_s1 + $0x288] sm:$0xff]  ;;  %v5188_v17 = vld [vmem:[%s10598_s1 + $0x300] sm:$0xff] }
 0x186   : > { %6059 = vmatprep.mubr.msk.f32.mxu1 %vm7409_vm0, %v10728_v46  ;;  %v7268_v21 = vpack.c.bf16 %v5173_v50, %v5172_v59  ;;  %v5174_v59 = vld [vmem:[%s10598_s1 + $0x290] sm:$0xff]  ;;  %v5175_v50 = vld [vmem:[%s10598_s1 + $0x298] sm:$0xff] }
 0x187   : > { %v8944_v63 = vpop.f32.mrb[14].mxu0 }
 0x188   : > { %v8956_v54 = vpop.f32.mrb[14].mxu1  ;;  %v5807_v19 = vpop.f32.mrb[15].mxu0  ;;  %6212 = vmatmul.mubr.f32.gmra.mrb[120].mxu0 %v8947_v0 }
 0x189   : > { %10758 = vst [vmem:[#allocation62_spill] sm:$0xff] %v8956_v54  ;;  %v5870_v3 = vpop.f32.mrb[15].mxu1  ;;  %6060 = vmatmul.mubr.f32.gmra.mrb[120].mxu1 %v1327_v26  ;;  %6214 = vmatprep.mubr.msk.f32.mxu0 %vm7409_vm0, %v10728_v46  ;;  %v5189_v19 = vld [vmem:[%s10598_s1 + $0x308] sm:$0xff] }
 0x18a   : > { %6249 = vmatprep.mubr.msk.f32.mxu1 %vm7409_vm0, %v10728_v46  ;;  %v10759_v3 = vrot.slane %v8302_v25, 7  ;;  %v5190_v25 = vld [vmem:[%s10598_s1 + $0x310] sm:$0xff] }
 0x18b   : > { %v8970_v39 = vpop.f32.mrb[16].mxu0 }
 0x18c   : > { %v8975_v26 = vsel %vm1656_vm3, %v1736_v4, %v10759_v3  ;;  %v8977_v22 = vpop.f32.mrb[16].mxu1  ;;  %v5810_v54 = vpop.f32.mrb[17].mxu0  ;;  %v7292_v4 = vpack.c.bf16 %v5189_v19, %v5188_v17  ;;  %v10761_v3 = vmov 0.0|0.0   ;;  %v5177_v19 = vld [vmem:[%s10598_s1 + $0x2a8] sm:$0xff] }
 0x18d   : > { %10760 = vst [vmem:[#allocation63_spill] sm:$0xff] %v8977_v22  ;;  %6215 = vmatmul.mubr.f32.gmra.mrb[122].mxu0 %v8975_v26  ;;  %v5873_v0 = vpop.f32.mrb[17].mxu1  ;;  %6250 = vmatmul.mubr.f32.vlgmr.msra.gmra.mrb[122].mxu1 %v8393_v57  ;;  %v7271_v22 = vpack.c.bf16 %v5175_v50, %v5174_v59 }
 0x18e   : > { %6404 = vmatprep.mubr.msk.f32.mxu0 %vm7409_vm0, %v10728_v46  ;;  %7269 = vmatpush3.bf16.msra.mxu1 %v7268_v21  ;;  %v5191_v0 = vld [vmem:[%s10598_s1 + $0x318] sm:$0xff]  ;;  %v5176_v21 = vld [vmem:[%s10598_s1 + $0x2a0] sm:$0xff] }
 0x18f   : > { %6252 = vmatprep.mubr.msk.f32.mxu1 %vm7409_vm0, %v10728_v46  ;;  %v8991_v54 = vpop.f32.mrb[18].mxu0  ;;  %7270 = vmatprep.subr.bf16.mxu1 %v10761_v3  ;;  %v7295_v50 = vpack.c.bf16 %v5191_v0, %v5190_v25  ;;  %v5178_v25 = vld [vmem:[%s10598_s1 + $0x2b0] sm:$0xff] }
 0x190   : > { %v9000_v57 = vpop.f32.mrb[18].mxu1  ;;  %v5813_v17 = vpop.f32.mrb[19].mxu0 }
 0x191   : > { %10762 = vst [vmem:[#allocation64_spill] sm:$0xff] %v9000_v57  ;;  %6405 = vmatmul.mubr.f32.vlgmr.msra.gmra.mrb[124].mxu0 %v7884_v1  ;;  %v5876_v59 = vpop.f32.mrb[19].mxu1  ;;  %6253 = vmatmul.mubr.f32.gmra.mrb[124].mxu1 %v8418_v20  ;;  %v7274_v57 = vpack.c.bf16 %v5177_v19, %v5176_v21  ;;  %v5193_v20 = vld [vmem:[%s10598_s1 + $0x328] sm:$0xff] }
 0x192   : > { %7293 = vmatpush3.bf16.msra.mxu0 %v7292_v4  ;;  %6255 = vmatprep.mubr.msk.f32.mxu1 %vm7409_vm0, %v10728_v46  ;;  %v5192_v59 = vld [vmem:[%s10598_s1 + $0x320] sm:$0xff] }
 0x193   : > { %6407 = vmatprep.mubr.msk.f32.mxu0 %vm7409_vm0, %v10728_v46  ;;  %v9014_v17 = vpop.f32.mrb[20].mxu0  ;;  %7272 = vmatpush3.bf16.msra.mxu1 %v7271_v22  ;;  %v5179_v22 = vld [vmem:[%s10598_s1 + $0x2b8] sm:$0xff] }
 0x194   : > { %7294 = vmatprep.subr.bf16.mxu0 %v10761_v3  ;;  %v9023_v4 = vpop.f32.mrb[20].mxu1  ;;  %v5816_v1 = vpop.f32.mrb[21].mxu0  ;;  %7273 = vmatprep.subr.bf16.mxu1 %v10761_v3  ;;  %v7277_v19 = vpack.c.bf16 %v5179_v22, %v5178_v25  ;;  %v5196_v22 = vld [vmem:[%s10598_s1 + $0x340] sm:$0xff] }
 0x195   : > { %10763 = vst [vmem:[#allocation65_spill] sm:$0xff] %v9023_v4  ;;  %6408 = vmatmul.mubr.f32.gmra.mrb[126].mxu0 %v7924_v35  ;;  %v5879_v0 = vpop.f32.mrb[21].mxu1  ;;  %6256 = vmatmul.mubr.f32.gmra.mrb[126].mxu1 %v8443_v9  ;;  %v7298_v1 = vpack.c.bf16 %v5193_v20, %v5192_v59  ;;  %v5195_v9 = vld [vmem:[%s10598_s1 + $0x338] sm:$0xff] }
 0x196   : > { %6410 = vmatprep.mubr.msk.f32.mxu0 %vm7409_vm0, %v10728_v46  ;;  %6258 = vmatprep.mubr.msk.f32.mxu1 %vm7409_vm0, %v10728_v46  ;;  %v5194_v0 = vld [vmem:[%s10598_s1 + $0x330] sm:$0xff] }
 0x197   : > { %7296 = vmatpush3.bf16.msra.mxu0 %v7295_v50  ;;  %v9038_v21 = vpop.f32.mrb[22].mxu0  ;;  %7275 = vmatpush3.bf16.msra.mxu1 %v7274_v57  ;;  %v5180_v57 = vld [vmem:[%s10598_s1 + $0x2c0] sm:$0xff]  ;;  %v5181_v50 = vld [vmem:[%s10598_s1 + $0x2c8] sm:$0xff] }
 0x198   : > { %7297 = vmatprep.subr.bf16.mxu0 %v10761_v3  ;;  %v9047_v4 = vpop.f32.mrb[22].mxu1  ;;  %v5819_v35 = vpop.f32.mrb[23].mxu0  ;;  %7276 = vmatprep.subr.bf16.mxu1 %v10761_v3  ;;  %v7280_v25 = vpack.c.bf16 %v5181_v50, %v5180_v57  ;;  %v5198_v50 = vld [vmem:[%s10598_s1 + $0x350] sm:$0xff] }
 0x199   : > { %10764 = vst [vmem:[#allocation66_spill] sm:$0xff] %v9047_v4  ;;  %6411 = vmatmul.mubr.f32.gmra.mrb[128].mxu0 %v7945_v60  ;;  %v5882_v59 = vpop.f32.mrb[23].mxu1  ;;  %6259 = vmatmul.mubr.f32.gmra.mrb[128].mxu1 %v8468_v52  ;;  %v7301_v35 = vpack.c.bf16 %v5195_v9, %v5194_v0  ;;  %v5197_v52 = vld [vmem:[%s10598_s1 + $0x348] sm:$0xff] }
 0x19a   : > { %6413 = vmatprep.mubr.msk.f32.mxu0 %vm7409_vm0, %v10728_v46  ;;  %6261 = vmatprep.mubr.msk.f32.mxu1 %vm7409_vm0, %v10728_v46 }
 0x19b   : > { %7299 = vmatpush3.bf16.msra.mxu0 %v7298_v1  ;;  %v9062_v20 = vpop.f32.mrb[24].mxu0  ;;  %7278 = vmatpush3.bf16.msra.mxu1 %v7277_v19  ;;  %v5182_v1 = vld [vmem:[%s10598_s1 + $0x2d0] sm:$0xff]  ;;  %v5183_v19 = vld [vmem:[%s10598_s1 + $0x2d8] sm:$0xff] }
 0x19c   : > { %7300 = vmatprep.subr.bf16.mxu0 %v10761_v3  ;;  %v9071_v59 = vpop.f32.mrb[24].mxu1  ;;  %v5822_v4 = vpop.f32.mrb[25].mxu0  ;;  %7279 = vmatprep.subr.bf16.mxu1 %v10761_v3  ;;  %v7283_v57 = vpack.c.bf16 %v5183_v19, %v5182_v1  ;;  %v5200_v19 = vld [vmem:[%s10598_s1 + $0x360] sm:$0xff] }
 0x19d   : > { %10765 = vst [vmem:[#allocation67_spill] sm:$0xff] %v9071_v59  ;;  %6414 = vmatmul.mubr.f32.gmra.mrb[130].mxu0 %v7977_v31  ;;  %v5885_v0 = vpop.f32.mrb[25].mxu1  ;;  %6262 = vmatmul.mubr.f32.gmra.mrb[130].mxu1 %v8493_v48  ;;  %v7304_v4 = vpack.c.bf16 %v5197_v52, %v5196_v22  ;;  %v5199_v48 = vld [vmem:[%s10598_s1 + $0x358] sm:$0xff] }
 0x19e   : > { %6416 = vmatprep.mubr.msk.f32.mxu0 %vm7409_vm0, %v10728_v46  ;;  %6264 = vmatprep.mubr.msk.f32.mxu1 %vm7409_vm0, %v10728_v46  ;;  %v7307_v52 = vpack.c.bf16 %v5199_v48, %v5198_v50  ;;  %v10768_v48 = vld [vmem:[#allocation32_spill] sm:$0xff] }
 0x19f   : > { %7302 = vmatpush3.bf16.msra.mxu0 %v7301_v35  ;;  %v9086_v9 = vpop.f32.mrb[26].mxu0  ;;  %7281 = vmatpush3.bf16.msra.mxu1 %v7280_v25  ;;  %v5184_v35 = vld [vmem:[%s10598_s1 + $0x2e0] sm:$0xff]  ;;  %v5185_v25 = vld [vmem:[%s10598_s1 + $0x2e8] sm:$0xff] }
 0x1a0   : > { %7303 = vmatprep.subr.bf16.mxu0 %v10761_v3  ;;  %v9095_v0 = vpop.f32.mrb[26].mxu1  ;;  %v5825_v59 = vpop.f32.mrb[27].mxu0  ;;  %7282 = vmatprep.subr.bf16.mxu1 %v10761_v3  ;;  %v7286_v1 = vpack.c.bf16 %v5185_v25, %v5184_v35 }
 0x1a1   : > { %10766 = vst [vmem:[#allocation68_spill] sm:$0xff] %v9095_v0  ;;  %6417 = vmatmul.mubr.f32.gmra.mrb[132].mxu0 %v8000_v16  ;;  %v5888_v22 = vpop.f32.mrb[27].mxu1  ;;  %6265 = vmatmul.mubr.f32.gmra.mrb[132].mxu1 %v8514_v49  ;;  %v5201_v49 = vld [vmem:[%s10598_s1 + $0x368] sm:$0xff]  ;;  %v10770_v16 = vld [vmem:[#allocation14_spill] sm:$0xff] }
 0x1a2   : > { %6419 = vmatprep.mubr.msk.f32.mxu0 %vm7409_vm0, %v10728_v46  ;;  %6267 = vmatprep.mubr.msk.f32.mxu1 %vm7409_vm0, %v10728_v46 }
 0x1a3   : > { %7305 = vmatpush3.bf16.msra.mxu0 %v7304_v4  ;;  %v9110_v59 = vpop.f32.mrb[28].mxu0  ;;  %7284 = vmatpush3.bf16.msra.mxu1 %v7283_v57  ;;  %v5186_v4 = vld [vmem:[%s10598_s1 + $0x2f0] sm:$0xff]  ;;  %v5187_v57 = vld [vmem:[%s10598_s1 + $0x2f8] sm:$0xff] }
 0x1a4   : > { %7306 = vmatprep.subr.bf16.mxu0 %v10761_v3  ;;  %v9119_v22 = vpop.f32.mrb[28].mxu1  ;;  %v5828_v0 = vpop.f32.mrb[29].mxu0  ;;  %7285 = vmatprep.subr.bf16.mxu1 %v10761_v3  ;;  %v7289_v25 = vpack.c.bf16 %v5187_v57, %v5186_v4  ;;  %v10772_v4 = vld [vmem:[#allocation16_spill] sm:$0xff] }
 0x1a5   : > { %10767 = vst [vmem:[#allocation69_spill] sm:$0xff] %v9119_v22  ;;  %6420 = vmatmul.mubr.f32.gmra.mrb[134].mxu0 %v8026_v30  ;;  %v5891_v50 = vpop.f32.mrb[29].mxu1  ;;  %6268 = vmatmul.mubr.f32.gmra.mrb[134].mxu1 %v10768_v48  ;;  %v7310_v0 = vpack.c.bf16 %v5201_v49, %v5200_v19  ;;  %v5203_v48 = vld [vmem:[%s10598_s1 + $0x378] sm:$0xff] }
 0x1a6   : > { %6422 = vmatprep.mubr.msk.f32.mxu0 %vm7409_vm0, %v10728_v46  ;;  %6270 = vmatprep.mubr.msk.f32.mxu1 %vm7409_vm0, %v10728_v46  ;;  %v5202_v50 = vld [vmem:[%s10598_s1 + $0x370] sm:$0xff] }
 0x1a7   : > { %7308 = vmatpush3.bf16.msra.mxu0 %v7307_v52  ;;  %v9134_v35 = vpop.f32.mrb[30].mxu0  ;;  %7287 = vmatpush3.bf16.msra.mxu1 %v7286_v1  ;;  %v7313_v1 = vpack.c.bf16 %v5203_v48, %v5202_v50  ;;  %v10774_v50 = vld [vmem:[#allocation18_spill] sm:$0xff] }
 0x1a8   : > { %7309 = vmatprep.subr.bf16.mxu0 %v10761_v3  ;;  %v9143_v22 = vpop.f32.mrb[30].mxu1  ;;  %v5831_v30 = vpop.f32.mrb[31].mxu0  ;;  %7288 = vmatprep.subr.bf16.mxu1 %v10761_v3 }
 0x1a9   : > { %10769 = vst [vmem:[#allocation32_spill] sm:$0xff] %v9143_v22  ;;  %6423 = vmatmul.mubr.f32.gmra.mrb[136].mxu0 %v10770_v16  ;;  %v5894_v52 = vpop.f32.mrb[31].mxu1  ;;  %6271 = vmatmul.mubr.f32.gmra.mrb[136].mxu1 %v8546_v41 }
 0x1aa   : > { %6425 = vmatprep.mubr.msk.f32.mxu0 %vm7409_vm0, %v10728_v46  ;;  %6273 = vmatprep.mubr.msk.f32.mxu1 %vm7409_vm0, %v10728_v46 }
 0x1ab   : > { %7311 = vmatpush3.bf16.msra.mxu0 %v7310_v0  ;;  %v9152_v19 = vpop.f32.mrb[32].mxu0  ;;  %7290 = vmatpush3.bf16.msra.mxu1 %v7289_v25 }
 0x1ac   : > { %7312 = vmatprep.subr.bf16.mxu0 %v10761_v3  ;;  %v9155_v30 = vpop.f32.mrb[32].mxu1  ;;  %v5834_v49 = vpop.f32.mrb[33].mxu0  ;;  %7315 = vmatprep.subr.bf16.mxu1 %v10761_v3 }
 0x1ad   : > { %10771 = vst [vmem:[#allocation70_spill] sm:$0xff] %v9155_v30  ;;  %6426 = vmatmul.mubr.f32.gmra.mrb[138].mxu0 %v10772_v4  ;;  %v5897_v41 = vpop.f32.mrb[33].mxu1  ;;  %6274 = vmatmul.mubr.f32.gmra.mrb[138].mxu1 %v8560_v34 }
 0x1ae   : > { %6428 = vmatprep.mubr.msk.f32.mxu0 %vm7409_vm0, %v10728_v46  ;;  %6276 = vmatprep.mubr.msk.f32.mxu1 %vm7409_vm0, %v10728_v46 }
 0x1af   : > { %7314 = vmatpush3.bf16.msra.mxu0 %v7313_v1  ;;  %v9164_v57 = vpop.f32.mrb[34].mxu0 }
 0x1b0   : > { %7339 = vmatprep.subr.bf16.mxu0 %v10761_v3  ;;  %v9167_v0 = vpop.f32.mrb[34].mxu1  ;;  %v5837_v25 = vpop.f32.mrb[35].mxu0 }
 0x1b1   : > { %10773 = vst [vmem:[#allocation71_spill] sm:$0xff] %v9167_v0  ;;  %6429 = vmatmul.mubr.f32.gmra.mrb[140].mxu0 %v10774_v50  ;;  %v5900_v48 = vpop.f32.mrb[35].mxu1  ;;  %6277 = vmatmul.mubr.f32.gmra.mrb[140].mxu1 %v8580_v10  ;;  %v10778_v0 = vld [vmem:[#allocation24_spill] sm:$0xff] }
 0x1b2   : > { %6431 = vmatprep.mubr.msk.f32.mxu0 %vm7409_vm0, %v10728_v46  ;;  %6279 = vmatprep.mubr.msk.f32.mxu1 %vm7409_vm0, %v10728_v46  ;;  %v10777_v48 = vld [vmem:[#allocation22_spill] sm:$0xff] }
 0x1b3   : > { %v9175_v34 = vpop.f32.mrb[36].mxu0 }
 0x1b4   : > { %v9177_v52 = vpop.f32.mrb[36].mxu1  ;;  %v5840_v1 = vpop.f32.mrb[37].mxu0 }
 0x1b5   : > { %10775 = vst [vmem:[#allocation72_spill] sm:$0xff] %v9177_v52  ;;  %6432 = vmatmul.mubr.f32.gmra.mrb[142].mxu0 %v8146_v51  ;;  %v5903_v49 = vpop.f32.mrb[37].mxu1  ;;  %6280 = vmatmul.mubr.f32.gmra.mrb[142].mxu1 %v8594_v24 }
 0x1b6   : > { %6434 = vmatprep.mubr.msk.f32.mxu0 %vm7409_vm0, %v10728_v46  ;;  %6282 = vmatprep.mubr.msk.f32.mxu1 %vm7409_vm0, %v10728_v46 }
 0x1b7   : > { %v9185_v10 = vpop.f32.mrb[38].mxu0 }
 0x1b8   : > { %v9187_v41 = vpop.f32.mrb[38].mxu1  ;;  %v5843_v25 = vpop.f32.mrb[39].mxu0 }
 0x1b9   : > { %10776 = vst [vmem:[#allocation73_spill] sm:$0xff] %v9187_v41  ;;  %6435 = vmatmul.mubr.f32.gmra.mrb[144].mxu0 %v10777_v48  ;;  %v5906_v52 = vpop.f32.mrb[39].mxu1  ;;  %6283 = vmatmul.mubr.f32.gmra.mrb[144].mxu1 %v8625_v23 }
 0x1ba   : > { %6437 = vmatprep.mubr.msk.f32.mxu0 %vm7409_vm0, %v10728_v46  ;;  %6285 = vmatprep.mubr.msk.f32.mxu1 %vm7409_vm0, %v10728_v46 }
 0x1bb   : > { %v9195_v24 = vpop.f32.mrb[40].mxu0 }
 0x1bc   : > { %v1435_v1 = vpop.f32.mrb[40].mxu1  ;;  %v5846_v49 = vpop.f32.mrb[41].mxu0 }
 0x1bd   : > { %6438 = vmatmul.mubr.f32.gmra.mrb[146].mxu0 %v10778_v0  ;;  %v1436_v41 = vadd.f32 %v1435_v1, %v8839_v40  ;;  %v5941_v25 = vpop.f32.mrb[41].mxu1  ;;  %6286 = vmatmul.mubr.f32.gmra.mrb[146].mxu1 %v8642_v45 }
 0x1be   : > { %6440 = vmatprep.mubr.msk.f32.mxu0 %vm7409_vm0, %v10728_v46  ;;  %6288 = vmatprep.mubr.msk.f32.mxu1 %vm7409_vm0, %v10728_v46 }
 0x1bf   : > { %v1847_v23 = vpop.f32.mrb[42].mxu0 }
 0x1c0   : > { %v1440_v52 = vpop.f32.mrb[42].mxu1  ;;  %v6096_v30 = vpop.f32.mrb[43].mxu0  ;;  %v9205_v22 = vadd.f32 %v1847_v23, %v1436_v41 }
 0x1c1   : > { %6441 = vmatmul.mubr.f32.gmra.mrb[148].mxu0 %v8221_v42  ;;  %v1441_v49 = vadd.f32 %v1440_v52, %v8854_v38  ;;  %v5944_v0 = vpop.f32.mrb[43].mxu1  ;;  %6289 = vmatmul.mubr.f32.gmra.mrb[148].mxu1 %v8653_v7 }
 0x1c2   : > { %6443 = vmatprep.mubr.msk.f32.mxu0 %vm7409_vm0, %v10728_v46  ;;  %6291 = vmatprep.mubr.msk.f32.mxu1 %vm7409_vm0, %v10728_v46 }
 0x1c3   : > { %v1852_v45 = vpop.f32.mrb[44].mxu0 }
 0x1c4   : > { %v1445_v40 = vpop.f32.mrb[44].mxu1  ;;  %v6099_v1 = vpop.f32.mrb[45].mxu0  ;;  %v9214_v30 = vadd.f32 %v1852_v45, %v1441_v49 }
 0x1c5   : > { %6444 = vmatmul.mubr.f32.gmra.mrb[150].mxu0 %v8241_v53  ;;  %v1446_v41 = vadd.f32 %v1445_v40, %v8869_v33  ;;  %v5947_v25 = vpop.f32.mrb[45].mxu1  ;;  %6292 = vmatmul.mubr.f32.gmra.mrb[150].mxu1 %v8664_v14 }
 0x1c6   : > { %6446 = vmatprep.mubr.msk.f32.mxu0 %vm7409_vm0, %v10728_v46  ;;  %6294 = vmatprep.mubr.msk.f32.mxu1 %vm7409_vm0, %v10728_v46 }
 0x1c7   : > { %v1857_v7 = vpop.f32.mrb[46].mxu0 }
 0x1c8   : > { %v1450_v38 = vpop.f32.mrb[46].mxu1  ;;  %v6102_v0 = vpop.f32.mrb[47].mxu0  ;;  %v9223_v23 = vadd.f32 %v1857_v7, %v1446_v41 }
 0x1c9   : > { %6447 = vmatmul.mubr.f32.gmra.mrb[152].mxu0 %v8260_v15  ;;  %v1451_v52 = vadd.f32 %v1450_v38, %v8884_v11  ;;  %v5950_v49 = vpop.f32.mrb[47].mxu1  ;;  %6295 = vmatmul.mubr.f32.gmra.mrb[152].mxu1 %v8675_v44 }
 0x1ca   : > { %6449 = vmatprep.mubr.msk.f32.mxu0 %vm7409_vm0, %v10728_v46  ;;  %6297 = vmatprep.mubr.msk.f32.mxu1 %vm7409_vm0, %v10728_v46 }
 0x1cb   : > { %v1862_v14 = vpop.f32.mrb[48].mxu0 }
 0x1cc   : > { %v1455_v33 = vpop.f32.mrb[48].mxu1  ;;  %v6105_v45 = vpop.f32.mrb[49].mxu0  ;;  %v9232_v40 = vadd.f32 %v1862_v14, %v1451_v52 }
 0x1cd   : > { %6450 = vmatmul.mubr.f32.gmra.mrb[154].mxu0 %v8278_v27  ;;  %v1456_v1 = vadd.f32 %v1455_v33, %v8899_v2  ;;  %v5953_v41 = vpop.f32.mrb[49].mxu1  ;;  %6298 = vmatmul.mubr.f32.gmra.mrb[154].mxu1 %v8686_v28 }
 0x1ce   : > { %6452 = vmatprep.mubr.msk.f32.mxu0 %vm7409_vm0, %v10728_v46  ;;  %6300 = vmatprep.mubr.msk.f32.mxu1 %vm7409_vm0, %v10728_v46 }
 0x1cf   : > { %v1867_v44 = vpop.f32.mrb[50].mxu0 }
 0x1d0   : > { %v1460_v11 = vpop.f32.mrb[50].mxu1  ;;  %v6108_v25 = vpop.f32.mrb[51].mxu0  ;;  %v9241_v7 = vadd.f32 %v1867_v44, %v1456_v1 }
 0x1d1   : > { %6453 = vmatmul.mubr.f32.gmra.mrb[156].mxu0 %v8292_v43  ;;  %v1461_v38 = vadd.f32 %v1460_v11, %v8914_v6  ;;  %v5956_v0 = vpop.f32.mrb[51].mxu1  ;;  %6301 = vmatmul.mubr.f32.gmra.mrb[156].mxu1 %v8697_v55 }
 0x1d2   : > { %6455 = vmatprep.mubr.msk.f32.mxu0 %vm7409_vm0, %v10728_v46  ;;  %6303 = vmatprep.mubr.msk.f32.mxu1 %vm7409_vm0, %v10728_v46 }
 0x1d3   : > { %v1872_v28 = vpop.f32.mrb[52].mxu0 }
 0x1d4   : > { %v1465_v2 = vpop.f32.mrb[52].mxu1  ;;  %v6111_v52 = vpop.f32.mrb[53].mxu0  ;;  %v9250_v49 = vadd.f32 %v1872_v28, %v1461_v38 }
 0x1d5   : > { %6456 = vmatmul.mubr.f32.gmra.mrb[158].mxu0 %v8304_v8  ;;  %v1466_v14 = vadd.f32 %v1465_v2, %v8929_v18  ;;  %v5959_v33 = vpop.f32.mrb[53].mxu1  ;;  %6304 = vmatmul.mubr.f32.gmra.mrb[158].mxu1 %v8708_v12 }
 0x1d6   : > { %6458 = vmatprep.mubr.msk.f32.mxu0 %vm7409_vm0, %v10728_v46  ;;  %6306 = vmatprep.mubr.msk.f32.mxu1 %vm7409_vm0, %v10728_v46 }
 0x1d7   : > { %v1877_v55 = vpop.f32.mrb[54].mxu0 }
 0x1d8   : > { %v1470_v6 = vpop.f32.mrb[54].mxu1  ;;  %v6114_v45 = vpop.f32.mrb[55].mxu0  ;;  %v9259_v1 = vadd.f32 %v1877_v55, %v1466_v14 }
 0x1d9   : > { %6459 = vmatmul.mubr.f32.gmra.mrb[160].mxu0 %v7833_v56  ;;  %v1471_v41 = vadd.f32 %v1470_v6, %v8944_v63  ;;  %v5962_v44 = vpop.f32.mrb[55].mxu1  ;;  %6307 = vmatmul.mubr.f32.gmra.mrb[160].mxu1 %v8719_v47 }
 0x1da   : > { %6461 = vmatprep.mubr.msk.f32.mxu0 %vm7409_vm0, %v10728_v46  ;;  %6309 = vmatprep.mubr.msk.f32.mxu1 %vm7409_vm0, %v10728_v46  ;;  %v10779_v44 = vld [vmem:[#allocation3_spill] sm:$0xff] }
 0x1db   : > { %v1882_v12 = vpop.f32.mrb[56].mxu0 }
 0x1dc   : > { %v1475_v18 = vpop.f32.mrb[56].mxu1  ;;  %v6117_v11 = vpop.f32.mrb[57].mxu0  ;;  %v9268_v25 = vadd.f32 %v1882_v12, %v1471_v41 }
 0x1dd   : > { %6462 = vmatmul.mubr.f32.gmra.mrb[162].mxu0 %v7836_v13  ;;  %v1476_v38 = vadd.f32 %v1475_v18, %v8970_v39  ;;  %v5965_v0 = vpop.f32.mrb[57].mxu1  ;;  %6310 = vmatmul.mubr.f32.gmra.mrb[162].mxu1 %v8730_v29 }
 0x1de   : > { %6464 = vmatprep.mubr.msk.f32.mxu0 %vm7409_vm0, %v10728_v46  ;;  %6312 = vmatprep.mubr.msk.f32.mxu1 %vm7409_vm0, %v10728_v46  ;;  %v10780_v0 = vld [vmem:[#allocation5_spill] sm:$0xff] }
 0x1df   : > { %v1887_v47 = vpop.f32.mrb[58].mxu0 }
 0x1e0   : > { %v1480_v63 = vpop.f32.mrb[58].mxu1  ;;  %v6120_v28 = vpop.f32.mrb[59].mxu0  ;;  %v9277_v2 = vadd.f32 %v1887_v47, %v1476_v38 }
 0x1e1   : > { %6465 = vmatmul.mubr.f32.gmra.mrb[164].mxu0 %v7849_v36  ;;  %v1481_v52 = vadd.f32 %v1480_v63, %v8991_v54  ;;  %v5968_v14 = vpop.f32.mrb[59].mxu1  ;;  %6313 = vmatmul.mubr.f32.gmra.mrb[164].mxu1 %v8741_v37 }
 0x1e2   : > { %6467 = vmatprep.mubr.msk.f32.mxu0 %vm7409_vm0, %v10728_v46  ;;  %6315 = vmatprep.mubr.msk.f32.mxu1 %vm7409_vm0, %v10728_v46  ;;  %v10781_v14 = vld [vmem:[#allocation7_spill] sm:$0xff] }
 0x1e3   : > { %v1892_v29 = vpop.f32.mrb[60].mxu0 }
 0x1e4   : > { %v1485_v39 = vpop.f32.mrb[60].mxu1  ;;  %v6123_v33 = vpop.f32.mrb[61].mxu0  ;;  %v9286_v55 = vadd.f32 %v1892_v29, %v1481_v52 }
 0x1e5   : > { %6468 = vmatmul.mubr.f32.gmra.mrb[166].mxu0 %v7882_v62  ;;  %v1486_v6 = vadd.f32 %v1485_v39, %v9014_v17  ;;  %v5971_v45 = vpop.f32.mrb[61].mxu1  ;;  %6316 = vmatmul.mubr.f32.gmra.mrb[166].mxu1 %v8752_v5 }
 0x1e6   : > { %6470 = vmatprep.mubr.msk.f32.mxu0 %vm7409_vm0, %v10728_v46  ;;  %6318 = vmatprep.mubr.msk.f32.mxu1 %vm7409_vm0, %v10728_v46  ;;  %v10782_v45 = vld [vmem:[#allocation9_spill] sm:$0xff] }
 0x1e7   : > { %v1897_v37 = vpop.f32.mrb[62].mxu0 }
 0x1e8   : > { %v1490_v54 = vpop.f32.mrb[62].mxu1  ;;  %v6126_v41 = vpop.f32.mrb[63].mxu0  ;;  %v9295_v12 = vadd.f32 %v1897_v37, %v1486_v6 }
 0x1e9   : > { %6471 = vmatmul.mubr.f32.gmra.mrb[168].mxu0 %v10779_v44  ;;  %v1491_v18 = vadd.f32 %v1490_v54, %v9038_v21  ;;  %v5974_v11 = vpop.f32.mrb[63].mxu1  ;;  %6319 = vmatmul.mubr.f32.gmra.mrb[168].mxu1 %v8763_v61 }
 0x1ea   : > { %6473 = vmatprep.mubr.msk.f32.mxu0 %vm7409_vm0, %v10728_v46  ;;  %6321 = vmatprep.mubr.msk.f32.mxu1 %vm7409_vm0, %v10728_v46 }
 0x1eb   : > { %v1902_v5 = vpop.f32.mrb[64].mxu0 }
 0x1ec   : > { %v1495_v17 = vpop.f32.mrb[64].mxu1  ;;  %v6129_v38 = vpop.f32.mrb[65].mxu0  ;;  %v9304_v47 = vadd.f32 %v1902_v5, %v1491_v18  ;;  %v10784_v5 = vld [vmem:[#allocation11_spill] sm:$0xff] }
 0x1ed   : > { %6474 = vmatmul.mubr.f32.gmra.mrb[170].mxu0 %v10780_v0  ;;  %v1496_v63 = vadd.f32 %v1495_v17, %v9062_v20  ;;  %v5977_v28 = vpop.f32.mrb[65].mxu1  ;;  %6322 = vmatmul.mubr.f32.gmra.mrb[170].mxu1 %v8774_v32 }
 0x1ee   : > { %6476 = vmatprep.mubr.msk.f32.mxu0 %vm7409_vm0, %v10728_v46  ;;  %6324 = vmatprep.mubr.msk.f32.mxu1 %vm7409_vm0, %v10728_v46 }
 0x1ef   : > { %v1907_v61 = vpop.f32.mrb[66].mxu0 }
 0x1f0   : > { %v1500_v21 = vpop.f32.mrb[66].mxu1  ;;  %v6132_v52 = vpop.f32.mrb[67].mxu0  ;;  %v9313_v29 = vadd.f32 %v1907_v61, %v1496_v63 }
 0x1f1   : > { %6477 = vmatmul.mubr.f32.gmra.mrb[172].mxu0 %v10781_v14  ;;  %v1501_v39 = vadd.f32 %v1500_v21, %v9086_v9  ;;  %v5980_v33 = vpop.f32.mrb[67].mxu1  ;;  %6325 = vmatmul.mubr.f32.gmra.mrb[172].mxu1 %v8785_v58  ;;  %v10783_v9 = vld [vmem:[#allocation43_spill] sm:$0xff]  ;;  %v10786_v52 = vld [vmem:[#allocation13_spill] sm:$0xff] }
 0x1f2   : > { %6479 = vmatprep.mubr.msk.f32.mxu0 %vm7409_vm0, %v10728_v46  ;;  %6327 = vmatprep.mubr.msk.f32.mxu1 %vm7409_vm0, %v10728_v46 }
 0x1f3   : > { %v1912_v32 = vpop.f32.mrb[68].mxu0 }
 0x1f4   : > { %v1505_v20 = vpop.f32.mrb[68].mxu1  ;;  %v6135_v6 = vpop.f32.mrb[69].mxu0  ;;  %v9322_v37 = vadd.f32 %v1912_v32, %v1501_v39 }
 0x1f5   : > { %6480 = vmatmul.mubr.f32.gmra.mrb[174].mxu0 %v10782_v45  ;;  %v1506_v54 = vadd.f32 %v1505_v20, %v9110_v59  ;;  %v5983_v41 = vpop.f32.mrb[69].mxu1  ;;  %6328 = vmatmul.mubr.f32.gmra.mrb[174].mxu1 %v10783_v9  ;;  %v10785_v59 = vld [vmem:[#allocation44_spill] sm:$0xff] }
 0x1f6   : > { %6482 = vmatprep.mubr.msk.f32.mxu0 %vm7409_vm0, %v10728_v46  ;;  %6330 = vmatprep.mubr.msk.f32.mxu1 %vm7409_vm0, %v10728_v46  ;;  %v10788_v41 = vld [vmem:[#allocation15_spill] sm:$0xff] }
 0x1f7   : > { %v1917_v58 = vpop.f32.mrb[70].mxu0 }
 0x1f8   : > { %v1510_v18 = vpop.f32.mrb[70].mxu1  ;;  %v6138_v11 = vpop.f32.mrb[71].mxu0  ;;  %v9331_v17 = vadd.f32 %v1917_v58, %v1506_v54 }
 0x1f9   : > { %6483 = vmatmul.mubr.f32.gmra.mrb[176].mxu0 %v10784_v5  ;;  %v1511_v38 = vadd.f32 %v1510_v18, %v9134_v35  ;;  %v5986_v63 = vpop.f32.mrb[71].mxu1  ;;  %6331 = vmatmul.mubr.f32.gmra.mrb[176].mxu1 %v10785_v59  ;;  %v10787_v35 = vld [vmem:[#allocation45_spill] sm:$0xff] }
 0x1fa   : > { %6485 = vmatprep.mubr.msk.f32.mxu0 %vm7409_vm0, %v10728_v46  ;;  %6333 = vmatprep.mubr.msk.f32.mxu1 %vm7409_vm0, %v10728_v46  ;;  %v10791_v59 = vld [vmem:[#allocation17_spill] sm:$0xff] }
 0x1fb   : > { %v1922_v28 = vpop.f32.mrb[72].mxu0 }
 0x1fc   : > { %v1515_v61 = vpop.f32.mrb[72].mxu1  ;;  %v6141_v21 = vpop.f32.mrb[73].mxu0  ;;  %v9340_v39 = vadd.f32 %v1922_v28, %v1511_v38 }
 0x1fd   : > { %6486 = vmatmul.mubr.f32.gmra.mrb[178].mxu0 %v10786_v52  ;;  %v1516_v33 = vadd.f32 %v1515_v61, %v9152_v19  ;;  %v5989_v32 = vpop.f32.mrb[73].mxu1  ;;  %6334 = vmatmul.mubr.f32.gmra.mrb[178].mxu1 %v10787_v35  ;;  %v10790_v19 = vld [vmem:[#allocation46_spill] sm:$0xff] }
 0x1fe   : > { %6488 = vmatprep.mubr.msk.f32.mxu0 %vm7409_vm0, %v10728_v46  ;;  %6336 = vmatprep.mubr.msk.f32.mxu1 %vm7409_vm0, %v10728_v46 }
 0x1ff   : > { %v1927_v20 = vpop.f32.mrb[74].mxu0 }
 0x200   : > { %v1520_v6 = vpop.f32.mrb[74].mxu1  ;;  %v6144_v54 = vpop.f32.mrb[75].mxu0  ;;  %v9349_v9 = vadd.f32 %v1927_v20, %v1516_v33  ;;  %v10794_v20 = vld [vmem:[#allocation19_spill] sm:$0xff] }
 0x201   : > { %6489 = vmatmul.mubr.f32.gmra.mrb[180].mxu0 %v10788_v41  ;;  %v1521_v58 = vadd.f32 %v1520_v6, %v9164_v57  ;;  %v5992_v18 = vpop.f32.mrb[75].mxu1  ;;  %6337 = vmatmul.mubr.f32.gmra.mrb[180].mxu1 %v10790_v19  ;;  %v10793_v57 = vld [vmem:[#allocation47_spill] sm:$0xff] }
 0x202   : > { %10789 = vst [vmem:[#allocation22_spill] sm:$0xff] %v9349_v9  ;;  %6491 = vmatprep.mubr.msk.f32.mxu0 %vm7409_vm0, %v10728_v46  ;;  %6339 = vmatprep.mubr.msk.f32.mxu1 %vm7409_vm0, %v10728_v46 }
 0x203   : > { %v1932_v11 = vpop.f32.mrb[76].mxu0 }
 0x204   : > { %v1525_v38 = vpop.f32.mrb[76].mxu1  ;;  %v6147_v63 = vpop.f32.mrb[77].mxu0  ;;  %v9358_v28 = vadd.f32 %v1932_v11, %v1521_v58 }
 0x205   : > { %6492 = vmatmul.mubr.f32.gmra.mrb[182].mxu0 %v10791_v59  ;;  %v1526_v61 = vadd.f32 %v1525_v38, %v9175_v34  ;;  %v5995_v21 = vpop.f32.mrb[77].mxu1  ;;  %6340 = vmatmul.mubr.f32.gmra.mrb[182].mxu1 %v10793_v57  ;;  %v10796_v34 = vld [vmem:[#allocation49_spill] sm:$0xff] }
 0x206   : > { %10792 = vst [vmem:[#allocation3_spill] sm:$0xff] %v9358_v28  ;;  %6494 = vmatprep.mubr.msk.f32.mxu0 %vm7409_vm0, %v10728_v46  ;;  %6342 = vmatprep.mubr.msk.f32.mxu1 %vm7409_vm0, %v10728_v46  ;;  %v10797_v38 = vld [vmem:[#allocation21_spill] sm:$0xff] }
 0x207   : > { %v1937_v33 = vpop.f32.mrb[78].mxu0 }
 0x208   : > { %v1530_v32 = vpop.f32.mrb[78].mxu1  ;;  %v6150_v35 = vpop.f32.mrb[79].mxu0  ;;  %v9367_v6 = vadd.f32 %v1937_v33, %v1526_v61 }
 0x209   : > { %6495 = vmatmul.mubr.f32.gmra.mrb[184].mxu0 %v10794_v20  ;;  %v1531_v54 = vadd.f32 %v1530_v32, %v9185_v10  ;;  %v5998_v58 = vpop.f32.mrb[79].mxu1  ;;  %6343 = vmatmul.mubr.f32.gmra.mrb[184].mxu1 %v10796_v34  ;;  %v10799_v10 = vld [vmem:[#allocation51_spill] sm:$0xff] }
 0x20a   : > { %10795 = vst [vmem:[#allocation5_spill] sm:$0xff] %v9367_v6  ;;  %6497 = vmatprep.mubr.msk.f32.mxu0 %vm7409_vm0, %v10728_v46  ;;  %6345 = vmatprep.mubr.msk.f32.mxu1 %vm7409_vm0, %v10728_v46  ;;  %v10800_v35 = vld [vmem:[#allocation23_spill] sm:$0xff] }
 0x20b   : > { %v1942_v18 = vpop.f32.mrb[80].mxu0 }
 0x20c   : > { %v1535_v19 = vpop.f32.mrb[80].mxu1  ;;  %v6153_v11 = vpop.f32.mrb[81].mxu0  ;;  %v9376_v63 = vadd.f32 %v1942_v18, %v1531_v54  ;;  %v10802_v54 = vld [vmem:[#allocation48_spill] sm:$0xff]  ;;  %v10803_v18 = vld [vmem:[#allocation53_spill] sm:$0xff] }
 0x20d   : > { %6498 = vmatmul.mubr.f32.gmra.mrb[186].mxu0 %v10797_v38  ;;  %v1536_v61 = vadd.f32 %v1535_v19, %v9195_v24  ;;  %v6001_v21 = vpop.f32.mrb[81].mxu1  ;;  %6346 = vmatmul.mubr.f32.gmra.mrb[186].mxu1 %v10799_v10  ;;  %v10804_v10 = vld [vmem:[#allocation25_spill] sm:$0xff] }
 0x20e   : > { %10798 = vst [vmem:[#allocation7_spill] sm:$0xff] %v9376_v63  ;;  %6500 = vmatprep.mubr.msk.f32.mxu0 %vm7409_vm0, %v10728_v46  ;;  %6348 = vmatprep.mubr.msk.f32.mxu1 %vm7409_vm0, %v10728_v46  ;;  %v10811_v63 = vld [vmem:[#allocation57_spill] sm:$0xff] }
 0x20f   : > { %v1947_v57 = vpop.f32.mrb[82].mxu0 }
 0x210   : > { %v1540_v33 = vpop.f32.mrb[82].mxu1  ;;  %v6156_v32 = vpop.f32.mrb[83].mxu0  ;;  %v9385_v58 = vadd.f32 %v1947_v57, %v1536_v61  ;;  %v379_v61 = vld [vmem:[%s7787_s29 + $0x158] sm:$0xff]  ;;  %v10806_v57 = vld [vmem:[#allocation50_spill] sm:$0xff] }
 0x211   : > { %6501 = vmatmul.mubr.f32.gmra.mrb[188].mxu0 %v10800_v35  ;;  %v1541_v34 = vadd.f32 %v1540_v33, %v10802_v54  ;;  %v6004_v24 = vpop.f32.mrb[83].mxu1  ;;  %6349 = vmatmul.mubr.f32.gmra.mrb[188].mxu1 %v10803_v18  ;;  %v10807_v54 = vld [vmem:[#allocation55_spill] sm:$0xff]  ;;  %v7396_v18 = vld [vmem:[%s10600_s3] ss:$0 sm:$0xff] }
 0x212   : > { %10801 = vst [vmem:[#allocation9_spill] sm:$0xff] %v9385_v58  ;;  %6503 = vmatprep.mubr.msk.f32.mxu0 %vm7409_vm0, %v10728_v46  ;;  %6351 = vmatprep.mubr.msk.f32.mxu1 %vm7409_vm0, %v10728_v46  ;;  %v10833_v35 = vld [vmem:[#allocation2_spill] sm:$0xff] }
 0x213   : > { %v1952_v19 = vpop.f32.mrb[84].mxu0 }
 0x214   : > { %v1545_v11 = vpop.f32.mrb[84].mxu1  ;;  %v6159_v21 = vpop.f32.mrb[85].mxu0  ;;  %v9394_v32 = vadd.f32 %v1952_v19, %v1541_v34 }
 0x215   : > { %6504 = vmatmul.mubr.f32.gmra.mrb[190].mxu0 %v10804_v10  ;;  %v1546_v58 = vadd.f32 %v1545_v11, %v10806_v57  ;;  %v6007_v33 = vpop.f32.mrb[85].mxu1  ;;  %6352 = vmatmul.mubr.f32.gmra.mrb[190].mxu1 %v10807_v54  ;;  %v433_v21 = vmul.f32 %v7396_v18, %v379_v61  ;;  %v10810_v57 = vld [vmem:[#allocation52_spill] sm:$0xff]  ;;  %v7397_v61 = vld [vmem:[%s10601_s4] ss:$0 sm:$0xff]  ;;  %v10816_v10 = vld [vmem:[#allocation31_spill] sm:$0xff] }
 0x216   : > { %10805 = vst [vmem:[#allocation43_spill] sm:$0xff] %v9394_v32  ;;  %6506 = vmatprep.mubr.msk.f32.mxu0 %vm7409_vm0, %v10728_v46  ;;  %6354 = vmatprep.mubr.msk.f32.mxu1 %vm7409_vm0, %v10728_v46  ;;  %v10808_v32 = vld [vmem:[#allocation26_spill] sm:$0xff] }
 0x217   : > { %v1957_v24 = vpop.f32.mrb[86].mxu0  ;;  %v487_v18 = vadd.f32 %v7397_v61, %v433_v21 }
 0x218   : > { %v1550_v34 = vpop.f32.mrb[86].mxu1  ;;  %v6162_v19 = vpop.f32.mrb[87].mxu0  ;;  %v9407_v11 = vadd.f32 %v1957_v24, %v1546_v58  ;;  %v10812_v24 = vld [vmem:[#allocation27_spill] sm:$0xff] }
 0x219   : > { %6507 = vmatmul.mubr.f32.gmra.mrb[192].mxu0 %v10808_v32  ;;  %v1551_v33 = vadd.f32 %v1550_v34, %v10810_v57  ;;  %v6010_v54 = vpop.f32.mrb[87].mxu1  ;;  %6355 = vmatmul.mubr.f32.gmra.mrb[192].mxu1 %v10811_v63  ;;  %v10814_v57 = vld [vmem:[#allocation54_spill] sm:$0xff]  ;;  %v9428_v21 = vmul.f32 %v10816_v10, %v487_v18 }
 0x21a   : > { %10809 = vst [vmem:[#allocation11_spill] sm:$0xff] %v9407_v11  ;;  %6509 = vmatprep.mubr.msk.f32.mxu0 %vm7409_vm0, %v10728_v46  ;;  %6357 = vmatprep.mubr.msk.f32.mxu1 %vm7409_vm0, %v10728_v46  ;;  %v10815_v11 = vld [vmem:[#allocation59_spill] sm:$0xff] }
 0x21b   : > { %v1962_v6 = vpop.f32.mrb[88].mxu0  ;;  %10817 = vst [vmem:[#allocation13_spill] sm:$0xff] %v9428_v21 }
 0x21c   : > { %v1555_v19 = vpop.f32.mrb[88].mxu1  ;;  %v6165_v58 = vpop.f32.mrb[89].mxu0  ;;  %v9419_v34 = vadd.f32 %v1962_v6, %v1551_v33  ;;  %v10820_v33 = vld [vmem:[#allocation56_spill] sm:$0xff] }
 0x21d   : > { %6510 = vmatmul.mubr.f32.gmra.mrb[194].mxu0 %v10812_v24  ;;  %v1556_v63 = vadd.f32 %v1555_v19, %v10814_v57  ;;  %v6013_v54 = vpop.f32.mrb[89].mxu1  ;;  %6358 = vmatmul.mubr.f32.gmra.mrb[194].mxu1 %v10815_v11  ;;  %v10818_v24 = vld [vmem:[#allocation28_spill] sm:$0xff]  ;;  %v10821_v11 = vld [vmem:[#allocation61_spill] sm:$0xff] }
 0x21e   : > { %10813 = vst [vmem:[#allocation44_spill] sm:$0xff] %v9419_v34  ;;  %6512 = vmatprep.mubr.msk.f32.mxu0 %vm7409_vm0, %v10728_v46  ;;  %6360 = vmatprep.mubr.msk.f32.mxu1 %vm7409_vm0, %v10728_v46  ;;  %v10822_v34 = vld [vmem:[#allocation29_spill] sm:$0xff] }
 0x21f   : > { %v1967_v32 = vpop.f32.mrb[90].mxu0 }
 0x220   : > { %v1560_v61 = vpop.f32.mrb[90].mxu1  ;;  %v6168_v58 = vpop.f32.mrb[91].mxu0  ;;  %v9431_v6 = vadd.f32 %v1967_v32, %v1556_v63  ;;  %v10824_v63 = vld [vmem:[#allocation58_spill] sm:$0xff] }
 0x221   : > { %6513 = vmatmul.mubr.f32.gmra.mrb[196].mxu0 %v10818_v24  ;;  %v1561_v19 = vadd.f32 %v1560_v61, %v10820_v33  ;;  %v6016_v57 = vpop.f32.mrb[91].mxu1  ;;  %6361 = vmatmul.mubr.f32.gmra.mrb[196].mxu1 %v10821_v11  ;;  %v2111_v58 = vrot.slane %v9428_v21, 7 }
 0x222   : > { %10819 = vst [vmem:[#allocation45_spill] sm:$0xff] %v9431_v6  ;;  %6515 = vmatprep.mubr.msk.f32.mxu0 %vm7409_vm0, %v10728_v46  ;;  %6363 = vmatprep.mubr.msk.f32.mxu1 %vm7409_vm0, %v10728_v46  ;;  %v10825_v6 = vld [vmem:[#allocation30_spill] sm:$0xff] }
 0x223   : > { %v1972_v54 = vpop.f32.mrb[92].mxu0 }
 0x224   : > { %v1565_v10 = vpop.f32.mrb[92].mxu1  ;;  %v6171_v18 = vpop.f32.mrb[93].mxu0  ;;  %v9441_v32 = vadd.f32 %v1972_v54, %v1561_v19  ;;  %v10827_v19 = vld [vmem:[#allocation36_spill] sm:$0xff] }
 0x225   : > { %6516 = vmatmul.mubr.f32.gmra.mrb[198].mxu0 %v10822_v34  ;;  %v1566_v61 = vadd.f32 %v1565_v10, %v10824_v63  ;;  %v6019_v33 = vpop.f32.mrb[93].mxu1  ;;  %6364 = vmatmul.mubr.f32.gmra.mrb[198].mxu1 %v8975_v26  ;;  %v10826_v34 = vrot.slane %v10825_v6, 7  ;;  %v2113_v54 = vrot.slane %v10827_v19, 7  ;;  %v10829_v26 = vld [vmem:[#allocation60_spill] sm:$0xff] }
 0x226   : > { %10823 = vst [vmem:[#allocation15_spill] sm:$0xff] %v9441_v32  ;;  %6518 = vmatprep.mubr.msk.f32.mxu0 %vm7409_vm0, %v10728_v46  ;;  %6366 = vmatprep.mubr.msk.f32.mxu1 %vm7409_vm0, %v10728_v46  ;;  %v10832_v32 = vld [vmem:[#allocation62_spill] sm:$0xff] }
 0x227   : > { %v1977_v57 = vpop.f32.mrb[94].mxu0  ;;  %v2112_v24 = vsel %vm1656_vm3, %v10826_v34, %v2111_v58  ;;  %v5204_v34 = vld [vmem:[%s10598_s1 + $0x380] sm:$0xff] }
 0x228   : > { %v1570_v11 = vpop.f32.mrb[94].mxu1  ;;  %v6174_v18 = vpop.f32.mrb[95].mxu0  ;;  %v9454_v10 = vadd.f32 %v1977_v57, %v1566_v61  ;;  %v5205_v61 = vld [vmem:[%s10598_s1 + $0x388] sm:$0xff] }
 0x229   : > { %6519 = vmatmul.mubr.f32.gmra.mrb[200].mxu0 %v10825_v6  ;;  %v1571_v63 = vadd.f32 %v1570_v11, %v10829_v26  ;;  %v6022_v33 = vpop.f32.mrb[95].mxu1  ;;  %6367 = vmatmul.mubr.f32.gmra.mrb[200].mxu1 %v2112_v24  ;;  %v2114_v11 = vsel %vm1656_vm3, %v2111_v58, %v2113_v54  ;;  %v10830_v24 = vld [vmem:[#allocation4_spill] sm:$0xff]  ;;  %v7316_v9 = vpack.c.bf16 %v5205_v61, %v5204_v34  ;;  %v5220_v58 = vld [vmem:[%s10598_s1 + $0x400] sm:$0xff]  ;;  %v5221_v54 = vld [vmem:[%s10598_s1 + $0x408] sm:$0xff] }
 0x22a   : > { %10828 = vst [vmem:[#allocation46_spill] sm:$0xff] %v9454_v10  ;;  %6521 = vmatprep.mubr.msk.f32.mxu0 %vm7409_vm0, %v10728_v46  ;;  %6369 = vmatprep.mubr.msk.f32.mxu1 %vm7409_vm0, %v10728_v46  ;;  %v2776_v26 = vrot.slane %v10830_v24, 1  ;;  %v5206_v34 = vld [vmem:[%s10598_s1 + $0x390] sm:$0xff]  ;;  %v5207_v61 = vld [vmem:[%s10598_s1 + $0x398] sm:$0xff]  ;;  %v10835_v24 = vld [vmem:[#allocation63_spill] sm:$0xff] }
 0x22b   : > { %v1982_v18 = vpop.f32.mrb[96].mxu0 }
 0x22c   : > { %v1575_v57 = vpop.f32.mrb[96].mxu1  ;;  %v6177_v10 = vpop.f32.mrb[97].mxu0  ;;  %v9470_v33 = vadd.f32 %v1982_v18, %v1571_v63 }
 0x22d   : > { %6522 = vmatmul.mubr.f32.gmra.mrb[202].mxu0 %v9428_v21  ;;  %v1576_v6 = vadd.f32 %v1575_v57, %v10832_v32  ;;  %v6025_v28 = vpop.f32.mrb[97].mxu1  ;;  %6370 = vmatmul.mubr.f32.gmra.mrb[202].mxu1 %v2114_v11  ;;  %v2775_v10 = vrot.slane %v10833_v35, 1  ;;  %v2778_v35 = vrot.slane %v7945_v60, 1 }
 0x22e   : > { %10831 = vst [vmem:[#allocation17_spill] sm:$0xff] %v9470_v33  ;;  %6524 = vmatprep.mubr.msk.f32.mxu0 %vm7409_vm0, %v10728_v46  ;;  %6559 = vmatprep.mubr.msk.f32.mxu1 %vm7409_vm0, %v10728_v46  ;;  %v2780_v28 = vrot.slane %v7977_v31, 1 }
 0x22f   : > { %v1987_v32 = vpop.f32.mrb[98].mxu0  ;;  %v2777_v57 = vsel %vm2774_vm6, %v2775_v10, %v2776_v26  ;;  %v7340_v10 = vpack.c.bf16 %v5221_v54, %v5220_v58  ;;  %v5223_v58 = vld [vmem:[%s10598_s1 + $0x418] sm:$0xff] }
 0x230   : > { %v1580_v63 = vpop.f32.mrb[98].mxu1  ;;  %v6180_v18 = vpop.f32.mrb[99].mxu0  ;;  %v9494_v11 = vadd.f32 %v1987_v32, %v1576_v6  ;;  %v2781_v60 = vsel %vm2774_vm6, %v2778_v35, %v2780_v28  ;;  %v7319_v6 = vpack.c.bf16 %v5207_v61, %v5206_v34  ;;  %v2779_v32 = vsel %vm2774_vm6, %v2776_v26, %v2778_v35  ;;  %v10837_v61 = vld [vmem:[#allocation64_spill] sm:$0xff] }
 0x231   : > { %6525 = vmatmul.mubr.f32.gmra.mrb[204].mxu0 %v10827_v19  ;;  %v1581_v31 = vadd.f32 %v1580_v63, %v10835_v24  ;;  %v6028_v33 = vpop.f32.mrb[99].mxu1  ;;  %6560 = vmatmul.mubr.f32.vlgmr.msra.gmra.mrb[204].mxu1 %v2777_v57  ;;  %v10836_v19 = vld [vmem:[#allocation10_spill] sm:$0xff]  ;;  %v5209_v57 = vld [vmem:[%s10598_s1 + $0x3a8] sm:$0xff] }
 0x232   : > { %10834 = vst [vmem:[#allocation47_spill] sm:$0xff] %v9494_v11  ;;  %6714 = vmatprep.mubr.msk.f32.mxu0 %vm7409_vm0, %v10728_v46  ;;  %7317 = vmatpush3.bf16.msra.mxu1 %v7316_v9  ;;  %v2782_v21 = vrot.slane %v10836_v19, 1  ;;  %v5222_v33 = vld [vmem:[%s10598_s1 + $0x410] sm:$0xff]  ;;  %v5208_v63 = vld [vmem:[%s10598_s1 + $0x3a0] sm:$0xff] }
 0x233   : > { %6562 = vmatprep.mubr.msk.f32.mxu1 %vm7409_vm0, %v10728_v46  ;;  %v1992_v18 = vpop.f32.mrb[100].mxu0  ;;  %7318 = vmatprep.subr.bf16.mxu1 %v10761_v3  ;;  %v7343_v26 = vpack.c.bf16 %v5223_v58, %v5222_v33  ;;  %v10838_v11 = vld [vmem:[#allocation12_spill] sm:$0xff]  ;;  %v10839_v58 = vld [vmem:[#allocation65_spill] sm:$0xff] }
 0x234   : > { %v1585_v9 = vpop.f32.mrb[100].mxu1  ;;  %v6183_v54 = vpop.f32.mrb[101].mxu0  ;;  %v9517_v34 = vadd.f32 %v1992_v18, %v1581_v31  ;;  %v2784_v38 = vrot.slane %v10838_v11, 1  ;;  %v7322_v31 = vpack.c.bf16 %v5209_v57, %v5208_v63  ;;  %v2786_v11 = vrot.slane %v10770_v16, 1 }
 0x235   : > { %6715 = vmatmul.mubr.f32.vlgmr.msra.gmra.mrb[206].mxu0 %v2781_v60  ;;  %v1586_v24 = vadd.f32 %v1585_v9, %v10837_v61  ;;  %v6031_v19 = vpop.f32.mrb[101].mxu1  ;;  %6563 = vmatmul.mubr.f32.gmra.mrb[206].mxu1 %v2779_v32  ;;  %v2783_v54 = vsel %vm2774_vm6, %v2780_v28, %v2782_v21  ;;  %v5210_v28 = vld [vmem:[%s10598_s1 + $0x3b0] sm:$0xff]  ;;  %v2788_v16 = vrot.slane %v10772_v4, 1  ;;  %v2790_v4 = vrot.slane %v10774_v50, 1 }
 0x236   : > { %7341 = vmatpush3.bf16.msra.mxu0 %v7340_v10  ;;  %6565 = vmatprep.mubr.msk.f32.mxu1 %vm7409_vm0, %v10728_v46  ;;  %v5224_v19 = vld [vmem:[%s10598_s1 + $0x420] sm:$0xff]  ;;  %v5225_v10 = vld [vmem:[%s10598_s1 + $0x428] sm:$0xff]  ;;  %v2792_v50 = vrot.slane %v8146_v51, 1  ;;  %v2794_v51 = vrot.slane %v10777_v48, 1 }
 0x237   : > { %6717 = vmatprep.mubr.msk.f32.mxu0 %vm7409_vm0, %v10728_v46  ;;  %v1997_v35 = vpop.f32.mrb[102].mxu0  ;;  %7320 = vmatpush3.bf16.msra.mxu1 %v7319_v6  ;;  %v5211_v6 = vld [vmem:[%s10598_s1 + $0x3b8] sm:$0xff]  ;;  %v7346_v57 = vpack.c.bf16 %v5225_v10, %v5224_v19  ;;  %v10840_v10 = vld [vmem:[#allocation66_spill] sm:$0xff] }
 0x238   : > { %7342 = vmatprep.subr.bf16.mxu0 %v10761_v3  ;;  %v1590_v18 = vpop.f32.mrb[102].mxu1  ;;  %v6186_v9 = vpop.f32.mrb[103].mxu0  ;;  %7321 = vmatprep.subr.bf16.mxu1 %v10761_v3  ;;  %v9540_v33 = vadd.f32 %v1997_v35, %v1586_v24  ;;  %v7325_v24 = vpack.c.bf16 %v5211_v6, %v5210_v28  ;;  %v5227_v35 = vld [vmem:[%s10598_s1 + $0x438] sm:$0xff] }
 0x239   : > { %6718 = vmatmul.mubr.f32.gmra.mrb[208].mxu0 %v2783_v54  ;;  %v1591_v32 = vadd.f32 %v1590_v18, %v10839_v58  ;;  %v6034_v63 = vpop.f32.mrb[103].mxu1  ;;  %6566 = vmatmul.mubr.f32.gmra.mrb[208].mxu1 %v2781_v60  ;;  %v2785_v9 = vsel %vm2774_vm6, %v2782_v21, %v2784_v38  ;;  %v5226_v60 = vld [vmem:[%s10598_s1 + $0x430] sm:$0xff]  ;;  %v5212_v21 = vld [vmem:[%s10598_s1 + $0x3c0] sm:$0xff] }
 0x23a   : > { %6720 = vmatprep.mubr.msk.f32.mxu0 %vm7409_vm0, %v10728_v46  ;;  %6568 = vmatprep.mubr.msk.f32.mxu1 %vm7409_vm0, %v10728_v46  ;;  %v7349_v58 = vpack.c.bf16 %v5227_v35, %v5226_v60  ;;  %v10841_v35 = vld [vmem:[#allocation67_spill] sm:$0xff] }
 0x23b   : > { %7344 = vmatpush3.bf16.msra.mxu0 %v7343_v26  ;;  %v2002_v61 = vpop.f32.mrb[104].mxu0  ;;  %7323 = vmatpush3.bf16.msra.mxu1 %v7322_v31  ;;  %v5213_v31 = vld [vmem:[%s10598_s1 + $0x3c8] sm:$0xff] }
 0x23c   : > { %7345 = vmatprep.subr.bf16.mxu0 %v10761_v3  ;;  %v1595_v18 = vpop.f32.mrb[104].mxu1  ;;  %v6189_v26 = vpop.f32.mrb[105].mxu0  ;;  %7324 = vmatprep.subr.bf16.mxu1 %v10761_v3  ;;  %v9563_v19 = vadd.f32 %v2002_v61, %v1591_v32  ;;  %v7328_v32 = vpack.c.bf16 %v5213_v31, %v5212_v21  ;;  %v5229_v61 = vld [vmem:[%s10598_s1 + $0x448] sm:$0xff] }
 0x23d   : > { %6721 = vmatmul.mubr.f32.gmra.mrb[210].mxu0 %v2785_v9  ;;  %v1596_v28 = vadd.f32 %v1595_v18, %v10840_v10  ;;  %v6037_v6 = vpop.f32.mrb[105].mxu1  ;;  %6569 = vmatmul.mubr.f32.gmra.mrb[210].mxu1 %v2783_v54  ;;  %v2787_v26 = vsel %vm2774_vm6, %v2784_v38, %v2786_v11  ;;  %v5228_v54 = vld [vmem:[%s10598_s1 + $0x440] sm:$0xff]  ;;  %v5214_v38 = vld [vmem:[%s10598_s1 + $0x3d0] sm:$0xff] }
 0x23e   : > { %6723 = vmatprep.mubr.msk.f32.mxu0 %vm7409_vm0, %v10728_v46  ;;  %6571 = vmatprep.mubr.msk.f32.mxu1 %vm7409_vm0, %v10728_v46  ;;  %v7352_v10 = vpack.c.bf16 %v5229_v61, %v5228_v54  ;;  %v10842_v61 = vld [vmem:[#allocation68_spill] sm:$0xff] }
 0x23f   : > { %7347 = vmatpush3.bf16.msra.mxu0 %v7346_v57  ;;  %v2007_v63 = vpop.f32.mrb[106].mxu0  ;;  %7326 = vmatpush3.bf16.msra.mxu1 %v7325_v24  ;;  %v5215_v24 = vld [vmem:[%s10598_s1 + $0x3d8] sm:$0xff] }
 0x240   : > { %7348 = vmatprep.subr.bf16.mxu0 %v10761_v3  ;;  %v1600_v18 = vpop.f32.mrb[106].mxu1  ;;  %v6192_v57 = vpop.f32.mrb[107].mxu0  ;;  %7327 = vmatprep.subr.bf16.mxu1 %v10761_v3  ;;  %v9586_v60 = vadd.f32 %v2007_v63, %v1596_v28  ;;  %v7331_v28 = vpack.c.bf16 %v5215_v24, %v5214_v38  ;;  %v5231_v63 = vld [vmem:[%s10598_s1 + $0x458] sm:$0xff] }
 0x241   : > { %6724 = vmatmul.mubr.f32.gmra.mrb[212].mxu0 %v2787_v26  ;;  %v1601_v21 = vadd.f32 %v1600_v18, %v10841_v35  ;;  %v6040_v31 = vpop.f32.mrb[107].mxu1  ;;  %6572 = vmatmul.mubr.f32.gmra.mrb[212].mxu1 %v2785_v9  ;;  %v2789_v57 = vsel %vm2774_vm6, %v2786_v11, %v2788_v16  ;;  %v5230_v9 = vld [vmem:[%s10598_s1 + $0x450] sm:$0xff]  ;;  %v5216_v11 = vld [vmem:[%s10598_s1 + $0x3e0] sm:$0xff] }
 0x242   : > { %6726 = vmatprep.mubr.msk.f32.mxu0 %vm7409_vm0, %v10728_v46  ;;  %6574 = vmatprep.mubr.msk.f32.mxu1 %vm7409_vm0, %v10728_v46  ;;  %v7355_v35 = vpack.c.bf16 %v5231_v63, %v5230_v9  ;;  %v10843_v63 = vld [vmem:[#allocation69_spill] sm:$0xff] }
 0x243   : > { %7350 = vmatpush3.bf16.msra.mxu0 %v7349_v58  ;;  %v2012_v6 = vpop.f32.mrb[108].mxu0  ;;  %7329 = vmatpush3.bf16.msra.mxu1 %v7328_v32  ;;  %v5217_v32 = vld [vmem:[%s10598_s1 + $0x3e8] sm:$0xff] }
 0x244   : > { %7351 = vmatprep.subr.bf16.mxu0 %v10761_v3  ;;  %v1605_v18 = vpop.f32.mrb[108].mxu1  ;;  %v6195_v58 = vpop.f32.mrb[109].mxu0  ;;  %7330 = vmatprep.subr.bf16.mxu1 %v10761_v3  ;;  %v9609_v54 = vadd.f32 %v2012_v6, %v1601_v21  ;;  %v7334_v21 = vpack.c.bf16 %v5217_v32, %v5216_v11  ;;  %v5233_v6 = vld [vmem:[%s10598_s1 + $0x468] sm:$0xff] }
 0x245   : > { %6727 = vmatmul.mubr.f32.gmra.mrb[214].mxu0 %v2789_v57  ;;  %v1606_v38 = vadd.f32 %v1605_v18, %v10842_v61  ;;  %v6043_v24 = vpop.f32.mrb[109].mxu1  ;;  %6575 = vmatmul.mubr.f32.gmra.mrb[214].mxu1 %v2787_v26  ;;  %v2791_v58 = vsel %vm2774_vm6, %v2788_v16, %v2790_v4  ;;  %v5232_v26 = vld [vmem:[%s10598_s1 + $0x460] sm:$0xff]  ;;  %v5218_v16 = vld [vmem:[%s10598_s1 + $0x3f0] sm:$0xff] }
 0x246   : > { %6729 = vmatprep.mubr.msk.f32.mxu0 %vm7409_vm0, %v10728_v46  ;;  %6577 = vmatprep.mubr.msk.f32.mxu1 %vm7409_vm0, %v10728_v46  ;;  %v7358_v61 = vpack.c.bf16 %v5233_v6, %v5232_v26  ;;  %v10844_v26 = vld [vmem:[#allocation32_spill] sm:$0xff] }
 0x247   : > { %7353 = vmatpush3.bf16.msra.mxu0 %v7352_v10  ;;  %v2017_v31 = vpop.f32.mrb[110].mxu0  ;;  %7332 = vmatpush3.bf16.msra.mxu1 %v7331_v28  ;;  %v5219_v28 = vld [vmem:[%s10598_s1 + $0x3f8] sm:$0xff] }
 0x248   : > { %7354 = vmatprep.subr.bf16.mxu0 %v10761_v3  ;;  %v1610_v18 = vpop.f32.mrb[110].mxu1  ;;  %v6198_v10 = vpop.f32.mrb[111].mxu0  ;;  %7333 = vmatprep.subr.bf16.mxu1 %v10761_v3  ;;  %v9632_v9 = vadd.f32 %v2017_v31, %v1606_v38  ;;  %v7337_v38 = vpack.c.bf16 %v5219_v28, %v5218_v16  ;;  %v5235_v31 = vld [vmem:[%s10598_s1 + $0x478] sm:$0xff] }
 0x249   : > { %6730 = vmatmul.mubr.f32.gmra.mrb[216].mxu0 %v2791_v58  ;;  %v1611_v11 = vadd.f32 %v1610_v18, %v10843_v63  ;;  %v6046_v32 = vpop.f32.mrb[111].mxu1  ;;  %6578 = vmatmul.mubr.f32.gmra.mrb[216].mxu1 %v2789_v57  ;;  %v2793_v10 = vsel %vm2774_vm6, %v2790_v4, %v2792_v50  ;;  %v5234_v57 = vld [vmem:[%s10598_s1 + $0x470] sm:$0xff]  ;;  %v2795_v63 = vsel %vm2774_vm6, %v2792_v50, %v2794_v51 }
 0x24a   : > { %6732 = vmatprep.mubr.msk.f32.mxu0 %vm7409_vm0, %v10728_v46  ;;  %6580 = vmatprep.mubr.msk.f32.mxu1 %vm7409_vm0, %v10728_v46  ;;  %v7361_v16 = vpack.c.bf16 %v5235_v31, %v5234_v57  ;;  %v10845_v32 = vld [vmem:[#allocation24_spill] sm:$0xff] }
 0x24b   : > { %7356 = vmatpush3.bf16.msra.mxu0 %v7355_v35  ;;  %v2022_v24 = vpop.f32.mrb[112].mxu0  ;;  %7335 = vmatpush3.bf16.msra.mxu1 %v7334_v21 }
 0x24c   : > { %7357 = vmatprep.subr.bf16.mxu0 %v10761_v3  ;;  %v1615_v18 = vpop.f32.mrb[112].mxu1  ;;  %v6201_v35 = vpop.f32.mrb[113].mxu0  ;;  %7336 = vmatprep.subr.bf16.mxu1 %v10761_v3  ;;  %v9649_v4 = vadd.f32 %v2022_v24, %v1611_v11 }
 0x24d   : > { %6733 = vmatmul.mubr.f32.gmra.mrb[218].mxu0 %v2793_v10  ;;  %v1616_v21 = vadd.f32 %v1615_v18, %v10844_v26  ;;  %v6049_v6 = vpop.f32.mrb[113].mxu1  ;;  %6581 = vmatmul.mubr.f32.gmra.mrb[218].mxu1 %v2791_v58  ;;  %v2796_v35 = vrot.slane %v10845_v32, 1  ;;  %v10846_v18 = vld [vmem:[#allocation70_spill] sm:$0xff] }
 0x24e   : > { %6735 = vmatprep.mubr.msk.f32.mxu0 %vm7409_vm0, %v10728_v46  ;;  %6583 = vmatprep.mubr.msk.f32.mxu1 %vm7409_vm0, %v10728_v46 }
 0x24f   : > { %7359 = vmatpush3.bf16.msra.mxu0 %v7358_v61  ;;  %v2027_v28 = vpop.f32.mrb[114].mxu0  ;;  %7338 = vmatpush3.bf16.msra.mxu1 %v7337_v38  ;;  %v2797_v61 = vsel %vm2774_vm6, %v2794_v51, %v2796_v35 }
 0x250   : > { %7360 = vmatprep.subr.bf16.mxu0 %v10761_v3  ;;  %v1620_v11 = vpop.f32.mrb[114].mxu1  ;;  %v9659_v24 = vadd.f32 %v2027_v28, %v1616_v21  ;;  %v6204_v58 = vpop.f32.mrb[115].mxu0  ;;  %v2798_v3 = vrot.slane %v8221_v42, 1  ;;  %v10847_v21 = vld [vmem:[#allocation71_spill] sm:$0xff] }
 0x251   : > { %6736 = vmatmul.mubr.f32.gmra.mrb[220].mxu0 %v2795_v63  ;;  %v1621_v26 = vadd.f32 %v1620_v11, %v10846_v18  ;;  %v6052_v6 = vpop.f32.mrb[115].mxu1  ;;  %6584 = vmatmul.mubr.f32.gmra.mrb[220].mxu1 %v2793_v10  ;;  %v2800_v11 = vrot.slane %v8241_v53, 1 }
 0x252   : > { %6738 = vmatprep.mubr.msk.f32.mxu0 %vm7409_vm0, %v10728_v46  ;;  %6586 = vmatprep.mubr.msk.f32.mxu1 %vm7409_vm0, %v10728_v46  ;;  %v2799_v51 = vsel %vm2774_vm6, %v2796_v35, %v2798_v3  ;;  %v10848_v6 = vld [vmem:[#allocation72_spill] sm:$0xff] }
 0x253   : > { %7362 = vmatpush3.bf16.msra.mxu0 %v7361_v16  ;;  %v2032_v50 = vpop.f32.mrb[116].mxu0  ;;  %v2801_v35 = vsel %vm2774_vm6, %v2798_v3, %v2800_v11 }
 0x254   : > { %v1625_v38 = vpop.f32.mrb[116].mxu1  ;;  %v9668_v57 = vadd.f32 %v2032_v50, %v1621_v26  ;;  %v6207_v31 = vpop.f32.mrb[117].mxu0 }
 0x255   : > { %6739 = vmatmul.mubr.f32.gmra.mrb[222].mxu0 %v2797_v61  ;;  %v1626_v28 = vadd.f32 %v1625_v38, %v10847_v21  ;;  %v6055_v10 = vpop.f32.mrb[117].mxu1  ;;  %6587 = vmatmul.mubr.f32.gmra.mrb[222].mxu1 %v2795_v63  ;;  %v2802_v31 = vrot.slane %v8260_v15, 1 }
 0x256   : > { %6741 = vmatprep.mubr.msk.f32.mxu0 %vm7409_vm0, %v10728_v46  ;;  %6589 = vmatprep.mubr.msk.f32.mxu1 %vm7409_vm0, %v10728_v46 }
 0x257   : > { %v2037_v16 = vpop.f32.mrb[118].mxu0  ;;  %v2803_v3 = vsel %vm2774_vm6, %v2800_v11, %v2802_v31 }
 0x258   : > { %v1630_v58 = vpop.f32.mrb[118].mxu1  ;;  %v9677_v18 = vadd.f32 %v2037_v16, %v1626_v28  ;;  %v6210_v26 = vpop.f32.mrb[119].mxu0  ;;  %v10849_v16 = vld [vmem:[#allocation73_spill] sm:$0xff] }
 0x259   : > { %6742 = vmatmul.mubr.f32.gmra.mrb[224].mxu0 %v2799_v51  ;;  %v1631_v50 = vadd.f32 %v1630_v58, %v10848_v6  ;;  %v6058_v38 = vpop.f32.mrb[119].mxu1  ;;  %6590 = vmatmul.mubr.f32.gmra.mrb[224].mxu1 %v2797_v61  ;;  %v2804_v6 = vrot.slane %v8278_v27, 1 }
 0x25a   : > { %6744 = vmatprep.mubr.msk.f32.mxu0 %vm7409_vm0, %v10728_v46  ;;  %6592 = vmatprep.mubr.msk.f32.mxu1 %vm7409_vm0, %v10728_v46 }
 0x25b   : > { %v2042_v63 = vpop.f32.mrb[120].mxu0  ;;  %v2805_v11 = vsel %vm2774_vm6, %v2802_v31, %v2804_v6 }
 0x25c   : > { %v1635_v21 = vpop.f32.mrb[120].mxu1  ;;  %v9686_v28 = vadd.f32 %v2042_v63, %v1631_v50  ;;  %v6213_v10 = vpop.f32.mrb[121].mxu0 }
 0x25d   : > { %6745 = vmatmul.mubr.f32.gmra.mrb[226].mxu0 %v2801_v35  ;;  %v1636_v58 = vadd.f32 %v1635_v21, %v10849_v16  ;;  %v6061_v26 = vpop.f32.mrb[121].mxu1  ;;  %6593 = vmatmul.mubr.f32.gmra.mrb[226].mxu1 %v2799_v51  ;;  %v2806_v16 = vrot.slane %v8292_v43, 1 }
 0x25e   : > { %6747 = vmatprep.mubr.msk.f32.mxu0 %vm7409_vm0, %v10728_v46  ;;  %6595 = vmatprep.mubr.msk.f32.mxu1 %vm7409_vm0, %v10728_v46 }
 0x25f   : > { %v2807_v31 = vsel %vm2774_vm6, %v2804_v6, %v2806_v16 }
 0x260   : > { %v2047_v61 = vpop.f32.mrb[122].mxu0  ;;  %v2183_v50 = vpop.f32.mrb[122].mxu1 }
 0x261   : > { %v9695_v38 = vadd.f32 %v2047_v61, %v1636_v58  ;;  %v6216_v63 = vpop.f32.mrb[123].mxu0  ;;  %6748 = vmatmul.mubr.f32.gmra.mrb[228].mxu0 %v2803_v3  ;;  %v2387_v21 = vadd.f32 %v2183_v50, %v9205_v22  ;;  %v6251_v10 = vpop.f32.mrb[123].mxu1  ;;  %6596 = vmatmul.mubr.f32.gmra.mrb[228].mxu1 %v2801_v35 }
 0x262   : > { %6750 = vmatprep.mubr.msk.f32.mxu0 %vm7409_vm0, %v10728_v46  ;;  %6598 = vmatprep.mubr.msk.f32.mxu1 %vm7409_vm0, %v10728_v46  ;;  %v2808_v63 = vrot.slane %v8304_v8, 1 }
 0x264   : > { %v2511_v51 = vpop.f32.mrb[124].mxu0  ;;  %v2188_v58 = vpop.f32.mrb[124].mxu1  ;;  %v2809_v6 = vsel %vm2774_vm6, %v2806_v16, %v2808_v63 }
 0x265   : > { %v9704_v26 = vadd.f32 %v2511_v51, %v2387_v21  ;;  %v6406_v61 = vpop.f32.mrb[125].mxu0  ;;  %6751 = vmatmul.mubr.f32.gmra.mrb[230].mxu0 %v2805_v11  ;;  %v2388_v22 = vadd.f32 %v2188_v58, %v9214_v30  ;;  %v6254_v50 = vpop.f32.mrb[125].mxu1  ;;  %6599 = vmatmul.mubr.f32.gmra.mrb[230].mxu1 %v2803_v3 }
 0x266   : > { %6753 = vmatprep.mubr.msk.f32.mxu0 %vm7409_vm0, %v10728_v46  ;;  %6601 = vmatprep.mubr.msk.f32.mxu1 %vm7409_vm0, %v10728_v46 }
 0x268   : > { %v2516_v35 = vpop.f32.mrb[126].mxu0  ;;  %v2193_v10 = vpop.f32.mrb[126].mxu1 }
 0x269   : > { %v9713_v21 = vadd.f32 %v2516_v35, %v2388_v22  ;;  %v6409_v51 = vpop.f32.mrb[127].mxu0  ;;  %6754 = vmatmul.mubr.f32.gmra.mrb[232].mxu0 %v2807_v31  ;;  %v2389_v30 = vadd.f32 %v2193_v10, %v9223_v23  ;;  %v6257_v58 = vpop.f32.mrb[127].mxu1  ;;  %6602 = vmatmul.mubr.f32.gmra.mrb[232].mxu1 %v2805_v11  ;;  %v2810_v23 = vrot.slane %v7833_v56, 1  ;;  %v2812_v10 = vrot.slane %v7836_v13, 1 }
 0x26a   : > { %6756 = vmatprep.mubr.msk.f32.mxu0 %vm7409_vm0, %v10728_v46  ;;  %6604 = vmatprep.mubr.msk.f32.mxu1 %vm7409_vm0, %v10728_v46 }
 0x26b   : > { %v2811_v16 = vsel %vm2774_vm6, %v2808_v63, %v2810_v23  ;;  %v2813_v63 = vsel %vm2774_vm6, %v2810_v23, %v2812_v10 }
 0x26c   : > { %v2521_v3 = vpop.f32.mrb[128].mxu0  ;;  %v2198_v61 = vpop.f32.mrb[128].mxu1 }
 0x26d   : > { %v9721_v50 = vadd.f32 %v2521_v3, %v2389_v30  ;;  %v6412_v22 = vpop.f32.mrb[129].mxu0  ;;  %6757 = vmatmul.mubr.f32.gmra.mrb[234].mxu0 %v2809_v6  ;;  %v2390_v35 = vadd.f32 %v2198_v61, %v9232_v40  ;;  %v6260_v51 = vpop.f32.mrb[129].mxu1  ;;  %6605 = vmatmul.mubr.f32.gmra.mrb[234].mxu1 %v2807_v31 }
 0x26e   : > { %6759 = vmatprep.mubr.msk.f32.mxu0 %vm7409_vm0, %v10728_v46  ;;  %6607 = vmatprep.mubr.msk.f32.mxu1 %vm7409_vm0, %v10728_v46  ;;  %v2814_v22 = vrot.slane %v7849_v36, 1 }
 0x270   : > { %v2526_v11 = vpop.f32.mrb[130].mxu0  ;;  %v2203_v30 = vpop.f32.mrb[130].mxu1  ;;  %v2815_v23 = vsel %vm2774_vm6, %v2812_v10, %v2814_v22 }
 0x271   : > { %v9731_v58 = vadd.f32 %v2526_v11, %v2390_v35  ;;  %v6415_v3 = vpop.f32.mrb[131].mxu0  ;;  %6760 = vmatmul.mubr.f32.gmra.mrb[236].mxu0 %v2811_v16  ;;  %v2391_v40 = vadd.f32 %v2203_v30, %v9241_v7  ;;  %v6263_v31 = vpop.f32.mrb[131].mxu1  ;;  %6608 = vmatmul.mubr.f32.gmra.mrb[236].mxu1 %v2809_v6 }
 0x272   : > { %6762 = vmatprep.mubr.msk.f32.mxu0 %vm7409_vm0, %v10728_v46  ;;  %6610 = vmatprep.mubr.msk.f32.mxu1 %vm7409_vm0, %v10728_v46  ;;  %v2816_v3 = vrot.slane %v7882_v62, 1 }
 0x274   : > { %v2531_v61 = vpop.f32.mrb[132].mxu0  ;;  %v2208_v51 = vpop.f32.mrb[132].mxu1  ;;  %v2817_v10 = vsel %vm2774_vm6, %v2814_v22, %v2816_v3 }
 0x275   : > { %v9740_v35 = vadd.f32 %v2531_v61, %v2391_v40  ;;  %v6418_v11 = vpop.f32.mrb[133].mxu0  ;;  %6763 = vmatmul.mubr.f32.gmra.mrb[238].mxu0 %v2813_v63  ;;  %v2392_v7 = vadd.f32 %v2208_v51, %v9250_v49  ;;  %v6266_v30 = vpop.f32.mrb[133].mxu1  ;;  %6611 = vmatmul.mubr.f32.gmra.mrb[238].mxu1 %v2811_v16 }
 0x276   : > { %6765 = vmatprep.mubr.msk.f32.mxu0 %vm7409_vm0, %v10728_v46  ;;  %6613 = vmatprep.mubr.msk.f32.mxu1 %vm7409_vm0, %v10728_v46  ;;  %v2818_v11 = vrot.slane %v10779_v44, 1 }
 0x278   : > { %v2536_v6 = vpop.f32.mrb[134].mxu0  ;;  %v2213_v31 = vpop.f32.mrb[134].mxu1  ;;  %v2819_v22 = vsel %vm2774_vm6, %v2816_v3, %v2818_v11 }
 0x279   : > { %v9749_v40 = vadd.f32 %v2536_v6, %v2392_v7  ;;  %v6421_v61 = vpop.f32.mrb[135].mxu0  ;;  %6766 = vmatmul.mubr.f32.gmra.mrb[240].mxu0 %v2815_v23  ;;  %v2393_v49 = vadd.f32 %v2213_v31, %v9259_v1  ;;  %v6269_v51 = vpop.f32.mrb[135].mxu1  ;;  %6614 = vmatmul.mubr.f32.gmra.mrb[240].mxu1 %v2813_v63 }
 0x27a   : > { %6768 = vmatprep.mubr.msk.f32.mxu0 %vm7409_vm0, %v10728_v46  ;;  %6616 = vmatprep.mubr.msk.f32.mxu1 %vm7409_vm0, %v10728_v46  ;;  %v2820_v61 = vrot.slane %v10780_v0, 1 }
 0x27c   : > { %v2541_v16 = vpop.f32.mrb[136].mxu0  ;;  %v2218_v30 = vpop.f32.mrb[136].mxu1  ;;  %v2821_v3 = vsel %vm2774_vm6, %v2818_v11, %v2820_v61 }
 0x27d   : > { %v9758_v7 = vadd.f32 %v2541_v16, %v2393_v49  ;;  %v6424_v6 = vpop.f32.mrb[137].mxu0  ;;  %6769 = vmatmul.mubr.f32.gmra.mrb[242].mxu0 %v2817_v10  ;;  %v2394_v1 = vadd.f32 %v2218_v30, %v9268_v25  ;;  %v6272_v31 = vpop.f32.mrb[137].mxu1  ;;  %6617 = vmatmul.mubr.f32.gmra.mrb[242].mxu1 %v2815_v23 }
 0x27e   : > { %6771 = vmatprep.mubr.msk.f32.mxu0 %vm7409_vm0, %v10728_v46  ;;  %6619 = vmatprep.mubr.msk.f32.mxu1 %vm7409_vm0, %v10728_v46  ;;  %v2822_v6 = vrot.slane %v10781_v14, 1 }
 0x280   : > { %v2546_v63 = vpop.f32.mrb[138].mxu0  ;;  %v2223_v51 = vpop.f32.mrb[138].mxu1  ;;  %v2823_v11 = vsel %vm2774_vm6, %v2820_v61, %v2822_v6 }
 0x281   : > { %v9767_v49 = vadd.f32 %v2546_v63, %v2394_v1  ;;  %v6427_v16 = vpop.f32.mrb[139].mxu0  ;;  %6772 = vmatmul.mubr.f32.gmra.mrb[244].mxu0 %v2819_v22  ;;  %v2395_v25 = vadd.f32 %v2223_v51, %v9277_v2  ;;  %v6275_v30 = vpop.f32.mrb[139].mxu1  ;;  %6620 = vmatmul.mubr.f32.gmra.mrb[244].mxu1 %v2817_v10 }
 0x282   : > { %6774 = vmatprep.mubr.msk.f32.mxu0 %vm7409_vm0, %v10728_v46  ;;  %6622 = vmatprep.mubr.msk.f32.mxu1 %vm7409_vm0, %v10728_v46  ;;  %v2824_v16 = vrot.slane %v10782_v45, 1 }
 0x284   : > { %v2551_v23 = vpop.f32.mrb[140].mxu0  ;;  %v2228_v31 = vpop.f32.mrb[140].mxu1  ;;  %v2825_v61 = vsel %vm2774_vm6, %v2822_v6, %v2824_v16 }
 0x285   : > { %v9776_v1 = vadd.f32 %v2551_v23, %v2395_v25  ;;  %v6430_v63 = vpop.f32.mrb[141].mxu0  ;;  %6775 = vmatmul.mubr.f32.gmra.mrb[246].mxu0 %v2821_v3  ;;  %v2396_v2 = vadd.f32 %v2228_v31, %v9286_v55  ;;  %v6278_v51 = vpop.f32.mrb[141].mxu1  ;;  %6623 = vmatmul.mubr.f32.gmra.mrb[246].mxu1 %v2819_v22 }
 0x286   : > { %6777 = vmatprep.mubr.msk.f32.mxu0 %vm7409_vm0, %v10728_v46  ;;  %6625 = vmatprep.mubr.msk.f32.mxu1 %vm7409_vm0, %v10728_v46  ;;  %v2826_v63 = vrot.slane %v10784_v5, 1 }
 0x288   : > { %v2556_v10 = vpop.f32.mrb[142].mxu0  ;;  %v2233_v30 = vpop.f32.mrb[142].mxu1  ;;  %v2827_v6 = vsel %vm2774_vm6, %v2824_v16, %v2826_v63 }
 0x289   : > { %v9785_v25 = vadd.f32 %v2556_v10, %v2396_v2  ;;  %v6433_v23 = vpop.f32.mrb[143].mxu0  ;;  %6778 = vmatmul.mubr.f32.gmra.mrb[248].mxu0 %v2823_v11  ;;  %v2397_v55 = vadd.f32 %v2233_v30, %v9295_v12  ;;  %v6281_v31 = vpop.f32.mrb[143].mxu1  ;;  %6626 = vmatmul.mubr.f32.gmra.mrb[248].mxu1 %v2821_v3 }
 0x28a   : > { %6780 = vmatprep.mubr.msk.f32.mxu0 %vm7409_vm0, %v10728_v46  ;;  %6628 = vmatprep.mubr.msk.f32.mxu1 %vm7409_vm0, %v10728_v46  ;;  %v2828_v23 = vrot.slane %v10786_v52, 1 }
 0x28c   : > { %v2561_v22 = vpop.f32.mrb[144].mxu0  ;;  %v2238_v51 = vpop.f32.mrb[144].mxu1  ;;  %v2829_v16 = vsel %vm2774_vm6, %v2826_v63, %v2828_v23 }
 0x28d   : > { %v9794_v2 = vadd.f32 %v2561_v22, %v2397_v55  ;;  %v6436_v10 = vpop.f32.mrb[145].mxu0  ;;  %6781 = vmatmul.mubr.f32.gmra.mrb[250].mxu0 %v2825_v61  ;;  %v2398_v12 = vadd.f32 %v2238_v51, %v9304_v47  ;;  %v6284_v30 = vpop.f32.mrb[145].mxu1  ;;  %6629 = vmatmul.mubr.f32.gmra.mrb[250].mxu1 %v2823_v11 }
 0x28e   : > { %6783 = vmatprep.mubr.msk.f32.mxu0 %vm7409_vm0, %v10728_v46  ;;  %6631 = vmatprep.mubr.msk.f32.mxu1 %vm7409_vm0, %v10728_v46  ;;  %v2830_v10 = vrot.slane %v10788_v41, 1 }
 0x290   : > { %v2566_v3 = vpop.f32.mrb[146].mxu0  ;;  %v2243_v31 = vpop.f32.mrb[146].mxu1  ;;  %v2831_v63 = vsel %vm2774_vm6, %v2828_v23, %v2830_v10 }
 0x291   : > { %v9803_v55 = vadd.f32 %v2566_v3, %v2398_v12  ;;  %v6439_v22 = vpop.f32.mrb[147].mxu0  ;;  %6784 = vmatmul.mubr.f32.gmra.mrb[252].mxu0 %v2827_v6  ;;  %v2399_v47 = vadd.f32 %v2243_v31, %v9313_v29  ;;  %v6287_v51 = vpop.f32.mrb[147].mxu1  ;;  %6632 = vmatmul.mubr.f32.gmra.mrb[252].mxu1 %v2825_v61 }
 0x292   : > { %6786 = vmatprep.mubr.msk.f32.mxu0 %vm7409_vm0, %v10728_v46  ;;  %6634 = vmatprep.mubr.msk.f32.mxu1 %vm7409_vm0, %v10728_v46  ;;  %v2832_v22 = vrot.slane %v10791_v59, 1 }
 0x294   : > { %v2571_v11 = vpop.f32.mrb[148].mxu0  ;;  %v2248_v30 = vpop.f32.mrb[148].mxu1  ;;  %v2833_v23 = vsel %vm2774_vm6, %v2830_v10, %v2832_v22 }
 0x295   : > { %v9812_v12 = vadd.f32 %v2571_v11, %v2399_v47  ;;  %v6442_v3 = vpop.f32.mrb[149].mxu0  ;;  %6787 = vmatmul.mubr.f32.gmra.mrb[254].mxu0 %v2829_v16  ;;  %v2400_v29 = vadd.f32 %v2248_v30, %v9322_v37  ;;  %v6290_v31 = vpop.f32.mrb[149].mxu1  ;;  %6635 = vmatmul.mubr.f32.gmra.mrb[254].mxu1 %v2827_v6 }
 0x296   : > { %6789 = vmatprep.mubr.msk.f32.mxu0 %vm7409_vm0, %v10728_v46  ;;  %6637 = vmatprep.mubr.msk.f32.mxu1 %vm7409_vm0, %v10728_v46  ;;  %v2834_v3 = vrot.slane %v10794_v20, 1 }
 0x298   : > { %v2576_v61 = vpop.f32.mrb[150].mxu0  ;;  %v2253_v51 = vpop.f32.mrb[150].mxu1  ;;  %v2835_v10 = vsel %vm2774_vm6, %v2832_v22, %v2834_v3 }
 0x299   : > { %v9821_v47 = vadd.f32 %v2576_v61, %v2400_v29  ;;  %v6445_v11 = vpop.f32.mrb[151].mxu0  ;;  %6790 = vmatmul.mubr.f32.gmra.mrb[0].mxu0 %v2831_v63  ;;  %v2401_v37 = vadd.f32 %v2253_v51, %v9331_v17  ;;  %v6293_v30 = vpop.f32.mrb[151].mxu1  ;;  %6638 = vmatmul.mubr.f32.gmra.mrb[0].mxu1 %v2829_v16 }
 0x29a   : > { %6792 = vmatprep.mubr.msk.f32.mxu0 %vm7409_vm0, %v10728_v46  ;;  %6640 = vmatprep.mubr.msk.f32.mxu1 %vm7409_vm0, %v10728_v46  ;;  %v10852_v11 = vld [vmem:[#allocation21_spill] sm:$0xff] }
 0x29b   : > { %10850 = vst [vmem:[#allocation49_spill] sm:$0xff] %v9821_v47  ;;  %v2836_v30 = vrot.slane %v10852_v11, 1 }
 0x29c   : > { %v2581_v6 = vpop.f32.mrb[152].mxu0  ;;  %v2258_v31 = vpop.f32.mrb[152].mxu1 }
 0x29d   : > { %v9830_v29 = vadd.f32 %v2581_v6, %v2401_v37  ;;  %v6448_v61 = vpop.f32.mrb[153].mxu0  ;;  %6793 = vmatmul.mubr.f32.gmra.mrb[2].mxu0 %v2833_v23  ;;  %v2402_v17 = vadd.f32 %v2258_v31, %v9340_v39  ;;  %v6296_v51 = vpop.f32.mrb[153].mxu1  ;;  %6641 = vmatmul.mubr.f32.gmra.mrb[2].mxu1 %v2831_v63  ;;  %v2837_v22 = vsel %vm2774_vm6, %v2834_v3, %v2836_v30 }
 0x29e   : > { %6795 = vmatprep.mubr.msk.f32.mxu0 %vm7409_vm0, %v10728_v46  ;;  %6643 = vmatprep.mubr.msk.f32.mxu1 %vm7409_vm0, %v10728_v46  ;;  %v10854_v61 = vld [vmem:[#allocation22_spill] sm:$0xff]  ;;  %v10855_v51 = vld [vmem:[#allocation23_spill] sm:$0xff] }
 0x29f   : > { %10851 = vst [vmem:[#allocation51_spill] sm:$0xff] %v9830_v29  ;;  %v2838_v11 = vrot.slane %v10855_v51, 1 }
 0x2a0   : > { %v2586_v16 = vpop.f32.mrb[154].mxu0  ;;  %v2263_v20 = vpop.f32.mrb[154].mxu1 }
 0x2a1   : > { %v9839_v37 = vadd.f32 %v2586_v16, %v2402_v17  ;;  %v6451_v6 = vpop.f32.mrb[155].mxu0  ;;  %6796 = vmatmul.mubr.f32.gmra.mrb[4].mxu0 %v2835_v10  ;;  %v2403_v39 = vadd.f32 %v2263_v20, %v10854_v61  ;;  %v6299_v31 = vpop.f32.mrb[155].mxu1  ;;  %6644 = vmatmul.mubr.f32.gmra.mrb[4].mxu1 %v2833_v23  ;;  %v2839_v3 = vsel %vm2774_vm6, %v2836_v30, %v2838_v11 }
 0x2a2   : > { %6798 = vmatprep.mubr.msk.f32.mxu0 %vm7409_vm0, %v10728_v46  ;;  %6646 = vmatprep.mubr.msk.f32.mxu1 %vm7409_vm0, %v10728_v46  ;;  %v10857_v6 = vld [vmem:[#allocation3_spill] sm:$0xff]  ;;  %v10858_v31 = vld [vmem:[#allocation25_spill] sm:$0xff] }
 0x2a3   : > { %10853 = vst [vmem:[#allocation48_spill] sm:$0xff] %v9839_v37  ;;  %v2840_v51 = vrot.slane %v10858_v31, 1 }
 0x2a4   : > { %v2591_v63 = vpop.f32.mrb[156].mxu0  ;;  %v2268_v29 = vpop.f32.mrb[156].mxu1 }
 0x2a5   : > { %v9848_v17 = vadd.f32 %v2591_v63, %v2403_v39  ;;  %v6454_v16 = vpop.f32.mrb[157].mxu0  ;;  %6799 = vmatmul.mubr.f32.gmra.mrb[6].mxu0 %v2837_v22  ;;  %v2404_v20 = vadd.f32 %v2268_v29, %v10857_v6  ;;  %v6302_v61 = vpop.f32.mrb[157].mxu1  ;;  %6647 = vmatmul.mubr.f32.gmra.mrb[6].mxu1 %v2835_v10  ;;  %v2841_v30 = vsel %vm2774_vm6, %v2838_v11, %v2840_v51 }
 0x2a6   : > { %6801 = vmatprep.mubr.msk.f32.mxu0 %vm7409_vm0, %v10728_v46  ;;  %6649 = vmatprep.mubr.msk.f32.mxu1 %vm7409_vm0, %v10728_v46  ;;  %v10860_v16 = vld [vmem:[#allocation5_spill] sm:$0xff]  ;;  %v10861_v61 = vld [vmem:[#allocation26_spill] sm:$0xff] }
 0x2a7   : > { %10856 = vst [vmem:[#allocation53_spill] sm:$0xff] %v9848_v17  ;;  %v2842_v31 = vrot.slane %v10861_v61, 1 }
 0x2a8   : > { %v2596_v23 = vpop.f32.mrb[158].mxu0  ;;  %v2273_v37 = vpop.f32.mrb[158].mxu1 }
 0x2a9   : > { %v9857_v39 = vadd.f32 %v2596_v23, %v2404_v20  ;;  %v6457_v63 = vpop.f32.mrb[159].mxu0  ;;  %6802 = vmatmul.mubr.f32.gmra.mrb[8].mxu0 %v2839_v3  ;;  %v2405_v29 = vadd.f32 %v2273_v37, %v10860_v16  ;;  %v6305_v6 = vpop.f32.mrb[159].mxu1  ;;  %6650 = vmatmul.mubr.f32.gmra.mrb[8].mxu1 %v2837_v22  ;;  %v2843_v11 = vsel %vm2774_vm6, %v2840_v51, %v2842_v31 }
 0x2aa   : > { %6804 = vmatprep.mubr.msk.f32.mxu0 %vm7409_vm0, %v10728_v46  ;;  %6652 = vmatprep.mubr.msk.f32.mxu1 %vm7409_vm0, %v10728_v46  ;;  %v10863_v63 = vld [vmem:[#allocation7_spill] sm:$0xff] }
 0x2ab   : > { %10859 = vst [vmem:[#allocation50_spill] sm:$0xff] %v9857_v39  ;;  %v10864_v6 = vld [vmem:[#allocation27_spill] sm:$0xff] }
 0x2ac   : > { %v2601_v10 = vpop.f32.mrb[160].mxu0  ;;  %v2278_v17 = vpop.f32.mrb[160].mxu1  ;;  %v2844_v61 = vrot.slane %v10864_v6, 1 }
 0x2ad   : > { %v9866_v20 = vadd.f32 %v2601_v10, %v2405_v29  ;;  %v6460_v23 = vpop.f32.mrb[161].mxu0  ;;  %6805 = vmatmul.mubr.f32.gmra.mrb[10].mxu0 %v2841_v30  ;;  %v2406_v37 = vadd.f32 %v2278_v17, %v10863_v63  ;;  %v6308_v16 = vpop.f32.mrb[161].mxu1  ;;  %6653 = vmatmul.mubr.f32.gmra.mrb[10].mxu1 %v2839_v3 }
 0x2ae   : > { %6807 = vmatprep.mubr.msk.f32.mxu0 %vm7409_vm0, %v10728_v46  ;;  %6655 = vmatprep.mubr.msk.f32.mxu1 %vm7409_vm0, %v10728_v46  ;;  %v10866_v23 = vld [vmem:[#allocation9_spill] sm:$0xff]  ;;  %v2845_v51 = vsel %vm2774_vm6, %v2842_v31, %v2844_v61  ;;  %v10867_v16 = vld [vmem:[#allocation28_spill] sm:$0xff] }
 0x2af   : > { %10862 = vst [vmem:[#allocation55_spill] sm:$0xff] %v9866_v20  ;;  %v2846_v6 = vrot.slane %v10867_v16, 1 }
 0x2b0   : > { %v2606_v22 = vpop.f32.mrb[162].mxu0  ;;  %v2283_v39 = vpop.f32.mrb[162].mxu1 }
 0x2b1   : > { %v9875_v29 = vadd.f32 %v2606_v22, %v2406_v37  ;;  %v6463_v10 = vpop.f32.mrb[163].mxu0  ;;  %6808 = vmatmul.mubr.f32.gmra.mrb[12].mxu0 %v2843_v11  ;;  %v2407_v17 = vadd.f32 %v2283_v39, %v10866_v23  ;;  %v6311_v63 = vpop.f32.mrb[163].mxu1  ;;  %6656 = vmatmul.mubr.f32.gmra.mrb[12].mxu1 %v2841_v30  ;;  %v2847_v31 = vsel %vm2774_vm6, %v2844_v61, %v2846_v6 }
 0x2b2   : > { %6810 = vmatprep.mubr.msk.f32.mxu0 %vm7409_vm0, %v10728_v46  ;;  %6658 = vmatprep.mubr.msk.f32.mxu1 %vm7409_vm0, %v10728_v46  ;;  %v10869_v10 = vld [vmem:[#allocation43_spill] sm:$0xff]  ;;  %v10870_v63 = vld [vmem:[#allocation29_spill] sm:$0xff] }
 0x2b3   : > { %10865 = vst [vmem:[#allocation52_spill] sm:$0xff] %v9875_v29  ;;  %v2848_v16 = vrot.slane %v10870_v63, 1 }
 0x2b4   : > { %v2611_v3 = vpop.f32.mrb[164].mxu0  ;;  %v2288_v20 = vpop.f32.mrb[164].mxu1 }
 0x2b5   : > { %v9884_v37 = vadd.f32 %v2611_v3, %v2407_v17  ;;  %v6466_v22 = vpop.f32.mrb[165].mxu0  ;;  %6811 = vmatmul.mubr.f32.gmra.mrb[14].mxu0 %v2845_v51  ;;  %v2408_v39 = vadd.f32 %v2288_v20, %v10869_v10  ;;  %v6314_v23 = vpop.f32.mrb[165].mxu1  ;;  %6659 = vmatmul.mubr.f32.gmra.mrb[14].mxu1 %v2843_v11  ;;  %v2849_v61 = vsel %vm2774_vm6, %v2846_v6, %v2848_v16 }
 0x2b6   : > { %6813 = vmatprep.mubr.msk.f32.mxu0 %vm7409_vm0, %v10728_v46  ;;  %6661 = vmatprep.mubr.msk.f32.mxu1 %vm7409_vm0, %v10728_v46  ;;  %v10872_v22 = vld [vmem:[#allocation11_spill] sm:$0xff]  ;;  %v10873_v23 = vld [vmem:[#allocation30_spill] sm:$0xff] }
 0x2b7   : > { %10868 = vst [vmem:[#allocation57_spill] sm:$0xff] %v9884_v37  ;;  %v2850_v63 = vrot.slane %v10873_v23, 1 }
 0x2b8   : > { %v2616_v30 = vpop.f32.mrb[166].mxu0  ;;  %v2293_v29 = vpop.f32.mrb[166].mxu1 }
 0x2b9   : > { %v9893_v17 = vadd.f32 %v2616_v30, %v2408_v39  ;;  %v6469_v3 = vpop.f32.mrb[167].mxu0  ;;  %6814 = vmatmul.mubr.f32.gmra.mrb[16].mxu0 %v2847_v31  ;;  %v2409_v20 = vadd.f32 %v2293_v29, %v10872_v22  ;;  %v6317_v10 = vpop.f32.mrb[167].mxu1  ;;  %6662 = vmatmul.mubr.f32.gmra.mrb[16].mxu1 %v2845_v51  ;;  %v2851_v6 = vsel %vm2774_vm6, %v2848_v16, %v2850_v63 }
 0x2ba   : > { %6816 = vmatprep.mubr.msk.f32.mxu0 %vm7409_vm0, %v10728_v46  ;;  %6664 = vmatprep.mubr.msk.f32.mxu1 %vm7409_vm0, %v10728_v46  ;;  %v10875_v3 = vld [vmem:[#allocation44_spill] sm:$0xff]  ;;  %v10876_v10 = vld [vmem:[#allocation13_spill] sm:$0xff] }
 0x2bb   : > { %10871 = vst [vmem:[#allocation54_spill] sm:$0xff] %v9893_v17  ;;  %v2852_v23 = vrot.slane %v10876_v10, 1 }
 0x2bc   : > { %v2621_v11 = vpop.f32.mrb[168].mxu0  ;;  %v2298_v37 = vpop.f32.mrb[168].mxu1 }
 0x2bd   : > { %v9902_v39 = vadd.f32 %v2621_v11, %v2409_v20  ;;  %v6472_v30 = vpop.f32.mrb[169].mxu0  ;;  %6817 = vmatmul.mubr.f32.gmra.mrb[18].mxu0 %v2849_v61  ;;  %v2410_v29 = vadd.f32 %v2298_v37, %v10875_v3  ;;  %v6320_v22 = vpop.f32.mrb[169].mxu1  ;;  %6665 = vmatmul.mubr.f32.gmra.mrb[18].mxu1 %v2847_v31  ;;  %v2853_v16 = vsel %vm2774_vm6, %v2850_v63, %v2852_v23 }
 0x2be   : > { %6819 = vmatprep.mubr.msk.f32.mxu0 %vm7409_vm0, %v10728_v46  ;;  %6667 = vmatprep.mubr.msk.f32.mxu1 %vm7409_vm0, %v10728_v46  ;;  %v10878_v30 = vld [vmem:[#allocation45_spill] sm:$0xff]  ;;  %v10879_v22 = vld [vmem:[#allocation36_spill] sm:$0xff] }
 0x2bf   : > { %10874 = vst [vmem:[#allocation59_spill] sm:$0xff] %v9902_v39  ;;  %v2854_v10 = vrot.slane %v10879_v22, 1 }
 0x2c0   : > { %v2626_v51 = vpop.f32.mrb[170].mxu0  ;;  %v2303_v17 = vpop.f32.mrb[170].mxu1 }
 0x2c1   : > { %v9911_v20 = vadd.f32 %v2626_v51, %v2410_v29  ;;  %v6475_v11 = vpop.f32.mrb[171].mxu0  ;;  %6820 = vmatmul.mubr.f32.gmra.mrb[20].mxu0 %v2851_v6  ;;  %v2411_v37 = vadd.f32 %v2303_v17, %v10878_v30  ;;  %v6323_v3 = vpop.f32.mrb[171].mxu1  ;;  %6668 = vmatmul.mubr.f32.gmra.mrb[20].mxu1 %v2849_v61  ;;  %v10882_v61 = vld [vmem:[#allocation34_spill] sm:$0xff]  ;;  %v2855_v22 = vsel %vm2774_vm6, %v2852_v23, %v2854_v10 }
 0x2c2   : > { %6822 = vmatprep.mubr.msk.f32.mxu0 %vm7409_vm0, %v10728_v46  ;;  %6670 = vmatprep.mubr.msk.f32.mxu1 %vm7409_vm0, %v10728_v46  ;;  %v10881_v11 = vld [vmem:[#allocation15_spill] sm:$0xff]  ;;  %v2856_v3 = vrot.slane %v10882_v61, 1 }
 0x2c3   : > { %10877 = vst [vmem:[#allocation31_spill] sm:$0xff] %v9911_v20 }
 0x2c4   : > { %v2631_v31 = vpop.f32.mrb[172].mxu0  ;;  %v2308_v39 = vpop.f32.mrb[172].mxu1  ;;  %v2857_v23 = vsel %vm2774_vm6, %v2854_v10, %v2856_v3 }
 0x2c5   : > { %v9920_v29 = vadd.f32 %v2631_v31, %v2411_v37  ;;  %v6478_v51 = vpop.f32.mrb[173].mxu0  ;;  %6823 = vmatmul.mubr.f32.gmra.mrb[22].mxu0 %v2853_v16  ;;  %v2412_v17 = vadd.f32 %v2308_v39, %v10881_v11  ;;  %v6326_v30 = vpop.f32.mrb[173].mxu1  ;;  %6671 = vmatmul.mubr.f32.gmra.mrb[22].mxu1 %v2851_v6  ;;  %v10885_v6 = vld [vmem:[#allocation33_spill] sm:$0xff] }
 0x2c6   : > { %6825 = vmatprep.mubr.msk.f32.mxu0 %vm7409_vm0, %v10728_v46  ;;  %6673 = vmatprep.mubr.msk.f32.mxu1 %vm7409_vm0, %v10728_v46  ;;  %v10884_v51 = vld [vmem:[#allocation46_spill] sm:$0xff]  ;;  %v3229_v30 = vrot.slane %v10885_v6, 1 }
 0x2c7   : > { %10880 = vst [vmem:[#allocation56_spill] sm:$0xff] %v9920_v29 }
 0x2c8   : > { %v2636_v63 = vpop.f32.mrb[174].mxu0  ;;  %v2313_v20 = vpop.f32.mrb[174].mxu1  ;;  %v3230_v10 = vsel %vm2774_vm6, %v2856_v3, %v3229_v30 }
 0x2c9   : > { %v9929_v37 = vadd.f32 %v2636_v63, %v2412_v17  ;;  %v6481_v31 = vpop.f32.mrb[175].mxu0  ;;  %6826 = vmatmul.mubr.f32.gmra.mrb[24].mxu0 %v2855_v22  ;;  %v2413_v39 = vadd.f32 %v2313_v20, %v10884_v51  ;;  %v6329_v11 = vpop.f32.mrb[175].mxu1  ;;  %6674 = vmatmul.mubr.f32.gmra.mrb[24].mxu1 %v2853_v16  ;;  %v10888_v16 = vld [vmem:[#allocation35_spill] sm:$0xff] }
 0x2ca   : > { %6828 = vmatprep.mubr.msk.f32.mxu0 %vm7409_vm0, %v10728_v46  ;;  %6676 = vmatprep.mubr.msk.f32.mxu1 %vm7409_vm0, %v10728_v46  ;;  %v10887_v31 = vld [vmem:[#allocation17_spill] sm:$0xff]  ;;  %v3231_v11 = vrot.slane %v10888_v16, 1  ;;  %v10892_v16 = vld [vmem:[#allocation6_spill] sm:$0xff] }
 0x2cb   : > { %10883 = vst [vmem:[#allocation61_spill] sm:$0xff] %v9929_v37 }
 0x2cc   : > { %v2641_v61 = vpop.f32.mrb[176].mxu0  ;;  %v2318_v29 = vpop.f32.mrb[176].mxu1 }
 0x2cd   : > { %v9938_v17 = vadd.f32 %v2641_v61, %v2413_v39  ;;  %v6484_v63 = vpop.f32.mrb[177].mxu0  ;;  %6829 = vmatmul.mubr.f32.gmra.mrb[26].mxu0 %v2857_v23  ;;  %v2414_v20 = vadd.f32 %v2318_v29, %v10887_v31  ;;  %v6332_v51 = vpop.f32.mrb[177].mxu1  ;;  %6677 = vmatmul.mubr.f32.gmra.mrb[26].mxu1 %v2855_v22  ;;  %v10891_v31 = vld [vmem:[#allocation47_spill] sm:$0xff] }
 0x2ce   : > { %6831 = vmatprep.mubr.msk.f32.mxu0 %vm7409_vm0, %v10728_v46  ;;  %6679 = vmatprep.mubr.msk.f32.mxu1 %vm7409_vm0, %v10728_v46  ;;  %v10890_v63 = vld [vmem:[#allocation8_spill] sm:$0xff] }
 0x2cf   : > { %10886 = vst [vmem:[#allocation58_spill] sm:$0xff] %v9938_v17  ;;  %v3565_v29 = vrot.slane %v10890_v63, 2  ;;  %v3564_v17 = vrot.slane %v10892_v16, 2 }
 0x2d0   : > { %v2646_v6 = vpop.f32.mrb[178].mxu0  ;;  %v2323_v37 = vpop.f32.mrb[178].mxu1 }
 0x2d1   : > { %v9947_v39 = vadd.f32 %v2646_v6, %v2414_v20  ;;  %v6487_v61 = vpop.f32.mrb[179].mxu0  ;;  %6832 = vmatmul.mubr.f32.gmra.mrb[28].mxu0 %v3230_v10  ;;  %v2415_v22 = vadd.f32 %v2323_v37, %v10891_v31  ;;  %v6335_v51 = vpop.f32.mrb[179].mxu1  ;;  %6680 = vmatmul.mubr.f32.gmra.mrb[28].mxu1 %v2857_v23  ;;  %v3232_v20 = vsel %vm2774_vm6, %v3229_v30, %v3231_v11  ;;  %v4018_v6 = vrot.slane %v10890_v63, 3  ;;  %v10893_v23 = vld [vmem:[#allocation10_spill] sm:$0xff] }
 0x2d2   : > { %6834 = vmatprep.mubr.msk.f32.mxu0 %vm7409_vm0, %v10728_v46  ;;  %6869 = vmatprep.mubr.msk.f32.mxu1 %vm7409_vm0, %v10728_v46  ;;  %v3566_v37 = vsel %vm3563_vm4, %v3564_v17, %v3565_v29  ;;  %v3567_v31 = vrot.slane %v10893_v23, 2  ;;  %v4017_v30 = vrot.slane %v10892_v16, 3  ;;  %v4020_v63 = vrot.slane %v10893_v23, 3 }
 0x2d3   : > { %10889 = vst [vmem:[#allocation60_spill] sm:$0xff] %v9947_v39 }
 0x2d4   : > { %v2651_v3 = vpop.f32.mrb[180].mxu0  ;;  %v2328_v10 = vpop.f32.mrb[180].mxu1  ;;  %v4021_v23 = vsel %vm4016_vm5, %v4018_v6, %v4020_v63 }
 0x2d5   : > { %v9958_v61 = vadd.f32 %v2651_v3, %v2415_v22  ;;  %v6490_v39 = vpop.f32.mrb[181].mxu0  ;;  %6835 = vmatmul.mubr.f32.gmra.mrb[30].mxu0 %v3232_v20  ;;  %v2416_v51 = vadd.f32 %v2328_v10, %v9517_v34  ;;  %v6338_v47 = vpop.f32.mrb[181].mxu1  ;;  %6870 = vmatmul.mubr.f32.vlgmr.msra.gmra.mrb[30].mxu1 %v3566_v37  ;;  %v3568_v34 = vsel %vm3563_vm4, %v3565_v29, %v3567_v31 }
 0x2d6   : > { %7024 = vmatprep.mubr.msk.f32.mxu0 %vm7409_vm0, %v10728_v46  ;;  %6872 = vmatprep.mubr.msk.f32.mxu1 %vm7409_vm0, %v10728_v46  ;;  %v4019_v39 = vsel %vm4016_vm5, %v4017_v30, %v4018_v6  ;;  %v10894_v47 = vld [vmem:[#allocation12_spill] sm:$0xff] }
 0x2d7   : > { %v3569_v20 = vrot.slane %v10894_v47, 2 }
 0x2d8   : > { %v2656_v11 = vpop.f32.mrb[182].mxu0  ;;  %v2333_v17 = vpop.f32.mrb[182].mxu1 }
 0x2d9   : > { %v9970_v22 = vadd.f32 %v2656_v11, %v2416_v51  ;;  %v6493_v3 = vpop.f32.mrb[183].mxu0  ;;  %7025 = vmatmul.mubr.f32.vlgmr.msra.gmra.mrb[32].mxu0 %v4019_v39  ;;  %v2417_v10 = vadd.f32 %v2333_v17, %v9540_v33  ;;  %v6341_v16 = vpop.f32.mrb[183].mxu1  ;;  %6873 = vmatmul.mubr.f32.gmra.mrb[32].mxu1 %v3568_v34  ;;  %v4022_v51 = vrot.slane %v10894_v47, 3  ;;  %v3570_v39 = vsel %vm3563_vm4, %v3567_v31, %v3569_v20  ;;  %v10895_v33 = vld [vmem:[#allocation14_spill] sm:$0xff] }
 0x2da   : > { %7027 = vmatprep.mubr.msk.f32.mxu0 %vm7409_vm0, %v10728_v46  ;;  %6875 = vmatprep.mubr.msk.f32.mxu1 %vm7409_vm0, %v10728_v46  ;;  %v3571_v17 = vrot.slane %v10895_v33, 2 }
 0x2db   : > { %v4023_v47 = vsel %vm4016_vm5, %v4020_v63, %v4022_v51 }
 0x2dc   : > { %v2661_v37 = vpop.f32.mrb[184].mxu0  ;;  %v2338_v30 = vpop.f32.mrb[184].mxu1 }
 0x2dd   : > { %v9981_v29 = vadd.f32 %v2661_v37, %v2417_v10  ;;  %v6496_v11 = vpop.f32.mrb[185].mxu0  ;;  %7028 = vmatmul.mubr.f32.gmra.mrb[34].mxu0 %v4021_v23  ;;  %v2418_v3 = vadd.f32 %v2338_v30, %v9563_v19  ;;  %v6344_v34 = vpop.f32.mrb[185].mxu1  ;;  %6876 = vmatmul.mubr.f32.gmra.mrb[34].mxu1 %v3570_v39  ;;  %v4024_v10 = vrot.slane %v10895_v33, 3  ;;  %v3572_v23 = vsel %vm3563_vm4, %v3569_v20, %v3571_v17  ;;  %v10896_v19 = vld [vmem:[#allocation16_spill] sm:$0xff] }
 0x2de   : > { %7030 = vmatprep.mubr.msk.f32.mxu0 %vm7409_vm0, %v10728_v46  ;;  %6878 = vmatprep.mubr.msk.f32.mxu1 %vm7409_vm0, %v10728_v46  ;;  %v3573_v30 = vrot.slane %v10896_v19, 2 }
 0x2df   : > { %v4025_v33 = vsel %vm4016_vm5, %v4022_v51, %v4024_v10 }
 0x2e0   : > { %v2666_v6 = vpop.f32.mrb[186].mxu0  ;;  %v2343_v16 = vpop.f32.mrb[186].mxu1 }
 0x2e1   : > { %v9992_v31 = vadd.f32 %v2666_v6, %v2418_v3  ;;  %v6499_v37 = vpop.f32.mrb[187].mxu0  ;;  %7031 = vmatmul.mubr.f32.gmra.mrb[36].mxu0 %v4023_v47  ;;  %v2419_v11 = vadd.f32 %v2343_v16, %v9586_v60  ;;  %v6347_v39 = vpop.f32.mrb[187].mxu1  ;;  %6879 = vmatmul.mubr.f32.gmra.mrb[36].mxu1 %v3572_v23  ;;  %v4026_v3 = vrot.slane %v10896_v19, 3  ;;  %v3574_v47 = vsel %vm3563_vm4, %v3571_v17, %v3573_v30  ;;  %v10897_v60 = vld [vmem:[#allocation18_spill] sm:$0xff] }
 0x2e2   : > { %7033 = vmatprep.mubr.msk.f32.mxu0 %vm7409_vm0, %v10728_v46  ;;  %6881 = vmatprep.mubr.msk.f32.mxu1 %vm7409_vm0, %v10728_v46  ;;  %v3575_v16 = vrot.slane %v10897_v60, 2 }
 0x2e3   : > { %v4027_v19 = vsel %vm4016_vm5, %v4024_v10, %v4026_v3 }
 0x2e4   : > { %v2671_v63 = vpop.f32.mrb[188].mxu0  ;;  %v2348_v34 = vpop.f32.mrb[188].mxu1 }
 0x2e5   : > { %v10003_v20 = vadd.f32 %v2671_v63, %v2419_v11  ;;  %v6502_v6 = vpop.f32.mrb[189].mxu0  ;;  %7034 = vmatmul.mubr.f32.gmra.mrb[38].mxu0 %v4025_v33  ;;  %v2420_v37 = vadd.f32 %v2348_v34, %v9609_v54  ;;  %v6350_v23 = vpop.f32.mrb[189].mxu1  ;;  %6882 = vmatmul.mubr.f32.gmra.mrb[38].mxu1 %v3574_v47  ;;  %v4028_v11 = vrot.slane %v10897_v60, 3  ;;  %v3576_v33 = vsel %vm3563_vm4, %v3573_v30, %v3575_v16  ;;  %v10898_v54 = vld [vmem:[#allocation20_spill] sm:$0xff] }
 0x2e6   : > { %7036 = vmatprep.mubr.msk.f32.mxu0 %vm7409_vm0, %v10728_v46  ;;  %6884 = vmatprep.mubr.msk.f32.mxu1 %vm7409_vm0, %v10728_v46  ;;  %v3577_v34 = vrot.slane %v10898_v54, 2 }
 0x2e7   : > { %v4029_v60 = vsel %vm4016_vm5, %v4026_v3, %v4028_v11 }
 0x2e8   : > { %v2676_v51 = vpop.f32.mrb[190].mxu0  ;;  %v2353_v39 = vpop.f32.mrb[190].mxu1 }
 0x2e9   : > { %v10014_v17 = vadd.f32 %v2676_v51, %v2420_v37  ;;  %v6505_v63 = vpop.f32.mrb[191].mxu0  ;;  %7037 = vmatmul.mubr.f32.gmra.mrb[40].mxu0 %v4027_v19  ;;  %v2421_v6 = vadd.f32 %v2353_v39, %v9632_v9  ;;  %v6353_v47 = vpop.f32.mrb[191].mxu1  ;;  %6885 = vmatmul.mubr.f32.gmra.mrb[40].mxu1 %v3576_v33  ;;  %v4030_v37 = vrot.slane %v10898_v54, 3  ;;  %v3578_v19 = vsel %vm3563_vm4, %v3575_v16, %v3577_v34 }
 0x2ea   : > { %7039 = vmatprep.mubr.msk.f32.mxu0 %vm7409_vm0, %v10728_v46  ;;  %6887 = vmatprep.mubr.msk.f32.mxu1 %vm7409_vm0, %v10728_v46  ;;  %v3579_v9 = vrot.slane %v10777_v48, 2  ;;  %v4032_v54 = vrot.slane %v10777_v48, 3 }
 0x2eb   : > { %v4031_v33 = vsel %vm4016_vm5, %v4028_v11, %v4030_v37 }
 0x2ec   : > { %v2681_v10 = vpop.f32.mrb[192].mxu0  ;;  %v2358_v23 = vpop.f32.mrb[192].mxu1  ;;  %v4033_v11 = vsel %vm4016_vm5, %v4030_v37, %v4032_v54 }
 0x2ed   : > { %v10025_v30 = vadd.f32 %v2681_v10, %v2421_v6  ;;  %v6508_v51 = vpop.f32.mrb[193].mxu0  ;;  %7040 = vmatmul.mubr.f32.gmra.mrb[42].mxu0 %v4029_v60  ;;  %v2422_v39 = vadd.f32 %v2358_v23, %v9649_v4  ;;  %v6356_v63 = vpop.f32.mrb[193].mxu1  ;;  %6888 = vmatmul.mubr.f32.gmra.mrb[42].mxu1 %v3578_v19  ;;  %v3580_v10 = vsel %vm3563_vm4, %v3577_v34, %v3579_v9  ;;  %v3581_v4 = vrot.slane %v10845_v32, 2 }
 0x2ee   : > { %7042 = vmatprep.mubr.msk.f32.mxu0 %vm7409_vm0, %v10728_v46  ;;  %6890 = vmatprep.mubr.msk.f32.mxu1 %vm7409_vm0, %v10728_v46  ;;  %v4034_v51 = vrot.slane %v10845_v32, 3 }
 0x2ef   : > { %v3582_v63 = vsel %vm3563_vm4, %v3579_v9, %v3581_v4 }
 0x2f0   : > { %v2686_v3 = vpop.f32.mrb[194].mxu0  ;;  %v2363_v6 = vpop.f32.mrb[194].mxu1  ;;  %v4035_v37 = vsel %vm4016_vm5, %v4032_v54, %v4034_v51 }
 0x2f1   : > { %v10036_v16 = vadd.f32 %v2686_v3, %v2422_v39  ;;  %v6511_v47 = vpop.f32.mrb[195].mxu0  ;;  %7043 = vmatmul.mubr.f32.gmra.mrb[44].mxu0 %v4031_v33  ;;  %v2423_v60 = vadd.f32 %v2363_v6, %v9659_v24  ;;  %v6359_v23 = vpop.f32.mrb[195].mxu1  ;;  %6891 = vmatmul.mubr.f32.gmra.mrb[44].mxu1 %v3580_v10  ;;  %v3583_v24 = vrot.slane %v8221_v42, 2  ;;  %v4036_v6 = vrot.slane %v8221_v42, 3 }
 0x2f2   : > { %7045 = vmatprep.mubr.msk.f32.mxu0 %vm7409_vm0, %v10728_v46  ;;  %6893 = vmatprep.mubr.msk.f32.mxu1 %vm7409_vm0, %v10728_v46 }
 0x2f3   : > { %v4037_v54 = vsel %vm4016_vm5, %v4034_v51, %v4036_v6 }
 0x2f4   : > { %v2691_v48 = vpop.f32.mrb[196].mxu0  ;;  %v2368_v19 = vpop.f32.mrb[196].mxu1 }
 0x2f5   : > { %v10047_v34 = vadd.f32 %v2691_v48, %v2423_v60  ;;  %v6514_v39 = vpop.f32.mrb[197].mxu0  ;;  %7046 = vmatmul.mubr.f32.gmra.mrb[46].mxu0 %v4033_v11  ;;  %v2424_v3 = vadd.f32 %v2368_v19, %v9668_v57  ;;  %v6362_v33 = vpop.f32.mrb[197].mxu1  ;;  %6894 = vmatmul.mubr.f32.gmra.mrb[46].mxu1 %v3582_v63  ;;  %v3584_v60 = vsel %vm3563_vm4, %v3581_v4, %v3583_v24  ;;  %v3585_v57 = vrot.slane %v8241_v53, 2 }
 0x2f6   : > { %7048 = vmatprep.mubr.msk.f32.mxu0 %vm7409_vm0, %v10728_v46  ;;  %6896 = vmatprep.mubr.msk.f32.mxu1 %vm7409_vm0, %v10728_v46  ;;  %v4038_v11 = vrot.slane %v8241_v53, 3 }
 0x2f7   : > { %v3586_v63 = vsel %vm3563_vm4, %v3583_v24, %v3585_v57 }
 0x2f8   : > { %v2696_v32 = vpop.f32.mrb[198].mxu0  ;;  %v2373_v47 = vpop.f32.mrb[198].mxu1  ;;  %v4039_v51 = vsel %vm4016_vm5, %v4036_v6, %v4038_v11 }
 0x2f9   : > { %v10058_v9 = vadd.f32 %v2696_v32, %v2424_v3  ;;  %v6517_v10 = vpop.f32.mrb[199].mxu0  ;;  %7049 = vmatmul.mubr.f32.gmra.mrb[48].mxu0 %v4035_v37  ;;  %v2425_v23 = vadd.f32 %v2373_v47, %v9677_v18  ;;  %v6365_v48 = vpop.f32.mrb[199].mxu1  ;;  %6897 = vmatmul.mubr.f32.gmra.mrb[48].mxu1 %v3584_v60  ;;  %v3587_v18 = vrot.slane %v8260_v15, 2  ;;  %v4040_v32 = vrot.slane %v8260_v15, 3 }
 0x2fa   : > { %7051 = vmatprep.mubr.msk.f32.mxu0 %vm7409_vm0, %v10728_v46  ;;  %6899 = vmatprep.mubr.msk.f32.mxu1 %vm7409_vm0, %v10728_v46  ;;  %v4042_v48 = vrot.slane %v8278_v27, 3 }
 0x2fb   : > { %v3588_v10 = vsel %vm3563_vm4, %v3585_v57, %v3587_v18  ;;  %v4041_v6 = vsel %vm4016_vm5, %v4038_v11, %v4040_v32 }
 0x2fc   : > { %v2701_v42 = vpop.f32.mrb[200].mxu0  ;;  %v2378_v19 = vpop.f32.mrb[200].mxu1  ;;  %v4043_v11 = vsel %vm4016_vm5, %v4040_v32, %v4042_v48 }
 0x2fd   : > { %v10069_v4 = vadd.f32 %v2701_v42, %v2425_v23  ;;  %v6520_v39 = vpop.f32.mrb[201].mxu0  ;;  %7052 = vmatmul.mubr.f32.gmra.mrb[50].mxu0 %v4037_v54  ;;  %v2426_v3 = vadd.f32 %v2378_v19, %v9686_v28  ;;  %v6368_v33 = vpop.f32.mrb[201].mxu1  ;;  %6900 = vmatmul.mubr.f32.gmra.mrb[50].mxu1 %v3586_v63  ;;  %v3589_v28 = vrot.slane %v8278_v27, 2 }
 0x2fe   : > { %7054 = vmatprep.mubr.msk.f32.mxu0 %vm7409_vm0, %v10728_v46  ;;  %6902 = vmatprep.mubr.msk.f32.mxu1 %vm7409_vm0, %v10728_v46 }
 0x2ff   : > { %v3590_v19 = vsel %vm3563_vm4, %v3587_v18, %v3589_v28 }
 0x300   : > { %v2706_v53 = vpop.f32.mrb[202].mxu0  ;;  %v2383_v37 = vpop.f32.mrb[202].mxu1 }
 0x301   : > { %v10080_v24 = vadd.f32 %v2706_v53, %v2426_v3  ;;  %v6523_v47 = vpop.f32.mrb[203].mxu0  ;;  %7055 = vmatmul.mubr.f32.gmra.mrb[52].mxu0 %v4039_v51  ;;  %v2427_v60 = vadd.f32 %v2383_v37, %v9695_v38  ;;  %v6371_v23 = vpop.f32.mrb[203].mxu1  ;;  %6903 = vmatmul.mubr.f32.gmra.mrb[52].mxu1 %v3588_v10  ;;  %v3591_v38 = vrot.slane %v8292_v43, 2  ;;  %v4044_v3 = vrot.slane %v8292_v43, 3 }
 0x302   : > { %7057 = vmatprep.mubr.msk.f32.mxu0 %vm7409_vm0, %v10728_v46  ;;  %6905 = vmatprep.mubr.msk.f32.mxu1 %vm7409_vm0, %v10728_v46  ;;  %v4046_v10 = vrot.slane %v8304_v8, 3 }
 0x303   : > { %v3592_v51 = vsel %vm3563_vm4, %v3589_v28, %v3591_v38  ;;  %v4045_v32 = vsel %vm4016_vm5, %v4042_v48, %v4044_v3  ;;  %v3595_v48 = vrot.slane %v7833_v56, 2 }
 0x304   : > { %v2711_v15 = vpop.f32.mrb[204].mxu0  ;;  %v2965_v57 = vpop.f32.mrb[204].mxu1 }
 0x305   : > { %v10091_v42 = vadd.f32 %v2711_v15, %v2427_v60  ;;  %v6526_v54 = vpop.f32.mrb[205].mxu0  ;;  %7058 = vmatmul.mubr.f32.gmra.mrb[54].mxu0 %v4041_v6  ;;  %v3169_v39 = vadd.f32 %v2965_v57, %v9704_v26  ;;  %v6561_v63 = vpop.f32.mrb[205].mxu1  ;;  %6906 = vmatmul.mubr.f32.gmra.mrb[54].mxu1 %v3590_v19  ;;  %v3593_v26 = vrot.slane %v8304_v8, 2  ;;  %v4047_v57 = vsel %vm4016_vm5, %v4044_v3, %v4046_v10 }
 0x306   : > { %7060 = vmatprep.mubr.msk.f32.mxu0 %vm7409_vm0, %v10728_v46  ;;  %6908 = vmatprep.mubr.msk.f32.mxu1 %vm7409_vm0, %v10728_v46 }
 0x307   : > { %v3594_v15 = vsel %vm3563_vm4, %v3591_v38, %v3593_v26 }
 0x308   : > { %v3301_v27 = vpop.f32.mrb[206].mxu0  ;;  %v2970_v33 = vpop.f32.mrb[206].mxu1 }
 0x309   : > { %v10102_v18 = vadd.f32 %v3301_v27, %v3169_v39  ;;  %v6716_v53 = vpop.f32.mrb[207].mxu0  ;;  %7061 = vmatmul.mubr.f32.gmra.mrb[56].mxu0 %v4043_v11  ;;  %v3170_v37 = vadd.f32 %v2970_v33, %v9713_v21  ;;  %v6564_v47 = vpop.f32.mrb[207].mxu1  ;;  %6909 = vmatmul.mubr.f32.gmra.mrb[56].mxu1 %v3592_v51  ;;  %v3596_v39 = vsel %vm3563_vm4, %v3593_v26, %v3595_v48  ;;  %v4048_v11 = vrot.slane %v7833_v56, 3 }
 0x30a   : > { %7063 = vmatprep.mubr.msk.f32.mxu0 %vm7409_vm0, %v10728_v46  ;;  %6911 = vmatprep.mubr.msk.f32.mxu1 %vm7409_vm0, %v10728_v46  ;;  %v4050_v53 = vrot.slane %v7836_v13, 3  ;;  %v3599_v47 = vrot.slane %v7849_v36, 2 }
 0x30b   : > { %v4049_v33 = vsel %vm4016_vm5, %v4046_v10, %v4048_v11  ;;  %v4052_v10 = vrot.slane %v7849_v36, 3 }
 0x30c   : > { %v3306_v43 = vpop.f32.mrb[208].mxu0  ;;  %v2975_v60 = vpop.f32.mrb[208].mxu1 }
 0x30d   : > { %v10113_v28 = vadd.f32 %v3306_v43, %v3170_v37  ;;  %v6719_v23 = vpop.f32.mrb[209].mxu0  ;;  %7064 = vmatmul.mubr.f32.gmra.mrb[58].mxu0 %v4045_v32  ;;  %v3171_v21 = vadd.f32 %v2975_v60, %v9721_v50  ;;  %v6567_v6 = vpop.f32.mrb[209].mxu1  ;;  %6912 = vmatmul.mubr.f32.gmra.mrb[58].mxu1 %v3594_v15  ;;  %v3597_v50 = vrot.slane %v7836_v13, 2  ;;  %v4051_v32 = vsel %vm4016_vm5, %v4048_v11, %v4050_v53 }
 0x30e   : > { %7066 = vmatprep.mubr.msk.f32.mxu0 %vm7409_vm0, %v10728_v46  ;;  %6914 = vmatprep.mubr.msk.f32.mxu1 %vm7409_vm0, %v10728_v46 }
 0x310   : > { %v3311_v8 = vpop.f32.mrb[210].mxu0  ;;  %v2980_v54 = vpop.f32.mrb[210].mxu1 }
 0x311   : > { %v10123_v19 = vadd.f32 %v3311_v8, %v3171_v21  ;;  %v6722_v38 = vpop.f32.mrb[211].mxu0  ;;  %7067 = vmatmul.mubr.f32.gmra.mrb[60].mxu0 %v4047_v57  ;;  %v3172_v63 = vadd.f32 %v2980_v54, %v9731_v58  ;;  %v6570_v27 = vpop.f32.mrb[211].mxu1  ;;  %6915 = vmatmul.mubr.f32.gmra.mrb[60].mxu1 %v3596_v39  ;;  %v3598_v58 = vsel %vm3563_vm4, %v3595_v48, %v3597_v50  ;;  %v4054_v57 = vrot.slane %v7882_v62, 3 }
 0x312   : > { %7069 = vmatprep.mubr.msk.f32.mxu0 %vm7409_vm0, %v10728_v46  ;;  %6917 = vmatprep.mubr.msk.f32.mxu1 %vm7409_vm0, %v10728_v46  ;;  %v3600_v21 = vsel %vm3563_vm4, %v3597_v50, %v3599_v47  ;;  %v4053_v8 = vsel %vm4016_vm5, %v4050_v53, %v4052_v10 }
 0x313   : > { %v4055_v11 = vsel %vm4016_vm5, %v4052_v10, %v4054_v57 }
 0x314   : > { %v3316_v3 = vpop.f32.mrb[212].mxu0  ;;  %v2985_v51 = vpop.f32.mrb[212].mxu1 }
 0x315   : > { %v10135_v26 = vadd.f32 %v3316_v3, %v3172_v63  ;;  %v6725_v37 = vpop.f32.mrb[213].mxu0  ;;  %7070 = vmatmul.mubr.f32.gmra.mrb[62].mxu0 %v4049_v33  ;;  %v3173_v43 = vadd.f32 %v2985_v51, %v9740_v35  ;;  %v6573_v56 = vpop.f32.mrb[213].mxu1  ;;  %6918 = vmatmul.mubr.f32.gmra.mrb[62].mxu1 %v3598_v58  ;;  %v3601_v35 = vrot.slane %v7882_v62, 2  ;;  %v4056_v3 = vrot.slane %v10779_v44, 3 }
 0x316   : > { %7072 = vmatprep.mubr.msk.f32.mxu0 %vm7409_vm0, %v10728_v46  ;;  %6920 = vmatprep.mubr.msk.f32.mxu1 %vm7409_vm0, %v10728_v46  ;;  %v4058_v56 = vrot.slane %v10780_v0, 3 }
 0x317   : > { %v3602_v50 = vsel %vm3563_vm4, %v3599_v47, %v3601_v35 }
 0x318   : > { %v3321_v13 = vpop.f32.mrb[214].mxu0  ;;  %v2990_v60 = vpop.f32.mrb[214].mxu1 }
 0x319   : > { %v10146_v23 = vadd.f32 %v3321_v13, %v3173_v43  ;;  %v6728_v15 = vpop.f32.mrb[215].mxu0  ;;  %7073 = vmatmul.mubr.f32.gmra.mrb[64].mxu0 %v4051_v32  ;;  %v3174_v6 = vadd.f32 %v2990_v60, %v9749_v40  ;;  %v6576_v48 = vpop.f32.mrb[215].mxu1  ;;  %6921 = vmatmul.mubr.f32.gmra.mrb[64].mxu1 %v3600_v21  ;;  %v3603_v40 = vrot.slane %v10779_v44, 2  ;;  %v4057_v43 = vsel %vm4016_vm5, %v4054_v57, %v4056_v3 }
 0x31a   : > { %7075 = vmatprep.mubr.msk.f32.mxu0 %vm7409_vm0, %v10728_v46  ;;  %6923 = vmatprep.mubr.msk.f32.mxu1 %vm7409_vm0, %v10728_v46 }
 0x31b   : > { %v3604_v37 = vsel %vm3563_vm4, %v3601_v35, %v3603_v40  ;;  %v4059_v35 = vsel %vm4016_vm5, %v4056_v3, %v4058_v56 }
 0x31c   : > { %v3326_v36 = vpop.f32.mrb[216].mxu0  ;;  %v2995_v54 = vpop.f32.mrb[216].mxu1 }
 0x31d   : > { %v10157_v38 = vadd.f32 %v3326_v36, %v3174_v6  ;;  %v6731_v39 = vpop.f32.mrb[217].mxu0  ;;  %7076 = vmatmul.mubr.f32.gmra.mrb[66].mxu0 %v4053_v8  ;;  %v3175_v63 = vadd.f32 %v2995_v54, %v9758_v7  ;;  %v6579_v27 = vpop.f32.mrb[217].mxu1  ;;  %6924 = vmatmul.mubr.f32.gmra.mrb[66].mxu1 %v3602_v50  ;;  %v3605_v7 = vrot.slane %v10780_v0, 2  ;;  %v4060_v6 = vrot.slane %v10781_v14, 3 }
 0x31e   : > { %7078 = vmatprep.mubr.msk.f32.mxu0 %vm7409_vm0, %v10728_v46  ;;  %6926 = vmatprep.mubr.msk.f32.mxu1 %vm7409_vm0, %v10728_v46 }
 0x31f   : > { %v3606_v60 = vsel %vm3563_vm4, %v3603_v40, %v3605_v7  ;;  %v4061_v50 = vsel %vm4016_vm5, %v4058_v56, %v4060_v6  ;;  %v4062_v40 = vrot.slane %v10782_v45, 3 }
 0x320   : > { %v3331_v62 = vpop.f32.mrb[218].mxu0  ;;  %v3000_v33 = vpop.f32.mrb[218].mxu1 }
 0x321   : > { %v10168_v53 = vadd.f32 %v3331_v62, %v3175_v63  ;;  %v6734_v51 = vpop.f32.mrb[219].mxu0  ;;  %7079 = vmatmul.mubr.f32.gmra.mrb[68].mxu0 %v4055_v11  ;;  %v3176_v58 = vadd.f32 %v3000_v33, %v9767_v49  ;;  %v6582_v47 = vpop.f32.mrb[219].mxu1  ;;  %6927 = vmatmul.mubr.f32.gmra.mrb[68].mxu1 %v3604_v37  ;;  %v3607_v49 = vrot.slane %v10781_v14, 2  ;;  %v3611_v11 = vrot.slane %v10784_v5, 2 }
 0x322   : > { %7081 = vmatprep.mubr.msk.f32.mxu0 %vm7409_vm0, %v10728_v46  ;;  %6929 = vmatprep.mubr.msk.f32.mxu1 %vm7409_vm0, %v10728_v46  ;;  %v4064_v51 = vrot.slane %v10784_v5, 3 }
 0x323   : > { %v3608_v57 = vsel %vm3563_vm4, %v3605_v7, %v3607_v49 }
 0x324   : > { %v3336_v44 = vpop.f32.mrb[220].mxu0  ;;  %v3005_v13 = vpop.f32.mrb[220].mxu1 }
 0x325   : > { %v10179_v32 = vadd.f32 %v3336_v44, %v3176_v58  ;;  %v6737_v10 = vpop.f32.mrb[221].mxu0  ;;  %7082 = vmatmul.mubr.f32.gmra.mrb[70].mxu0 %v4057_v43  ;;  %v3177_v15 = vadd.f32 %v3005_v13, %v9776_v1  ;;  %v6585_v21 = vpop.f32.mrb[221].mxu1  ;;  %6930 = vmatmul.mubr.f32.gmra.mrb[70].mxu1 %v3606_v60  ;;  %v3609_v1 = vrot.slane %v10782_v45, 2  ;;  %v3613_v44 = vrot.slane %v10786_v52, 2 }
 0x326   : > { %7084 = vmatprep.mubr.msk.f32.mxu0 %vm7409_vm0, %v10728_v46  ;;  %6932 = vmatprep.mubr.msk.f32.mxu1 %vm7409_vm0, %v10728_v46  ;;  %v4065_v13 = vsel %vm4016_vm5, %v4062_v40, %v4064_v51  ;;  %v4066_v10 = vrot.slane %v10786_v52, 3 }
 0x327   : > { %v3612_v47 = vsel %vm3563_vm4, %v3609_v1, %v3611_v11  ;;  %v3614_v21 = vsel %vm3563_vm4, %v3611_v11, %v3613_v44 }
 0x328   : > { %v3341_v0 = vpop.f32.mrb[222].mxu0  ;;  %v3010_v48 = vpop.f32.mrb[222].mxu1 }
 0x329   : > { %v10190_v36 = vadd.f32 %v3341_v0, %v3177_v15  ;;  %v6740_v8 = vpop.f32.mrb[223].mxu0  ;;  %7085 = vmatmul.mubr.f32.gmra.mrb[72].mxu0 %v4059_v35  ;;  %v3178_v54 = vadd.f32 %v3010_v48, %v9785_v25  ;;  %v6588_v39 = vpop.f32.mrb[223].mxu1  ;;  %6933 = vmatmul.mubr.f32.gmra.mrb[72].mxu1 %v3608_v57  ;;  %v3610_v25 = vsel %vm3563_vm4, %v3607_v49, %v3609_v1  ;;  %v4068_v48 = vrot.slane %v10788_v41, 3 }
 0x32a   : > { %7087 = vmatprep.mubr.msk.f32.mxu0 %vm7409_vm0, %v10728_v46  ;;  %6935 = vmatprep.mubr.msk.f32.mxu1 %vm7409_vm0, %v10728_v46  ;;  %v10899_v39 = vld [vmem:[#allocation49_spill] sm:$0xff] }
 0x32c   : > { %v3346_v14 = vpop.f32.mrb[224].mxu0  ;;  %v3015_v63 = vpop.f32.mrb[224].mxu1 }
 0x32d   : > { %v10201_v27 = vadd.f32 %v3346_v14, %v3178_v54  ;;  %v6743_v62 = vpop.f32.mrb[225].mxu0  ;;  %7088 = vmatmul.mubr.f32.gmra.mrb[74].mxu0 %v4061_v50  ;;  %v3179_v3 = vadd.f32 %v3015_v63, %v9794_v2  ;;  %v6591_v33 = vpop.f32.mrb[225].mxu1  ;;  %6936 = vmatmul.mubr.f32.gmra.mrb[74].mxu1 %v3610_v25  ;;  %v4063_v2 = vsel %vm4016_vm5, %v4060_v6, %v4062_v40  ;;  %v4070_v63 = vrot.slane %v10791_v59, 3 }
 0x32e   : > { %7090 = vmatprep.mubr.msk.f32.mxu0 %vm7409_vm0, %v10728_v46  ;;  %6938 = vmatprep.mubr.msk.f32.mxu1 %vm7409_vm0, %v10728_v46  ;;  %v4067_v6 = vsel %vm4016_vm5, %v4064_v51, %v4066_v10  ;;  %v4069_v40 = vsel %vm4016_vm5, %v4066_v10, %v4068_v48  ;;  %v10900_v33 = vld [vmem:[#allocation19_spill] sm:$0xff] }
 0x330   : > { %v3351_v45 = vpop.f32.mrb[226].mxu0  ;;  %v3020_v37 = vpop.f32.mrb[226].mxu1 }
 0x331   : > { %v10235_v7 = vadd.f32 %v3351_v45, %v3179_v3  ;;  %v6746_v58 = vpop.f32.mrb[227].mxu0  ;;  %7091 = vmatmul.mubr.f32.gmra.mrb[76].mxu0 %v4063_v2  ;;  %v3180_v43 = vadd.f32 %v3020_v37, %v9803_v55  ;;  %v6594_v56 = vpop.f32.mrb[227].mxu1  ;;  %6939 = vmatmul.mubr.f32.gmra.mrb[76].mxu1 %v3612_v47  ;;  %v3615_v55 = vrot.slane %v10788_v41, 2  ;;  %v3619_v45 = vrot.slane %v10900_v33, 2  ;;  %v10901_v2 = vld [vmem:[#allocation51_spill] sm:$0xff] }
 0x332   : > { %7093 = vmatprep.mubr.msk.f32.mxu0 %vm7409_vm0, %v10728_v46  ;;  %6941 = vmatprep.mubr.msk.f32.mxu1 %vm7409_vm0, %v10728_v46  ;;  %v4071_v58 = vsel %vm4016_vm5, %v4068_v48, %v4070_v63  ;;  %v4072_v47 = vrot.slane %v10900_v33, 3  ;;  %v10906_v33 = vld [vmem:[#allocation25_spill] sm:$0xff] }
 0x333   : > { %v3616_v54 = vsel %vm3563_vm4, %v3613_v44, %v3615_v55 }
 0x334   : > { %v3356_v5 = vpop.f32.mrb[228].mxu0  ;;  %v3025_v60 = vpop.f32.mrb[228].mxu1 }
 0x335   : > { %v10246_v49 = vadd.f32 %v3356_v5, %v3180_v43  ;;  %v6749_v15 = vpop.f32.mrb[229].mxu0  ;;  %7094 = vmatmul.mubr.f32.gmra.mrb[78].mxu0 %v4065_v13  ;;  %v3181_v0 = vadd.f32 %v3025_v60, %v9812_v12  ;;  %v6597_v35 = vpop.f32.mrb[229].mxu1  ;;  %6942 = vmatmul.mubr.f32.gmra.mrb[78].mxu1 %v3614_v21  ;;  %v3617_v12 = vrot.slane %v10791_v59, 2  ;;  %v10902_v13 = vld [vmem:[#allocation21_spill] sm:$0xff]  ;;  %v10903_v60 = vld [vmem:[#allocation48_spill] sm:$0xff] }
 0x336   : > { %7096 = vmatprep.mubr.msk.f32.mxu0 %vm7409_vm0, %v10728_v46  ;;  %6944 = vmatprep.mubr.msk.f32.mxu1 %vm7409_vm0, %v10728_v46  ;;  %v3621_v10 = vrot.slane %v10902_v13, 2  ;;  %v4074_v35 = vrot.slane %v10902_v13, 3 }
 0x337   : > { %v3618_v3 = vsel %vm3563_vm4, %v3615_v55, %v3617_v12  ;;  %v3620_v5 = vsel %vm3563_vm4, %v3617_v12, %v3619_v45  ;;  %v10905_v12 = vld [vmem:[#allocation53_spill] sm:$0xff] }
 0x338   : > { %v3361_v52 = vpop.f32.mrb[230].mxu0  ;;  %v3030_v8 = vpop.f32.mrb[230].mxu1 }
 0x339   : > { %v10257_v57 = vadd.f32 %v3361_v52, %v3181_v0  ;;  %v6752_v1 = vpop.f32.mrb[231].mxu0  ;;  %7097 = vmatmul.mubr.f32.gmra.mrb[80].mxu0 %v4067_v6  ;;  %v3182_v14 = vadd.f32 %v3030_v8, %v10899_v39  ;;  %v6600_v50 = vpop.f32.mrb[231].mxu1  ;;  %6945 = vmatmul.mubr.f32.gmra.mrb[80].mxu1 %v3616_v54  ;;  %v4073_v0 = vsel %vm4016_vm5, %v4070_v63, %v4072_v47 }
 0x33a   : > { %7099 = vmatprep.mubr.msk.f32.mxu0 %vm7409_vm0, %v10728_v46  ;;  %6947 = vmatprep.mubr.msk.f32.mxu1 %vm7409_vm0, %v10728_v46  ;;  %v3622_v8 = vsel %vm3563_vm4, %v3619_v45, %v3621_v10  ;;  %v10904_v1 = vld [vmem:[#allocation23_spill] sm:$0xff]  ;;  %v3625_v45 = vrot.slane %v10906_v33, 2 }
 0x33b   : > { %v3623_v54 = vrot.slane %v10904_v1, 2 }
 0x33c   : > { %v3366_v41 = vpop.f32.mrb[232].mxu0  ;;  %v3035_v62 = vpop.f32.mrb[232].mxu1 }
 0x33d   : > { %v10268_v25 = vadd.f32 %v3366_v41, %v3182_v14  ;;  %v6755_v11 = vpop.f32.mrb[233].mxu0  ;;  %7100 = vmatmul.mubr.f32.gmra.mrb[82].mxu0 %v4069_v40  ;;  %v3183_v51 = vadd.f32 %v3035_v62, %v10901_v2  ;;  %v6603_v37 = vpop.f32.mrb[233].mxu1  ;;  %6948 = vmatmul.mubr.f32.gmra.mrb[82].mxu1 %v3618_v3  ;;  %v4075_v41 = vsel %vm4016_vm5, %v4072_v47, %v4074_v35  ;;  %v4076_v40 = vrot.slane %v10904_v1, 3  ;;  %v10907_v2 = vld [vmem:[#allocation50_spill] sm:$0xff] }
 0x33e   : > { %7102 = vmatprep.mubr.msk.f32.mxu0 %vm7409_vm0, %v10728_v46  ;;  %6950 = vmatprep.mubr.msk.f32.mxu1 %vm7409_vm0, %v10728_v46  ;;  %v3624_v3 = vsel %vm3563_vm4, %v3621_v10, %v3623_v54  ;;  %v4078_v47 = vrot.slane %v10906_v33, 3  ;;  %v3626_v13 = vsel %vm3563_vm4, %v3623_v54, %v3625_v45  ;;  %v10908_v10 = vld [vmem:[#allocation26_spill] sm:$0xff] }
 0x340   : > { %v3371_v59 = vpop.f32.mrb[234].mxu0  ;;  %v3040_v44 = vpop.f32.mrb[234].mxu1 }
 0x341   : > { %v10279_v43 = vadd.f32 %v3371_v59, %v3183_v51  ;;  %v6758_v56 = vpop.f32.mrb[235].mxu0  ;;  %7103 = vmatmul.mubr.f32.gmra.mrb[84].mxu0 %v4071_v58  ;;  %v3184_v15 = vadd.f32 %v3040_v44, %v10903_v60  ;;  %v6606_v21 = vpop.f32.mrb[235].mxu1  ;;  %6951 = vmatmul.mubr.f32.gmra.mrb[84].mxu1 %v3620_v5  ;;  %v4077_v58 = vsel %vm4016_vm5, %v4074_v35, %v4076_v40  ;;  %v3627_v60 = vrot.slane %v10908_v10, 2 }
 0x342   : > { %7105 = vmatprep.mubr.msk.f32.mxu0 %vm7409_vm0, %v10728_v46  ;;  %6953 = vmatprep.mubr.msk.f32.mxu1 %vm7409_vm0, %v10728_v46  ;;  %v4079_v35 = vsel %vm4016_vm5, %v4076_v40, %v4078_v47 }
 0x343   : > { %v3628_v54 = vsel %vm3563_vm4, %v3625_v45, %v3627_v60 }
 0x344   : > { %v3376_v55 = vpop.f32.mrb[236].mxu0  ;;  %v3045_v52 = vpop.f32.mrb[236].mxu1 }
 0x345   : > { %v10290_v6 = vadd.f32 %v3376_v55, %v3184_v15  ;;  %v6761_v48 = vpop.f32.mrb[237].mxu0  ;;  %7106 = vmatmul.mubr.f32.gmra.mrb[86].mxu0 %v4073_v0  ;;  %v3185_v39 = vadd.f32 %v3045_v52, %v10905_v12  ;;  %v6609_v14 = vpop.f32.mrb[237].mxu1  ;;  %6954 = vmatmul.mubr.f32.gmra.mrb[86].mxu1 %v3622_v8  ;;  %v10909_v15 = vld [vmem:[#allocation55_spill] sm:$0xff]  ;;  %v4080_v52 = vrot.slane %v10908_v10, 3 }
 0x346   : > { %7108 = vmatprep.mubr.msk.f32.mxu0 %vm7409_vm0, %v10728_v46  ;;  %6956 = vmatprep.mubr.msk.f32.mxu1 %vm7409_vm0, %v10728_v46  ;;  %v10910_v12 = vld [vmem:[#allocation27_spill] sm:$0xff]  ;;  %v10911_v14 = vld [vmem:[#allocation52_spill] sm:$0xff] }
 0x348   : > { %v3381_v50 = vpop.f32.mrb[238].mxu0  ;;  %v3050_v63 = vpop.f32.mrb[238].mxu1 }
 0x349   : > { %v10301_v62 = vadd.f32 %v3381_v50, %v3185_v39  ;;  %v6764_v11 = vpop.f32.mrb[239].mxu0  ;;  %7109 = vmatmul.mubr.f32.gmra.mrb[88].mxu0 %v4075_v41  ;;  %v3186_v51 = vadd.f32 %v3050_v63, %v10907_v2  ;;  %v6612_v37 = vpop.f32.mrb[239].mxu1  ;;  %6957 = vmatmul.mubr.f32.gmra.mrb[88].mxu1 %v3624_v3  ;;  %v3629_v39 = vrot.slane %v10910_v12, 2  ;;  %v4081_v63 = vsel %vm4016_vm5, %v4078_v47, %v4080_v52 }
 0x34a   : > { %7111 = vmatprep.mubr.msk.f32.mxu0 %vm7409_vm0, %v10728_v46  ;;  %6959 = vmatprep.mubr.msk.f32.mxu1 %vm7409_vm0, %v10728_v46  ;;  %v4082_v11 = vrot.slane %v10910_v12, 3 }
 0x34b   : > { %v3630_v2 = vsel %vm3563_vm4, %v3627_v60, %v3629_v39 }
 0x34c   : > { %v3386_v59 = vpop.f32.mrb[240].mxu0  ;;  %v3055_v44 = vpop.f32.mrb[240].mxu1 }
 0x34d   : > { %v10312_v56 = vadd.f32 %v3386_v59, %v3186_v51  ;;  %v6767_v5 = vpop.f32.mrb[241].mxu0  ;;  %7112 = vmatmul.mubr.f32.gmra.mrb[90].mxu0 %v4077_v58  ;;  %v3187_v21 = vadd.f32 %v3055_v44, %v10909_v15  ;;  %v6615_v55 = vpop.f32.mrb[241].mxu1  ;;  %6960 = vmatmul.mubr.f32.gmra.mrb[90].mxu1 %v3626_v13  ;;  %v10912_v51 = vld [vmem:[#allocation28_spill] sm:$0xff]  ;;  %v10913_v59 = vld [vmem:[#allocation57_spill] sm:$0xff] }
 0x34e   : > { %7114 = vmatprep.mubr.msk.f32.mxu0 %vm7409_vm0, %v10728_v46  ;;  %6962 = vmatprep.mubr.msk.f32.mxu1 %vm7409_vm0, %v10728_v46  ;;  %v3631_v37 = vrot.slane %v10912_v51, 2  ;;  %v4083_v5 = vsel %vm4016_vm5, %v4080_v52, %v4082_v11  ;;  %v4084_v13 = vrot.slane %v10912_v51, 3  ;;  %v10914_v55 = vld [vmem:[#allocation29_spill] sm:$0xff] }
 0x34f   : > { %v4086_v12 = vrot.slane %v10914_v55, 3 }
 0x350   : > { %v3391_v0 = vpop.f32.mrb[242].mxu0  ;;  %v3060_v48 = vpop.f32.mrb[242].mxu1 }
 0x351   : > { %v10323_v8 = vadd.f32 %v3391_v0, %v3187_v21  ;;  %v6770_v1 = vpop.f32.mrb[243].mxu0  ;;  %7115 = vmatmul.mubr.f32.gmra.mrb[92].mxu0 %v4079_v35  ;;  %v3188_v50 = vadd.f32 %v3060_v48, %v10911_v14  ;;  %v6618_v41 = vpop.f32.mrb[243].mxu1  ;;  %6963 = vmatmul.mubr.f32.gmra.mrb[92].mxu1 %v3628_v54  ;;  %v3632_v21 = vsel %vm3563_vm4, %v3629_v39, %v3631_v37  ;;  %v3633_v0 = vrot.slane %v10914_v55, 2  ;;  %v10915_v35 = vld [vmem:[#allocation54_spill] sm:$0xff] }
 0x352   : > { %7117 = vmatprep.mubr.msk.f32.mxu0 %vm7409_vm0, %v10728_v46  ;;  %6965 = vmatprep.mubr.msk.f32.mxu1 %vm7409_vm0, %v10728_v46  ;;  %v4085_v54 = vsel %vm4016_vm5, %v4082_v11, %v4084_v13  ;;  %v4087_v51 = vsel %vm4016_vm5, %v4084_v13, %v4086_v12 }
 0x353   : > { %v3634_v41 = vsel %vm3563_vm4, %v3631_v37, %v3633_v0 }
 0x354   : > { %v3396_v40 = vpop.f32.mrb[244].mxu0  ;;  %v3065_v3 = vpop.f32.mrb[244].mxu1 }
 0x355   : > { %v10334_v33 = vadd.f32 %v3396_v40, %v3188_v50  ;;  %v6773_v45 = vpop.f32.mrb[245].mxu0  ;;  %7118 = vmatmul.mubr.f32.gmra.mrb[94].mxu0 %v4081_v63  ;;  %v3189_v58 = vadd.f32 %v3065_v3, %v10913_v59  ;;  %v6621_v44 = vpop.f32.mrb[245].mxu1  ;;  %6966 = vmatmul.mubr.f32.gmra.mrb[94].mxu1 %v3630_v2  ;;  %v10916_v40 = vld [vmem:[#allocation30_spill] sm:$0xff]  ;;  %v10917_v3 = vld [vmem:[#allocation59_spill] sm:$0xff] }
 0x356   : > { %7120 = vmatprep.mubr.msk.f32.mxu0 %vm7409_vm0, %v10728_v46  ;;  %6968 = vmatprep.mubr.msk.f32.mxu1 %vm7409_vm0, %v10728_v46  ;;  %v3635_v63 = vrot.slane %v10916_v40, 2  ;;  %v4088_v59 = vrot.slane %v10916_v40, 3 }
 0x358   : > { %v3401_v47 = vpop.f32.mrb[246].mxu0  ;;  %v3070_v10 = vpop.f32.mrb[246].mxu1 }
 0x359   : > { %v10345_v60 = vadd.f32 %v3401_v47, %v3189_v58  ;;  %v6776_v15 = vpop.f32.mrb[247].mxu0  ;;  %7121 = vmatmul.mubr.f32.gmra.mrb[96].mxu0 %v4083_v5  ;;  %v3190_v48 = vadd.f32 %v3070_v10, %v10915_v35  ;;  %v6624_v1 = vpop.f32.mrb[247].mxu1  ;;  %6969 = vmatmul.mubr.f32.gmra.mrb[96].mxu1 %v3632_v21  ;;  %v3636_v47 = vsel %vm3563_vm4, %v3633_v0, %v3635_v63  ;;  %v10918_v5 = vld [vmem:[#allocation13_spill] sm:$0xff] }
 0x35a   : > { %7123 = vmatprep.mubr.msk.f32.mxu0 %vm7409_vm0, %v10728_v46  ;;  %6971 = vmatprep.mubr.msk.f32.mxu1 %vm7409_vm0, %v10728_v46  ;;  %v3637_v10 = vrot.slane %v10918_v5, 2  ;;  %v10919_v15 = vld [vmem:[#allocation31_spill] sm:$0xff]  ;;  %v4089_v35 = vsel %vm4016_vm5, %v4086_v12, %v4088_v59 }
 0x35c   : > { %v3406_v52 = vpop.f32.mrb[248].mxu0  ;;  %v3075_v14 = vpop.f32.mrb[248].mxu1 }
 0x35d   : > { %v10356_v39 = vadd.f32 %v3406_v52, %v3190_v48  ;;  %v6779_v50 = vpop.f32.mrb[249].mxu0  ;;  %7124 = vmatmul.mubr.f32.gmra.mrb[98].mxu0 %v4085_v54  ;;  %v3191_v45 = vadd.f32 %v3075_v14, %v10917_v3  ;;  %v6627_v2 = vpop.f32.mrb[249].mxu1  ;;  %6972 = vmatmul.mubr.f32.gmra.mrb[98].mxu1 %v3634_v41  ;;  %v4090_v48 = vrot.slane %v10918_v5, 3  ;;  %v3638_v54 = vsel %vm3563_vm4, %v3635_v63, %v3637_v10  ;;  %v10920_v14 = vld [vmem:[#allocation56_spill] sm:$0xff] }
 0x35e   : > { %7126 = vmatprep.mubr.msk.f32.mxu0 %vm7409_vm0, %v10728_v46  ;;  %6974 = vmatprep.mubr.msk.f32.mxu1 %vm7409_vm0, %v10728_v46 }
 0x35f   : > { %v4091_v40 = vsel %vm4016_vm5, %v4088_v59, %v4090_v48 }
 0x360   : > { %v3411_v11 = vpop.f32.mrb[250].mxu0  ;;  %v3080_v58 = vpop.f32.mrb[250].mxu1 }
 0x361   : > { %v10367_v37 = vadd.f32 %v3411_v11, %v3191_v45  ;;  %v6782_v44 = vpop.f32.mrb[251].mxu0  ;;  %7127 = vmatmul.mubr.f32.gmra.mrb[100].mxu0 %v4087_v51  ;;  %v3192_v21 = vadd.f32 %v3080_v58, %v10919_v15  ;;  %v6630_v55 = vpop.f32.mrb[251].mxu1  ;;  %6975 = vmatmul.mubr.f32.gmra.mrb[100].mxu1 %v3636_v47  ;;  %v10921_v11 = vld [vmem:[#allocation36_spill] sm:$0xff]  ;;  %v10923_v58 = vld [vmem:[#allocation61_spill] sm:$0xff] }
 0x362   : > { %7129 = vmatprep.mubr.msk.f32.mxu0 %vm7409_vm0, %v10728_v46  ;;  %6977 = vmatprep.mubr.msk.f32.mxu1 %vm7409_vm0, %v10728_v46  ;;  %v10922_v63 = vrot.slane %v10921_v11, 2  ;;  %v10924_v5 = vrot.slane %v10921_v11, 3 }
 0x364   : > { %v3416_v13 = vpop.f32.mrb[252].mxu0  ;;  %v3085_v1 = vpop.f32.mrb[252].mxu1  ;;  %v3640_v51 = vsel %vm3563_vm4, %v3637_v10, %v10922_v63  ;;  %v4093_v15 = vsel %vm4016_vm5, %v4090_v48, %v10924_v5  ;;  %v10931_v5 = vld [vmem:[#allocation40_spill] sm:$0xff] }
 0x365   : > { %v10378_v0 = vadd.f32 %v3416_v13, %v3192_v21  ;;  %v6785_v52 = vpop.f32.mrb[253].mxu0  ;;  %7130 = vmatmul.mubr.f32.gmra.mrb[102].mxu0 %v4089_v35  ;;  %v3193_v50 = vadd.f32 %v3085_v1, %v10920_v14  ;;  %v6633_v41 = vpop.f32.mrb[253].mxu1  ;;  %6978 = vmatmul.mubr.f32.gmra.mrb[102].mxu1 %v3638_v54  ;;  %v10925_v13 = vld [vmem:[#allocation58_spill] sm:$0xff] }
 0x366   : > { %7132 = vmatprep.mubr.msk.f32.mxu0 %vm7409_vm0, %v10728_v46  ;;  %6980 = vmatprep.mubr.msk.f32.mxu1 %vm7409_vm0, %v10728_v46  ;;  %v10926_v52 = vld [vmem:[#allocation38_spill] sm:$0xff]  ;;  %v10927_v41 = vld [vmem:[#allocation39_spill] sm:$0xff] }
 0x368   : > { %v3421_v12 = vpop.f32.mrb[254].mxu0  ;;  %v3090_v3 = vpop.f32.mrb[254].mxu1 }
 0x369   : > { %v10387_v45 = vadd.f32 %v3421_v12, %v3193_v50  ;;  %v6788_v2 = vpop.f32.mrb[255].mxu0  ;;  %7133 = vmatmul.mubr.f32.gmra.mrb[104].mxu0 %v4091_v40  ;;  %v3194_v44 = vadd.f32 %v3090_v3, %v10923_v58  ;;  %v6636_v47 = vpop.f32.mrb[255].mxu1  ;;  %6981 = vmatmul.mubr.f32.gmra.mrb[104].mxu1 %v3640_v51  ;;  %v10928_v12 = vld [vmem:[#allocation60_spill] sm:$0xff] }
 0x36a   : > { %7135 = vmatprep.mubr.msk.f32.mxu0 %vm7409_vm0, %v10728_v46  ;;  %6983 = vmatprep.mubr.msk.f32.mxu1 %vm7409_vm0, %v10728_v46  ;;  %v10929_v2 = vld [vmem:[#allocation37_spill] sm:$0xff] }
 0x36c   : > { %v3426_v59 = vpop.f32.mrb[0].mxu0  ;;  %v3095_v21 = vpop.f32.mrb[0].mxu1 }
 0x36d   : > { %v10400_v55 = vadd.f32 %v3426_v59, %v3194_v44  ;;  %v6791_v10 = vpop.f32.mrb[1].mxu0  ;;  %7136 = vmatmul.mubr.f32.gmra.mrb[106].mxu0 %v4093_v15  ;;  %v3195_v35 = vadd.f32 %v3095_v21, %v10925_v13  ;;  %v6639_v1 = vpop.f32.mrb[1].mxu1  ;;  %6984 = vmatmul.mubr.f32.gmra.mrb[106].mxu1 %v10926_v52  ;;  %v10930_v44 = vld [vmem:[#allocation41_spill] sm:$0xff] }
 0x36e   : > { %7138 = vmatprep.mubr.msk.f32.mxu0 %vm7409_vm0, %v10728_v46  ;;  %6986 = vmatprep.mubr.msk.f32.mxu1 %vm7409_vm0, %v10728_v46 }
 0x370   : > { %v3431_v54 = vpop.f32.mrb[2].mxu0  ;;  %v3100_v14 = vpop.f32.mrb[2].mxu1 }
 0x371   : > { %v10408_v50 = vadd.f32 %v3431_v54, %v3195_v35  ;;  %v6794_v48 = vpop.f32.mrb[3].mxu0  ;;  %7139 = vmatmul.mubr.f32.gmra.mrb[108].mxu0 %v10927_v41  ;;  %v3196_v40 = vadd.f32 %v3100_v14, %v10928_v12  ;;  %v6642_v3 = vpop.f32.mrb[3].mxu1  ;;  %6987 = vmatmul.mubr.f32.gmra.mrb[108].mxu1 %v10929_v2  ;;  %v10932_v35 = vld [vmem:[#allocation42_spill] sm:$0xff] }
 0x372   : > { %7141 = vmatprep.mubr.msk.f32.mxu0 %vm7409_vm0, %v10728_v46  ;;  %6989 = vmatprep.mubr.msk.f32.mxu1 %vm7409_vm0, %v10728_v46 }
 0x374   : > { %v3436_v11 = vpop.f32.mrb[4].mxu0  ;;  %v3105_v63 = vpop.f32.mrb[4].mxu1 }
 0x375   : > { %v10417_v51 = vadd.f32 %v3436_v11, %v3196_v40  ;;  %v6797_v58 = vpop.f32.mrb[5].mxu0  ;;  %7142 = vmatmul.mubr.f32.gmra.mrb[110].mxu0 %v10930_v44  ;;  %v3197_v47 = vadd.f32 %v3105_v63, %v9958_v61  ;;  %v6645_v59 = vpop.f32.mrb[5].mxu1  ;;  %6990 = vmatmul.mubr.f32.gmra.mrb[110].mxu1 %v10931_v5 }
 0x376   : > { %7144 = vmatprep.mubr.msk.f32.mxu0 %vm7409_vm0, %v10728_v46 }
 0x378   : > { %v3441_v15 = vpop.f32.mrb[6].mxu0  ;;  %v3110_v21 = vpop.f32.mrb[6].mxu1 }
 0x379   : > { %v10424_v10 = vadd.f32 %v3441_v15, %v3197_v47  ;;  %v6800_v13 = vpop.f32.mrb[7].mxu0  ;;  %7145 = vmatmul.mubr.f32.gmra.mrb[112].mxu0 %v10932_v35  ;;  %v3198_v1 = vadd.f32 %v3110_v21, %v9970_v22  ;;  %v6648_v52 = vpop.f32.mrb[7].mxu1 }
 0x37c   : > { %v3446_v54 = vpop.f32.mrb[8].mxu0  ;;  %v3115_v14 = vpop.f32.mrb[8].mxu1 }
 0x37d   : > { %v10428_v48 = vadd.f32 %v3446_v54, %v3198_v1  ;;  %v6803_v61 = vpop.f32.mrb[9].mxu0  ;;  %v3199_v41 = vadd.f32 %v3115_v14, %v9981_v29  ;;  %v6651_v12 = vpop.f32.mrb[9].mxu1 }
 0x380   : > { %v3451_v40 = vpop.f32.mrb[10].mxu0  ;;  %v3120_v46 = vpop.f32.mrb[10].mxu1 }
 0x381   : > { %v10431_v3 = vadd.f32 %v3451_v40, %v3199_v41  ;;  %v6806_v2 = vpop.f32.mrb[11].mxu0  ;;  %v3200_v11 = vadd.f32 %v3120_v46, %v9992_v31  ;;  %v6654_v63 = vpop.f32.mrb[11].mxu1 }
 0x384   : > { %v3456_v58 = vpop.f32.mrb[12].mxu0  ;;  %v3125_v44 = vpop.f32.mrb[12].mxu1 }
 0x385   : > { %v10434_v22 = vadd.f32 %v3456_v58, %v3200_v11  ;;  %v6809_v47 = vpop.f32.mrb[13].mxu0  ;;  %v3201_v59 = vadd.f32 %v3125_v44, %v10003_v20  ;;  %v6657_v5 = vpop.f32.mrb[13].mxu1 }
 0x388   : > { %v3461_v15 = vpop.f32.mrb[14].mxu0  ;;  %v3130_v21 = vpop.f32.mrb[14].mxu1 }
 0x389   : > { %v10437_v29 = vadd.f32 %v3461_v15, %v3201_v59  ;;  %v6812_v13 = vpop.f32.mrb[15].mxu0  ;;  %v3202_v35 = vadd.f32 %v3130_v21, %v10014_v17  ;;  %v6660_v1 = vpop.f32.mrb[15].mxu1 }
 0x38c   : > { %v3466_v52 = vpop.f32.mrb[16].mxu0  ;;  %v3135_v54 = vpop.f32.mrb[16].mxu1 }
 0x38d   : > { %v10440_v31 = vadd.f32 %v3466_v52, %v3202_v35  ;;  %v6815_v14 = vpop.f32.mrb[17].mxu0  ;;  %v3203_v61 = vadd.f32 %v3135_v54, %v10025_v30  ;;  %v6663_v41 = vpop.f32.mrb[17].mxu1 }
 0x390   : > { %v3471_v12 = vpop.f32.mrb[18].mxu0  ;;  %v3140_v40 = vpop.f32.mrb[18].mxu1 }
 0x391   : > { %v10443_v20 = vadd.f32 %v3471_v12, %v3203_v61  ;;  %v6818_v46 = vpop.f32.mrb[19].mxu0  ;;  %v3204_v2 = vadd.f32 %v3140_v40, %v10036_v16  ;;  %v6666_v11 = vpop.f32.mrb[19].mxu1 }
 0x394   : > { %v3476_v63 = vpop.f32.mrb[20].mxu0  ;;  %v3145_v58 = vpop.f32.mrb[20].mxu1 }
 0x395   : > { %v10446_v17 = vadd.f32 %v3476_v63, %v3204_v2  ;;  %v6821_v44 = vpop.f32.mrb[21].mxu0  ;;  %v3205_v47 = vadd.f32 %v3145_v58, %v10047_v34  ;;  %v6669_v59 = vpop.f32.mrb[21].mxu1 }
 0x398   : > { %v3481_v5 = vpop.f32.mrb[22].mxu0  ;;  %v3150_v15 = vpop.f32.mrb[22].mxu1 }
 0x399   : > { %v10449_v30 = vadd.f32 %v3481_v5, %v3205_v47  ;;  %v6824_v21 = vpop.f32.mrb[23].mxu0  ;;  %v3206_v13 = vadd.f32 %v3150_v15, %v10058_v9  ;;  %v6672_v35 = vpop.f32.mrb[23].mxu1 }
 0x39c   : > { %v3486_v1 = vpop.f32.mrb[24].mxu0  ;;  %v3155_v52 = vpop.f32.mrb[24].mxu1 }
 0x39d   : > { %v10452_v16 = vadd.f32 %v3486_v1, %v3206_v13  ;;  %v6827_v54 = vpop.f32.mrb[25].mxu0  ;;  %v3207_v14 = vadd.f32 %v3155_v52, %v10069_v4  ;;  %v6675_v61 = vpop.f32.mrb[25].mxu1 }
 0x3a0   : > { %v3491_v41 = vpop.f32.mrb[26].mxu0  ;;  %v3160_v12 = vpop.f32.mrb[26].mxu1 }
 0x3a1   : > { %v10455_v34 = vadd.f32 %v3491_v41, %v3207_v14  ;;  %v6830_v40 = vpop.f32.mrb[27].mxu0  ;;  %v3208_v46 = vadd.f32 %v3160_v12, %v10080_v24  ;;  %v6678_v2 = vpop.f32.mrb[27].mxu1  ;;  %v10467_v24 = vld [vmem:[%s10599_s2] ss:$0 sm:$0xff] }
 0x3a2   : > { %v4585_v2 = vpop.permute.xlu1 %4584 }
 0x3a4   : > { %v3496_v11 = vpop.f32.mrb[28].mxu0  ;;  %v3165_v63 = vpop.f32.mrb[28].mxu1 }
 0x3a5   : > { %v10458_v9 = vadd.f32 %v3496_v11, %v3208_v46  ;;  %v6833_v58 = vpop.f32.mrb[29].mxu0  ;;  %v3209_v44 = vadd.f32 %v3165_v63, %v10091_v42  ;;  %v6681_v47 = vpop.f32.mrb[29].mxu1 }
 0x3a8   : > { %v3501_v59 = vpop.f32.mrb[30].mxu0  ;;  %v3754_v4 = vpop.f32.mrb[30].mxu1 }
 0x3a9   : > { %v10461_v5 = vadd.f32 %v3501_v59, %v3209_v44  ;;  %v6836_v15 = vpop.f32.mrb[31].mxu0  ;;  %v3958_v21 = vadd.f32 %v3754_v4, %v10102_v18  ;;  %v6871_v13 = vpop.f32.mrb[31].mxu1 }
 0x3ac   : > { %v4207_v35 = vpop.f32.mrb[32].mxu0  ;;  %v3759_v1 = vpop.f32.mrb[32].mxu1 }
 0x3ad   : > { %v4411_v52 = vadd.f32 %v4207_v35, %v3958_v21  ;;  %v7026_v54 = vpop.f32.mrb[33].mxu0  ;;  %v3959_v42 = vadd.f32 %v3759_v1, %v10113_v28  ;;  %v6874_v14 = vpop.f32.mrb[33].mxu1 }
 0x3ae   : > { %v4590_v21 = vpop.permute.xlu0 %4589 }
 0x3af   : > { %v4459_v61 = vadd.f32 %v10467_v24, %v4411_v52 }
 0x3b0   : > { %v4212_v41 = vpop.f32.mrb[34].mxu0  ;;  %v3764_v40 = vpop.f32.mrb[34].mxu1 }
 0x3b1   : > { %v4500_v12 = vmax.f32 %v4459_v61, 0.0  ;;  %v4412_v18 = vadd.f32 %v4212_v41, %v3959_v42  ;;  %v7029_v46 = vpop.f32.mrb[35].mxu0  ;;  %v3960_v11 = vadd.f32 %v3764_v40, %v10123_v19  ;;  %v6877_v63 = vpop.f32.mrb[35].mxu1 }
 0x3b3   : > { %v4787_v58 = vmul.f32 %v4585_v2, %v4500_v12  ;;  %v4460_v44 = vadd.f32 %v10467_v24, %v4412_v18  ;;  %v4595_v18 = vpop.permute.xlu1 %4594 }
 0x3b4   : > { %v4217_v47 = vpop.f32.mrb[36].mxu0  ;;  %v3769_v28 = vpop.f32.mrb[36].mxu1 }
 0x3b5   : > { %4967 = vst [vmem:[%s10213_s30 + $0x20] sm:$0xff] %v4787_v58  ;;  %v4501_v59 = vmax.f32 %v4460_v44, 0.0  ;;  %v4413_v4 = vadd.f32 %v4217_v47, %v3960_v11  ;;  %v7032_v15 = vpop.f32.mrb[37].mxu0  ;;  %v3961_v13 = vadd.f32 %v3769_v28, %v10135_v26  ;;  %v6880_v35 = vpop.f32.mrb[37].mxu1  ;;  %v4875_v54 = vmul.f32 %v4787_v58, %v4787_v58 }
 0x3b7   : > { %v4788_v1 = vmul.f32 %v4590_v21, %v4501_v59  ;;  %v4461_v52 = vadd.f32 %v10467_v24, %v4413_v4  ;;  %v4600_v21 = vpop.permute.xlu0 %4599 }
 0x3b8   : > { %v4222_v19 = vpop.f32.mrb[38].mxu0  ;;  %v3774_v41 = vpop.f32.mrb[38].mxu1 }
 0x3b9   : > { %v4828_v42 = vadd.f32 %v4788_v1, %v4787_v58  ;;  %v4876_v14 = vmul.f32 %v4788_v1, %v4788_v1  ;;  %4968 = vst [vmem:[%s10213_s30 + $0x28] sm:$0xff] %v4788_v1  ;;  %v4502_v61 = vmax.f32 %v4461_v52, 0.0  ;;  %v4414_v12 = vadd.f32 %v4222_v19, %v3961_v13  ;;  %v7035_v40 = vpop.f32.mrb[39].mxu0  ;;  %v6883_v2 = vpop.f32.mrb[39].mxu1 }
 0x3ba   : > { %v3962_v46 = vadd.f32 %v3774_v41, %v10146_v23  ;;  %v4605_v40 = vpop.permute.xlu1 %4604 }
 0x3bb   : > { %v4916_v11 = vadd.f32 %v4876_v14, %v4875_v54  ;;  %v4789_v26 = vmul.f32 %v4595_v18, %v4502_v61  ;;  %v4462_v63 = vadd.f32 %v10467_v24, %v4414_v12 }
 0x3bc   : > { %v4227_v44 = vpop.f32.mrb[40].mxu0  ;;  %v3779_v28 = vpop.f32.mrb[40].mxu1 }
 0x3bd   : > { %v4829_v47 = vadd.f32 %v4828_v42, %v4789_v26  ;;  %v4877_v59 = vmul.f32 %v4789_v26, %v4789_v26  ;;  %4969 = vst [vmem:[%s10213_s30 + $0x30] sm:$0xff] %v4789_v26  ;;  %v4503_v58 = vmax.f32 %v4462_v63, 0.0  ;;  %v4415_v4 = vadd.f32 %v4227_v44, %v3962_v46  ;;  %v7038_v15 = vpop.f32.mrb[41].mxu0  ;;  %v6886_v35 = vpop.f32.mrb[41].mxu1 }
 0x3be   : > { %v3963_v13 = vadd.f32 %v3779_v28, %v10157_v38 }
 0x3bf   : > { %v4917_v1 = vadd.f32 %v4916_v11, %v4877_v59  ;;  %v4790_v23 = vmul.f32 %v4600_v21, %v4503_v58  ;;  %v4463_v52 = vadd.f32 %v10467_v24, %v4415_v4  ;;  %v4610_v4 = vpop.permute.xlu0 %4609 }
 0x3c0   : > { %v4232_v54 = vpop.f32.mrb[42].mxu0  ;;  %v3784_v61 = vpop.f32.mrb[42].mxu1 }
 0x3c1   : > { %v4830_v19 = vadd.f32 %v4829_v47, %v4790_v23  ;;  %v4878_v14 = vmul.f32 %v4790_v23, %v4790_v23  ;;  %4970 = vst [vmem:[%s10213_s30 + $0x38] sm:$0xff] %v4790_v23  ;;  %v4504_v42 = vmax.f32 %v4463_v52, 0.0  ;;  %v4416_v41 = vadd.f32 %v4232_v54, %v3963_v13  ;;  %v7041_v12 = vpop.f32.mrb[43].mxu0  ;;  %v6889_v46 = vpop.f32.mrb[43].mxu1 }
 0x3c2   : > { %v3964_v18 = vadd.f32 %v3784_v61, %v10168_v53  ;;  %v4615_v61 = vpop.permute.xlu1 %4614 }
 0x3c3   : > { %v4918_v2 = vadd.f32 %v4917_v1, %v4878_v14  ;;  %v4791_v38 = vmul.f32 %v4605_v40, %v4504_v42  ;;  %v4464_v11 = vadd.f32 %v10467_v24, %v4416_v41 }
 0x3c4   : > { %v4237_v26 = vpop.f32.mrb[44].mxu0  ;;  %v3789_v59 = vpop.f32.mrb[44].mxu1 }
 0x3c5   : > { %v4831_v63 = vadd.f32 %v4830_v19, %v4791_v38  ;;  %v4879_v44 = vmul.f32 %v4791_v38, %v4791_v38  ;;  %4971 = vst [vmem:[%s10213_s30 + $0x40] sm:$0xff] %v4791_v38  ;;  %v4505_v47 = vmax.f32 %v4464_v11, 0.0  ;;  %v4417_v58 = vadd.f32 %v4237_v26, %v3964_v18  ;;  %v7044_v28 = vpop.f32.mrb[45].mxu0  ;;  %v6892_v21 = vpop.f32.mrb[45].mxu1 }
 0x3c6   : > { %v3965_v15 = vadd.f32 %v3789_v59, %v10179_v32 }
 0x3c7   : > { %v4919_v13 = vadd.f32 %v4918_v2, %v4879_v44  ;;  %v4792_v53 = vmul.f32 %v4610_v4, %v4505_v47  ;;  %v4465_v35 = vadd.f32 %v10467_v24, %v4417_v58  ;;  %v4620_v47 = vpop.permute.xlu0 %4619 }
 0x3c8   : > { %v4242_v1 = vpop.f32.mrb[46].mxu0  ;;  %v3794_v19 = vpop.f32.mrb[46].mxu1 }
 0x3c9   : > { %v4832_v23 = vadd.f32 %v4831_v63, %v4792_v53  ;;  %v4880_v52 = vmul.f32 %v4792_v53, %v4792_v53  ;;  %4972 = vst [vmem:[%s10213_s30 + $0x48] sm:$0xff] %v4792_v53  ;;  %v4506_v54 = vmax.f32 %v4465_v35, 0.0  ;;  %v4418_v14 = vadd.f32 %v4242_v1, %v3965_v15  ;;  %v7047_v42 = vpop.f32.mrb[47].mxu0  ;;  %v6895_v12 = vpop.f32.mrb[47].mxu1 }
 0x3ca   : > { %v3966_v41 = vadd.f32 %v3794_v19, %v10190_v36 }
 0x3cb   : > { %v4920_v40 = vadd.f32 %v4919_v13, %v4880_v52  ;;  %v4793_v32 = vmul.f32 %v4615_v61, %v4506_v54  ;;  %v4466_v18 = vadd.f32 %v10467_v24, %v4418_v14  ;;  %v4625_v52 = vpop.permute.xlu1 %4624 }
 0x3cc   : > { %v4247_v46 = vpop.f32.mrb[48].mxu0  ;;  %v3799_v26 = vpop.f32.mrb[48].mxu1 }
 0x3cd   : > { %v4833_v2 = vadd.f32 %v4832_v23, %v4793_v32  ;;  %v4881_v38 = vmul.f32 %v4793_v32, %v4793_v32  ;;  %4973 = vst [vmem:[%s10213_s30 + $0x50] sm:$0xff] %v4793_v32  ;;  %v4507_v11 = vmax.f32 %v4466_v18, 0.0  ;;  %v4419_v63 = vadd.f32 %v4247_v46, %v3966_v41  ;;  %v7050_v44 = vpop.f32.mrb[49].mxu0  ;;  %v6898_v58 = vpop.f32.mrb[49].mxu1 }
 0x3ce   : > { %v3967_v59 = vadd.f32 %v3799_v26, %v10201_v27 }
 0x3cf   : > { %v4921_v28 = vadd.f32 %v4920_v40, %v4881_v38  ;;  %v4794_v36 = vmul.f32 %v4620_v47, %v4507_v11  ;;  %v4467_v4 = vadd.f32 %v10467_v24, %v4419_v63 }
 0x3d0   : > { %v4252_v15 = vpop.f32.mrb[50].mxu0  ;;  %v3804_v35 = vpop.f32.mrb[50].mxu1 }
 0x3d1   : > { %v4834_v21 = vadd.f32 %v4833_v2, %v4794_v36  ;;  %v4882_v13 = vmul.f32 %v4794_v36, %v4794_v36  ;;  %4974 = vst [vmem:[%s10213_s30 + $0x58] sm:$0xff] %v4794_v36  ;;  %v4508_v53 = vmax.f32 %v4467_v4, 0.0  ;;  %v4420_v1 = vadd.f32 %v4252_v15, %v3967_v59  ;;  %v7053_v23 = vpop.f32.mrb[51].mxu0  ;;  %v6901_v19 = vpop.f32.mrb[51].mxu1 }
 0x3d2   : > { %v3968_v54 = vadd.f32 %v3804_v35, %v10235_v7  ;;  %v4630_v2 = vpop.permute.xlu0 %4629  ;;  %v4635_v15 = vpop.permute.xlu1 %4634 }
 0x3d3   : > { %v4922_v14 = vadd.f32 %v4921_v28, %v4882_v13  ;;  %v4795_v27 = vmul.f32 %v4625_v52, %v4508_v53  ;;  %v4468_v42 = vadd.f32 %v10467_v24, %v4420_v1 }
 0x3d4   : > { %v4257_v61 = vpop.f32.mrb[52].mxu0  ;;  %v3809_v32 = vpop.f32.mrb[52].mxu1 }
 0x3d5   : > { %v4835_v41 = vadd.f32 %v4834_v21, %v4795_v27  ;;  %v4883_v12 = vmul.f32 %v4795_v27, %v4795_v27  ;;  %4975 = vst [vmem:[%s10213_s30 + $0x60] sm:$0xff] %v4795_v27  ;;  %v4509_v40 = vmax.f32 %v4468_v42, 0.0  ;;  %v4421_v18 = vadd.f32 %v4257_v61, %v3968_v54  ;;  %v7056_v46 = vpop.f32.mrb[53].mxu0  ;;  %v6904_v11 = vpop.f32.mrb[53].mxu1 }
 0x3d6   : > { %v3969_v38 = vadd.f32 %v3809_v32, %v10246_v49  ;;  %v4640_v42 = vpop.permute.xlu0 %4639 }
 0x3d7   : > { %v4923_v26 = vadd.f32 %v4922_v14, %v4883_v12  ;;  %v4796_v7 = vmul.f32 %v4630_v2, %v4509_v40  ;;  %v4469_v63 = vadd.f32 %v10467_v24, %v4421_v18 }
 0x3d8   : > { %v4262_v44 = vpop.f32.mrb[54].mxu0  ;;  %v3814_v28 = vpop.f32.mrb[54].mxu1 }
 0x3d9   : > { %v4836_v47 = vadd.f32 %v4835_v41, %v4796_v7  ;;  %v4884_v59 = vmul.f32 %v4796_v7, %v4796_v7  ;;  %4976 = vst [vmem:[%s10213_s30 + $0x68] sm:$0xff] %v4796_v7  ;;  %v4510_v58 = vmax.f32 %v4469_v63, 0.0  ;;  %v4422_v36 = vadd.f32 %v4262_v44, %v3969_v38  ;;  %v7059_v4 = vpop.f32.mrb[55].mxu0  ;;  %v6907_v13 = vpop.f32.mrb[55].mxu1 }
 0x3da   : > { %v3970_v21 = vadd.f32 %v3814_v28, %v10257_v57  ;;  %v4645_v7 = vpop.permute.xlu1 %4644 }
 0x3db   : > { %v4924_v53 = vadd.f32 %v4923_v26, %v4884_v59  ;;  %v4797_v49 = vmul.f32 %v4635_v15, %v4510_v58  ;;  %v4470_v35 = vadd.f32 %v10467_v24, %v4422_v36 }
 0x3dc   : > { %v4267_v1 = vpop.f32.mrb[56].mxu0  ;;  %v3819_v19 = vpop.f32.mrb[56].mxu1 }
 0x3dd   : > { %v4837_v23 = vadd.f32 %v4836_v47, %v4797_v49  ;;  %v4885_v52 = vmul.f32 %v4797_v49, %v4797_v49  ;;  %4977 = vst [vmem:[%s10213_s30 + $0x70] sm:$0xff] %v4797_v49  ;;  %v4511_v54 = vmax.f32 %v4470_v35, 0.0  ;;  %v4423_v14 = vadd.f32 %v4267_v1, %v3970_v21  ;;  %v7062_v27 = vpop.f32.mrb[57].mxu0  ;;  %v6910_v41 = vpop.f32.mrb[57].mxu1 }
 0x3de   : > { %v3971_v61 = vadd.f32 %v3819_v19, %v10268_v25  ;;  %v4655_v41 = vpop.permute.xlu1 %4654 }
 0x3df   : > { %v4925_v12 = vadd.f32 %v4924_v53, %v4885_v52  ;;  %v4798_v57 = vmul.f32 %v4640_v42, %v4511_v54  ;;  %v4471_v40 = vadd.f32 %v10467_v24, %v4423_v14  ;;  %v4650_v53 = vpop.permute.xlu0 %4649 }
 0x3e0   : > { %v4272_v32 = vpop.f32.mrb[58].mxu0  ;;  %v3824_v38 = vpop.f32.mrb[58].mxu1 }
 0x3e1   : > { %v4838_v18 = vadd.f32 %v4837_v23, %v4798_v57  ;;  %v4886_v46 = vmul.f32 %v4798_v57, %v4798_v57  ;;  %4978 = vst [vmem:[%s10213_s30 + $0x78] sm:$0xff] %v4798_v57  ;;  %v4512_v2 = vmax.f32 %v4471_v40, 0.0  ;;  %v4424_v11 = vadd.f32 %v4272_v32, %v3971_v61  ;;  %v7065_v26 = vpop.f32.mrb[59].mxu0  ;;  %v6913_v44 = vpop.f32.mrb[59].mxu1 }
 0x3e2   : > { %v3972_v63 = vadd.f32 %v3824_v38, %v10279_v43 }
 0x3e3   : > { %v4926_v47 = vadd.f32 %v4925_v12, %v4886_v46  ;;  %v4799_v25 = vmul.f32 %v4645_v7, %v4512_v2  ;;  %v4472_v59 = vadd.f32 %v10467_v24, %v4424_v11 }
 0x3e4   : > { %v4277_v58 = vpop.f32.mrb[60].mxu0  ;;  %v3829_v15 = vpop.f32.mrb[60].mxu1 }
 0x3e5   : > { %v4839_v28 = vadd.f32 %v4838_v18, %v4799_v25  ;;  %v4887_v36 = vmul.f32 %v4799_v25, %v4799_v25  ;;  %4979 = vst [vmem:[%s10213_s30 + $0x80] sm:$0xff] %v4799_v25  ;;  %v4513_v4 = vmax.f32 %v4472_v59, 0.0  ;;  %v4425_v21 = vadd.f32 %v4277_v58, %v3972_v63  ;;  %v7068_v13 = vpop.f32.mrb[61].mxu0  ;;  %v6916_v35 = vpop.f32.mrb[61].mxu1 }
 0x3e6   : > { %v3973_v49 = vadd.f32 %v3829_v15, %v10290_v6  ;;  %v4660_v63 = vpop.permute.xlu0 %4659 }
 0x3e7   : > { %v4927_v1 = vadd.f32 %v4926_v47, %v4887_v36  ;;  %v4800_v43 = vmul.f32 %v4650_v53, %v4513_v4  ;;  %v4473_v23 = vadd.f32 %v10467_v24, %v4425_v21  ;;  %v4665_v53 = vpop.permute.xlu1 %4664 }
 0x3e8   : > { %v4282_v52 = vpop.f32.mrb[62].mxu0  ;;  %v3834_v27 = vpop.f32.mrb[62].mxu1 }
 0x3e9   : > { %v4840_v54 = vadd.f32 %v4839_v28, %v4800_v43  ;;  %v4888_v19 = vmul.f32 %v4800_v43, %v4800_v43  ;;  %4980 = vst [vmem:[%s10213_s30 + $0x88] sm:$0xff] %v4800_v43  ;;  %v4514_v14 = vmax.f32 %v4473_v23, 0.0  ;;  %v4426_v42 = vadd.f32 %v4282_v52, %v3973_v49  ;;  %v7071_v61 = vpop.f32.mrb[63].mxu0  ;;  %v6919_v57 = vpop.f32.mrb[63].mxu1 }
 0x3ea   : > { %v3974_v12 = vadd.f32 %v3834_v27, %v10301_v62  ;;  %v4670_v61 = vpop.permute.xlu0 %4669 }
 0x3eb   : > { %v4928_v40 = vadd.f32 %v4927_v1, %v4888_v19  ;;  %v4801_v6 = vmul.f32 %v4655_v41, %v4514_v14  ;;  %v4474_v32 = vadd.f32 %v10467_v24, %v4426_v42 }
 0x3ec   : > { %v4287_v18 = vpop.f32.mrb[64].mxu0  ;;  %v3839_v11 = vpop.f32.mrb[64].mxu1 }
 0x3ed   : > { %v4841_v46 = vadd.f32 %v4840_v54, %v4801_v6  ;;  %v4889_v2 = vmul.f32 %v4801_v6, %v4801_v6  ;;  %4981 = vst [vmem:[%s10213_s30 + $0x90] sm:$0xff] %v4801_v6  ;;  %v4515_v38 = vmax.f32 %v4474_v32, 0.0  ;;  %v4427_v26 = vadd.f32 %v4287_v18, %v3974_v12  ;;  %v7074_v7 = vpop.f32.mrb[65].mxu0  ;;  %v6922_v47 = vpop.f32.mrb[65].mxu1 }
 0x3ee   : > { %v3975_v44 = vadd.f32 %v3839_v11, %v10312_v56 }
 0x3ef   : > { %v4929_v25 = vadd.f32 %v4928_v40, %v4889_v2  ;;  %v4802_v62 = vmul.f32 %v4660_v63, %v4515_v38  ;;  %v4475_v59 = vadd.f32 %v10467_v24, %v4427_v26  ;;  %v4675_v26 = vpop.permute.xlu1 %4674 }
 0x3f0   : > { %v4292_v58 = vpop.f32.mrb[66].mxu0  ;;  %v3844_v15 = vpop.f32.mrb[66].mxu1 }
 0x3f1   : > { %v4842_v28 = vadd.f32 %v4841_v46, %v4802_v62  ;;  %v4890_v36 = vmul.f32 %v4802_v62, %v4802_v62  ;;  %4982 = vst [vmem:[%s10213_s30 + $0x98] sm:$0xff] %v4802_v62  ;;  %v4516_v4 = vmax.f32 %v4475_v59, 0.0  ;;  %v4428_v21 = vadd.f32 %v4292_v58, %v3975_v44  ;;  %v7077_v13 = vpop.f32.mrb[67].mxu0  ;;  %v6925_v35 = vpop.f32.mrb[67].mxu1 }
 0x3f2   : > { %v3976_v49 = vadd.f32 %v3844_v15, %v10323_v8  ;;  %v4680_v15 = vpop.permute.xlu0 %4679 }
 0x3f3   : > { %v4930_v1 = vadd.f32 %v4929_v25, %v4890_v36  ;;  %v4803_v56 = vmul.f32 %v4665_v53, %v4516_v4  ;;  %v4476_v43 = vadd.f32 %v10467_v24, %v4428_v21 }
 0x3f4   : > { %v4297_v23 = vpop.f32.mrb[68].mxu0  ;;  %v3849_v14 = vpop.f32.mrb[68].mxu1 }
 0x3f5   : > { %v4843_v52 = vadd.f32 %v4842_v28, %v4803_v56  ;;  %v4891_v54 = vmul.f32 %v4803_v56, %v4803_v56  ;;  %4983 = vst [vmem:[%s10213_s30 + $0xa0] sm:$0xff] %v4803_v56  ;;  %v4517_v19 = vmax.f32 %v4476_v43, 0.0  ;;  %v4429_v27 = vadd.f32 %v4297_v23, %v3976_v49  ;;  %v7080_v42 = vpop.f32.mrb[69].mxu0  ;;  %v6928_v12 = vpop.f32.mrb[69].mxu1 }
 0x3f6   : > { %v3977_v41 = vadd.f32 %v3849_v14, %v10334_v33 }
 0x3f7   : > { %v4931_v57 = vadd.f32 %v4930_v1, %v4891_v54  ;;  %v4804_v8 = vmul.f32 %v4670_v61, %v4517_v19  ;;  %v4477_v40 = vadd.f32 %v10467_v24, %v4429_v27  ;;  %v4685_v19 = vpop.permute.xlu1 %4684 }
 0x3f8   : > { %v4302_v6 = vpop.f32.mrb[70].mxu0  ;;  %v3854_v2 = vpop.f32.mrb[70].mxu1 }
 0x3f9   : > { %v4844_v32 = vadd.f32 %v4843_v52, %v4804_v8  ;;  %v4892_v18 = vmul.f32 %v4804_v8, %v4804_v8  ;;  %4984 = vst [vmem:[%s10213_s30 + $0xa8] sm:$0xff] %v4804_v8  ;;  %v4518_v46 = vmax.f32 %v4477_v40, 0.0  ;;  %v4430_v38 = vadd.f32 %v4302_v6, %v3977_v41  ;;  %v7083_v11 = vpop.f32.mrb[71].mxu0  ;;  %v6931_v63 = vpop.f32.mrb[71].mxu1 }
 0x3fa   : > { %v3978_v7 = vadd.f32 %v3854_v2, %v10345_v60 }
 0x3fb   : > { %v4932_v44 = vadd.f32 %v4931_v57, %v4892_v18  ;;  %v4805_v33 = vmul.f32 %v4675_v26, %v4518_v46  ;;  %v4478_v47 = vadd.f32 %v10467_v24, %v4430_v38  ;;  %v4690_v18 = vpop.permute.xlu0 %4689 }
 0x3fc   : > { %v4307_v25 = vpop.f32.mrb[72].mxu0  ;;  %v3859_v28 = vpop.f32.mrb[72].mxu1 }
 0x3fd   : > { %v4845_v62 = vadd.f32 %v4844_v32, %v4805_v33  ;;  %v4893_v59 = vmul.f32 %v4805_v33, %v4805_v33  ;;  %4985 = vst [vmem:[%s10213_s30 + $0xb0] sm:$0xff] %v4805_v33  ;;  %v4519_v58 = vmax.f32 %v4478_v47, 0.0  ;;  %v4431_v36 = vadd.f32 %v4307_v25, %v3978_v7  ;;  %v7086_v4 = vpop.f32.mrb[73].mxu0  ;;  %v6934_v13 = vpop.f32.mrb[73].mxu1 }
 0x3fe   : > { %v3979_v21 = vadd.f32 %v3859_v28, %v10356_v39 }
 0x3ff   : > { %v4933_v53 = vadd.f32 %v4932_v44, %v4893_v59  ;;  %v4806_v60 = vmul.f32 %v4680_v15, %v4519_v58  ;;  %v4479_v49 = vadd.f32 %v10467_v24, %v4431_v36 }
 0x400   : > { %v4312_v35 = vpop.f32.mrb[74].mxu0  ;;  %v3864_v23 = vpop.f32.mrb[74].mxu1 }
 0x401   : > { %v4846_v1 = vadd.f32 %v4845_v62, %v4806_v60  ;;  %v4894_v56 = vmul.f32 %v4806_v60, %v4806_v60  ;;  %4986 = vst [vmem:[%s10213_s30 + $0xb8] sm:$0xff] %v4806_v60  ;;  %v4520_v43 = vmax.f32 %v4479_v49, 0.0  ;;  %v4432_v52 = vadd.f32 %v4312_v35, %v3979_v21  ;;  %v7089_v54 = vpop.f32.mrb[75].mxu0  ;;  %v6937_v27 = vpop.f32.mrb[75].mxu1 }
 0x402   : > { %v3980_v14 = vadd.f32 %v3864_v23, %v10367_v37  ;;  %v4695_v62 = vpop.permute.xlu1 %4694  ;;  %v4700_v35 = vpop.permute.xlu0 %4699 }
 0x403   : > { %v4934_v42 = vadd.f32 %v4933_v53, %v4894_v56  ;;  %v4807_v39 = vmul.f32 %v4685_v19, %v4520_v43  ;;  %v4480_v61 = vadd.f32 %v10467_v24, %v4432_v52 }
 0x404   : > { %v4317_v41 = vpop.f32.mrb[76].mxu0  ;;  %v3869_v40 = vpop.f32.mrb[76].mxu1 }
 0x405   : > { %v4847_v12 = vadd.f32 %v4846_v1, %v4807_v39  ;;  %v4895_v57 = vmul.f32 %v4807_v39, %v4807_v39  ;;  %4987 = vst [vmem:[%s10213_s30 + $0xc0] sm:$0xff] %v4807_v39  ;;  %v4521_v8 = vmax.f32 %v4480_v61, 0.0  ;;  %v4433_v6 = vadd.f32 %v4317_v41, %v3980_v14  ;;  %v7092_v32 = vpop.f32.mrb[77].mxu0  ;;  %v6940_v2 = vpop.f32.mrb[77].mxu1 }
 0x406   : > { %v3981_v46 = vadd.f32 %v3869_v40, %v10378_v0  ;;  %v4705_v61 = vpop.permute.xlu1 %4704 }
 0x407   : > { %v4935_v38 = vadd.f32 %v4934_v42, %v4895_v57  ;;  %v4808_v37 = vmul.f32 %v4690_v18, %v4521_v8  ;;  %v4481_v11 = vadd.f32 %v10467_v24, %v4433_v6 }
 0x408   : > { %v4322_v26 = vpop.f32.mrb[78].mxu0  ;;  %v3874_v33 = vpop.f32.mrb[78].mxu1 }
 0x409   : > { %v4848_v7 = vadd.f32 %v4847_v12, %v4808_v37  ;;  %v4896_v63 = vmul.f32 %v4808_v37, %v4808_v37  ;;  %4988 = vst [vmem:[%s10213_s30 + $0xc8] sm:$0xff] %v4808_v37  ;;  %v4522_v44 = vmax.f32 %v4481_v11, 0.0  ;;  %v4434_v47 = vadd.f32 %v4322_v26, %v3981_v46  ;;  %v7095_v25 = vpop.f32.mrb[79].mxu0  ;;  %v6943_v58 = vpop.f32.mrb[79].mxu1 }
 0x40a   : > { %v3982_v59 = vadd.f32 %v3874_v33, %v10387_v45  ;;  %v4710_v37 = vpop.permute.xlu0 %4709 }
 0x40b   : > { %v4936_v28 = vadd.f32 %v4935_v38, %v4896_v63  ;;  %v4809_v0 = vmul.f32 %v4695_v62, %v4522_v44  ;;  %v4482_v36 = vadd.f32 %v10467_v24, %v4434_v47 }
 0x40c   : > { %v4327_v4 = vpop.f32.mrb[80].mxu0  ;;  %v3879_v53 = vpop.f32.mrb[80].mxu1 }
 0x40d   : > { %v4849_v15 = vadd.f32 %v4848_v7, %v4809_v0  ;;  %v4897_v21 = vmul.f32 %v4809_v0, %v4809_v0  ;;  %4989 = vst [vmem:[%s10213_s30 + $0xd0] sm:$0xff] %v4809_v0  ;;  %v4523_v13 = vmax.f32 %v4482_v36, 0.0  ;;  %v4435_v60 = vadd.f32 %v4327_v4, %v3982_v59  ;;  %v7098_v49 = vpop.f32.mrb[81].mxu0  ;;  %v6946_v56 = vpop.f32.mrb[81].mxu1 }
 0x40e   : > { %v3983_v1 = vadd.f32 %v3879_v53, %v10400_v55  ;;  %v4720_v56 = vpop.permute.xlu0 %4719 }
 0x40f   : > { %v4937_v43 = vadd.f32 %v4936_v28, %v4897_v21  ;;  %v4810_v45 = vmul.f32 %v4700_v35, %v4523_v13  ;;  %v4483_v23 = vadd.f32 %v10467_v24, %v4435_v60  ;;  %v4715_v28 = vpop.permute.xlu1 %4714 }
 0x410   : > { %v4332_v52 = vpop.f32.mrb[82].mxu0  ;;  %v3884_v27 = vpop.f32.mrb[82].mxu1 }
 0x411   : > { %v4850_v54 = vadd.f32 %v4849_v15, %v4810_v45  ;;  %v4898_v19 = vmul.f32 %v4810_v45, %v4810_v45  ;;  %4990 = vst [vmem:[%s10213_s30 + $0xd8] sm:$0xff] %v4810_v45  ;;  %v4524_v14 = vmax.f32 %v4483_v23, 0.0  ;;  %v4436_v42 = vadd.f32 %v4332_v52, %v3983_v1  ;;  %v7101_v39 = vpop.f32.mrb[83].mxu0  ;;  %v6949_v12 = vpop.f32.mrb[83].mxu1 }
 0x412   : > { %v3984_v41 = vadd.f32 %v3884_v27, %v10408_v50 }
 0x413   : > { %v4938_v57 = vadd.f32 %v4937_v43, %v4898_v19  ;;  %v4811_v55 = vmul.f32 %v4705_v61, %v4524_v14  ;;  %v4484_v8 = vadd.f32 %v10467_v24, %v4436_v42 }
 0x414   : > { %v4337_v40 = vpop.f32.mrb[84].mxu0  ;;  %v3889_v46 = vpop.f32.mrb[84].mxu1 }
 0x415   : > { %v4851_v6 = vadd.f32 %v4850_v54, %v4811_v55  ;;  %v4899_v32 = vmul.f32 %v4811_v55, %v4811_v55  ;;  %4991 = vst [vmem:[%s10213_s30 + $0xe0] sm:$0xff] %v4811_v55  ;;  %v4525_v18 = vmax.f32 %v4484_v8, 0.0  ;;  %v4437_v2 = vadd.f32 %v4337_v40, %v3984_v41  ;;  %v7104_v38 = vpop.f32.mrb[85].mxu0  ;;  %v6952_v26 = vpop.f32.mrb[85].mxu1 }
 0x416   : > { %v3985_v11 = vadd.f32 %v3889_v46, %v10417_v51  ;;  %v4725_v41 = vpop.permute.xlu1 %4724 }
 0x417   : > { %v4939_v7 = vadd.f32 %v4938_v57, %v4899_v32  ;;  %v4812_v50 = vmul.f32 %v4710_v37, %v4525_v18  ;;  %v4485_v63 = vadd.f32 %v10467_v24, %v4437_v2  ;;  %v4730_v37 = vpop.permute.xlu0 %4729 }
 0x418   : > { %v4342_v44 = vpop.f32.mrb[86].mxu0  ;;  %v3894_v62 = vpop.f32.mrb[86].mxu1 }
 0x419   : > { %v4852_v33 = vadd.f32 %v4851_v6, %v4812_v50  ;;  %v4900_v47 = vmul.f32 %v4812_v50, %v4812_v50  ;;  %4992 = vst [vmem:[%s10213_s30 + $0xe8] sm:$0xff] %v4812_v50  ;;  %v4526_v25 = vmax.f32 %v4485_v63, 0.0  ;;  %v4438_v59 = vadd.f32 %v4342_v44, %v3985_v11  ;;  %v7107_v58 = vpop.f32.mrb[87].mxu0  ;;  %v6955_v36 = vpop.f32.mrb[87].mxu1 }
 0x41a   : > { %v3986_v0 = vadd.f32 %v3894_v62, %v10424_v10  ;;  %v4735_v58 = vpop.permute.xlu1 %4734 }
 0x41b   : > { %v4940_v4 = vadd.f32 %v4939_v7, %v4900_v47  ;;  %v4813_v51 = vmul.f32 %v4715_v28, %v4526_v25  ;;  %v4486_v15 = vadd.f32 %v10467_v24, %v4438_v59 }
 0x41c   : > { %v4347_v21 = vpop.f32.mrb[88].mxu0  ;;  %v3899_v49 = vpop.f32.mrb[88].mxu1 }
 0x41d   : > { %v4853_v13 = vadd.f32 %v4852_v33, %v4813_v51  ;;  %v4901_v53 = vmul.f32 %v4813_v51, %v4813_v51  ;;  %4993 = vst [vmem:[%s10213_s30 + $0xf0] sm:$0xff] %v4813_v51  ;;  %v4527_v60 = vmax.f32 %v4486_v15, 0.0  ;;  %v4439_v35 = vadd.f32 %v4347_v21, %v3986_v0  ;;  %v7110_v1 = vpop.f32.mrb[89].mxu0  ;;  %v6958_v45 = vpop.f32.mrb[89].mxu1 }
 0x41e   : > { %v3987_v43 = vadd.f32 %v3899_v49, %v10428_v48 }
 0x41f   : > { %v4941_v23 = vadd.f32 %v4940_v4, %v4901_v53  ;;  %v4814_v10 = vmul.f32 %v4720_v56, %v4527_v60  ;;  %v4487_v52 = vadd.f32 %v10467_v24, %v4439_v35  ;;  %v4740_v35 = vpop.permute.xlu0 %4739 }
 0x420   : > { %v4352_v54 = vpop.f32.mrb[90].mxu0  ;;  %v3904_v42 = vpop.f32.mrb[90].mxu1 }
 0x421   : > { %v4854_v19 = vadd.f32 %v4853_v13, %v4814_v10  ;;  %v4902_v14 = vmul.f32 %v4814_v10, %v4814_v10  ;;  %4994 = vst [vmem:[%s10213_s30 + $0xf8] sm:$0xff] %v4814_v10  ;;  %v4528_v27 = vmax.f32 %v4487_v52, 0.0  ;;  %v4440_v39 = vadd.f32 %v4352_v54, %v3987_v43  ;;  %v7113_v61 = vpop.f32.mrb[91].mxu0  ;;  %v6961_v57 = vpop.f32.mrb[91].mxu1 }
 0x422   : > { %v3988_v12 = vadd.f32 %v3904_v42, %v10431_v3  ;;  %v4745_v42 = vpop.permute.xlu1 %4744 }
 0x423   : > { %v4942_v55 = vadd.f32 %v4941_v23, %v4902_v14  ;;  %v4815_v48 = vmul.f32 %v4725_v41, %v4528_v27  ;;  %v4488_v8 = vadd.f32 %v10467_v24, %v4440_v39 }
 0x424   : > { %v4357_v40 = vpop.f32.mrb[92].mxu0  ;;  %v3909_v46 = vpop.f32.mrb[92].mxu1 }
 0x425   : > { %v4855_v6 = vadd.f32 %v4854_v19, %v4815_v48  ;;  %v4903_v32 = vmul.f32 %v4815_v48, %v4815_v48  ;;  %4995 = vst [vmem:[%s10213_s30 + $0x100] sm:$0xff] %v4815_v48  ;;  %v4529_v18 = vmax.f32 %v4488_v8, 0.0  ;;  %v4441_v2 = vadd.f32 %v4357_v40, %v3988_v12  ;;  %v7116_v38 = vpop.f32.mrb[93].mxu0  ;;  %v6964_v26 = vpop.f32.mrb[93].mxu1 }
 0x426   : > { %v3989_v11 = vadd.f32 %v3909_v46, %v10434_v22 }
 0x427   : > { %v4943_v7 = vadd.f32 %v4942_v55, %v4903_v32  ;;  %v4816_v3 = vmul.f32 %v4730_v37, %v4529_v18  ;;  %v4489_v50 = vadd.f32 %v10467_v24, %v4441_v2  ;;  %v4750_v18 = vpop.permute.xlu0 %4749 }
 0x428   : > { %v4362_v63 = vpop.f32.mrb[94].mxu0  ;;  %v3914_v25 = vpop.f32.mrb[94].mxu1 }
 0x429   : > { %v4856_v44 = vadd.f32 %v4855_v6, %v4816_v3  ;;  %v4904_v33 = vmul.f32 %v4816_v3, %v4816_v3  ;;  %4996 = vst [vmem:[%s10213_s30 + $0x108] sm:$0xff] %v4816_v3  ;;  %v4530_v47 = vmax.f32 %v4489_v50, 0.0  ;;  %v4442_v62 = vadd.f32 %v4362_v63, %v3989_v11  ;;  %v7119_v59 = vpop.f32.mrb[95].mxu0  ;;  %v6967_v0 = vpop.f32.mrb[95].mxu1 }
 0x42a   : > { %v3990_v28 = vadd.f32 %v3914_v25, %v10437_v29 }
 0x42b   : > { %v4944_v36 = vadd.f32 %v4943_v7, %v4904_v33  ;;  %v4817_v22 = vmul.f32 %v4735_v58, %v4530_v47  ;;  %v4490_v4 = vadd.f32 %v10467_v24, %v4442_v62  ;;  %v4755_v33 = vpop.permute.xlu1 %4754 }
 0x42c   : > { %v4367_v51 = vpop.f32.mrb[96].mxu0  ;;  %v3919_v53 = vpop.f32.mrb[96].mxu1 }
 0x42d   : > { %v4857_v15 = vadd.f32 %v4856_v44, %v4817_v22  ;;  %v4905_v21 = vmul.f32 %v4817_v22, %v4817_v22  ;;  %4997 = vst [vmem:[%s10213_s30 + $0x110] sm:$0xff] %v4817_v22  ;;  %v4531_v13 = vmax.f32 %v4490_v4, 0.0  ;;  %v4443_v60 = vadd.f32 %v4367_v51, %v3990_v28  ;;  %v7122_v49 = vpop.f32.mrb[97].mxu0  ;;  %v6970_v56 = vpop.f32.mrb[97].mxu1 }
 0x42e   : > { %v3991_v1 = vadd.f32 %v3919_v53, %v10440_v31 }
 0x42f   : > { %v4945_v43 = vadd.f32 %v4944_v36, %v4905_v21  ;;  %v4818_v29 = vmul.f32 %v4740_v35, %v4531_v13  ;;  %v4491_v45 = vadd.f32 %v10467_v24, %v4443_v60 }
 0x430   : > { %v4372_v23 = vpop.f32.mrb[98].mxu0  ;;  %v3924_v19 = vpop.f32.mrb[98].mxu1 }
 0x431   : > { %v4858_v10 = vadd.f32 %v4857_v15, %v4818_v29  ;;  %v4906_v52 = vmul.f32 %v4818_v29, %v4818_v29  ;;  %4998 = vst [vmem:[%s10213_s30 + $0x118] sm:$0xff] %v4818_v29  ;;  %v4532_v54 = vmax.f32 %v4491_v45, 0.0  ;;  %v4444_v14 = vadd.f32 %v4372_v23, %v3991_v1  ;;  %v7125_v27 = vpop.f32.mrb[99].mxu0  ;;  %v6973_v61 = vpop.f32.mrb[99].mxu1 }
 0x432   : > { %v3992_v39 = vadd.f32 %v3924_v19, %v10443_v20  ;;  %v4760_v15 = vpop.permute.xlu0 %4759  ;;  %v4765_v23 = vpop.permute.xlu1 %4764  ;;  %v7398_v19 = vld [vmem:[%s10599_s2] ss:$0 sm:$0xff] }
 0x433   : > { %v4946_v41 = vadd.f32 %v4945_v43, %v4906_v52  ;;  %v4819_v31 = vmul.f32 %v4745_v42, %v4532_v54  ;;  %v4492_v12 = vadd.f32 %v10467_v24, %v4444_v14 }
 0x434   : > { %v4377_v57 = vpop.f32.mrb[100].mxu0  ;;  %v3929_v40 = vpop.f32.mrb[100].mxu1 }
 0x435   : > { %v4859_v55 = vadd.f32 %v4858_v10, %v4819_v31  ;;  %v4907_v48 = vmul.f32 %v4819_v31, %v4819_v31  ;;  %4999 = vst [vmem:[%s10213_s30 + $0x120] sm:$0xff] %v4819_v31  ;;  %v4533_v8 = vmax.f32 %v4492_v12, 0.0  ;;  %v4445_v6 = vadd.f32 %v4377_v57, %v3992_v39  ;;  %v7128_v32 = vpop.f32.mrb[101].mxu0  ;;  %v6976_v2 = vpop.f32.mrb[101].mxu1 }
 0x436   : > { %v3993_v46 = vadd.f32 %v3929_v40, %v10446_v17  ;;  %v4770_v12 = vpop.permute.xlu0 %4769 }
 0x437   : > { %v4947_v38 = vadd.f32 %v4946_v41, %v4907_v48  ;;  %v4820_v20 = vmul.f32 %v4750_v18, %v4533_v8  ;;  %v4493_v37 = vadd.f32 %v10467_v24, %v4445_v6 }
 0x438   : > { %v4382_v11 = vpop.f32.mrb[102].mxu0  ;;  %v3934_v50 = vpop.f32.mrb[102].mxu1 }
 0x439   : > { %v4860_v26 = vadd.f32 %v4859_v55, %v4820_v20  ;;  %v4908_v7 = vmul.f32 %v4820_v20, %v4820_v20  ;;  %5000 = vst [vmem:[%s10213_s30 + $0x128] sm:$0xff] %v4820_v20  ;;  %v4534_v3 = vmax.f32 %v4493_v37, 0.0  ;;  %v4446_v63 = vadd.f32 %v4382_v11, %v3993_v46  ;;  %v7131_v44 = vpop.f32.mrb[103].mxu0  ;;  %v6979_v25 = vpop.f32.mrb[103].mxu1 }
 0x43a   : > { %v3994_v47 = vadd.f32 %v3934_v50, %v10449_v30  ;;  %v4775_v20 = vpop.permute.xlu1 %4774  ;;  %v4780_v25 = vpop.permute.xlu0 %4779 }
 0x43b   : > { %v4948_v62 = vadd.f32 %v4947_v38, %v4908_v7  ;;  %v4821_v17 = vmul.f32 %v4755_v33, %v4534_v3  ;;  %v4494_v59 = vadd.f32 %v10467_v24, %v4446_v63 }
 0x43c   : > { %v4387_v58 = vpop.f32.mrb[104].mxu0  ;;  %v3939_v22 = vpop.f32.mrb[104].mxu1 }
 0x43d   : > { %v4861_v28 = vadd.f32 %v4860_v26, %v4821_v17  ;;  %v4909_v0 = vmul.f32 %v4821_v17, %v4821_v17  ;;  %5001 = vst [vmem:[%s10213_s30 + $0x130] sm:$0xff] %v4821_v17  ;;  %v4535_v36 = vmax.f32 %v4494_v59, 0.0  ;;  %v4447_v4 = vadd.f32 %v4387_v58, %v3994_v47  ;;  %v7134_v51 = vpop.f32.mrb[105].mxu0  ;;  %v6982_v13 = vpop.f32.mrb[105].mxu1 }
 0x43e   : > { %v3995_v21 = vadd.f32 %v3939_v22, %v10452_v16 }
 0x43f   : > { %v4949_v53 = vadd.f32 %v4948_v62, %v4909_v0  ;;  %v4822_v30 = vmul.f32 %v4760_v15, %v4535_v36  ;;  %v4495_v60 = vadd.f32 %v10467_v24, %v4447_v4  ;;  %v4785_v0 = vpop.permute.xlu1 %4784 }
 0x440   : > { %v4392_v49 = vpop.f32.mrb[106].mxu0  ;;  %v3944_v43 = vpop.f32.mrb[106].mxu1 }
 0x441   : > { %v4862_v35 = vadd.f32 %v4861_v28, %v4822_v30  ;;  %v4910_v1 = vmul.f32 %v4822_v30, %v4822_v30  ;;  %5002 = vst [vmem:[%s10213_s30 + $0x138] sm:$0xff] %v4822_v30  ;;  %v4536_v56 = vmax.f32 %v4495_v60, 0.0  ;;  %v4448_v29 = vadd.f32 %v4392_v49, %v3995_v21  ;;  %v7137_v45 = vpop.f32.mrb[107].mxu0  ;;  %v6985_v52 = vpop.f32.mrb[107].mxu1 }
 0x442   : > { %v3996_v10 = vadd.f32 %v3944_v43, %v10455_v34 }
 0x443   : > { %v4950_v54 = vadd.f32 %v4949_v53, %v4910_v1  ;;  %v4823_v16 = vmul.f32 %v4765_v23, %v4536_v56  ;;  %v4496_v24 = vadd.f32 %v7398_v19, %v4448_v29 }
 0x444   : > { %v4397_v14 = vpop.f32.mrb[108].mxu0  ;;  %v3949_v61 = vpop.f32.mrb[108].mxu1 }
 0x445   : > { %v4863_v27 = vadd.f32 %v4862_v35, %v4823_v16  ;;  %v4911_v42 = vmul.f32 %v4823_v16, %v4823_v16  ;;  %5003 = vst [vmem:[%s10213_s30 + $0x140] sm:$0xff] %v4823_v16  ;;  %v4537_v39 = vmax.f32 %v4496_v24, 0.0  ;;  %v4449_v41 = vadd.f32 %v4397_v14, %v3996_v10  ;;  %v7140_v31 = vpop.f32.mrb[109].mxu0  ;;  %v6988_v57 = vpop.f32.mrb[109].mxu1 }
 0x446   : > { %v3997_v34 = vadd.f32 %v3949_v61, %v10458_v9 }
 0x447   : > { %v4951_v55 = vadd.f32 %v4950_v54, %v4911_v42  ;;  %v4824_v48 = vmul.f32 %v4770_v12, %v4537_v39  ;;  %v4497_v8 = vadd.f32 %v7398_v19, %v4449_v41 }
 0x448   : > { %v4402_v40 = vpop.f32.mrb[110].mxu0  ;;  %v3954_v46 = vpop.f32.mrb[110].mxu1 }
 0x449   : > { %v4864_v6 = vadd.f32 %v4863_v27, %v4824_v48  ;;  %v4912_v32 = vmul.f32 %v4824_v48, %v4824_v48  ;;  %5004 = vst [vmem:[%s10213_s30 + $0x148] sm:$0xff] %v4824_v48  ;;  %v4538_v18 = vmax.f32 %v4497_v8, 0.0  ;;  %v4450_v2 = vadd.f32 %v4402_v40, %v3997_v34  ;;  %v7143_v38 = vpop.f32.mrb[111].mxu0  ;;  %v6991_v11 = vpop.f32.mrb[111].mxu1 }
 0x44a   : > { %v3998_v37 = vadd.f32 %v3954_v46, %v10461_v5 }
 0x44b   : > { %v4952_v26 = vadd.f32 %v4951_v55, %v4912_v32  ;;  %v4825_v9 = vmul.f32 %v4775_v20, %v4538_v18  ;;  %v4498_v7 = vadd.f32 %v7398_v19, %v4450_v2 }
 0x44c   : > { %v4407_v3 = vpop.f32.mrb[112].mxu0 }
 0x44d   : > { %v4865_v50 = vadd.f32 %v4864_v6, %v4825_v9  ;;  %v4913_v63 = vmul.f32 %v4825_v9, %v4825_v9  ;;  %5005 = vst [vmem:[%s10213_s30 + $0x150] sm:$0xff] %v4825_v9  ;;  %v4539_v44 = vmax.f32 %v4498_v7, 0.0  ;;  %v4451_v33 = vadd.f32 %v4407_v3, %v3998_v37  ;;  %v7146_v47 = vpop.f32.mrb[113].mxu0 }
 0x44f   : > { %v4953_v62 = vadd.f32 %v4952_v26, %v4913_v63  ;;  %v4826_v17 = vmul.f32 %v4780_v25, %v4539_v44  ;;  %v4499_v59 = vadd.f32 %v7398_v19, %v4451_v33 }
 0x451   : > { %v4866_v58 = vadd.f32 %v4865_v50, %v4826_v17  ;;  %v4914_v5 = vmul.f32 %v4826_v17, %v4826_v17  ;;  %5006 = vst [vmem:[%s10213_s30 + $0x158] sm:$0xff] %v4826_v17  ;;  %v4540_v28 = vmax.f32 %v4499_v59, 0.0 }
 0x453   : > { %v4954_v36 = vadd.f32 %v4953_v62, %v4914_v5  ;;  %v4827_v22 = vmul.f32 %v4785_v0, %v4540_v28 }
 0x455   : > { %v4867_v4 = vadd.f32 %v4866_v58, %v4827_v22  ;;  %v4915_v51 = vmul.f32 %v4827_v22, %v4827_v22  ;;  %5007 = vst [vmem:[%s10213_s30 + $0x160] sm:$0xff] %v4827_v22 }
 0x457   : > { %v4868_v15 = vrot.slane %v4867_v4, 4  ;;  %v4955_v21 = vadd.f32 %v4954_v36, %v4915_v51 }
 0x459   : > { %v4869_v13 = vadd.f32 %v4868_v15, %v4867_v4  ;;  %v4956_v53 = vrot.slane %v4955_v21, 4 }
 0x45b   : > { %v4870_v30 = vrot.slane %v4869_v13, 2  ;;  %v4957_v60 = vadd.f32 %v4956_v53, %v4955_v21 }
 0x45d   : > { %v4871_v49 = vadd.f32 %v4870_v30, %v4869_v13  ;;  %v4958_v35 = vrot.slane %v4957_v60, 2 }
 0x45f   : > { %v4872_v1 = vrot.slane %v4871_v49, 1  ;;  %v4959_v56 = vadd.f32 %v4958_v35, %v4957_v60 }
 0x461   : > { %v4873_v43 = vadd.f32 %v4872_v1, %v4871_v49  ;;  %v4960_v29 = vrot.slane %v4959_v56, 1 }
 0x463   : > { %4874 = vst [vmem:[%s289_s14] sm:$0x1] %v4873_v43  ;;  %v4961_v45 = vadd.f32 %v4960_v29, %v4959_v56 }
 0x465   : > { %4962 = vst [vmem:[%s289_s14 + $0x1] sm:$0x1] %v4961_v45 }
 0x466 PF: > { %s18_s24 = sadd.s32 1, %s7405_s24  }
 0x467   : > { %p15_p4 = scmp.ge.s32.totalorder %s18_s24, 4  }
 0x469   :  { %17 = sbr.rel (!%p15_p4) target bundleno = 1 (0x1), region = 94 }

</bundles_post_ra>
